<compile_context>
chip_gen: v7x
topology: tpu7x:2x2x1
jax: 0.10.0
libtpu: 0.0.40
codegen_flags: <defaults>
</compile_context>

<pallas_src>
import functools
import math

import jax
import jax.numpy as jnp
from jax.experimental import pallas as pl
from jax.experimental.pallas import tpu as pltpu


# ---------------------------------------------------------------------------
# helpers
# ---------------------------------------------------------------------------
def _round_up(x, m):
    return ((x + m - 1) // m) * m


def _pick_tm(m_pad):
    # Prefer the biggest tile that still gives >= 2 grid steps (v7x megacore);
    # m_pad is always a multiple of 128.
    for t in (512, 256, 128):
        if m_pad % t == 0 and m_pad // t >= 2:
            return t
    return 128


# ---------------------------------------------------------------------------
# Pallas kernel 1: bf16 matmul + f32 bias (+ ReLU)  -- every conv via im2col
# ---------------------------------------------------------------------------
def _matmul_bias_kernel(x_ref, w_ref, b_ref, o_ref, *, relu):
    acc = jnp.dot(x_ref[...], w_ref[...], preferred_element_type=jnp.float32)
    acc = acc + b_ref[...]
    if relu:
        acc = jnp.maximum(acc, 0.0)
    o_ref[...] = acc.astype(o_ref.dtype)


def matmul_bias_pallas(x, w, b, relu=False, out_dtype=jnp.bfloat16):
    """(M, K) @ (K, N) + b, optional ReLU.  bf16 operands on the MXU,
    f32 accumulate/bias, lane-dense (Cout padded to 128) output."""
    M, K = x.shape
    Kw, N = w.shape
    assert K == Kw

    x = x.astype(jnp.bfloat16)
    w = w.astype(jnp.bfloat16)
    b = b.astype(jnp.float32)

    n_pad = _round_up(N, 128)
    if n_pad != N:
        w = jnp.pad(w, ((0, 0), (0, n_pad - N)))
        b = jnp.pad(b, ((0, n_pad - N),))

    m_pad = _round_up(M, 128)
    if m_pad != M:
        # Padded rows hold ReLU(bias) garbage and MUST stay sliced off below.
        x = jnp.pad(x, ((0, m_pad - M), (0, 0)))
    tm = _pick_tm(m_pad)

    out = pl.pallas_call(
        functools.partial(_matmul_bias_kernel, relu=relu),
        out_shape=jax.ShapeDtypeStruct((m_pad, n_pad), out_dtype),
        grid_spec=pltpu.PrefetchScalarGridSpec(
            num_scalar_prefetch=0,
            grid=(m_pad // tm,),
            in_specs=[
                pl.BlockSpec((tm, K), lambda i: (i, 0)),
                pl.BlockSpec((K, n_pad), lambda i: (0, 0)),
                pl.BlockSpec((1, n_pad), lambda i: (0, 0)),
            ],
            out_specs=pl.BlockSpec((tm, n_pad), lambda i: (i, 0)),
        ),
        compiler_params=pltpu.CompilerParams(
            dimension_semantics=("parallel",)),
    )(x, w, b.reshape(1, n_pad))
    return out[:M, :N]


# ---------------------------------------------------------------------------
# conv2d = im2col (glue) + Pallas matmul
# ---------------------------------------------------------------------------
def _im2col(x, kh, kw, stride, pad):
    n, h, w, c = x.shape
    xp = jnp.pad(x, ((0, 0), (pad, pad), (pad, pad), (0, 0)))
    ho = (h + 2 * pad - kh) // stride + 1
    wo = (w + 2 * pad - kw) // stride + 1
    cols = []
    for i in range(kh):
        for j in range(kw):
            cols.append(xp[:, i:i + stride * ho:stride, j:j + stride * wo:stride, :])
    cols = jnp.concatenate(cols, axis=-1)  # (n, ho, wo, kh*kw*c)
    return cols.reshape(n * ho * wo, kh * kw * c), (n, ho, wo)


def conv2d_pallas(x, w, b, stride=1, pad=0, relu=False, out_dtype=jnp.bfloat16):
    """x: (N,H,W,Cin) NHWC.  w: (KH,KW,Cin,Cout)."""
    kh, kw, cin, cout = w.shape
    cols, (n, ho, wo) = _im2col(x, kh, kw, stride, pad)
    out = matmul_bias_pallas(cols, w.reshape(kh * kw * cin, cout), b,
                             relu=relu, out_dtype=out_dtype)
    return out.reshape(n, ho, wo, cout)


# ---------------------------------------------------------------------------
# Pallas kernel 2: anchor-major sigmoid scoring + box decoding + clipping
# ---------------------------------------------------------------------------
def _decode_kernel(cls_ref, box_ref, anc_ref, scores_ref, boxes_ref, *, img_h, img_w):
    # cls_ref: (NF, C, A) logits; box_ref: (NF, 4, A) deltas; anc_ref: (4, A) xyxy
    scores_ref[...] = jax.nn.sigmoid(cls_ref[...])

    anc = anc_ref[...]                      # (4, A)
    x1 = anc[0:1, :]
    y1 = anc[1:2, :]
    x2 = anc[2:3, :]
    y2 = anc[3:4, :]
    ws = x2 - x1
    hs = y2 - y1
    cx = x1 + 0.5 * ws
    cy = y1 + 0.5 * hs

    deltas = box_ref[...]                   # (NF, 4, A)
    dx = deltas[:, 0:1, :]
    dy = deltas[:, 1:2, :]
    dw = deltas[:, 2:3, :]
    dh = deltas[:, 3:4, :]
    clip = math.log(1000.0 / 16.0)          # torchvision BoxCoder bbox_xform_clip
    dw = jnp.minimum(dw, clip)
    dh = jnp.minimum(dh, clip)
    pcx = dx * ws + cx
    pcy = dy * hs + cy
    pw = jnp.exp(dw) * ws
    ph = jnp.exp(dh) * hs
    bx1 = jnp.clip(pcx - 0.5 * pw, 0.0, img_w)
    by1 = jnp.clip(pcy - 0.5 * ph, 0.0, img_h)
    bx2 = jnp.clip(pcx + 0.5 * pw, 0.0, img_w)
    by2 = jnp.clip(pcy + 0.5 * ph, 0.0, img_h)
    boxes_ref[...] = jnp.concatenate([bx1, by1, bx2, by2], axis=1)


def decode_pallas(cls_logits, bbox_reg, anchors, img_h, img_w):
    """Returns anchor-minor scores (NF, C, A) and boxes (NF, 4, A), f32."""
    nf, a, c = cls_logits.shape
    a_pad = _round_up(a, 128)

    cls_t = jnp.transpose(cls_logits.astype(jnp.float32), (0, 2, 1))   # (nf, c, a)
    box_t = jnp.transpose(bbox_reg.astype(jnp.float32), (0, 2, 1))     # (nf, 4, a)
    anc_t = jnp.transpose(anchors.astype(jnp.float32), (1, 0))         # (4, a)
    if a_pad != a:
        cls_t = jnp.pad(cls_t, ((0, 0), (0, 0), (0, a_pad - a)))
        box_t = jnp.pad(box_t, ((0, 0), (0, 0), (0, a_pad - a)))
        anc_t = jnp.pad(anc_t, ((0, 0), (0, a_pad - a)))

    scores_t, boxes_t = pl.pallas_call(
        functools.partial(_decode_kernel, img_h=float(img_h), img_w=float(img_w)),
        out_shape=(
            jax.ShapeDtypeStruct((nf, c, a_pad), jnp.float32),
            jax.ShapeDtypeStruct((nf, 4, a_pad), jnp.float32),
        ),
        grid_spec=pltpu.PrefetchScalarGridSpec(
            num_scalar_prefetch=0,
            grid=(1,),
            in_specs=[
                pl.BlockSpec((nf, c, a_pad), lambda i: (0, 0, 0)),
                pl.BlockSpec((nf, 4, a_pad), lambda i: (0, 0, 0)),
                pl.BlockSpec((4, a_pad), lambda i: (0, 0)),
            ],
            out_specs=[
                pl.BlockSpec((nf, c, a_pad), lambda i: (0, 0, 0)),
                pl.BlockSpec((nf, 4, a_pad), lambda i: (0, 0, 0)),
            ],
        ),
    )(cls_t, box_t, anc_t)
    return scores_t[:, :, :a], boxes_t[:, :, :a]


# ---------------------------------------------------------------------------
# Model pieces (glue: data movement / reshapes in plain JAX)
# ---------------------------------------------------------------------------
def temporal_shift(x, B, T, shift_fraction=0.125):
    """TSM channel shift across the time axis (zero-padded at clip edges).
    Note: 'residual' mode in the reference applies the shift on the residual
    branch of MBConv blocks; this simplified backbone has no residual blocks."""
    bt, h, w, c = x.shape
    fold = max(1, int(c * shift_fraction))
    xt = x.reshape(B, T, h, w, c)
    fwd = jnp.concatenate(
        [jnp.zeros_like(xt[:, :1, ..., :fold]), xt[:, :-1, ..., :fold]], axis=1)
    bwd = jnp.concatenate(
        [xt[:, 1:, ..., fold:2 * fold], jnp.zeros_like(xt[:, :1, ..., fold:2 * fold])], axis=1)
    out = jnp.concatenate([fwd, bwd, xt[..., 2 * fold:]], axis=-1)
    return out.reshape(bt, h, w, c)


def backbone(x, params, B, T, shift_fraction):
    # synthetic stand-in for tsm_efficientnet_b0 feature stages (BN folded away)
    x = conv2d_pallas(x, params['stem_w'], params['stem_b'], 2, 1, relu=True)   # /2,  C=16
    x = conv2d_pallas(x, params['s2_w'], params['s2_b'], 2, 1, relu=True)       # /4,  C=24
    x = temporal_shift(x, B, T, shift_fraction)
    c3 = conv2d_pallas(x, params['s3_w'], params['s3_b'], 2, 1, relu=True)      # /8,  C=40
    x = temporal_shift(c3, B, T, shift_fraction)
    c5 = conv2d_pallas(x, params['s5_w'], params['s5_b'], 2, 1, relu=True)      # /16, C=112
    x = temporal_shift(c5, B, T, shift_fraction)
    c6 = conv2d_pallas(x, params['s6_w'], params['s6_b'], 2, 1, relu=True)      # /32, C=192
    return [c3, c5, c6]


def _nearest_upsample_to(x, th, tw):
    n, h, w, c = x.shape
    return jnp.repeat(jnp.repeat(x, th // h, axis=1), tw // w, axis=2)


def fpn(feats, params):
    inners = [
        conv2d_pallas(f, params[f'fpn_inner{i}_w'], params[f'fpn_inner{i}_b'], 1, 0)
        for i, f in enumerate(feats)
    ]
    last = inners[-1]
    outs = [conv2d_pallas(last, params['fpn_layer2_w'], params['fpn_layer2_b'], 1, 1)]
    for i in range(len(feats) - 2, -1, -1):
        th, tw = inners[i].shape[1:3]
        last = inners[i] + _nearest_upsample_to(last, th, tw)
        outs.insert(0, conv2d_pallas(last, params[f'fpn_layer{i}_w'],
                                     params[f'fpn_layer{i}_b'], 1, 1))
    return outs


def _conv_all_levels(feats, w, b, relu, out_dtype):
    """Shared-weight 3x3/s1/p1 conv applied to every FPN level with a single
    Pallas matmul (rows of all levels concatenated)."""
    kh, kw, cin, cout = w.shape
    cols_list, metas = [], []
    for f in feats:
        cols, meta = _im2col(f, kh, kw, 1, 1)
        cols_list.append(cols)
        metas.append(meta)
    sizes = [c.shape[0] for c in cols_list]
    cols = jnp.concatenate(cols_list, axis=0)
    out = matmul_bias_pallas(cols, w.reshape(kh * kw * cin, cout), b,
                             relu=relu, out_dtype=out_dtype)
    outs, off = [], 0
    for (n, ho, wo), m in zip(metas, sizes):
        outs.append(out[off:off + m].reshape(n, ho, wo, cout))
        off += m
    return outs


def retinanet_head(fpn_feats, params, num_anchors, num_classes):
    # Head weights are shared across levels -> fuse levels into one matmul per
    # layer (10 matmul calls total instead of 30).
    xc = fpn_feats
    xr = fpn_feats
    for i in range(4):
        xc = _conv_all_levels(xc, params[f'cls_conv{i}_w'], params[f'cls_conv{i}_b'],
                              True, jnp.bfloat16)
        xr = _conv_all_levels(xr, params[f'reg_conv{i}_w'], params[f'reg_conv{i}_b'],
                              True, jnp.bfloat16)
    cls_lvls = _conv_all_levels(xc, params['cls_logits_w'], params['cls_logits_b'],
                                False, jnp.float32)
    reg_lvls = _conv_all_levels(xr, params['reg_out_w'], params['reg_out_b'],
                                False, jnp.float32)

    cls_all, reg_all = [], []
    for cls, reg in zip(cls_lvls, reg_lvls):
        n, h, w, _ = cls.shape
        # NHWC -> (N, H*W*A, num_classes)  (matches torchvision (H,W,A,C) ordering)
        cls_all.append(cls.reshape(n, h * w * num_anchors, num_classes))
        reg_all.append(reg.reshape(n, h * w * num_anchors, 4))
    return jnp.concatenate(cls_all, axis=1), jnp.concatenate(reg_all, axis=1)


def make_anchors(image_hw, feat_shapes, anchor_sizes, aspect_ratios):
    ih, iw = image_hw
    per_level = []
    for (fh, fw), sizes, ratios in zip(feat_shapes, anchor_sizes, aspect_ratios):
        stride_h = ih // fh
        stride_w = iw // fw
        cell = []
        for r in ratios:
            hr = math.sqrt(r)
            wr = 1.0 / hr
            for s in sizes:
                cell.append([-wr * s / 2.0, -hr * s / 2.0, wr * s / 2.0, hr * s / 2.0])
        cell = jnp.round(jnp.asarray(cell, jnp.float32))
        sx = jnp.arange(fw, dtype=jnp.float32) * stride_w
        sy = jnp.arange(fh, dtype=jnp.float32) * stride_h
        yy, xx = jnp.meshgrid(sy, sx, indexing='ij')
        shifts = jnp.stack([xx.ravel(), yy.ravel(), xx.ravel(), yy.ravel()], axis=1)
        per_level.append((shifts[:, None, :] + cell[None, :, :]).reshape(-1, 4))
    return jnp.concatenate(per_level, axis=0)


# ---------------------------------------------------------------------------
# Full forward (inference path of TSMRetinaNet.forward)
# ---------------------------------------------------------------------------
def tsm_retinanet_forward(params, videos, *, cfg):
    B, T, C, H, W = videos.shape
    num_classes = cfg['num_classes']
    num_anchors = len(cfg['anchor_aspect_ratios'][0]) * len(cfg['anchor_sizes'][0])

    # videos.view(B*T, C, H, W) then NCHW -> NHWC; bf16 activations feed the MXU
    x = jnp.transpose(videos.reshape(B * T, C, H, W), (0, 2, 3, 1)).astype(jnp.bfloat16)

    feats = backbone(x, params, B, T, cfg['tsm_shift_fraction'])
    fpn_feats = fpn(feats, params)
    cls_logits, bbox_reg = retinanet_head(fpn_feats, params, num_anchors, num_classes)

    feat_shapes = [f.shape[1:3] for f in fpn_feats]
    anchors = make_anchors((H, W), feat_shapes, cfg['anchor_sizes'],
                           cfg['anchor_aspect_ratios'])

    # postprocess_detections: sigmoid + box decode + clip (Pallas), then top-k.
    # scores: (NF, C, A) anchor-minor; boxes: (NF, 4, A).
    scores, boxes = decode_pallas(cls_logits, bbox_reg, anchors, H, W)

    nf, c, a = scores.shape
    k = cfg['inference_detections_per_img']

    # torchvision removes sub-threshold candidates before top-k; emulate with a
    # fixed-size output by zeroing them first and masking the selected slots.
    flat = scores.reshape(nf, c * a)
    flat = jnp.where(flat > cfg['inference_score_thresh'], flat, 0.0)
    top_scores, top_idx = jax.lax.top_k(flat, k)
    labels = (top_idx // a).astype(jnp.int32)
    box_idx = top_idx % a

    det_boxes = jnp.take_along_axis(
        boxes, jnp.broadcast_to(box_idx[:, None, :], (nf, 4, k)), axis=2)
    det_boxes = jnp.transpose(det_boxes, (0, 2, 1))          # (NF, k, 4)

    valid = top_scores > 0.0
    det_scores = jnp.where(valid, top_scores, 0.0)
    det_labels = jnp.where(valid, labels, -1)
    det_boxes = jnp.where(valid[..., None], det_boxes, 0.0)
    # TODO(synk): per-class NMS omitted (no clean Pallas equivalent).
    return {'boxes': det_boxes, 'scores': det_scores, 'labels': det_labels}


# ---------------------------------------------------------------------------
# Deterministic synthetic parameters
# ---------------------------------------------------------------------------
def init_params(key, num_classes, num_anchors, fpn_out):
    keys = list(jax.random.split(key, 64))
    kit = iter(keys)

    def conv_p(kh, kw, cin, cout, scale=0.05):
        w = jax.random.normal(next(kit), (kh, kw, cin, cout), jnp.float32) * scale
        b = jnp.zeros((cout,), jnp.float32)
        return w, b

    p = {}
    p['stem_w'], p['stem_b'] = conv_p(3, 3, 3, 16)
    p['s2_w'], p['s2_b'] = conv_p(3, 3, 16, 24)
    p['s3_w'], p['s3_b'] = conv_p(3, 3, 24, 40)
    p['s5_w'], p['s5_b'] = conv_p(3, 3, 40, 112)
    p['s6_w'], p['s6_b'] = conv_p(3, 3, 112, 192)
    for i, cin in enumerate([40, 112, 192]):
        p[f'fpn_inner{i}_w'], p[f'fpn_inner{i}_b'] = conv_p(1, 1, cin, fpn_out)
        p[f'fpn_layer{i}_w'], p[f'fpn_layer{i}_b'] = conv_p(3, 3, fpn_out, fpn_out)
    for i in range(4):
        p[f'cls_conv{i}_w'], p[f'cls_conv{i}_b'] = conv_p(3, 3, fpn_out, fpn_out)
        p[f'reg_conv{i}_w'], p[f'reg_conv{i}_b'] = conv_p(3, 3, fpn_out, fpn_out)
    p['cls_logits_w'], _ = conv_p(3, 3, fpn_out, num_anchors * num_classes)
    # RetinaNet prior-probability bias init (prior_probability=0.01)
    p['cls_logits_b'] = jnp.full((num_anchors * num_classes,),
                                 -math.log((1.0 - 0.01) / 0.01), jnp.float32)
    p['reg_out_w'], p['reg_out_b'] = conv_p(3, 3, fpn_out, num_anchors * 4)
    return p


# ---------------------------------------------------------------------------
if __name__ == "__main__":
    cfg = dict(
        num_classes=4,
        inference_score_thresh=0.05,
        inference_nms_thresh=0.5,
        inference_detections_per_img=10,
        fpn_out_channels=128,
        anchor_sizes=((32,), (64,), (128,)),
        anchor_aspect_ratios=((0.5, 1.0, 2.0),) * 3,
        t_clip=2,
        tsm_shift_fraction=0.125,
    )
    num_anchors = len(cfg['anchor_aspect_ratios'][0]) * len(cfg['anchor_sizes'][0])

    key = jax.random.PRNGKey(0)
    k_param, k_data = jax.random.split(key)
    params = init_params(k_param, cfg['num_classes'], num_anchors, cfg['fpn_out_channels'])

    # videos: (B, T, C, H, W) — small shapes: B=2, T=t_clip=2, C=3, H=W=64
    videos = jax.random.normal(k_data, (2, cfg['t_clip'], 3, 64, 64), jnp.float32)

    fwd = jax.jit(functools.partial(tsm_retinanet_forward, cfg=cfg))
    detections = fwd(params, videos)
    jax.block_until_ready(detections)

    assert detections['boxes'].shape == (4, 10, 4)
    assert detections['scores'].shape == (4, 10)
    assert detections['labels'].shape == (4, 10)
    print("KERNEL_OK")
</pallas_src>

<mosaic_0001>
module attributes {stable_mosaic.version = 11 : i64} {
  func.func @_matmul_bias_kernel(%arg0: i32, %arg1: memref<512x27xbf16, #tpu.memory_space<vmem>>, %arg2: memref<27x128xbf16, #tpu.memory_space<vmem>>, %arg3: memref<1x128xf32, #tpu.memory_space<vmem>>, %arg4: memref<512x128xbf16, #tpu.memory_space<vmem>>) attributes {dimension_semantics = [#tpu.dimension_semantics<parallel>], iteration_bounds = array<i64: 8>, scalar_prefetch = 0 : i64, scratch_operands = 0 : i64, tpu.core_type = #tpu.core_type<tc>, window_params = [{transform_indices = @transform_0, window_bounds = array<i64: 512, 27>}, {pipeline_mode = #tpu.pipeline_mode<synchronous>, transform_indices = @transform_1, window_bounds = array<i64: 27, 128>}, {pipeline_mode = #tpu.pipeline_mode<synchronous>, transform_indices = @transform_2, window_bounds = array<i64: 1, 128>}, {transform_indices = @transform_3, window_bounds = array<i64: 512, 128>}]} {
    %c0 = arith.constant 0 : index
    %c0_0 = arith.constant 0 : index
    %0 = vector.load %arg1[%c0, %c0_0] : memref<512x27xbf16, #tpu.memory_space<vmem>>, vector<512x27xbf16>
    %c0_1 = arith.constant 0 : index
    %c0_2 = arith.constant 0 : index
    %1 = vector.load %arg2[%c0_1, %c0_2] : memref<27x128xbf16, #tpu.memory_space<vmem>>, vector<27x128xbf16>
    %cst = arith.constant dense<0.000000e+00> : vector<512x128xf32>
    %2 = tpu.matmul %0, %1, %cst {dimension_numbers = #tpu.dot_dimension_numbers<[1], [0], [0], [1], [0, 0, 1, 1], [], []>} : vector<512x27xbf16>, vector<27x128xbf16>, vector<512x128xf32> -> vector<512x128xf32>
    %c0_3 = arith.constant 0 : index
    %c0_4 = arith.constant 0 : index
    %3 = vector.load %arg3[%c0_3, %c0_4] : memref<1x128xf32, #tpu.memory_space<vmem>>, vector<1x128xf32>
    %4 = vector.broadcast %3 : vector<1x128xf32> to vector<512x128xf32>
    %5 = arith.addf %2, %4 : vector<512x128xf32>
    %cst_5 = arith.constant 0.000000e+00 : f32
    %6 = vector.broadcast %cst_5 : f32 to vector<512x128xf32>
    %7 = arith.maximumf %5, %6 : vector<512x128xf32>
    %8 = arith.truncf %7 : vector<512x128xf32> to vector<512x128xbf16>
    %c0_6 = arith.constant 0 : index
    %c0_7 = arith.constant 0 : index
    %9 = vector.load %arg4[%c0_6, %c0_7] : memref<512x128xbf16, #tpu.memory_space<vmem>>, vector<512x128xbf16>
    tpu.vector_store %arg4[%c0_6, %c0_7], %8 {strides = array<i32>} : memref<512x128xbf16, #tpu.memory_space<vmem>>, vector<512x128xbf16>,
    return
  }
  func.func @transform_0(%arg0: i32) -> (i32, i32) {
    %c0_i32 = arith.constant 0 : i32
    %c0_i32_0 = arith.constant 0 : i32
    return %arg0, %c0_i32 : i32, i32
  }
  func.func @transform_1(%arg0: i32) -> (i32, i32) {
    %c0_i32 = arith.constant 0 : i32
    %c0_i32_0 = arith.constant 0 : i32
    %c0_i32_1 = arith.constant 0 : i32
    return %c0_i32, %c0_i32_0 : i32, i32
  }
  func.func @transform_2(%arg0: i32) -> (i32, i32) {
    %c0_i32 = arith.constant 0 : i32
    %c0_i32_0 = arith.constant 0 : i32
    %c0_i32_1 = arith.constant 0 : i32
    return %c0_i32, %c0_i32_0 : i32, i32
  }
  func.func @transform_3(%arg0: i32) -> (i32, i32) {
    %c0_i32 = arith.constant 0 : i32
    %c0_i32_0 = arith.constant 0 : i32
    return %arg0, %c0_i32 : i32, i32
  }
}

module attributes {stable_mosaic.version = 11 : i64} {
  func.func @_matmul_bias_kernel(%arg0: i32, %arg1: memref<512x144xbf16, #tpu.memory_space<vmem>>, %arg2: memref<144x128xbf16, #tpu.memory_space<vmem>>, %arg3: memref<1x128xf32, #tpu.memory_space<vmem>>, %arg4: memref<512x128xbf16, #tpu.memory_space<vmem>>) attributes {dimension_semantics = [#tpu.dimension_semantics<parallel>], iteration_bounds = array<i64: 2>, scalar_prefetch = 0 : i64, scratch_operands = 0 : i64, tpu.core_type = #tpu.core_type<tc>, window_params = [{transform_indices = @transform_0, window_bounds = array<i64: 512, 144>}, {pipeline_mode = #tpu.pipeline_mode<synchronous>, transform_indices = @transform_1, window_bounds = array<i64: 144, 128>}, {pipeline_mode = #tpu.pipeline_mode<synchronous>, transform_indices = @transform_2, window_bounds = array<i64: 1, 128>}, {transform_indices = @transform_3, window_bounds = array<i64: 512, 128>}]} {
    %c0 = arith.constant 0 : index
    %c0_0 = arith.constant 0 : index
    %0 = vector.load %arg1[%c0, %c0_0] : memref<512x144xbf16, #tpu.memory_space<vmem>>, vector<512x144xbf16>
    %c0_1 = arith.constant 0 : index
    %c0_2 = arith.constant 0 : index
    %1 = vector.load %arg2[%c0_1, %c0_2] : memref<144x128xbf16, #tpu.memory_space<vmem>>, vector<144x128xbf16>
    %cst = arith.constant dense<0.000000e+00> : vector<512x128xf32>
    %2 = tpu.matmul %0, %1, %cst {dimension_numbers = #tpu.dot_dimension_numbers<[1], [0], [0], [1], [0, 0, 1, 1], [], []>} : vector<512x144xbf16>, vector<144x128xbf16>, vector<512x128xf32> -> vector<512x128xf32>
    %c0_3 = arith.constant 0 : index
    %c0_4 = arith.constant 0 : index
    %3 = vector.load %arg3[%c0_3, %c0_4] : memref<1x128xf32, #tpu.memory_space<vmem>>, vector<1x128xf32>
    %4 = vector.broadcast %3 : vector<1x128xf32> to vector<512x128xf32>
    %5 = arith.addf %2, %4 : vector<512x128xf32>
    %cst_5 = arith.constant 0.000000e+00 : f32
    %6 = vector.broadcast %cst_5 : f32 to vector<512x128xf32>
    %7 = arith.maximumf %5, %6 : vector<512x128xf32>
    %8 = arith.truncf %7 : vector<512x128xf32> to vector<512x128xbf16>
    %c0_6 = arith.constant 0 : index
    %c0_7 = arith.constant 0 : index
    %9 = vector.load %arg4[%c0_6, %c0_7] : memref<512x128xbf16, #tpu.memory_space<vmem>>, vector<512x128xbf16>
    tpu.vector_store %arg4[%c0_6, %c0_7], %8 {strides = array<i32>} : memref<512x128xbf16, #tpu.memory_space<vmem>>, vector<512x128xbf16>,
    return
  }
  func.func @transform_0(%arg0: i32) -> (i32, i32) {
    %c0_i32 = arith.constant 0 : i32
    %c0_i32_0 = arith.constant 0 : i32
    return %arg0, %c0_i32 : i32, i32
  }
  func.func @transform_1(%arg0: i32) -> (i32, i32) {
    %c0_i32 = arith.constant 0 : i32
    %c0_i32_0 = arith.constant 0 : i32
    %c0_i32_1 = arith.constant 0 : i32
    return %c0_i32, %c0_i32_0 : i32, i32
  }
  func.func @transform_2(%arg0: i32) -> (i32, i32) {
    %c0_i32 = arith.constant 0 : i32
    %c0_i32_0 = arith.constant 0 : i32
    %c0_i32_1 = arith.constant 0 : i32
    return %c0_i32, %c0_i32_0 : i32, i32
  }
  func.func @transform_3(%arg0: i32) -> (i32, i32) {
    %c0_i32 = arith.constant 0 : i32
    %c0_i32_0 = arith.constant 0 : i32
    return %arg0, %c0_i32 : i32, i32
  }
}

module attributes {stable_mosaic.version = 11 : i64} {
  func.func @_matmul_bias_kernel(%arg0: i32, %arg1: memref<128x216xbf16, #tpu.memory_space<vmem>>, %arg2: memref<216x128xbf16, #tpu.memory_space<vmem>>, %arg3: memref<1x128xf32, #tpu.memory_space<vmem>>, %arg4: memref<128x128xbf16, #tpu.memory_space<vmem>>) attributes {dimension_semantics = [#tpu.dimension_semantics<parallel>], iteration_bounds = array<i64: 2>, scalar_prefetch = 0 : i64, scratch_operands = 0 : i64, tpu.core_type = #tpu.core_type<tc>, window_params = [{transform_indices = @transform_0, window_bounds = array<i64: 128, 216>}, {pipeline_mode = #tpu.pipeline_mode<synchronous>, transform_indices = @transform_1, window_bounds = array<i64: 216, 128>}, {pipeline_mode = #tpu.pipeline_mode<synchronous>, transform_indices = @transform_2, window_bounds = array<i64: 1, 128>}, {transform_indices = @transform_3, window_bounds = array<i64: 128, 128>}]} {
    %c0 = arith.constant 0 : index
    %c0_0 = arith.constant 0 : index
    %0 = vector.load %arg1[%c0, %c0_0] : memref<128x216xbf16, #tpu.memory_space<vmem>>, vector<128x216xbf16>
    %c0_1 = arith.constant 0 : index
    %c0_2 = arith.constant 0 : index
    %1 = vector.load %arg2[%c0_1, %c0_2] : memref<216x128xbf16, #tpu.memory_space<vmem>>, vector<216x128xbf16>
    %cst = arith.constant dense<0.000000e+00> : vector<128x128xf32>
    %2 = tpu.matmul %0, %1, %cst {dimension_numbers = #tpu.dot_dimension_numbers<[1], [0], [0], [1], [0, 0, 1, 1], [], []>} : vector<128x216xbf16>, vector<216x128xbf16>, vector<128x128xf32> -> vector<128x128xf32>
    %c0_3 = arith.constant 0 : index
    %c0_4 = arith.constant 0 : index
    %3 = vector.load %arg3[%c0_3, %c0_4] : memref<1x128xf32, #tpu.memory_space<vmem>>, vector<1x128xf32>
    %4 = vector.broadcast %3 : vector<1x128xf32> to vector<128x128xf32>
    %5 = arith.addf %2, %4 : vector<128x128xf32>
    %cst_5 = arith.constant 0.000000e+00 : f32
    %6 = vector.broadcast %cst_5 : f32 to vector<128x128xf32>
    %7 = arith.maximumf %5, %6 : vector<128x128xf32>
    %8 = arith.truncf %7 : vector<128x128xf32> to vector<128x128xbf16>
    %c0_6 = arith.constant 0 : index
    %c0_7 = arith.constant 0 : index
    %9 = vector.load %arg4[%c0_6, %c0_7] : memref<128x128xbf16, #tpu.memory_space<vmem>>, vector<128x128xbf16>
    tpu.vector_store %arg4[%c0_6, %c0_7], %8 {strides = array<i32>} : memref<128x128xbf16, #tpu.memory_space<vmem>>, vector<128x128xbf16>,
    return
  }
  func.func @transform_0(%arg0: i32) -> (i32, i32) {
    %c0_i32 = arith.constant 0 : i32
    %c0_i32_0 = arith.constant 0 : i32
    return %arg0, %c0_i32 : i32, i32
  }
  func.func @transform_1(%arg0: i32) -> (i32, i32) {
    %c0_i32 = arith.constant 0 : i32
    %c0_i32_0 = arith.constant 0 : i32
    %c0_i32_1 = arith.constant 0 : i32
    return %c0_i32, %c0_i32_0 : i32, i32
  }
  func.func @transform_2(%arg0: i32) -> (i32, i32) {
    %c0_i32 = arith.constant 0 : i32
    %c0_i32_0 = arith.constant 0 : i32
    %c0_i32_1 = arith.constant 0 : i32
    return %c0_i32, %c0_i32_0 : i32, i32
  }
  func.func @transform_3(%arg0: i32) -> (i32, i32) {
    %c0_i32 = arith.constant 0 : i32
    %c0_i32_0 = arith.constant 0 : i32
    return %arg0, %c0_i32 : i32, i32
  }
}

module attributes {stable_mosaic.version = 11 : i64} {
  func.func @_matmul_bias_kernel(%arg0: i32, %arg1: memref<128x360xbf16, #tpu.memory_space<vmem>>, %arg2: memref<360x128xbf16, #tpu.memory_space<vmem>>, %arg3: memref<1x128xf32, #tpu.memory_space<vmem>>, %arg4: memref<128x128xbf16, #tpu.memory_space<vmem>>) attributes {dimension_semantics = [#tpu.dimension_semantics<parallel>], iteration_bounds = array<i64: 1>, scalar_prefetch = 0 : i64, scratch_operands = 0 : i64, tpu.core_type = #tpu.core_type<tc>, window_params = [{transform_indices = @transform_0, window_bounds = array<i64: 128, 360>}, {pipeline_mode = #tpu.pipeline_mode<synchronous>, transform_indices = @transform_1, window_bounds = array<i64: 360, 128>}, {pipeline_mode = #tpu.pipeline_mode<synchronous>, transform_indices = @transform_2, window_bounds = array<i64: 1, 128>}, {transform_indices = @transform_3, window_bounds = array<i64: 128, 128>}]} {
    %c0 = arith.constant 0 : index
    %c0_0 = arith.constant 0 : index
    %0 = vector.load %arg1[%c0, %c0_0] : memref<128x360xbf16, #tpu.memory_space<vmem>>, vector<128x360xbf16>
    %c0_1 = arith.constant 0 : index
    %c0_2 = arith.constant 0 : index
    %1 = vector.load %arg2[%c0_1, %c0_2] : memref<360x128xbf16, #tpu.memory_space<vmem>>, vector<360x128xbf16>
    %cst = arith.constant dense<0.000000e+00> : vector<128x128xf32>
    %2 = tpu.matmul %0, %1, %cst {dimension_numbers = #tpu.dot_dimension_numbers<[1], [0], [0], [1], [0, 0, 1, 1], [], []>} : vector<128x360xbf16>, vector<360x128xbf16>, vector<128x128xf32> -> vector<128x128xf32>
    %c0_3 = arith.constant 0 : index
    %c0_4 = arith.constant 0 : index
    %3 = vector.load %arg3[%c0_3, %c0_4] : memref<1x128xf32, #tpu.memory_space<vmem>>, vector<1x128xf32>
    %4 = vector.broadcast %3 : vector<1x128xf32> to vector<128x128xf32>
    %5 = arith.addf %2, %4 : vector<128x128xf32>
    %cst_5 = arith.constant 0.000000e+00 : f32
    %6 = vector.broadcast %cst_5 : f32 to vector<128x128xf32>
    %7 = arith.maximumf %5, %6 : vector<128x128xf32>
    %8 = arith.truncf %7 : vector<128x128xf32> to vector<128x128xbf16>
    %c0_6 = arith.constant 0 : index
    %c0_7 = arith.constant 0 : index
    %9 = vector.load %arg4[%c0_6, %c0_7] : memref<128x128xbf16, #tpu.memory_space<vmem>>, vector<128x128xbf16>
    tpu.vector_store %arg4[%c0_6, %c0_7], %8 {strides = array<i32>} : memref<128x128xbf16, #tpu.memory_space<vmem>>, vector<128x128xbf16>,
    return
  }
  func.func @transform_0(%arg0: i32) -> (i32, i32) {
    %c0_i32 = arith.constant 0 : i32
    %c0_i32_0 = arith.constant 0 : i32
    return %arg0, %c0_i32 : i32, i32
  }
  func.func @transform_1(%arg0: i32) -> (i32, i32) {
    %c0_i32 = arith.constant 0 : i32
    %c0_i32_0 = arith.constant 0 : i32
    %c0_i32_1 = arith.constant 0 : i32
    return %c0_i32, %c0_i32_0 : i32, i32
  }
  func.func @transform_2(%arg0: i32) -> (i32, i32) {
    %c0_i32 = arith.constant 0 : i32
    %c0_i32_0 = arith.constant 0 : i32
    %c0_i32_1 = arith.constant 0 : i32
    return %c0_i32, %c0_i32_0 : i32, i32
  }
  func.func @transform_3(%arg0: i32) -> (i32, i32) {
    %c0_i32 = arith.constant 0 : i32
    %c0_i32_0 = arith.constant 0 : i32
    return %arg0, %c0_i32 : i32, i32
  }
}

module attributes {stable_mosaic.version = 11 : i64} {
  func.func @_matmul_bias_kernel(%arg0: i32, %arg1: memref<128x1008xbf16, #tpu.memory_space<vmem>>, %arg2: memref<1008x256xbf16, #tpu.memory_space<vmem>>, %arg3: memref<1x256xf32, #tpu.memory_space<vmem>>, %arg4: memref<128x256xbf16, #tpu.memory_space<vmem>>) attributes {dimension_semantics = [#tpu.dimension_semantics<parallel>], iteration_bounds = array<i64: 1>, scalar_prefetch = 0 : i64, scratch_operands = 0 : i64, tpu.core_type = #tpu.core_type<tc>, window_params = [{transform_indices = @transform_0, window_bounds = array<i64: 128, 1008>}, {pipeline_mode = #tpu.pipeline_mode<synchronous>, transform_indices = @transform_1, window_bounds = array<i64: 1008, 256>}, {pipeline_mode = #tpu.pipeline_mode<synchronous>, transform_indices = @transform_2, window_bounds = array<i64: 1, 256>}, {transform_indices = @transform_3, window_bounds = array<i64: 128, 256>}]} {
    %c0 = arith.constant 0 : index
    %c0_0 = arith.constant 0 : index
    %0 = vector.load %arg1[%c0, %c0_0] : memref<128x1008xbf16, #tpu.memory_space<vmem>>, vector<128x1008xbf16>
    %c0_1 = arith.constant 0 : index
    %c0_2 = arith.constant 0 : index
    %1 = vector.load %arg2[%c0_1, %c0_2] : memref<1008x256xbf16, #tpu.memory_space<vmem>>, vector<1008x256xbf16>
    %cst = arith.constant dense<0.000000e+00> : vector<128x256xf32>
    %2 = tpu.matmul %0, %1, %cst {dimension_numbers = #tpu.dot_dimension_numbers<[1], [0], [0], [1], [0, 0, 1, 1], [], []>} : vector<128x1008xbf16>, vector<1008x256xbf16>, vector<128x256xf32> -> vector<128x256xf32>
    %c0_3 = arith.constant 0 : index
    %c0_4 = arith.constant 0 : index
    %3 = vector.load %arg3[%c0_3, %c0_4] : memref<1x256xf32, #tpu.memory_space<vmem>>, vector<1x256xf32>
    %4 = vector.broadcast %3 : vector<1x256xf32> to vector<128x256xf32>
    %5 = arith.addf %2, %4 : vector<128x256xf32>
    %cst_5 = arith.constant 0.000000e+00 : f32
    %6 = vector.broadcast %cst_5 : f32 to vector<128x256xf32>
    %7 = arith.maximumf %5, %6 : vector<128x256xf32>
    %8 = arith.truncf %7 : vector<128x256xf32> to vector<128x256xbf16>
    %c0_6 = arith.constant 0 : index
    %c0_7 = arith.constant 0 : index
    %9 = vector.load %arg4[%c0_6, %c0_7] : memref<128x256xbf16, #tpu.memory_space<vmem>>, vector<128x256xbf16>
    tpu.vector_store %arg4[%c0_6, %c0_7], %8 {strides = array<i32>} : memref<128x256xbf16, #tpu.memory_space<vmem>>, vector<128x256xbf16>,
    return
  }
  func.func @transform_0(%arg0: i32) -> (i32, i32) {
    %c0_i32 = arith.constant 0 : i32
    %c0_i32_0 = arith.constant 0 : i32
    return %arg0, %c0_i32 : i32, i32
  }
  func.func @transform_1(%arg0: i32) -> (i32, i32) {
    %c0_i32 = arith.constant 0 : i32
    %c0_i32_0 = arith.constant 0 : i32
    %c0_i32_1 = arith.constant 0 : i32
    return %c0_i32, %c0_i32_0 : i32, i32
  }
  func.func @transform_2(%arg0: i32) -> (i32, i32) {
    %c0_i32 = arith.constant 0 : i32
    %c0_i32_0 = arith.constant 0 : i32
    %c0_i32_1 = arith.constant 0 : i32
    return %c0_i32, %c0_i32_0 : i32, i32
  }
  func.func @transform_3(%arg0: i32) -> (i32, i32) {
    %c0_i32 = arith.constant 0 : i32
    %c0_i32_0 = arith.constant 0 : i32
    return %arg0, %c0_i32 : i32, i32
  }
}

module attributes {stable_mosaic.version = 11 : i64} {
  func.func @_matmul_bias_kernel(%arg0: i32, %arg1: memref<128x192xbf16, #tpu.memory_space<vmem>>, %arg2: memref<192x128xbf16, #tpu.memory_space<vmem>>, %arg3: memref<1x128xf32, #tpu.memory_space<vmem>>, %arg4: memref<128x128xbf16, #tpu.memory_space<vmem>>) attributes {dimension_semantics = [#tpu.dimension_semantics<parallel>], iteration_bounds = array<i64: 1>, scalar_prefetch = 0 : i64, scratch_operands = 0 : i64, tpu.core_type = #tpu.core_type<tc>, window_params = [{transform_indices = @transform_0, window_bounds = array<i64: 128, 192>}, {pipeline_mode = #tpu.pipeline_mode<synchronous>, transform_indices = @transform_1, window_bounds = array<i64: 192, 128>}, {pipeline_mode = #tpu.pipeline_mode<synchronous>, transform_indices = @transform_2, window_bounds = array<i64: 1, 128>}, {transform_indices = @transform_3, window_bounds = array<i64: 128, 128>}]} {
    %c0 = arith.constant 0 : index
    %c0_0 = arith.constant 0 : index
    %0 = vector.load %arg1[%c0, %c0_0] : memref<128x192xbf16, #tpu.memory_space<vmem>>, vector<128x192xbf16>
    %c0_1 = arith.constant 0 : index
    %c0_2 = arith.constant 0 : index
    %1 = vector.load %arg2[%c0_1, %c0_2] : memref<192x128xbf16, #tpu.memory_space<vmem>>, vector<192x128xbf16>
    %cst = arith.constant dense<0.000000e+00> : vector<128x128xf32>
    %2 = tpu.matmul %0, %1, %cst {dimension_numbers = #tpu.dot_dimension_numbers<[1], [0], [0], [1], [0, 0, 1, 1], [], []>} : vector<128x192xbf16>, vector<192x128xbf16>, vector<128x128xf32> -> vector<128x128xf32>
    %c0_3 = arith.constant 0 : index
    %c0_4 = arith.constant 0 : index
    %3 = vector.load %arg3[%c0_3, %c0_4] : memref<1x128xf32, #tpu.memory_space<vmem>>, vector<1x128xf32>
    %4 = vector.broadcast %3 : vector<1x128xf32> to vector<128x128xf32>
    %5 = arith.addf %2, %4 : vector<128x128xf32>
    %6 = arith.truncf %5 : vector<128x128xf32> to vector<128x128xbf16>
    %c0_5 = arith.constant 0 : index
    %c0_6 = arith.constant 0 : index
    %7 = vector.load %arg4[%c0_5, %c0_6] : memref<128x128xbf16, #tpu.memory_space<vmem>>, vector<128x128xbf16>
    tpu.vector_store %arg4[%c0_5, %c0_6], %6 {strides = array<i32>} : memref<128x128xbf16, #tpu.memory_space<vmem>>, vector<128x128xbf16>,
    return
  }
  func.func @transform_0(%arg0: i32) -> (i32, i32) {
    %c0_i32 = arith.constant 0 : i32
    %c0_i32_0 = arith.constant 0 : i32
    return %arg0, %c0_i32 : i32, i32
  }
  func.func @transform_1(%arg0: i32) -> (i32, i32) {
    %c0_i32 = arith.constant 0 : i32
    %c0_i32_0 = arith.constant 0 : i32
    %c0_i32_1 = arith.constant 0 : i32
    return %c0_i32, %c0_i32_0 : i32, i32
  }
  func.func @transform_2(%arg0: i32) -> (i32, i32) {
    %c0_i32 = arith.constant 0 : i32
    %c0_i32_0 = arith.constant 0 : i32
    %c0_i32_1 = arith.constant 0 : i32
    return %c0_i32, %c0_i32_0 : i32, i32
  }
  func.func @transform_3(%arg0: i32) -> (i32, i32) {
    %c0_i32 = arith.constant 0 : i32
    %c0_i32_0 = arith.constant 0 : i32
    return %arg0, %c0_i32 : i32, i32
  }
}

module attributes {stable_mosaic.version = 11 : i64} {
  func.func @_matmul_bias_kernel(%arg0: i32, %arg1: memref<128x112xbf16, #tpu.memory_space<vmem>>, %arg2: memref<112x128xbf16, #tpu.memory_space<vmem>>, %arg3: memref<1x128xf32, #tpu.memory_space<vmem>>, %arg4: memref<128x128xbf16, #tpu.memory_space<vmem>>) attributes {dimension_semantics = [#tpu.dimension_semantics<parallel>], iteration_bounds = array<i64: 1>, scalar_prefetch = 0 : i64, scratch_operands = 0 : i64, tpu.core_type = #tpu.core_type<tc>, window_params = [{transform_indices = @transform_0, window_bounds = array<i64: 128, 112>}, {pipeline_mode = #tpu.pipeline_mode<synchronous>, transform_indices = @transform_1, window_bounds = array<i64: 112, 128>}, {pipeline_mode = #tpu.pipeline_mode<synchronous>, transform_indices = @transform_2, window_bounds = array<i64: 1, 128>}, {transform_indices = @transform_3, window_bounds = array<i64: 128, 128>}]} {
    %c0 = arith.constant 0 : index
    %c0_0 = arith.constant 0 : index
    %0 = vector.load %arg1[%c0, %c0_0] : memref<128x112xbf16, #tpu.memory_space<vmem>>, vector<128x112xbf16>
    %c0_1 = arith.constant 0 : index
    %c0_2 = arith.constant 0 : index
    %1 = vector.load %arg2[%c0_1, %c0_2] : memref<112x128xbf16, #tpu.memory_space<vmem>>, vector<112x128xbf16>
    %cst = arith.constant dense<0.000000e+00> : vector<128x128xf32>
    %2 = tpu.matmul %0, %1, %cst {dimension_numbers = #tpu.dot_dimension_numbers<[1], [0], [0], [1], [0, 0, 1, 1], [], []>} : vector<128x112xbf16>, vector<112x128xbf16>, vector<128x128xf32> -> vector<128x128xf32>
    %c0_3 = arith.constant 0 : index
    %c0_4 = arith.constant 0 : index
    %3 = vector.load %arg3[%c0_3, %c0_4] : memref<1x128xf32, #tpu.memory_space<vmem>>, vector<1x128xf32>
    %4 = vector.broadcast %3 : vector<1x128xf32> to vector<128x128xf32>
    %5 = arith.addf %2, %4 : vector<128x128xf32>
    %6 = arith.truncf %5 : vector<128x128xf32> to vector<128x128xbf16>
    %c0_5 = arith.constant 0 : index
    %c0_6 = arith.constant 0 : index
    %7 = vector.load %arg4[%c0_5, %c0_6] : memref<128x128xbf16, #tpu.memory_space<vmem>>, vector<128x128xbf16>
    tpu.vector_store %arg4[%c0_5, %c0_6], %6 {strides = array<i32>} : memref<128x128xbf16, #tpu.memory_space<vmem>>, vector<128x128xbf16>,
    return
  }
  func.func @transform_0(%arg0: i32) -> (i32, i32) {
    %c0_i32 = arith.constant 0 : i32
    %c0_i32_0 = arith.constant 0 : i32
    return %arg0, %c0_i32 : i32, i32
  }
  func.func @transform_1(%arg0: i32) -> (i32, i32) {
    %c0_i32 = arith.constant 0 : i32
    %c0_i32_0 = arith.constant 0 : i32
    %c0_i32_1 = arith.constant 0 : i32
    return %c0_i32, %c0_i32_0 : i32, i32
  }
  func.func @transform_2(%arg0: i32) -> (i32, i32) {
    %c0_i32 = arith.constant 0 : i32
    %c0_i32_0 = arith.constant 0 : i32
    %c0_i32_1 = arith.constant 0 : i32
    return %c0_i32, %c0_i32_0 : i32, i32
  }
  func.func @transform_3(%arg0: i32) -> (i32, i32) {
    %c0_i32 = arith.constant 0 : i32
    %c0_i32_0 = arith.constant 0 : i32
    return %arg0, %c0_i32 : i32, i32
  }
}

module attributes {stable_mosaic.version = 11 : i64} {
  func.func @_matmul_bias_kernel(%arg0: i32, %arg1: memref<128x40xbf16, #tpu.memory_space<vmem>>, %arg2: memref<40x128xbf16, #tpu.memory_space<vmem>>, %arg3: memref<1x128xf32, #tpu.memory_space<vmem>>, %arg4: memref<128x128xbf16, #tpu.memory_space<vmem>>) attributes {dimension_semantics = [#tpu.dimension_semantics<parallel>], iteration_bounds = array<i64: 2>, scalar_prefetch = 0 : i64, scratch_operands = 0 : i64, tpu.core_type = #tpu.core_type<tc>, window_params = [{transform_indices = @transform_0, window_bounds = array<i64: 128, 40>}, {pipeline_mode = #tpu.pipeline_mode<synchronous>, transform_indices = @transform_1, window_bounds = array<i64: 40, 128>}, {pipeline_mode = #tpu.pipeline_mode<synchronous>, transform_indices = @transform_2, window_bounds = array<i64: 1, 128>}, {transform_indices = @transform_3, window_bounds = array<i64: 128, 128>}]} {
    %c0 = arith.constant 0 : index
    %c0_0 = arith.constant 0 : index
    %0 = vector.load %arg1[%c0, %c0_0] : memref<128x40xbf16, #tpu.memory_space<vmem>>, vector<128x40xbf16>
    %c0_1 = arith.constant 0 : index
    %c0_2 = arith.constant 0 : index
    %1 = vector.load %arg2[%c0_1, %c0_2] : memref<40x128xbf16, #tpu.memory_space<vmem>>, vector<40x128xbf16>
    %cst = arith.constant dense<0.000000e+00> : vector<128x128xf32>
    %2 = tpu.matmul %0, %1, %cst {dimension_numbers = #tpu.dot_dimension_numbers<[1], [0], [0], [1], [0, 0, 1, 1], [], []>} : vector<128x40xbf16>, vector<40x128xbf16>, vector<128x128xf32> -> vector<128x128xf32>
    %c0_3 = arith.constant 0 : index
    %c0_4 = arith.constant 0 : index
    %3 = vector.load %arg3[%c0_3, %c0_4] : memref<1x128xf32, #tpu.memory_space<vmem>>, vector<1x128xf32>
    %4 = vector.broadcast %3 : vector<1x128xf32> to vector<128x128xf32>
    %5 = arith.addf %2, %4 : vector<128x128xf32>
    %6 = arith.truncf %5 : vector<128x128xf32> to vector<128x128xbf16>
    %c0_5 = arith.constant 0 : index
    %c0_6 = arith.constant 0 : index
    %7 = vector.load %arg4[%c0_5, %c0_6] : memref<128x128xbf16, #tpu.memory_space<vmem>>, vector<128x128xbf16>
    tpu.vector_store %arg4[%c0_5, %c0_6], %6 {strides = array<i32>} : memref<128x128xbf16, #tpu.memory_space<vmem>>, vector<128x128xbf16>,
    return
  }
  func.func @transform_0(%arg0: i32) -> (i32, i32) {
    %c0_i32 = arith.constant 0 : i32
    %c0_i32_0 = arith.constant 0 : i32
    return %arg0, %c0_i32 : i32, i32
  }
  func.func @transform_1(%arg0: i32) -> (i32, i32) {
    %c0_i32 = arith.constant 0 : i32
    %c0_i32_0 = arith.constant 0 : i32
    %c0_i32_1 = arith.constant 0 : i32
    return %c0_i32, %c0_i32_0 : i32, i32
  }
  func.func @transform_2(%arg0: i32) -> (i32, i32) {
    %c0_i32 = arith.constant 0 : i32
    %c0_i32_0 = arith.constant 0 : i32
    %c0_i32_1 = arith.constant 0 : i32
    return %c0_i32, %c0_i32_0 : i32, i32
  }
  func.func @transform_3(%arg0: i32) -> (i32, i32) {
    %c0_i32 = arith.constant 0 : i32
    %c0_i32_0 = arith.constant 0 : i32
    return %arg0, %c0_i32 : i32, i32
  }
}

module attributes {stable_mosaic.version = 11 : i64} {
  func.func @_matmul_bias_kernel(%arg0: i32, %arg1: memref<128x1152xbf16, #tpu.memory_space<vmem>>, %arg2: memref<1152x128xbf16, #tpu.memory_space<vmem>>, %arg3: memref<1x128xf32, #tpu.memory_space<vmem>>, %arg4: memref<128x128xbf16, #tpu.memory_space<vmem>>) attributes {dimension_semantics = [#tpu.dimension_semantics<parallel>], iteration_bounds = array<i64: 2>, scalar_prefetch = 0 : i64, scratch_operands = 0 : i64, tpu.core_type = #tpu.core_type<tc>, window_params = [{transform_indices = @transform_0, window_bounds = array<i64: 128, 1152>}, {pipeline_mode = #tpu.pipeline_mode<synchronous>, transform_indices = @transform_1, window_bounds = array<i64: 1152, 128>}, {pipeline_mode = #tpu.pipeline_mode<synchronous>, transform_indices = @transform_2, window_bounds = array<i64: 1, 128>}, {transform_indices = @transform_3, window_bounds = array<i64: 128, 128>}]} {
    %c0 = arith.constant 0 : index
    %c0_0 = arith.constant 0 : index
    %0 = vector.load %arg1[%c0, %c0_0] : memref<128x1152xbf16, #tpu.memory_space<vmem>>, vector<128x1152xbf16>
    %c0_1 = arith.constant 0 : index
    %c0_2 = arith.constant 0 : index
    %1 = vector.load %arg2[%c0_1, %c0_2] : memref<1152x128xbf16, #tpu.memory_space<vmem>>, vector<1152x128xbf16>
    %cst = arith.constant dense<0.000000e+00> : vector<128x128xf32>
    %2 = tpu.matmul %0, %1, %cst {dimension_numbers = #tpu.dot_dimension_numbers<[1], [0], [0], [1], [0, 0, 1, 1], [], []>} : vector<128x1152xbf16>, vector<1152x128xbf16>, vector<128x128xf32> -> vector<128x128xf32>
    %c0_3 = arith.constant 0 : index
    %c0_4 = arith.constant 0 : index
    %3 = vector.load %arg3[%c0_3, %c0_4] : memref<1x128xf32, #tpu.memory_space<vmem>>, vector<1x128xf32>
    %4 = vector.broadcast %3 : vector<1x128xf32> to vector<128x128xf32>
    %5 = arith.addf %2, %4 : vector<128x128xf32>
    %6 = arith.truncf %5 : vector<128x128xf32> to vector<128x128xbf16>
    %c0_5 = arith.constant 0 : index
    %c0_6 = arith.constant 0 : index
    %7 = vector.load %arg4[%c0_5, %c0_6] : memref<128x128xbf16, #tpu.memory_space<vmem>>, vector<128x128xbf16>
    tpu.vector_store %arg4[%c0_5, %c0_6], %6 {strides = array<i32>} : memref<128x128xbf16, #tpu.memory_space<vmem>>, vector<128x128xbf16>,
    return
  }
  func.func @transform_0(%arg0: i32) -> (i32, i32) {
    %c0_i32 = arith.constant 0 : i32
    %c0_i32_0 = arith.constant 0 : i32
    return %arg0, %c0_i32 : i32, i32
  }
  func.func @transform_1(%arg0: i32) -> (i32, i32) {
    %c0_i32 = arith.constant 0 : i32
    %c0_i32_0 = arith.constant 0 : i32
    %c0_i32_1 = arith.constant 0 : i32
    return %c0_i32, %c0_i32_0 : i32, i32
  }
  func.func @transform_2(%arg0: i32) -> (i32, i32) {
    %c0_i32 = arith.constant 0 : i32
    %c0_i32_0 = arith.constant 0 : i32
    %c0_i32_1 = arith.constant 0 : i32
    return %c0_i32, %c0_i32_0 : i32, i32
  }
  func.func @transform_3(%arg0: i32) -> (i32, i32) {
    %c0_i32 = arith.constant 0 : i32
    %c0_i32_0 = arith.constant 0 : i32
    return %arg0, %c0_i32 : i32, i32
  }
}

module attributes {stable_mosaic.version = 11 : i64} {
  func.func @_matmul_bias_kernel(%arg0: i32, %arg1: memref<128x1152xbf16, #tpu.memory_space<vmem>>, %arg2: memref<1152x128xbf16, #tpu.memory_space<vmem>>, %arg3: memref<1x128xf32, #tpu.memory_space<vmem>>, %arg4: memref<128x128xbf16, #tpu.memory_space<vmem>>) attributes {dimension_semantics = [#tpu.dimension_semantics<parallel>], iteration_bounds = array<i64: 1>, scalar_prefetch = 0 : i64, scratch_operands = 0 : i64, tpu.core_type = #tpu.core_type<tc>, window_params = [{transform_indices = @transform_0, window_bounds = array<i64: 128, 1152>}, {pipeline_mode = #tpu.pipeline_mode<synchronous>, transform_indices = @transform_1, window_bounds = array<i64: 1152, 128>}, {pipeline_mode = #tpu.pipeline_mode<synchronous>, transform_indices = @transform_2, window_bounds = array<i64: 1, 128>}, {transform_indices = @transform_3, window_bounds = array<i64: 128, 128>}]} {
    %c0 = arith.constant 0 : index
    %c0_0 = arith.constant 0 : index
    %0 = vector.load %arg1[%c0, %c0_0] : memref<128x1152xbf16, #tpu.memory_space<vmem>>, vector<128x1152xbf16>
    %c0_1 = arith.constant 0 : index
    %c0_2 = arith.constant 0 : index
    %1 = vector.load %arg2[%c0_1, %c0_2] : memref<1152x128xbf16, #tpu.memory_space<vmem>>, vector<1152x128xbf16>
    %cst = arith.constant dense<0.000000e+00> : vector<128x128xf32>
    %2 = tpu.matmul %0, %1, %cst {dimension_numbers = #tpu.dot_dimension_numbers<[1], [0], [0], [1], [0, 0, 1, 1], [], []>} : vector<128x1152xbf16>, vector<1152x128xbf16>, vector<128x128xf32> -> vector<128x128xf32>
    %c0_3 = arith.constant 0 : index
    %c0_4 = arith.constant 0 : index
    %3 = vector.load %arg3[%c0_3, %c0_4] : memref<1x128xf32, #tpu.memory_space<vmem>>, vector<1x128xf32>
    %4 = vector.broadcast %3 : vector<1x128xf32> to vector<128x128xf32>
    %5 = arith.addf %2, %4 : vector<128x128xf32>
    %6 = arith.truncf %5 : vector<128x128xf32> to vector<128x128xbf16>
    %c0_5 = arith.constant 0 : index
    %c0_6 = arith.constant 0 : index
    %7 = vector.load %arg4[%c0_5, %c0_6] : memref<128x128xbf16, #tpu.memory_space<vmem>>, vector<128x128xbf16>
    tpu.vector_store %arg4[%c0_5, %c0_6], %6 {strides = array<i32>} : memref<128x128xbf16, #tpu.memory_space<vmem>>, vector<128x128xbf16>,
    return
  }
  func.func @transform_0(%arg0: i32) -> (i32, i32) {
    %c0_i32 = arith.constant 0 : i32
    %c0_i32_0 = arith.constant 0 : i32
    return %arg0, %c0_i32 : i32, i32
  }
  func.func @transform_1(%arg0: i32) -> (i32, i32) {
    %c0_i32 = arith.constant 0 : i32
    %c0_i32_0 = arith.constant 0 : i32
    %c0_i32_1 = arith.constant 0 : i32
    return %c0_i32, %c0_i32_0 : i32, i32
  }
  func.func @transform_2(%arg0: i32) -> (i32, i32) {
    %c0_i32 = arith.constant 0 : i32
    %c0_i32_0 = arith.constant 0 : i32
    %c0_i32_1 = arith.constant 0 : i32
    return %c0_i32, %c0_i32_0 : i32, i32
  }
  func.func @transform_3(%arg0: i32) -> (i32, i32) {
    %c0_i32 = arith.constant 0 : i32
    %c0_i32_0 = arith.constant 0 : i32
    return %arg0, %c0_i32 : i32, i32
  }
}

module attributes {stable_mosaic.version = 11 : i64} {
  func.func @_matmul_bias_kernel(%arg0: i32, %arg1: memref<128x1152xbf16, #tpu.memory_space<vmem>>, %arg2: memref<1152x128xbf16, #tpu.memory_space<vmem>>, %arg3: memref<1x128xf32, #tpu.memory_space<vmem>>, %arg4: memref<128x128xbf16, #tpu.memory_space<vmem>>) attributes {dimension_semantics = [#tpu.dimension_semantics<parallel>], iteration_bounds = array<i64: 3>, scalar_prefetch = 0 : i64, scratch_operands = 0 : i64, tpu.core_type = #tpu.core_type<tc>, window_params = [{transform_indices = @transform_0, window_bounds = array<i64: 128, 1152>}, {pipeline_mode = #tpu.pipeline_mode<synchronous>, transform_indices = @transform_1, window_bounds = array<i64: 1152, 128>}, {pipeline_mode = #tpu.pipeline_mode<synchronous>, transform_indices = @transform_2, window_bounds = array<i64: 1, 128>}, {transform_indices = @transform_3, window_bounds = array<i64: 128, 128>}]} {
    %c0 = arith.constant 0 : index
    %c0_0 = arith.constant 0 : index
    %0 = vector.load %arg1[%c0, %c0_0] : memref<128x1152xbf16, #tpu.memory_space<vmem>>, vector<128x1152xbf16>
    %c0_1 = arith.constant 0 : index
    %c0_2 = arith.constant 0 : index
    %1 = vector.load %arg2[%c0_1, %c0_2] : memref<1152x128xbf16, #tpu.memory_space<vmem>>, vector<1152x128xbf16>
    %cst = arith.constant dense<0.000000e+00> : vector<128x128xf32>
    %2 = tpu.matmul %0, %1, %cst {dimension_numbers = #tpu.dot_dimension_numbers<[1], [0], [0], [1], [0, 0, 1, 1], [], []>} : vector<128x1152xbf16>, vector<1152x128xbf16>, vector<128x128xf32> -> vector<128x128xf32>
    %c0_3 = arith.constant 0 : index
    %c0_4 = arith.constant 0 : index
    %3 = vector.load %arg3[%c0_3, %c0_4] : memref<1x128xf32, #tpu.memory_space<vmem>>, vector<1x128xf32>
    %4 = vector.broadcast %3 : vector<1x128xf32> to vector<128x128xf32>
    %5 = arith.addf %2, %4 : vector<128x128xf32>
    %cst_5 = arith.constant 0.000000e+00 : f32
    %6 = vector.broadcast %cst_5 : f32 to vector<128x128xf32>
    %7 = arith.maximumf %5, %6 : vector<128x128xf32>
    %8 = arith.truncf %7 : vector<128x128xf32> to vector<128x128xbf16>
    %c0_6 = arith.constant 0 : index
    %c0_7 = arith.constant 0 : index
    %9 = vector.load %arg4[%c0_6, %c0_7] : memref<128x128xbf16, #tpu.memory_space<vmem>>, vector<128x128xbf16>
    tpu.vector_store %arg4[%c0_6, %c0_7], %8 {strides = array<i32>} : memref<128x128xbf16, #tpu.memory_space<vmem>>, vector<128x128xbf16>,
    return
  }
  func.func @transform_0(%arg0: i32) -> (i32, i32) {
    %c0_i32 = arith.constant 0 : i32
    %c0_i32_0 = arith.constant 0 : i32
    return %arg0, %c0_i32 : i32, i32
  }
  func.func @transform_1(%arg0: i32) -> (i32, i32) {
    %c0_i32 = arith.constant 0 : i32
    %c0_i32_0 = arith.constant 0 : i32
    %c0_i32_1 = arith.constant 0 : i32
    return %c0_i32, %c0_i32_0 : i32, i32
  }
  func.func @transform_2(%arg0: i32) -> (i32, i32) {
    %c0_i32 = arith.constant 0 : i32
    %c0_i32_0 = arith.constant 0 : i32
    %c0_i32_1 = arith.constant 0 : i32
    return %c0_i32, %c0_i32_0 : i32, i32
  }
  func.func @transform_3(%arg0: i32) -> (i32, i32) {
    %c0_i32 = arith.constant 0 : i32
    %c0_i32_0 = arith.constant 0 : i32
    return %arg0, %c0_i32 : i32, i32
  }
}

module attributes {stable_mosaic.version = 11 : i64} {
  func.func @_matmul_bias_kernel(%arg0: i32, %arg1: memref<128x1152xbf16, #tpu.memory_space<vmem>>, %arg2: memref<1152x128xbf16, #tpu.memory_space<vmem>>, %arg3: memref<1x128xf32, #tpu.memory_space<vmem>>, %arg4: memref<128x128xf32, #tpu.memory_space<vmem>>) attributes {dimension_semantics = [#tpu.dimension_semantics<parallel>], iteration_bounds = array<i64: 3>, scalar_prefetch = 0 : i64, scratch_operands = 0 : i64, tpu.core_type = #tpu.core_type<tc>, window_params = [{transform_indices = @transform_0, window_bounds = array<i64: 128, 1152>}, {pipeline_mode = #tpu.pipeline_mode<synchronous>, transform_indices = @transform_1, window_bounds = array<i64: 1152, 128>}, {pipeline_mode = #tpu.pipeline_mode<synchronous>, transform_indices = @transform_2, window_bounds = array<i64: 1, 128>}, {transform_indices = @transform_3, window_bounds = array<i64: 128, 128>}]} {
    %c0 = arith.constant 0 : index
    %c0_0 = arith.constant 0 : index
    %0 = vector.load %arg1[%c0, %c0_0] : memref<128x1152xbf16, #tpu.memory_space<vmem>>, vector<128x1152xbf16>
    %c0_1 = arith.constant 0 : index
    %c0_2 = arith.constant 0 : index
    %1 = vector.load %arg2[%c0_1, %c0_2] : memref<1152x128xbf16, #tpu.memory_space<vmem>>, vector<1152x128xbf16>
    %cst = arith.constant dense<0.000000e+00> : vector<128x128xf32>
    %2 = tpu.matmul %0, %1, %cst {dimension_numbers = #tpu.dot_dimension_numbers<[1], [0], [0], [1], [0, 0, 1, 1], [], []>} : vector<128x1152xbf16>, vector<1152x128xbf16>, vector<128x128xf32> -> vector<128x128xf32>
    %c0_3 = arith.constant 0 : index
    %c0_4 = arith.constant 0 : index
    %3 = vector.load %arg3[%c0_3, %c0_4] : memref<1x128xf32, #tpu.memory_space<vmem>>, vector<1x128xf32>
    %4 = vector.broadcast %3 : vector<1x128xf32> to vector<128x128xf32>
    %5 = arith.addf %2, %4 : vector<128x128xf32>
    %c0_5 = arith.constant 0 : index
    %c0_6 = arith.constant 0 : index
    %6 = vector.load %arg4[%c0_5, %c0_6] : memref<128x128xf32, #tpu.memory_space<vmem>>, vector<128x128xf32>
    tpu.vector_store %arg4[%c0_5, %c0_6], %5 {strides = array<i32>} : memref<128x128xf32, #tpu.memory_space<vmem>>, vector<128x128xf32>,
    return
  }
  func.func @transform_0(%arg0: i32) -> (i32, i32) {
    %c0_i32 = arith.constant 0 : i32
    %c0_i32_0 = arith.constant 0 : i32
    return %arg0, %c0_i32 : i32, i32
  }
  func.func @transform_1(%arg0: i32) -> (i32, i32) {
    %c0_i32 = arith.constant 0 : i32
    %c0_i32_0 = arith.constant 0 : i32
    %c0_i32_1 = arith.constant 0 : i32
    return %c0_i32, %c0_i32_0 : i32, i32
  }
  func.func @transform_2(%arg0: i32) -> (i32, i32) {
    %c0_i32 = arith.constant 0 : i32
    %c0_i32_0 = arith.constant 0 : i32
    %c0_i32_1 = arith.constant 0 : i32
    return %c0_i32, %c0_i32_0 : i32, i32
  }
  func.func @transform_3(%arg0: i32) -> (i32, i32) {
    %c0_i32 = arith.constant 0 : i32
    %c0_i32_0 = arith.constant 0 : i32
    return %arg0, %c0_i32 : i32, i32
  }
}

module attributes {stable_mosaic.version = 11 : i64} {
  func.func @_decode_kernel(%arg0: i32, %arg1: memref<4x4x256xf32, #tpu.memory_space<vmem>>, %arg2: memref<4x4x256xf32, #tpu.memory_space<vmem>>, %arg3: memref<4x256xf32, #tpu.memory_space<vmem>>, %arg4: memref<4x4x256xf32, #tpu.memory_space<vmem>>, %arg5: memref<4x4x256xf32, #tpu.memory_space<vmem>>) attributes {dimension_semantics = [#tpu.dimension_semantics<arbitrary>], iteration_bounds = array<i64: 1>, scalar_prefetch = 0 : i64, scratch_operands = 0 : i64, tpu.core_type = #tpu.core_type<tc>, window_params = [{pipeline_mode = #tpu.pipeline_mode<synchronous>, transform_indices = @transform_0, window_bounds = array<i64: 4, 4, 256>}, {pipeline_mode = #tpu.pipeline_mode<synchronous>, transform_indices = @transform_1, window_bounds = array<i64: 4, 4, 256>}, {pipeline_mode = #tpu.pipeline_mode<synchronous>, transform_indices = @transform_2, window_bounds = array<i64: 4, 256>}, {pipeline_mode = #tpu.pipeline_mode<synchronous>, transform_indices = @transform_3, window_bounds = array<i64: 4, 4, 256>}, {pipeline_mode = #tpu.pipeline_mode<synchronous>, transform_indices = @transform_4, window_bounds = array<i64: 4, 4, 256>}]} {
    %c0 = arith.constant 0 : index
    %c0_0 = arith.constant 0 : index
    %c0_1 = arith.constant 0 : index
    %0 = vector.load %arg1[%c0, %c0_0, %c0_1] : memref<4x4x256xf32, #tpu.memory_space<vmem>>, vector<4x4x256xf32>
    %1 = arith.negf %0 : vector<4x4x256xf32>
    %2 = math.exp %1 : vector<4x4x256xf32>
    %cst = arith.constant 1.000000e+00 : f32
    %3 = vector.broadcast %cst : f32 to vector<4x4x256xf32>
    %4 = arith.addf %3, %2 : vector<4x4x256xf32>
    %5 = arith.divf %3, %4 : vector<4x4x256xf32>
    %c0_2 = arith.constant 0 : index
    %c0_3 = arith.constant 0 : index
    %c0_4 = arith.constant 0 : index
    %6 = vector.load %arg4[%c0_2, %c0_3, %c0_4] : memref<4x4x256xf32, #tpu.memory_space<vmem>>, vector<4x4x256xf32>
    tpu.vector_store %arg4[%c0_2, %c0_3, %c0_4], %5 {strides = array<i32>} : memref<4x4x256xf32, #tpu.memory_space<vmem>>, vector<4x4x256xf32>,
    %c0_5 = arith.constant 0 : index
    %c0_6 = arith.constant 0 : index
    %7 = vector.load %arg3[%c0_5, %c0_6] : memref<4x256xf32, #tpu.memory_space<vmem>>, vector<4x256xf32>
    %8 = vector.extract_strided_slice %7 {offsets = [0, 0], sizes = [1, 256], strides = [1, 1]} : vector<4x256xf32> to vector<1x256xf32>
    %9 = vector.extract_strided_slice %7 {offsets = [1, 0], sizes = [1, 256], strides = [1, 1]} : vector<4x256xf32> to vector<1x256xf32>
    %10 = vector.extract_strided_slice %7 {offsets = [2, 0], sizes = [1, 256], strides = [1, 1]} : vector<4x256xf32> to vector<1x256xf32>
    %11 = vector.extract_strided_slice %7 {offsets = [3, 0], sizes = [1, 256], strides = [1, 1]} : vector<4x256xf32> to vector<1x256xf32>
    %12 = arith.subf %10, %8 : vector<1x256xf32>
    %13 = arith.subf %11, %9 : vector<1x256xf32>
    %cst_7 = arith.constant 5.000000e-01 : f32
    %14 = vector.broadcast %cst_7 : f32 to vector<1x256xf32>
    %15 = arith.mulf %14, %12 : vector<1x256xf32>
    %16 = arith.addf %8, %15 : vector<1x256xf32>
    %cst_8 = arith.constant 5.000000e-01 : f32
    %17 = vector.broadcast %cst_8 : f32 to vector<1x256xf32>
    %18 = arith.mulf %17, %13 : vector<1x256xf32>
    %19 = arith.addf %9, %18 : vector<1x256xf32>
    %c0_9 = arith.constant 0 : index
    %c0_10 = arith.constant 0 : index
    %c0_11 = arith.constant 0 : index
    %20 = vector.load %arg2[%c0_9, %c0_10, %c0_11] : memref<4x4x256xf32, #tpu.memory_space<vmem>>, vector<4x4x256xf32>
    %21 = vector.extract_strided_slice %20 {offsets = [0, 0, 0], sizes = [4, 1, 256], strides = [1, 1, 1]} : vector<4x4x256xf32> to vector<4x1x256xf32>
    %22 = vector.extract_strided_slice %20 {offsets = [0, 1, 0], sizes = [4, 1, 256], strides = [1, 1, 1]} : vector<4x4x256xf32> to vector<4x1x256xf32>
    %23 = vector.extract_strided_slice %20 {offsets = [0, 2, 0], sizes = [4, 1, 256], strides = [1, 1, 1]} : vector<4x4x256xf32> to vector<4x1x256xf32>
    %24 = vector.extract_strided_slice %20 {offsets = [0, 3, 0], sizes = [4, 1, 256], strides = [1, 1, 1]} : vector<4x4x256xf32> to vector<4x1x256xf32>
    %cst_12 = arith.constant 4.13516665 : f32
    %25 = vector.broadcast %cst_12 : f32 to vector<4x1x256xf32>
    %26 = arith.minimumf %23, %25 : vector<4x1x256xf32>
    %cst_13 = arith.constant 4.13516665 : f32
    %27 = vector.broadcast %cst_13 : f32 to vector<4x1x256xf32>
    %28 = arith.minimumf %24, %27 : vector<4x1x256xf32>
    %29 = vector.shape_cast %12 : vector<1x256xf32> to vector<1x1x256xf32>
    %30 = vector.broadcast %29 : vector<1x1x256xf32> to vector<4x1x256xf32>
    %31 = arith.mulf %21, %30 : vector<4x1x256xf32>
    %32 = vector.shape_cast %16 : vector<1x256xf32> to vector<1x1x256xf32>
    %33 = vector.broadcast %32 : vector<1x1x256xf32> to vector<4x1x256xf32>
    %34 = arith.addf %31, %33 : vector<4x1x256xf32>
    %35 = vector.shape_cast %13 : vector<1x256xf32> to vector<1x1x256xf32>
    %36 = vector.broadcast %35 : vector<1x1x256xf32> to vector<4x1x256xf32>
    %37 = arith.mulf %22, %36 : vector<4x1x256xf32>
    %38 = vector.shape_cast %19 : vector<1x256xf32> to vector<1x1x256xf32>
    %39 = vector.broadcast %38 : vector<1x1x256xf32> to vector<4x1x256xf32>
    %40 = arith.addf %37, %39 : vector<4x1x256xf32>
    %41 = math.exp %26 : vector<4x1x256xf32>
    %42 = vector.shape_cast %12 : vector<1x256xf32> to vector<1x1x256xf32>
    %43 = vector.broadcast %42 : vector<1x1x256xf32> to vector<4x1x256xf32>
    %44 = arith.mulf %41, %43 : vector<4x1x256xf32>
    %45 = math.exp %28 : vector<4x1x256xf32>
    %46 = vector.shape_cast %13 : vector<1x256xf32> to vector<1x1x256xf32>
    %47 = vector.broadcast %46 : vector<1x1x256xf32> to vector<4x1x256xf32>
    %48 = arith.mulf %45, %47 : vector<4x1x256xf32>
    %cst_14 = arith.constant 5.000000e-01 : f32
    %49 = vector.broadcast %cst_14 : f32 to vector<4x1x256xf32>
    %50 = arith.mulf %49, %44 : vector<4x1x256xf32>
    %51 = arith.subf %34, %50 : vector<4x1x256xf32>
    %cst_15 = arith.constant 0.000000e+00 : f32
    %cst_16 = arith.constant 6.400000e+01 : f32
    %52 = vector.broadcast %cst_15 : f32 to vector<4x1x256xf32>
    %53 = arith.maximumf %52, %51 : vector<4x1x256xf32>
    %54 = vector.broadcast %cst_16 : f32 to vector<4x1x256xf32>
    %55 = arith.minimumf %54, %53 : vector<4x1x256xf32>
    %cst_17 = arith.constant 5.000000e-01 : f32
    %56 = vector.broadcast %cst_17 : f32 to vector<4x1x256xf32>
    %57 = arith.mulf %56, %48 : vector<4x1x256xf32>
    %58 = arith.subf %40, %57 : vector<4x1x256xf32>
    %cst_18 = arith.constant 0.000000e+00 : f32
    %cst_19 = arith.constant 6.400000e+01 : f32
    %59 = vector.broadcast %cst_18 : f32 to vector<4x1x256xf32>
    %60 = arith.maximumf %59, %58 : vector<4x1x256xf32>
    %61 = vector.broadcast %cst_19 : f32 to vector<4x1x256xf32>
    %62 = arith.minimumf %61, %60 : vector<4x1x256xf32>
    %cst_20 = arith.constant 5.000000e-01 : f32
    %63 = vector.broadcast %cst_20 : f32 to vector<4x1x256xf32>
    %64 = arith.mulf %63, %44 : vector<4x1x256xf32>
    %65 = arith.addf %34, %64 : vector<4x1x256xf32>
    %cst_21 = arith.constant 0.000000e+00 : f32
    %cst_22 = arith.constant 6.400000e+01 : f32
    %66 = vector.broadcast %cst_21 : f32 to vector<4x1x256xf32>
    %67 = arith.maximumf %66, %65 : vector<4x1x256xf32>
    %68 = vector.broadcast %cst_22 : f32 to vector<4x1x256xf32>
    %69 = arith.minimumf %68, %67 : vector<4x1x256xf32>
    %cst_23 = arith.constant 5.000000e-01 : f32
    %70 = vector.broadcast %cst_23 : f32 to vector<4x1x256xf32>
    %71 = arith.mulf %70, %48 : vector<4x1x256xf32>
    %72 = arith.addf %40, %71 : vector<4x1x256xf32>
    %cst_24 = arith.constant 0.000000e+00 : f32
    %cst_25 = arith.constant 6.400000e+01 : f32
    %73 = vector.broadcast %cst_24 : f32 to vector<4x1x256xf32>
    %74 = arith.maximumf %73, %72 : vector<4x1x256xf32>
    %75 = vector.broadcast %cst_25 : f32 to vector<4x1x256xf32>
    %76 = arith.minimumf %75, %74 : vector<4x1x256xf32>
    %77 = tpu.concatenate %55, %62, %69, %76 in 1 : vector<4x1x256xf32>, vector<4x1x256xf32>, vector<4x1x256xf32>, vector<4x1x256xf32> -> vector<4x4x256xf32>
    %c0_26 = arith.constant 0 : index
    %c0_27 = arith.constant 0 : index
    %c0_28 = arith.constant 0 : index
    %78 = vector.load %arg5[%c0_26, %c0_27, %c0_28] : memref<4x4x256xf32, #tpu.memory_space<vmem>>, vector<4x4x256xf32>
    tpu.vector_store %arg5[%c0_26, %c0_27, %c0_28], %77 {strides = array<i32>} : memref<4x4x256xf32, #tpu.memory_space<vmem>>, vector<4x4x256xf32>,
    return
  }
  func.func @transform_0(%arg0: i32) -> (i32, i32, i32) {
    %c0_i32 = arith.constant 0 : i32
    %c0_i32_0 = arith.constant 0 : i32
    %c0_i32_1 = arith.constant 0 : i32
    %c0_i32_2 = arith.constant 0 : i32
    return %c0_i32, %c0_i32_0, %c0_i32_1 : i32, i32, i32
  }
  func.func @transform_1(%arg0: i32) -> (i32, i32, i32) {
    %c0_i32 = arith.constant 0 : i32
    %c0_i32_0 = arith.constant 0 : i32
    %c0_i32_1 = arith.constant 0 : i32
    %c0_i32_2 = arith.constant 0 : i32
    return %c0_i32, %c0_i32_0, %c0_i32_1 : i32, i32, i32
  }
  func.func @transform_2(%arg0: i32) -> (i32, i32) {
    %c0_i32 = arith.constant 0 : i32
    %c0_i32_0 = arith.constant 0 : i32
    %c0_i32_1 = arith.constant 0 : i32
    return %c0_i32, %c0_i32_0 : i32, i32
  }
  func.func @transform_3(%arg0: i32) -> (i32, i32, i32) {
    %c0_i32 = arith.constant 0 : i32
    %c0_i32_0 = arith.constant 0 : i32
    %c0_i32_1 = arith.constant 0 : i32
    %c0_i32_2 = arith.constant 0 : i32
    return %c0_i32, %c0_i32_0, %c0_i32_1 : i32, i32, i32
  }
  func.func @transform_4(%arg0: i32) -> (i32, i32, i32) {
    %c0_i32 = arith.constant 0 : i32
    %c0_i32_0 = arith.constant 0 : i32
    %c0_i32_1 = arith.constant 0 : i32
    %c0_i32_2 = arith.constant 0 : i32
    return %c0_i32, %c0_i32_0, %c0_i32_1 : i32, i32, i32
  }
}

</mosaic_0001>

<bundles_post_ra>
// kernel: tsm_retinanet_forward.22
= control target key start
LH: loop header
LB: loop body
LE: loop exit
PB: predicated region body
PF: predicated region fallthrough
CT: control target
= control target key end

     0   :  { %s1829_s12 = smov 0   ;;  %s2028_s0 = inlined_call_operand.vmem [shape: bf16[4096,27], index: 0, kind: input, shape index: {}]   ;;  %s2029_s1 = inlined_call_operand.vmem [shape: bf16[27,128], index: 1, kind: input, shape index: {}]   ;;  %s2030_s2 = inlined_call_operand.vmem [shape: f32[1,128], index: 2, kind: input, shape index: {}]   ;;  %s2031_s3 = inlined_call_operand.vmem [shape: bf16[4096,128], index: 3, kind: output, shape index: {}]  }
   0x1 LB: > { %s1254_s13 = sadd.s32 4294967295, %s1806_s12   ;;  %p1258_p0 = scmp.ge.s32.totalorder %s1806_s12, 1  ;;  %s1806_s12 = sphi %s1829_s12, %s13_s12  }
   0x2   : > { %p138_p1 = scmp.lt.s32.totalorder %s1806_s12, 9 }
   0x4   : > { %p139_p2 = pnand %p1258_p0, %p138_p1 }
   0x5   : > { %v1766_v0 = vld [vmem:[%s2029_s1] sm:$0xff] (!%p139_p2)   ;;  %vm518_vm0 = vcmask (!%p139_p2), 1044480   ;;  %v1767_v1 = vld [vmem:[%s2029_s1 + $0x8] sm:$0x3f] (!%p139_p2)   ;;  %vm519_vm1 = vcmask (!%p139_p2), 1045504   ;;  %s1259_s18 = sshll.u32 (!%p139_p2), %s1254_s13, 6 }
   0x6   : > { %142 = sbr.rel (%p139_p2) target bundleno = 297 (0x129), region = 32  ;;  %1685 = vmatprep.subr.bf16.mxu0 (!%p139_p2), %v1766_v0  ;;  %1753 = vmatprep.subr.bf16.mxu1 (!%p139_p2), %v1766_v0  ;;  %v1808_v2 = vmov (!%p139_p2), 65535   ;;  %p163_p3 = scmp.lt.s32.totalorder (!%p139_p2), %s1259_s18, 511  ;;  %vm421_vm2 = vcmask (!%p139_p2), 220160   ;;  %v1920_v38 = vld [vmem:[%s2030_s2] ss:$0 sm:$0xff] (!%p139_p2) }
   0x7   : > { %1686 = vmatpush3.bf16.msra.mxu0 (!%p139_p2), %v1766_v0  ;;  %1755 = vmatpush3.bf16.msra.mxu1 (!%p139_p2), %v1766_v0  ;;  %v520_v3 = vsel (!%p139_p2), %vm518_vm0, 4294967295, %v1808_v2 }
   0x8   : > { %v521_v4 = vsel (!%p139_p2), %vm519_vm1, %v520_v3, 0 }
   0x9   : > { %v523_v5 = vand.u32 (!%p139_p2), %v1767_v1, %v521_v4 }
   0xb   : > { %1687 = vmatprep.subr.bf16.mxu0 (!%p139_p2), %v523_v5  ;;  %1754 = vmatprep.subr.bf16.mxu1 (!%p139_p2), %v523_v5 }
   0xc   : > { %1688 = vmatpush3.bf16.msra.mxu0 (!%p139_p2), %v523_v5  ;;  %1756 = vmatpush3.bf16.msra.mxu1 (!%p139_p2), %v523_v5 }
   0xd   : > { %s2033_s18 = smov (!%p163_p3, %s1259_s18), 511 }
   0xe   : > { %s1260_s19 = sshll.u32 %s2033_s18, 2 }
   0xf   : > { %s1851_s22 = scalar_lea.vmem %s2028_s0, %s1260_s19  ;;  %s1935_s27 = scalar_lea.vmem %s2031_s3, %s1260_s19 }
  0x10   : > { %v1768_v6 = vld [vmem:[%s1851_s22] sm:$0xff]   ;;  %v1770_v8 = vld [vmem:[%s1851_s22 + $0x8] sm:$0xff]   ;;  %v1772_v10 = vld [vmem:[%s1851_s22 + $0x10] sm:$0xff]  }
  0x11   : > { %v1769_v7 = vld [vmem:[%s1851_s22 + $0x80] sm:$0xff]   ;;  %1689 = vmatprep.mubr.msk.bf16.mxu0 %vm421_vm2, %v1768_v6  ;;  %v1771_v9 = vld [vmem:[%s1851_s22 + $0x88] sm:$0xff]   ;;  %v1773_v11 = vld [vmem:[%s1851_s22 + $0x90] sm:$0xff]  }
  0x12   : > { %1721 = vmatprep.mubr.msk.bf16.mxu1 %vm421_vm2, %v1769_v7  ;;  %1690 = vmatmul.mubr.msk.bf16.vlgmr.msra.gmra.mrb[0].mxu0 %vm421_vm2, %v1770_v8  ;;  %v1774_v12 = vld [vmem:[%s1851_s22 + $0x18] sm:$0xff]   ;;  %v1776_v14 = vld [vmem:[%s1851_s22 + $0x20] sm:$0xff]   ;;  %v1778_v16 = vld [vmem:[%s1851_s22 + $0x28] sm:$0xff]  }
  0x13   : > { %1722 = vmatmul.mubr.msk.bf16.vlgmr.msra.gmra.mrb[0].mxu1 %vm421_vm2, %v1771_v9  ;;  %1693 = vmatprep.mubr.msk.bf16.mxu0 %vm421_vm2, %v1772_v10  ;;  %v1775_v13 = vld [vmem:[%s1851_s22 + $0x98] sm:$0xff]   ;;  %v1777_v15 = vld [vmem:[%s1851_s22 + $0xa0] sm:$0xff]   ;;  %v1779_v17 = vld [vmem:[%s1851_s22 + $0xa8] sm:$0xff]  }
  0x14   : > { %1725 = vmatprep.mubr.msk.bf16.mxu1 %vm421_vm2, %v1773_v11  ;;  %v1780_v18 = vld [vmem:[%s1851_s22 + $0x30] sm:$0xff]   ;;  %v1782_v20 = vld [vmem:[%s1851_s22 + $0x38] sm:$0xff]   ;;  %v1784_v22 = vld [vmem:[%s1851_s22 + $0x40] sm:$0xff]  }
  0x15   : > { %v1781_v19 = vld [vmem:[%s1851_s22 + $0xb0] sm:$0xff]   ;;  %v1783_v21 = vld [vmem:[%s1851_s22 + $0xb8] sm:$0xff]   ;;  %v1785_v23 = vld [vmem:[%s1851_s22 + $0xc0] sm:$0xff]  }
  0x16   : > { %v1786_v24 = vld [vmem:[%s1851_s22 + $0x48] sm:$0xff]   ;;  %v1788_v26 = vld [vmem:[%s1851_s22 + $0x50] sm:$0xff]   ;;  %v1790_v28 = vld [vmem:[%s1851_s22 + $0x58] sm:$0xff]  }
  0x17   : > { %v1787_v25 = vld [vmem:[%s1851_s22 + $0xc8] sm:$0xff]   ;;  %v1789_v27 = vld [vmem:[%s1851_s22 + $0xd0] sm:$0xff]   ;;  %v1791_v29 = vld [vmem:[%s1851_s22 + $0xd8] sm:$0xff]  }
  0x18   : > { %v1792_v30 = vld [vmem:[%s1851_s22 + $0x60] sm:$0xff]   ;;  %v1794_v32 = vld [vmem:[%s1851_s22 + $0x68] sm:$0xff]   ;;  %v1796_v34 = vld [vmem:[%s1851_s22 + $0x70] sm:$0xff]  }
  0x19   : > { %v1793_v31 = vld [vmem:[%s1851_s22 + $0xe0] sm:$0xff]   ;;  %v1795_v33 = vld [vmem:[%s1851_s22 + $0xe8] sm:$0xff]   ;;  %v1797_v35 = vld [vmem:[%s1851_s22 + $0xf0] sm:$0xff]  }
  0x1a   : > { %1694 = vmatmul.mubr.msk.bf16.gmra.mrb[4].mxu0 %vm421_vm2, %v1774_v12  ;;  %v1798_v36 = vld [vmem:[%s1851_s22 + $0x78] sm:$0xff]  }
  0x1b   : > { %1726 = vmatmul.mubr.msk.bf16.gmra.mrb[4].mxu1 %vm421_vm2, %v1775_v13  ;;  %1697 = vmatprep.mubr.msk.bf16.mxu0 %vm421_vm2, %v1776_v14  ;;  %v1799_v37 = vld [vmem:[%s1851_s22 + $0xf8] sm:$0xff]  }
  0x1c   : > { %1729 = vmatprep.mubr.msk.bf16.mxu1 %vm421_vm2, %v1777_v15 }
  0x22   : > { %1698 = vmatmul.mubr.msk.bf16.gmra.mrb[8].mxu0 %vm421_vm2, %v1778_v16 }
  0x23   : > { %1730 = vmatmul.mubr.msk.bf16.gmra.mrb[8].mxu1 %vm421_vm2, %v1779_v17  ;;  %1701 = vmatprep.mubr.msk.bf16.mxu0 %vm421_vm2, %v1780_v18 }
  0x24   : > { %1733 = vmatprep.mubr.msk.bf16.mxu1 %vm421_vm2, %v1781_v19 }
  0x2a   : > { %1702 = vmatmul.mubr.msk.bf16.gmra.mrb[12].mxu0 %vm421_vm2, %v1782_v20 }
  0x2b   : > { %1734 = vmatmul.mubr.msk.bf16.gmra.mrb[12].mxu1 %vm421_vm2, %v1783_v21  ;;  %1705 = vmatprep.mubr.msk.bf16.mxu0 %vm421_vm2, %v1784_v22 }
  0x2c   : > { %1737 = vmatprep.mubr.msk.bf16.mxu1 %vm421_vm2, %v1785_v23 }
  0x32   : > { %1706 = vmatmul.mubr.msk.bf16.gmra.mrb[16].mxu0 %vm421_vm2, %v1786_v24 }
  0x33   : > { %1738 = vmatmul.mubr.msk.bf16.gmra.mrb[16].mxu1 %vm421_vm2, %v1787_v25  ;;  %1709 = vmatprep.mubr.msk.bf16.mxu0 %vm421_vm2, %v1788_v26 }
  0x34   : > { %1741 = vmatprep.mubr.msk.bf16.mxu1 %vm421_vm2, %v1789_v27 }
  0x3a   : > { %1710 = vmatmul.mubr.msk.bf16.gmra.mrb[20].mxu0 %vm421_vm2, %v1790_v28 }
  0x3b   : > { %1742 = vmatmul.mubr.msk.bf16.gmra.mrb[20].mxu1 %vm421_vm2, %v1791_v29  ;;  %1713 = vmatprep.mubr.msk.bf16.mxu0 %vm421_vm2, %v1792_v30 }
  0x3c   : > { %1745 = vmatprep.mubr.msk.bf16.mxu1 %vm421_vm2, %v1793_v31 }
  0x42   : > { %1714 = vmatmul.mubr.msk.bf16.gmra.mrb[24].mxu0 %vm421_vm2, %v1794_v32 }
  0x43   : > { %1746 = vmatmul.mubr.msk.bf16.gmra.mrb[24].mxu1 %vm421_vm2, %v1795_v33  ;;  %1717 = vmatprep.mubr.msk.bf16.mxu0 %vm421_vm2, %v1796_v34 }
  0x44   : > { %1749 = vmatprep.mubr.msk.bf16.mxu1 %vm421_vm2, %v1797_v35 }
  0x4a   : > { %1718 = vmatmul.mubr.msk.bf16.gmra.mrb[28].mxu0 %vm421_vm2, %v1798_v36 }
  0x4b   : > { %1750 = vmatmul.mubr.msk.bf16.gmra.mrb[28].mxu1 %vm421_vm2, %v1799_v37 }
  0xe5   : > { %v1691_v39 = vpop.f32.mrb[0].mxu0 }
  0xe6   : > { %v568_v40 = vadd.f32 %v1691_v39, %v1920_v38  ;;  %v1723_v41 = vpop.f32.mrb[0].mxu1  ;;  %v559_v42 = vpop.f32.mrb[1].mxu0 }
  0xe7   : > { %v696_v43 = vadd.f32 %v1723_v41, %v1920_v38  ;;  %v560_v44 = vadd.f32 %v1920_v38, %v559_v42  ;;  %v687_v45 = vpop.f32.mrb[1].mxu1  ;;  %v1692_v46 = vpop.f32.mrb[2].mxu0 }
  0xe8   : > { %v688_v47 = vadd.f32 %v1920_v38, %v687_v45  ;;  %v571_v48 = vadd.f32 %v1692_v46, %v1920_v38  ;;  %v1724_v49 = vpop.f32.mrb[2].mxu1  ;;  %v562_v50 = vpop.f32.mrb[3].mxu0  ;;  %v816_v54 = vmax.f32 %v568_v40, 0.0 }
  0xe9   : > { %v699_v51 = vadd.f32 %v1724_v49, %v1920_v38  ;;  %v563_v52 = vadd.f32 %v1920_v38, %v562_v50  ;;  %v690_v53 = vpop.f32.mrb[3].mxu1  ;;  %v848_v57 = vmax.f32 %v696_v43, 0.0  ;;  %v814_v58 = vmax.f32 %v560_v44, 0.0 }
  0xea   : > { %v817_v55 = vmax.f32 %v571_v48, 0.0  ;;  %v691_v56 = vadd.f32 %v1920_v38, %v690_v53  ;;  %v846_v61 = vmax.f32 %v688_v47, 0.0 }
  0xeb   : > { %v849_v59 = vmax.f32 %v699_v51, 0.0  ;;  %v815_v60 = vmax.f32 %v563_v52, 0.0 }
  0xec   : > { %v1468_v62 = vpack.c.bf16 %v817_v55, %v816_v54  ;;  %v847_v63 = vmax.f32 %v691_v56, 0.0 }
  0xed   : > { %v1548_v0 = vpack.c.bf16 %v849_v59, %v848_v57  ;;  %v1463_v1 = vpack.c.bf16 %v815_v60, %v814_v58  ;;  %v1695_v2 = vpop.f32.mrb[4].mxu0 }
  0xee   : > { %1620 = vst [vmem:[%s1935_s27 + $0x8] sm:$0xff] %v1468_v62   ;;  %v1543_v3 = vpack.c.bf16 %v847_v63, %v846_v61  ;;  %v584_v4 = vadd.f32 %v1695_v2, %v1920_v38  ;;  %v1727_v5 = vpop.f32.mrb[4].mxu1  ;;  %v575_v6 = vpop.f32.mrb[5].mxu0 }
  0xef   : > { %1636 = vst [vmem:[%s1935_s27 + $0x88] sm:$0xff] %v1548_v0   ;;  %1464 = vst [vmem:[%s1935_s27] sm:$0xff] %v1463_v1   ;;  %v712_v7 = vadd.f32 %v1727_v5, %v1920_v38  ;;  %v576_v8 = vadd.f32 %v1920_v38, %v575_v6  ;;  %v703_v9 = vpop.f32.mrb[5].mxu1  ;;  %v1696_v10 = vpop.f32.mrb[6].mxu0 }
  0xf0   : > { %1635 = vst [vmem:[%s1935_s27 + $0x80] sm:$0xff] %v1543_v3   ;;  %v704_v11 = vadd.f32 %v1920_v38, %v703_v9  ;;  %v587_v12 = vadd.f32 %v1696_v10, %v1920_v38  ;;  %v1728_v13 = vpop.f32.mrb[6].mxu1  ;;  %v578_v14 = vpop.f32.mrb[7].mxu0  ;;  %v820_v18 = vmax.f32 %v584_v4, 0.0 }
  0xf1   : > { %v715_v15 = vadd.f32 %v1728_v13, %v1920_v38  ;;  %v579_v16 = vadd.f32 %v1920_v38, %v578_v14  ;;  %v706_v17 = vpop.f32.mrb[7].mxu1  ;;  %v852_v21 = vmax.f32 %v712_v7, 0.0  ;;  %v818_v22 = vmax.f32 %v576_v8, 0.0 }
  0xf2   : > { %v821_v19 = vmax.f32 %v587_v12, 0.0  ;;  %v707_v20 = vadd.f32 %v1920_v38, %v706_v17  ;;  %v850_v25 = vmax.f32 %v704_v11, 0.0 }
  0xf3   : > { %v853_v23 = vmax.f32 %v715_v15, 0.0  ;;  %v819_v24 = vmax.f32 %v579_v16, 0.0 }
  0xf4   : > { %v1478_v26 = vpack.c.bf16 %v821_v19, %v820_v18  ;;  %v851_v27 = vmax.f32 %v707_v20, 0.0 }
  0xf5   : > { %v1558_v28 = vpack.c.bf16 %v853_v23, %v852_v21  ;;  %v1473_v29 = vpack.c.bf16 %v819_v24, %v818_v22  ;;  %v1699_v30 = vpop.f32.mrb[8].mxu0 }
  0xf6   : > { %1622 = vst [vmem:[%s1935_s27 + $0x18] sm:$0xff] %v1478_v26   ;;  %v1553_v31 = vpack.c.bf16 %v851_v27, %v850_v25  ;;  %v600_v32 = vadd.f32 %v1699_v30, %v1920_v38  ;;  %v1731_v33 = vpop.f32.mrb[8].mxu1  ;;  %v591_v34 = vpop.f32.mrb[9].mxu0 }
  0xf7   : > { %1638 = vst [vmem:[%s1935_s27 + $0x98] sm:$0xff] %v1558_v28   ;;  %1621 = vst [vmem:[%s1935_s27 + $0x10] sm:$0xff] %v1473_v29   ;;  %v728_v35 = vadd.f32 %v1731_v33, %v1920_v38  ;;  %v592_v36 = vadd.f32 %v1920_v38, %v591_v34  ;;  %v719_v37 = vpop.f32.mrb[9].mxu1  ;;  %v1700_v39 = vpop.f32.mrb[10].mxu0 }
  0xf8   : > { %1637 = vst [vmem:[%s1935_s27 + $0x90] sm:$0xff] %v1553_v31   ;;  %v720_v40 = vadd.f32 %v1920_v38, %v719_v37  ;;  %v603_v41 = vadd.f32 %v1700_v39, %v1920_v38  ;;  %v1732_v42 = vpop.f32.mrb[10].mxu1  ;;  %v594_v43 = vpop.f32.mrb[11].mxu0  ;;  %v824_v47 = vmax.f32 %v600_v32, 0.0 }
  0xf9   : > { %v731_v44 = vadd.f32 %v1732_v42, %v1920_v38  ;;  %v595_v45 = vadd.f32 %v1920_v38, %v594_v43  ;;  %v722_v46 = vpop.f32.mrb[11].mxu1  ;;  %v856_v50 = vmax.f32 %v728_v35, 0.0  ;;  %v822_v51 = vmax.f32 %v592_v36, 0.0 }
  0xfa   : > { %v825_v48 = vmax.f32 %v603_v41, 0.0  ;;  %v723_v49 = vadd.f32 %v1920_v38, %v722_v46  ;;  %v854_v54 = vmax.f32 %v720_v40, 0.0 }
  0xfb   : > { %v857_v52 = vmax.f32 %v731_v44, 0.0  ;;  %v823_v53 = vmax.f32 %v595_v45, 0.0 }
  0xfc   : > { %v1488_v55 = vpack.c.bf16 %v825_v48, %v824_v47  ;;  %v855_v56 = vmax.f32 %v723_v49, 0.0 }
  0xfd   : > { %v1568_v57 = vpack.c.bf16 %v857_v52, %v856_v50  ;;  %v1483_v58 = vpack.c.bf16 %v823_v53, %v822_v51  ;;  %v1703_v59 = vpop.f32.mrb[12].mxu0 }
  0xfe   : > { %1624 = vst [vmem:[%s1935_s27 + $0x28] sm:$0xff] %v1488_v55   ;;  %v1563_v60 = vpack.c.bf16 %v855_v56, %v854_v54  ;;  %v616_v61 = vadd.f32 %v1703_v59, %v1920_v38  ;;  %v1735_v62 = vpop.f32.mrb[12].mxu1  ;;  %v607_v63 = vpop.f32.mrb[13].mxu0 }
  0xff   : > { %1640 = vst [vmem:[%s1935_s27 + $0xa8] sm:$0xff] %v1568_v57   ;;  %1623 = vst [vmem:[%s1935_s27 + $0x20] sm:$0xff] %v1483_v58   ;;  %v744_v0 = vadd.f32 %v1735_v62, %v1920_v38  ;;  %v608_v1 = vadd.f32 %v1920_v38, %v607_v63  ;;  %v735_v2 = vpop.f32.mrb[13].mxu1  ;;  %v1704_v3 = vpop.f32.mrb[14].mxu0 }
 0x100   : > { %1639 = vst [vmem:[%s1935_s27 + $0xa0] sm:$0xff] %v1563_v60   ;;  %v736_v4 = vadd.f32 %v1920_v38, %v735_v2  ;;  %v619_v5 = vadd.f32 %v1704_v3, %v1920_v38  ;;  %v1736_v6 = vpop.f32.mrb[14].mxu1  ;;  %v610_v7 = vpop.f32.mrb[15].mxu0  ;;  %v828_v11 = vmax.f32 %v616_v61, 0.0 }
 0x101   : > { %v747_v8 = vadd.f32 %v1736_v6, %v1920_v38  ;;  %v611_v9 = vadd.f32 %v1920_v38, %v610_v7  ;;  %v738_v10 = vpop.f32.mrb[15].mxu1  ;;  %v860_v14 = vmax.f32 %v744_v0, 0.0  ;;  %v826_v15 = vmax.f32 %v608_v1, 0.0 }
 0x102   : > { %v829_v12 = vmax.f32 %v619_v5, 0.0  ;;  %v739_v13 = vadd.f32 %v1920_v38, %v738_v10  ;;  %v858_v18 = vmax.f32 %v736_v4, 0.0 }
 0x103   : > { %v861_v16 = vmax.f32 %v747_v8, 0.0  ;;  %v827_v17 = vmax.f32 %v611_v9, 0.0 }
 0x104   : > { %v1498_v19 = vpack.c.bf16 %v829_v12, %v828_v11  ;;  %v859_v20 = vmax.f32 %v739_v13, 0.0 }
 0x105   : > { %v1578_v21 = vpack.c.bf16 %v861_v16, %v860_v14  ;;  %v1493_v22 = vpack.c.bf16 %v827_v17, %v826_v15  ;;  %v1707_v23 = vpop.f32.mrb[16].mxu0 }
 0x106   : > { %1626 = vst [vmem:[%s1935_s27 + $0x38] sm:$0xff] %v1498_v19   ;;  %v1573_v24 = vpack.c.bf16 %v859_v20, %v858_v18  ;;  %v632_v25 = vadd.f32 %v1707_v23, %v1920_v38  ;;  %v1739_v26 = vpop.f32.mrb[16].mxu1  ;;  %v623_v27 = vpop.f32.mrb[17].mxu0 }
 0x107   : > { %1642 = vst [vmem:[%s1935_s27 + $0xb8] sm:$0xff] %v1578_v21   ;;  %1625 = vst [vmem:[%s1935_s27 + $0x30] sm:$0xff] %v1493_v22   ;;  %v760_v28 = vadd.f32 %v1739_v26, %v1920_v38  ;;  %v624_v29 = vadd.f32 %v1920_v38, %v623_v27  ;;  %v751_v30 = vpop.f32.mrb[17].mxu1  ;;  %v1708_v31 = vpop.f32.mrb[18].mxu0 }
 0x108   : > { %1641 = vst [vmem:[%s1935_s27 + $0xb0] sm:$0xff] %v1573_v24   ;;  %v752_v32 = vadd.f32 %v1920_v38, %v751_v30  ;;  %v635_v33 = vadd.f32 %v1708_v31, %v1920_v38  ;;  %v1740_v34 = vpop.f32.mrb[18].mxu1  ;;  %v626_v35 = vpop.f32.mrb[19].mxu0  ;;  %v832_v40 = vmax.f32 %v632_v25, 0.0 }
 0x109   : > { %v763_v36 = vadd.f32 %v1740_v34, %v1920_v38  ;;  %v627_v37 = vadd.f32 %v1920_v38, %v626_v35  ;;  %v754_v39 = vpop.f32.mrb[19].mxu1  ;;  %v864_v43 = vmax.f32 %v760_v28, 0.0  ;;  %v830_v44 = vmax.f32 %v624_v29, 0.0 }
 0x10a   : > { %v833_v41 = vmax.f32 %v635_v33, 0.0  ;;  %v755_v42 = vadd.f32 %v1920_v38, %v754_v39  ;;  %v862_v47 = vmax.f32 %v752_v32, 0.0 }
 0x10b   : > { %v865_v45 = vmax.f32 %v763_v36, 0.0  ;;  %v831_v46 = vmax.f32 %v627_v37, 0.0 }
 0x10c   : > { %v1508_v48 = vpack.c.bf16 %v833_v41, %v832_v40  ;;  %v863_v49 = vmax.f32 %v755_v42, 0.0 }
 0x10d   : > { %v1588_v50 = vpack.c.bf16 %v865_v45, %v864_v43  ;;  %v1503_v51 = vpack.c.bf16 %v831_v46, %v830_v44  ;;  %v1711_v52 = vpop.f32.mrb[20].mxu0 }
 0x10e   : > { %1628 = vst [vmem:[%s1935_s27 + $0x48] sm:$0xff] %v1508_v48   ;;  %v1583_v53 = vpack.c.bf16 %v863_v49, %v862_v47  ;;  %v648_v54 = vadd.f32 %v1711_v52, %v1920_v38  ;;  %v1743_v55 = vpop.f32.mrb[20].mxu1  ;;  %v639_v56 = vpop.f32.mrb[21].mxu0 }
 0x10f   : > { %1644 = vst [vmem:[%s1935_s27 + $0xc8] sm:$0xff] %v1588_v50   ;;  %1627 = vst [vmem:[%s1935_s27 + $0x40] sm:$0xff] %v1503_v51   ;;  %v776_v57 = vadd.f32 %v1743_v55, %v1920_v38  ;;  %v640_v58 = vadd.f32 %v1920_v38, %v639_v56  ;;  %v767_v59 = vpop.f32.mrb[21].mxu1  ;;  %v1712_v60 = vpop.f32.mrb[22].mxu0 }
 0x110   : > { %1643 = vst [vmem:[%s1935_s27 + $0xc0] sm:$0xff] %v1583_v53   ;;  %v768_v61 = vadd.f32 %v1920_v38, %v767_v59  ;;  %v651_v62 = vadd.f32 %v1712_v60, %v1920_v38  ;;  %v1744_v63 = vpop.f32.mrb[22].mxu1  ;;  %v642_v0 = vpop.f32.mrb[23].mxu0  ;;  %v836_v4 = vmax.f32 %v648_v54, 0.0 }
 0x111   : > { %v779_v1 = vadd.f32 %v1744_v63, %v1920_v38  ;;  %v643_v2 = vadd.f32 %v1920_v38, %v642_v0  ;;  %v770_v3 = vpop.f32.mrb[23].mxu1  ;;  %v868_v7 = vmax.f32 %v776_v57, 0.0  ;;  %v834_v8 = vmax.f32 %v640_v58, 0.0 }
 0x112   : > { %v837_v5 = vmax.f32 %v651_v62, 0.0  ;;  %v771_v6 = vadd.f32 %v1920_v38, %v770_v3  ;;  %v866_v11 = vmax.f32 %v768_v61, 0.0 }
 0x113   : > { %v869_v9 = vmax.f32 %v779_v1, 0.0  ;;  %v835_v10 = vmax.f32 %v643_v2, 0.0 }
 0x114   : > { %v1518_v12 = vpack.c.bf16 %v837_v5, %v836_v4  ;;  %v867_v13 = vmax.f32 %v771_v6, 0.0 }
 0x115   : > { %v1598_v14 = vpack.c.bf16 %v869_v9, %v868_v7  ;;  %v1513_v15 = vpack.c.bf16 %v835_v10, %v834_v8  ;;  %v1715_v16 = vpop.f32.mrb[24].mxu0 }
 0x116   : > { %1630 = vst [vmem:[%s1935_s27 + $0x58] sm:$0xff] %v1518_v12   ;;  %v1593_v17 = vpack.c.bf16 %v867_v13, %v866_v11  ;;  %v664_v18 = vadd.f32 %v1715_v16, %v1920_v38  ;;  %v1747_v19 = vpop.f32.mrb[24].mxu1  ;;  %v655_v20 = vpop.f32.mrb[25].mxu0 }
 0x117   : > { %1646 = vst [vmem:[%s1935_s27 + $0xd8] sm:$0xff] %v1598_v14   ;;  %1629 = vst [vmem:[%s1935_s27 + $0x50] sm:$0xff] %v1513_v15   ;;  %v792_v21 = vadd.f32 %v1747_v19, %v1920_v38  ;;  %v656_v22 = vadd.f32 %v1920_v38, %v655_v20  ;;  %v783_v23 = vpop.f32.mrb[25].mxu1  ;;  %v1716_v24 = vpop.f32.mrb[26].mxu0 }
 0x118   : > { %1645 = vst [vmem:[%s1935_s27 + $0xd0] sm:$0xff] %v1593_v17   ;;  %v784_v25 = vadd.f32 %v1920_v38, %v783_v23  ;;  %v667_v26 = vadd.f32 %v1716_v24, %v1920_v38  ;;  %v1748_v27 = vpop.f32.mrb[26].mxu1  ;;  %v658_v28 = vpop.f32.mrb[27].mxu0  ;;  %v840_v32 = vmax.f32 %v664_v18, 0.0 }
 0x119   : > { %v795_v29 = vadd.f32 %v1748_v27, %v1920_v38  ;;  %v659_v30 = vadd.f32 %v1920_v38, %v658_v28  ;;  %v786_v31 = vpop.f32.mrb[27].mxu1  ;;  %v872_v35 = vmax.f32 %v792_v21, 0.0  ;;  %v838_v36 = vmax.f32 %v656_v22, 0.0 }
 0x11a   : > { %v841_v33 = vmax.f32 %v667_v26, 0.0  ;;  %v787_v34 = vadd.f32 %v1920_v38, %v786_v31  ;;  %v870_v40 = vmax.f32 %v784_v25, 0.0 }
 0x11b   : > { %v873_v37 = vmax.f32 %v795_v29, 0.0  ;;  %v839_v39 = vmax.f32 %v659_v30, 0.0 }
 0x11c   : > { %v1528_v41 = vpack.c.bf16 %v841_v33, %v840_v32  ;;  %v871_v42 = vmax.f32 %v787_v34, 0.0 }
 0x11d   : > { %v1608_v43 = vpack.c.bf16 %v873_v37, %v872_v35  ;;  %v1523_v44 = vpack.c.bf16 %v839_v39, %v838_v36  ;;  %v1719_v45 = vpop.f32.mrb[28].mxu0 }
 0x11e   : > { %1632 = vst [vmem:[%s1935_s27 + $0x68] sm:$0xff] %v1528_v41   ;;  %v1603_v46 = vpack.c.bf16 %v871_v42, %v870_v40  ;;  %v680_v47 = vadd.f32 %v1719_v45, %v1920_v38  ;;  %v1751_v48 = vpop.f32.mrb[28].mxu1  ;;  %v671_v49 = vpop.f32.mrb[29].mxu0 }
 0x11f   : > { %1648 = vst [vmem:[%s1935_s27 + $0xe8] sm:$0xff] %v1608_v43   ;;  %1631 = vst [vmem:[%s1935_s27 + $0x60] sm:$0xff] %v1523_v44   ;;  %v808_v50 = vadd.f32 %v1751_v48, %v1920_v38  ;;  %v672_v51 = vadd.f32 %v1920_v38, %v671_v49  ;;  %v799_v52 = vpop.f32.mrb[29].mxu1  ;;  %v1720_v53 = vpop.f32.mrb[30].mxu0 }
 0x120   : > { %1647 = vst [vmem:[%s1935_s27 + $0xe0] sm:$0xff] %v1603_v46   ;;  %v800_v54 = vadd.f32 %v1920_v38, %v799_v52  ;;  %v683_v55 = vadd.f32 %v1720_v53, %v1920_v38  ;;  %v1752_v56 = vpop.f32.mrb[30].mxu1  ;;  %v674_v57 = vpop.f32.mrb[31].mxu0  ;;  %v844_v61 = vmax.f32 %v680_v47, 0.0 }
 0x121   : > { %v811_v58 = vadd.f32 %v1752_v56, %v1920_v38  ;;  %v675_v59 = vadd.f32 %v1920_v38, %v674_v57  ;;  %v802_v60 = vpop.f32.mrb[31].mxu1  ;;  %v876_v0 = vmax.f32 %v808_v50, 0.0  ;;  %v842_v1 = vmax.f32 %v672_v51, 0.0 }
 0x122   : > { %v845_v62 = vmax.f32 %v683_v55, 0.0  ;;  %v803_v63 = vadd.f32 %v1920_v38, %v802_v60  ;;  %v874_v4 = vmax.f32 %v800_v54, 0.0 }
 0x123   : > { %v877_v2 = vmax.f32 %v811_v58, 0.0  ;;  %v843_v3 = vmax.f32 %v675_v59, 0.0 }
 0x124   : > { %v1538_v5 = vpack.c.bf16 %v845_v62, %v844_v61  ;;  %v875_v6 = vmax.f32 %v803_v63, 0.0 }
 0x125   : > { %v1618_v7 = vpack.c.bf16 %v877_v2, %v876_v0  ;;  %v1533_v8 = vpack.c.bf16 %v843_v3, %v842_v1 }
 0x126   : > { %1634 = vst [vmem:[%s1935_s27 + $0x78] sm:$0xff] %v1538_v5   ;;  %v1613_v9 = vpack.c.bf16 %v875_v6, %v874_v4 }
 0x127   : > { %1650 = vst [vmem:[%s1935_s27 + $0xf8] sm:$0xff] %v1618_v7   ;;  %1633 = vst [vmem:[%s1935_s27 + $0x70] sm:$0xff] %v1533_v8  }
 0x128   : > { %1649 = vst [vmem:[%s1935_s27 + $0xf0] sm:$0xff] %v1613_v9  }
 0x129 PF: > { %s13_s12 = sadd.s32 1, %s1806_s12  }
 0x12a   : > { %p10_p4 = scmp.ge.s32.totalorder %s13_s12, 10  }
 0x12c   :  { %12 = sbr.rel (!%p10_p4) target bundleno = 1 (0x1), region = 62 }

// kernel: tsm_retinanet_forward.23
= control target key start
LH: loop header
LB: loop body
LE: loop exit
PB: predicated region body
PF: predicated region fallthrough
CT: control target
= control target key end

     0   :  { %s2034_s12 = smov 0   ;;  %s2283_s0 = inlined_call_operand.vmem [shape: bf16[1024,144], index: 0, kind: input, shape index: {}]   ;;  %s2284_s1 = inlined_call_operand.vmem [shape: bf16[144,128], index: 1, kind: input, shape index: {}]   ;;  %s2285_s2 = inlined_call_operand.vmem [shape: f32[1,128], index: 2, kind: input, shape index: {}]   ;;  %s2286_s3 = inlined_call_operand.vmem [shape: bf16[1024,128], index: 3, kind: output, shape index: {}]  }
   0x1 LB: > { %s1435_s13 = sadd.s32 4294967295, %s2011_s12   ;;  %p1439_p0 = scmp.ge.s32.totalorder %s2011_s12, 1  ;;  %s2011_s12 = sphi %s2034_s12, %s13_s12  }
   0x2   : > { %p139_p1 = scmp.lt.s32.totalorder %s2011_s12, 3 }
   0x4   : > { %p140_p2 = pnand %p1439_p0, %p139_p1 }
   0x5   : > { %v1900_v0 = vld [vmem:[%s2284_s1] sm:$0xff] (!%p140_p2)   ;;  %v2013_v1 = vmov (!%p140_p2), 0   ;;  %s1440_s16 = sshll.u32 (!%p140_p2), %s1435_s13, 6  ;;  %v1901_v2 = vld [vmem:[%s2284_s1 + $0x8] sm:$0xff] (!%p140_p2)   ;;  %v1902_v3 = vld [vmem:[%s2284_s1 + $0x10] sm:$0xff] (!%p140_p2)   ;;  %vm609_vm0 = vcmask (!%p140_p2), 130048  }
   0x6   : > { %143 = sbr.rel (%p140_p2) target bundleno = 383 (0x17f), region = 32  ;;  %706 = vmatprep.subr.bf16.mxu0 (!%p140_p2), %v2013_v1  ;;  %1873 = vmatprep.subr.bf16.mxu1 (!%p140_p2), %v2013_v1  ;;  %p165_p3 = scmp.lt.s32.totalorder (!%p140_p2), %s1440_s16, 127  ;;  %v1903_v4 = vld [vmem:[%s2284_s1 + $0x18] sm:$0xff] (!%p140_p2)   ;;  %v1904_v7 = vld [vmem:[%s2284_s1 + $0x20] sm:$0xff] (!%p140_p2)   ;;  %v1905_v8 = vld [vmem:[%s2284_s1 + $0x28] sm:$0xff] (!%p140_p2)  }
   0x7   : > { %707 = vmatpush1.bf16.msra.mxu0 (!%p140_p2), %v1900_v0  ;;  %1882 = vmatpush1.bf16.msra.mxu1 (!%p140_p2), %v1900_v0  ;;  %v1906_v9 = vld [vmem:[%s2284_s1 + $0x30] sm:$0xff] (!%p140_p2)   ;;  %v1907_v10 = vld [vmem:[%s2284_s1 + $0x38] sm:$0xff] (!%p140_p2)   ;;  %v1908_v11 = vld [vmem:[%s2284_s1 + $0x40] sm:$0xff] (!%p140_p2)  }
   0x8   : > { %708 = vmatprep.subr.bf16.mxu0 (!%p140_p2), %v2013_v1  ;;  %1874 = vmatprep.subr.bf16.mxu1 (!%p140_p2), %v2013_v1 }
   0xb   : > { %709 = vmatpush1.bf16.msra.mxu0 (!%p140_p2), %v1901_v2  ;;  %1883 = vmatpush1.bf16.msra.mxu1 (!%p140_p2), %v1901_v2 }
   0xc   : > { %710 = vmatprep.subr.bf16.mxu0 (!%p140_p2), %v2013_v1  ;;  %1875 = vmatprep.subr.bf16.mxu1 (!%p140_p2), %v2013_v1 }
   0xd   : > { %s2288_s16 = smov (!%p165_p3, %s1440_s16), 127 }
   0xe   : > { %s1617_s21 = sshll.u32 %s2288_s16, 3  ;;  %s1444_s13 = sshll.u32 %s2288_s16, 2 }
   0xf   : > { %s2057_s24 = scalar_lea.vmem %s2283_s0, %s1617_s21  ;;  %711 = vmatpush1.bf16.msra.mxu0 %v1902_v3  ;;  %1884 = vmatpush1.bf16.msra.mxu1 %v1902_v3  ;;  %s2186_s17 = scalar_lea.vmem %s2286_s3, %s1444_s13 }
  0x10   : > { %v1911_v5 = vld [vmem:[%s2057_s24 + $0x4] ss:$8 sps:$4 sm:$0xff]   ;;  %712 = vmatprep.subr.bf16.mxu0 %v2013_v1  ;;  %1876 = vmatprep.subr.bf16.mxu1 %v2013_v1  ;;  %v1909_v12 = vld [vmem:[%s2057_s24] ss:$8 sps:$4 sm:$0xff]   ;;  %v1915_v14 = vld [vmem:[%s2057_s24 + $0x14] ss:$8 sps:$4 sm:$0xff]  }
  0x11   : > { %v1914_v6 = vld [vmem:[%s2057_s24 + $0x104] ss:$8 sps:$4 sm:$0xff]   ;;  %1519 = vmatprep.mubr.msk.bf16.mxu0 %vm609_vm0, %v1911_v5  ;;  %v1912_v13 = vld [vmem:[%s2057_s24 + $0x100] ss:$8 sps:$4 sm:$0xff]   ;;  %v1917_v15 = vld [vmem:[%s2057_s24 + $0x114] ss:$8 sps:$4 sm:$0xff]  }
  0x12   : > { %1535 = vmatprep.mubr.msk.bf16.mxu1 %vm609_vm0, %v1914_v6  ;;  %v1919_v16 = vld [vmem:[%s2057_s24 + $0x10] ss:$8 sps:$4 sm:$0xff]   ;;  %v1921_v18 = vld [vmem:[%s2057_s24 + $0x24] ss:$8 sps:$4 sm:$0xff]   ;;  %v1925_v20 = vld [vmem:[%s2057_s24 + $0x20] ss:$8 sps:$4 sm:$0xff]  }
  0x13   : > { %713 = vmatpush1.bf16.msra.mxu0 %v1903_v4  ;;  %1885 = vmatpush1.bf16.msra.mxu1 %v1903_v4  ;;  %v1920_v17 = vld [vmem:[%s2057_s24 + $0x110] ss:$8 sps:$4 sm:$0xff]   ;;  %v1923_v19 = vld [vmem:[%s2057_s24 + $0x124] ss:$8 sps:$4 sm:$0xff]   ;;  %v1926_v21 = vld [vmem:[%s2057_s24 + $0x120] ss:$8 sps:$4 sm:$0xff]  }
  0x14   : > { %714 = vmatprep.subr.bf16.mxu0 %v2013_v1  ;;  %1877 = vmatprep.subr.bf16.mxu1 %v2013_v1  ;;  %v1927_v22 = vld [vmem:[%s2057_s24 + $0x34] ss:$8 sps:$4 sm:$0xff]   ;;  %v1931_v24 = vld [vmem:[%s2057_s24 + $0x30] ss:$8 sps:$4 sm:$0xff]   ;;  %v1933_v26 = vld [vmem:[%s2057_s24 + $0x44] ss:$8 sps:$4 sm:$0xff]  }
  0x15   : > { %v1929_v23 = vld [vmem:[%s2057_s24 + $0x134] ss:$8 sps:$4 sm:$0xff]   ;;  %v1932_v25 = vld [vmem:[%s2057_s24 + $0x130] ss:$8 sps:$4 sm:$0xff]   ;;  %v1935_v27 = vld [vmem:[%s2057_s24 + $0x144] ss:$8 sps:$4 sm:$0xff]  }
  0x16   : > { %v1937_v28 = vld [vmem:[%s2057_s24 + $0x40] ss:$8 sps:$4 sm:$0xff]   ;;  %v1939_v30 = vld [vmem:[%s2057_s24 + $0x54] ss:$8 sps:$4 sm:$0xff]   ;;  %v1943_v32 = vld [vmem:[%s2057_s24 + $0x50] ss:$8 sps:$4 sm:$0xff]  }
  0x17   : > { %715 = vmatpush1.bf16.msra.mxu0 %v1904_v7  ;;  %1886 = vmatpush1.bf16.msra.mxu1 %v1904_v7  ;;  %v1938_v29 = vld [vmem:[%s2057_s24 + $0x140] ss:$8 sps:$4 sm:$0xff]   ;;  %v1941_v31 = vld [vmem:[%s2057_s24 + $0x154] ss:$8 sps:$4 sm:$0xff]   ;;  %v1944_v33 = vld [vmem:[%s2057_s24 + $0x150] ss:$8 sps:$4 sm:$0xff]  }
  0x18   : > { %716 = vmatprep.subr.bf16.mxu0 %v2013_v1  ;;  %1878 = vmatprep.subr.bf16.mxu1 %v2013_v1  ;;  %v1945_v34 = vld [vmem:[%s2057_s24 + $0x64] ss:$8 sps:$4 sm:$0xff]   ;;  %v1949_v36 = vld [vmem:[%s2057_s24 + $0x60] ss:$8 sps:$4 sm:$0xff]   ;;  %v1951_v38 = vld [vmem:[%s2057_s24 + $0x74] ss:$8 sps:$4 sm:$0xff]  }
  0x19   : > { %v1947_v35 = vld [vmem:[%s2057_s24 + $0x164] ss:$8 sps:$4 sm:$0xff]   ;;  %v1950_v37 = vld [vmem:[%s2057_s24 + $0x160] ss:$8 sps:$4 sm:$0xff]   ;;  %v1953_v39 = vld [vmem:[%s2057_s24 + $0x174] ss:$8 sps:$4 sm:$0xff]  }
  0x1a   : > { %v1955_v40 = vld [vmem:[%s2057_s24 + $0x70] ss:$8 sps:$4 sm:$0xff]   ;;  %v1957_v42 = vld [vmem:[%s2057_s24 + $0x84] ss:$8 sps:$4 sm:$0xff]   ;;  %v1961_v44 = vld [vmem:[%s2057_s24 + $0x80] ss:$8 sps:$4 sm:$0xff]  }
  0x1b   : > { %717 = vmatpush1.bf16.msra.mxu0 %v1905_v8  ;;  %1887 = vmatpush1.bf16.msra.mxu1 %v1905_v8  ;;  %v1956_v41 = vld [vmem:[%s2057_s24 + $0x170] ss:$8 sps:$4 sm:$0xff]   ;;  %v1959_v43 = vld [vmem:[%s2057_s24 + $0x184] ss:$8 sps:$4 sm:$0xff]   ;;  %v1962_v45 = vld [vmem:[%s2057_s24 + $0x180] ss:$8 sps:$4 sm:$0xff]  }
  0x1c   : > { %718 = vmatprep.subr.bf16.mxu0 %v2013_v1  ;;  %1879 = vmatprep.subr.bf16.mxu1 %v2013_v1  ;;  %v1963_v46 = vld [vmem:[%s2057_s24 + $0x94] ss:$8 sps:$4 sm:$0xff]   ;;  %v1967_v48 = vld [vmem:[%s2057_s24 + $0x90] ss:$8 sps:$4 sm:$0xff]   ;;  %v1969_v50 = vld [vmem:[%s2057_s24 + $0xa4] ss:$8 sps:$4 sm:$0xff]  }
  0x1d   : > { %v1965_v47 = vld [vmem:[%s2057_s24 + $0x194] ss:$8 sps:$4 sm:$0xff]   ;;  %v1968_v49 = vld [vmem:[%s2057_s24 + $0x190] ss:$8 sps:$4 sm:$0xff]   ;;  %v1971_v51 = vld [vmem:[%s2057_s24 + $0x1a4] ss:$8 sps:$4 sm:$0xff]  }
  0x1e   : > { %v1973_v52 = vld [vmem:[%s2057_s24 + $0xa0] ss:$8 sps:$4 sm:$0xff]   ;;  %v1975_v54 = vld [vmem:[%s2057_s24 + $0xb4] ss:$8 sps:$4 sm:$0xff]   ;;  %v1979_v56 = vld [vmem:[%s2057_s24 + $0xb0] ss:$8 sps:$4 sm:$0xff]  }
  0x1f   : > { %719 = vmatpush1.bf16.msra.mxu0 %v1906_v9  ;;  %1888 = vmatpush1.bf16.msra.mxu1 %v1906_v9  ;;  %v1974_v53 = vld [vmem:[%s2057_s24 + $0x1a0] ss:$8 sps:$4 sm:$0xff]   ;;  %v1977_v55 = vld [vmem:[%s2057_s24 + $0x1b4] ss:$8 sps:$4 sm:$0xff]   ;;  %v1980_v57 = vld [vmem:[%s2057_s24 + $0x1b0] ss:$8 sps:$4 sm:$0xff]  }
  0x20   : > { %720 = vmatprep.subr.bf16.mxu0 %v2013_v1  ;;  %1880 = vmatprep.subr.bf16.mxu1 %v2013_v1  ;;  %v1981_v58 = vld [vmem:[%s2057_s24 + $0xc4] ss:$8 sps:$4 sm:$0xff]   ;;  %v1985_v60 = vld [vmem:[%s2057_s24 + $0xc0] ss:$8 sps:$4 sm:$0xff]   ;;  %v1987_v62 = vld [vmem:[%s2057_s24 + $0xd4] ss:$8 sps:$4 sm:$0xff]  }
  0x21   : > { %v1983_v59 = vld [vmem:[%s2057_s24 + $0x1c4] ss:$8 sps:$4 sm:$0xff]   ;;  %v1986_v61 = vld [vmem:[%s2057_s24 + $0x1c0] ss:$8 sps:$4 sm:$0xff]   ;;  %v1989_v63 = vld [vmem:[%s2057_s24 + $0x1d4] ss:$8 sps:$4 sm:$0xff]  }
  0x22   : > { %v1991_v0 = vld [vmem:[%s2057_s24 + $0xd0] ss:$8 sps:$4 sm:$0xff]   ;;  %v1993_v2 = vld [vmem:[%s2057_s24 + $0xe4] ss:$8 sps:$4 sm:$0xff]   ;;  %v1997_v4 = vld [vmem:[%s2057_s24 + $0xe0] ss:$8 sps:$4 sm:$0xff]  }
  0x23   : > { %721 = vmatpush1.bf16.msra.mxu0 %v1907_v10  ;;  %1889 = vmatpush1.bf16.msra.mxu1 %v1907_v10  ;;  %v1995_v3 = vld [vmem:[%s2057_s24 + $0x1e4] ss:$8 sps:$4 sm:$0xff]   ;;  %v1998_v5 = vld [vmem:[%s2057_s24 + $0x1e0] ss:$8 sps:$4 sm:$0xff]   ;;  %v1999_v6 = vld [vmem:[%s2057_s24 + $0xf4] ss:$8 sps:$4 sm:$0xff]  }
  0x24   : > { %722 = vmatprep.subr.bf16.mxu0 %v2013_v1  ;;  %1881 = vmatprep.subr.bf16.mxu1 %v2013_v1  ;;  %v1992_v1 = vld [vmem:[%s2057_s24 + $0x1d0] ss:$8 sps:$4 sm:$0xff]   ;;  %v2001_v7 = vld [vmem:[%s2057_s24 + $0x1f4] ss:$8 sps:$4 sm:$0xff]   ;;  %v2176_v10 = vld [vmem:[%s2285_s2] ss:$0 sm:$0xff] }
  0x25   : > { %v2003_v8 = vld [vmem:[%s2057_s24 + $0xf0] ss:$8 sps:$4 sm:$0xff]  }
  0x26   : > { %v2004_v9 = vld [vmem:[%s2057_s24 + $0x1f0] ss:$8 sps:$4 sm:$0xff]  }
  0x27   : > { %723 = vmatpush1.bf16.msra.mxu0 %v1908_v11  ;;  %1890 = vmatpush1.bf16.msra.mxu1 %v1908_v11 }
  0x2a   : > { %739 = vmatmul.mubr.bf16.vlgmr.msra.gmra.mrb[0].mxu0 %v1909_v12  ;;  %867 = vmatmul.mubr.bf16.vlgmr.msra.gmra.mrb[0].mxu1 %v1912_v13 }
  0x2b   : > { %1520 = vmatprep.mubr.msk.bf16.mxu0 %vm609_vm0, %v1915_v14  ;;  %1536 = vmatprep.mubr.msk.bf16.mxu1 %vm609_vm0, %v1917_v15 }
  0x32   : > { %747 = vmatmul.mubr.bf16.gmra.mrb[4].mxu0 %v1919_v16  ;;  %875 = vmatmul.mubr.bf16.gmra.mrb[4].mxu1 %v1920_v17 }
  0x33   : > { %1521 = vmatprep.mubr.msk.bf16.mxu0 %vm609_vm0, %v1921_v18  ;;  %1537 = vmatprep.mubr.msk.bf16.mxu1 %vm609_vm0, %v1923_v19 }
  0x3a   : > { %755 = vmatmul.mubr.bf16.gmra.mrb[8].mxu0 %v1925_v20  ;;  %883 = vmatmul.mubr.bf16.gmra.mrb[8].mxu1 %v1926_v21 }
  0x3b   : > { %1522 = vmatprep.mubr.msk.bf16.mxu0 %vm609_vm0, %v1927_v22  ;;  %1538 = vmatprep.mubr.msk.bf16.mxu1 %vm609_vm0, %v1929_v23 }
  0x42   : > { %763 = vmatmul.mubr.bf16.gmra.mrb[12].mxu0 %v1931_v24  ;;  %891 = vmatmul.mubr.bf16.gmra.mrb[12].mxu1 %v1932_v25 }
  0x43   : > { %1523 = vmatprep.mubr.msk.bf16.mxu0 %vm609_vm0, %v1933_v26  ;;  %1539 = vmatprep.mubr.msk.bf16.mxu1 %vm609_vm0, %v1935_v27 }
  0x4a   : > { %771 = vmatmul.mubr.bf16.gmra.mrb[16].mxu0 %v1937_v28  ;;  %899 = vmatmul.mubr.bf16.gmra.mrb[16].mxu1 %v1938_v29 }
  0x4b   : > { %1524 = vmatprep.mubr.msk.bf16.mxu0 %vm609_vm0, %v1939_v30  ;;  %1540 = vmatprep.mubr.msk.bf16.mxu1 %vm609_vm0, %v1941_v31 }
  0x52   : > { %779 = vmatmul.mubr.bf16.gmra.mrb[20].mxu0 %v1943_v32  ;;  %907 = vmatmul.mubr.bf16.gmra.mrb[20].mxu1 %v1944_v33 }
  0x53   : > { %1525 = vmatprep.mubr.msk.bf16.mxu0 %vm609_vm0, %v1945_v34  ;;  %1541 = vmatprep.mubr.msk.bf16.mxu1 %vm609_vm0, %v1947_v35 }
  0x5a   : > { %787 = vmatmul.mubr.bf16.gmra.mrb[24].mxu0 %v1949_v36  ;;  %915 = vmatmul.mubr.bf16.gmra.mrb[24].mxu1 %v1950_v37 }
  0x5b   : > { %1526 = vmatprep.mubr.msk.bf16.mxu0 %vm609_vm0, %v1951_v38  ;;  %1542 = vmatprep.mubr.msk.bf16.mxu1 %vm609_vm0, %v1953_v39 }
  0x62   : > { %795 = vmatmul.mubr.bf16.gmra.mrb[28].mxu0 %v1955_v40  ;;  %923 = vmatmul.mubr.bf16.gmra.mrb[28].mxu1 %v1956_v41 }
  0x63   : > { %1527 = vmatprep.mubr.msk.bf16.mxu0 %vm609_vm0, %v1957_v42  ;;  %1543 = vmatprep.mubr.msk.bf16.mxu1 %vm609_vm0, %v1959_v43 }
  0x6a   : > { %803 = vmatmul.mubr.bf16.gmra.mrb[32].mxu0 %v1961_v44  ;;  %931 = vmatmul.mubr.bf16.gmra.mrb[32].mxu1 %v1962_v45 }
  0x6b   : > { %1528 = vmatprep.mubr.msk.bf16.mxu0 %vm609_vm0, %v1963_v46  ;;  %1544 = vmatprep.mubr.msk.bf16.mxu1 %vm609_vm0, %v1965_v47 }
  0x72   : > { %811 = vmatmul.mubr.bf16.gmra.mrb[36].mxu0 %v1967_v48  ;;  %939 = vmatmul.mubr.bf16.gmra.mrb[36].mxu1 %v1968_v49 }
  0x73   : > { %1529 = vmatprep.mubr.msk.bf16.mxu0 %vm609_vm0, %v1969_v50  ;;  %1545 = vmatprep.mubr.msk.bf16.mxu1 %vm609_vm0, %v1971_v51 }
  0x7a   : > { %819 = vmatmul.mubr.bf16.gmra.mrb[40].mxu0 %v1973_v52  ;;  %947 = vmatmul.mubr.bf16.gmra.mrb[40].mxu1 %v1974_v53 }
  0x7b   : > { %1530 = vmatprep.mubr.msk.bf16.mxu0 %vm609_vm0, %v1975_v54  ;;  %1546 = vmatprep.mubr.msk.bf16.mxu1 %vm609_vm0, %v1977_v55 }
  0x82   : > { %827 = vmatmul.mubr.bf16.gmra.mrb[44].mxu0 %v1979_v56  ;;  %955 = vmatmul.mubr.bf16.gmra.mrb[44].mxu1 %v1980_v57 }
  0x83   : > { %1531 = vmatprep.mubr.msk.bf16.mxu0 %vm609_vm0, %v1981_v58  ;;  %1547 = vmatprep.mubr.msk.bf16.mxu1 %vm609_vm0, %v1983_v59 }
  0x8a   : > { %835 = vmatmul.mubr.bf16.gmra.mrb[48].mxu0 %v1985_v60  ;;  %963 = vmatmul.mubr.bf16.gmra.mrb[48].mxu1 %v1986_v61 }
  0x8b   : > { %1532 = vmatprep.mubr.msk.bf16.mxu0 %vm609_vm0, %v1987_v62  ;;  %1548 = vmatprep.mubr.msk.bf16.mxu1 %vm609_vm0, %v1989_v63 }
  0x92   : > { %843 = vmatmul.mubr.bf16.gmra.mrb[52].mxu0 %v1991_v0  ;;  %971 = vmatmul.mubr.bf16.gmra.mrb[52].mxu1 %v1992_v1 }
  0x93   : > { %1533 = vmatprep.mubr.msk.bf16.mxu0 %vm609_vm0, %v1993_v2  ;;  %1549 = vmatprep.mubr.msk.bf16.mxu1 %vm609_vm0, %v1995_v3 }
  0x9a   : > { %851 = vmatmul.mubr.bf16.gmra.mrb[56].mxu0 %v1997_v4  ;;  %979 = vmatmul.mubr.bf16.gmra.mrb[56].mxu1 %v1998_v5 }
  0x9b   : > { %1534 = vmatprep.mubr.msk.bf16.mxu0 %vm609_vm0, %v1999_v6  ;;  %1550 = vmatprep.mubr.msk.bf16.mxu1 %vm609_vm0, %v2001_v7 }
  0xa2   : > { %859 = vmatmul.mubr.bf16.gmra.mrb[60].mxu0 %v2003_v8  ;;  %987 = vmatmul.mubr.bf16.gmra.mrb[60].mxu1 %v2004_v9 }
  0xfd   : > { %v740_v11 = vpop.f32.mrb[0].mxu0  ;;  %v868_v12 = vpop.f32.mrb[0].mxu1 }
  0xfe   : > { %v741_v13 = vadd.f32 %v2176_v10, %v740_v11  ;;  %v869_v14 = vadd.f32 %v2176_v10, %v868_v12  ;;  %v742_v15 = vpop.f32.mrb[1].mxu0  ;;  %v870_v16 = vpop.f32.mrb[1].mxu1 }
  0xff   : > { %v743_v17 = vpop.f32.mrb[2].mxu0  ;;  %v871_v18 = vpop.f32.mrb[2].mxu1 }
 0x100   : > { %v744_v19 = vadd.f32 %v2176_v10, %v743_v17  ;;  %v872_v20 = vadd.f32 %v2176_v10, %v871_v18  ;;  %v745_v21 = vpop.f32.mrb[3].mxu0  ;;  %v873_v22 = vpop.f32.mrb[3].mxu1  ;;  %v995_v23 = vmax.f32 %v741_v13, 0.0  ;;  %v1027_v24 = vmax.f32 %v869_v14, 0.0 }
 0x102   : > { %v996_v25 = vmax.f32 %v744_v19, 0.0  ;;  %v1028_v26 = vmax.f32 %v872_v20, 0.0 }
 0x104   : > { %v1685_v27 = vpack.c.bf16 %v996_v25, %v995_v23  ;;  %v1765_v28 = vpack.c.bf16 %v1028_v26, %v1027_v24 }
 0x105   : > { %v748_v29 = vpop.f32.mrb[4].mxu0  ;;  %v876_v30 = vpop.f32.mrb[4].mxu1 }
 0x106   : > { %1686 = vst [vmem:[%s2186_s17] sm:$0xff] %v1685_v27   ;;  %1857 = vst [vmem:[%s2186_s17 + $0x80] sm:$0xff] %v1765_v28   ;;  %v749_v31 = vadd.f32 %v2176_v10, %v748_v29  ;;  %v877_v32 = vadd.f32 %v2176_v10, %v876_v30  ;;  %v750_v33 = vpop.f32.mrb[5].mxu0  ;;  %v878_v34 = vpop.f32.mrb[5].mxu1 }
 0x107   : > { %v751_v35 = vpop.f32.mrb[6].mxu0  ;;  %v879_v36 = vpop.f32.mrb[6].mxu1 }
 0x108   : > { %v752_v37 = vadd.f32 %v2176_v10, %v751_v35  ;;  %v880_v38 = vadd.f32 %v2176_v10, %v879_v36  ;;  %v753_v39 = vpop.f32.mrb[7].mxu0  ;;  %v881_v40 = vpop.f32.mrb[7].mxu1  ;;  %v997_v41 = vmax.f32 %v749_v31, 0.0  ;;  %v1029_v42 = vmax.f32 %v877_v32, 0.0 }
 0x10a   : > { %v998_v43 = vmax.f32 %v752_v37, 0.0  ;;  %v1030_v44 = vmax.f32 %v880_v38, 0.0 }
 0x10c   : > { %v1690_v45 = vpack.c.bf16 %v998_v43, %v997_v41  ;;  %v1770_v46 = vpack.c.bf16 %v1030_v44, %v1029_v42 }
 0x10d   : > { %v756_v47 = vpop.f32.mrb[8].mxu0  ;;  %v884_v48 = vpop.f32.mrb[8].mxu1 }
 0x10e   : > { %1842 = vst [vmem:[%s2186_s17 + $0x8] sm:$0xff] %v1690_v45   ;;  %1858 = vst [vmem:[%s2186_s17 + $0x88] sm:$0xff] %v1770_v46   ;;  %v757_v49 = vadd.f32 %v2176_v10, %v756_v47  ;;  %v885_v50 = vadd.f32 %v2176_v10, %v884_v48  ;;  %v758_v51 = vpop.f32.mrb[9].mxu0  ;;  %v886_v52 = vpop.f32.mrb[9].mxu1 }
 0x10f   : > { %v759_v53 = vpop.f32.mrb[10].mxu0  ;;  %v887_v54 = vpop.f32.mrb[10].mxu1 }
 0x110   : > { %v760_v55 = vadd.f32 %v2176_v10, %v759_v53  ;;  %v888_v56 = vadd.f32 %v2176_v10, %v887_v54  ;;  %v761_v57 = vpop.f32.mrb[11].mxu0  ;;  %v889_v58 = vpop.f32.mrb[11].mxu1  ;;  %v999_v59 = vmax.f32 %v757_v49, 0.0  ;;  %v1031_v60 = vmax.f32 %v885_v50, 0.0 }
 0x112   : > { %v1000_v61 = vmax.f32 %v760_v55, 0.0  ;;  %v1032_v62 = vmax.f32 %v888_v56, 0.0 }
 0x114   : > { %v1695_v63 = vpack.c.bf16 %v1000_v61, %v999_v59  ;;  %v1775_v0 = vpack.c.bf16 %v1032_v62, %v1031_v60 }
 0x115   : > { %v764_v1 = vpop.f32.mrb[12].mxu0  ;;  %v892_v2 = vpop.f32.mrb[12].mxu1 }
 0x116   : > { %1843 = vst [vmem:[%s2186_s17 + $0x10] sm:$0xff] %v1695_v63   ;;  %1859 = vst [vmem:[%s2186_s17 + $0x90] sm:$0xff] %v1775_v0   ;;  %v765_v3 = vadd.f32 %v2176_v10, %v764_v1  ;;  %v893_v4 = vadd.f32 %v2176_v10, %v892_v2  ;;  %v766_v5 = vpop.f32.mrb[13].mxu0  ;;  %v894_v6 = vpop.f32.mrb[13].mxu1 }
 0x117   : > { %v767_v7 = vpop.f32.mrb[14].mxu0  ;;  %v895_v8 = vpop.f32.mrb[14].mxu1 }
 0x118   : > { %v768_v9 = vadd.f32 %v2176_v10, %v767_v7  ;;  %v896_v11 = vadd.f32 %v2176_v10, %v895_v8  ;;  %v769_v12 = vpop.f32.mrb[15].mxu0  ;;  %v897_v13 = vpop.f32.mrb[15].mxu1  ;;  %v1001_v14 = vmax.f32 %v765_v3, 0.0  ;;  %v1033_v15 = vmax.f32 %v893_v4, 0.0 }
 0x11a   : > { %v1002_v16 = vmax.f32 %v768_v9, 0.0  ;;  %v1034_v17 = vmax.f32 %v896_v11, 0.0 }
 0x11c   : > { %v1700_v18 = vpack.c.bf16 %v1002_v16, %v1001_v14  ;;  %v1780_v19 = vpack.c.bf16 %v1034_v17, %v1033_v15 }
 0x11d   : > { %v772_v20 = vpop.f32.mrb[16].mxu0  ;;  %v900_v21 = vpop.f32.mrb[16].mxu1 }
 0x11e   : > { %1844 = vst [vmem:[%s2186_s17 + $0x18] sm:$0xff] %v1700_v18   ;;  %1860 = vst [vmem:[%s2186_s17 + $0x98] sm:$0xff] %v1780_v19   ;;  %v773_v22 = vadd.f32 %v2176_v10, %v772_v20  ;;  %v901_v23 = vadd.f32 %v2176_v10, %v900_v21  ;;  %v774_v24 = vpop.f32.mrb[17].mxu0  ;;  %v902_v25 = vpop.f32.mrb[17].mxu1 }
 0x11f   : > { %v775_v26 = vpop.f32.mrb[18].mxu0  ;;  %v903_v27 = vpop.f32.mrb[18].mxu1 }
 0x120   : > { %v776_v28 = vadd.f32 %v2176_v10, %v775_v26  ;;  %v904_v29 = vadd.f32 %v2176_v10, %v903_v27  ;;  %v777_v30 = vpop.f32.mrb[19].mxu0  ;;  %v905_v31 = vpop.f32.mrb[19].mxu1  ;;  %v1003_v32 = vmax.f32 %v773_v22, 0.0  ;;  %v1035_v33 = vmax.f32 %v901_v23, 0.0 }
 0x122   : > { %v1004_v34 = vmax.f32 %v776_v28, 0.0  ;;  %v1036_v35 = vmax.f32 %v904_v29, 0.0 }
 0x124   : > { %v1705_v36 = vpack.c.bf16 %v1004_v34, %v1003_v32  ;;  %v1785_v37 = vpack.c.bf16 %v1036_v35, %v1035_v33 }
 0x125   : > { %v780_v38 = vpop.f32.mrb[20].mxu0  ;;  %v908_v39 = vpop.f32.mrb[20].mxu1 }
 0x126   : > { %1845 = vst [vmem:[%s2186_s17 + $0x20] sm:$0xff] %v1705_v36   ;;  %1861 = vst [vmem:[%s2186_s17 + $0xa0] sm:$0xff] %v1785_v37   ;;  %v781_v40 = vadd.f32 %v2176_v10, %v780_v38  ;;  %v909_v41 = vadd.f32 %v2176_v10, %v908_v39  ;;  %v782_v42 = vpop.f32.mrb[21].mxu0  ;;  %v910_v43 = vpop.f32.mrb[21].mxu1 }
 0x127   : > { %v783_v44 = vpop.f32.mrb[22].mxu0  ;;  %v911_v45 = vpop.f32.mrb[22].mxu1 }
 0x128   : > { %v784_v46 = vadd.f32 %v2176_v10, %v783_v44  ;;  %v912_v47 = vadd.f32 %v2176_v10, %v911_v45  ;;  %v785_v48 = vpop.f32.mrb[23].mxu0  ;;  %v913_v49 = vpop.f32.mrb[23].mxu1  ;;  %v1005_v50 = vmax.f32 %v781_v40, 0.0  ;;  %v1037_v51 = vmax.f32 %v909_v41, 0.0 }
 0x12a   : > { %v1006_v52 = vmax.f32 %v784_v46, 0.0  ;;  %v1038_v53 = vmax.f32 %v912_v47, 0.0 }
 0x12c   : > { %v1710_v54 = vpack.c.bf16 %v1006_v52, %v1005_v50  ;;  %v1790_v55 = vpack.c.bf16 %v1038_v53, %v1037_v51 }
 0x12d   : > { %v788_v56 = vpop.f32.mrb[24].mxu0  ;;  %v916_v57 = vpop.f32.mrb[24].mxu1 }
 0x12e   : > { %1846 = vst [vmem:[%s2186_s17 + $0x28] sm:$0xff] %v1710_v54   ;;  %1862 = vst [vmem:[%s2186_s17 + $0xa8] sm:$0xff] %v1790_v55   ;;  %v789_v58 = vadd.f32 %v2176_v10, %v788_v56  ;;  %v917_v59 = vadd.f32 %v2176_v10, %v916_v57  ;;  %v790_v60 = vpop.f32.mrb[25].mxu0  ;;  %v918_v61 = vpop.f32.mrb[25].mxu1 }
 0x12f   : > { %v791_v62 = vpop.f32.mrb[26].mxu0  ;;  %v919_v63 = vpop.f32.mrb[26].mxu1 }
 0x130   : > { %v792_v0 = vadd.f32 %v2176_v10, %v791_v62  ;;  %v920_v1 = vadd.f32 %v2176_v10, %v919_v63  ;;  %v793_v2 = vpop.f32.mrb[27].mxu0  ;;  %v921_v3 = vpop.f32.mrb[27].mxu1  ;;  %v1007_v4 = vmax.f32 %v789_v58, 0.0  ;;  %v1039_v5 = vmax.f32 %v917_v59, 0.0 }
 0x132   : > { %v1008_v6 = vmax.f32 %v792_v0, 0.0  ;;  %v1040_v7 = vmax.f32 %v920_v1, 0.0 }
 0x134   : > { %v1715_v8 = vpack.c.bf16 %v1008_v6, %v1007_v4  ;;  %v1795_v9 = vpack.c.bf16 %v1040_v7, %v1039_v5 }
 0x135   : > { %v796_v11 = vpop.f32.mrb[28].mxu0  ;;  %v924_v12 = vpop.f32.mrb[28].mxu1 }
 0x136   : > { %1847 = vst [vmem:[%s2186_s17 + $0x30] sm:$0xff] %v1715_v8   ;;  %1863 = vst [vmem:[%s2186_s17 + $0xb0] sm:$0xff] %v1795_v9   ;;  %v797_v13 = vadd.f32 %v2176_v10, %v796_v11  ;;  %v925_v14 = vadd.f32 %v2176_v10, %v924_v12  ;;  %v798_v15 = vpop.f32.mrb[29].mxu0  ;;  %v926_v16 = vpop.f32.mrb[29].mxu1 }
 0x137   : > { %v799_v17 = vpop.f32.mrb[30].mxu0  ;;  %v927_v18 = vpop.f32.mrb[30].mxu1 }
 0x138   : > { %v800_v19 = vadd.f32 %v2176_v10, %v799_v17  ;;  %v928_v20 = vadd.f32 %v2176_v10, %v927_v18  ;;  %v801_v21 = vpop.f32.mrb[31].mxu0  ;;  %v929_v22 = vpop.f32.mrb[31].mxu1  ;;  %v1009_v23 = vmax.f32 %v797_v13, 0.0  ;;  %v1041_v24 = vmax.f32 %v925_v14, 0.0 }
 0x13a   : > { %v1010_v25 = vmax.f32 %v800_v19, 0.0  ;;  %v1042_v26 = vmax.f32 %v928_v20, 0.0 }
 0x13c   : > { %v1720_v27 = vpack.c.bf16 %v1010_v25, %v1009_v23  ;;  %v1800_v28 = vpack.c.bf16 %v1042_v26, %v1041_v24 }
 0x13d   : > { %v804_v29 = vpop.f32.mrb[32].mxu0  ;;  %v932_v30 = vpop.f32.mrb[32].mxu1 }
 0x13e   : > { %1848 = vst [vmem:[%s2186_s17 + $0x38] sm:$0xff] %v1720_v27   ;;  %1864 = vst [vmem:[%s2186_s17 + $0xb8] sm:$0xff] %v1800_v28   ;;  %v805_v31 = vadd.f32 %v2176_v10, %v804_v29  ;;  %v933_v32 = vadd.f32 %v2176_v10, %v932_v30  ;;  %v806_v33 = vpop.f32.mrb[33].mxu0  ;;  %v934_v34 = vpop.f32.mrb[33].mxu1 }
 0x13f   : > { %v807_v35 = vpop.f32.mrb[34].mxu0  ;;  %v935_v36 = vpop.f32.mrb[34].mxu1 }
 0x140   : > { %v808_v37 = vadd.f32 %v2176_v10, %v807_v35  ;;  %v936_v38 = vadd.f32 %v2176_v10, %v935_v36  ;;  %v809_v39 = vpop.f32.mrb[35].mxu0  ;;  %v937_v40 = vpop.f32.mrb[35].mxu1  ;;  %v1011_v41 = vmax.f32 %v805_v31, 0.0  ;;  %v1043_v42 = vmax.f32 %v933_v32, 0.0 }
 0x142   : > { %v1012_v43 = vmax.f32 %v808_v37, 0.0  ;;  %v1044_v44 = vmax.f32 %v936_v38, 0.0 }
 0x144   : > { %v1725_v45 = vpack.c.bf16 %v1012_v43, %v1011_v41  ;;  %v1805_v46 = vpack.c.bf16 %v1044_v44, %v1043_v42 }
 0x145   : > { %v812_v47 = vpop.f32.mrb[36].mxu0  ;;  %v940_v48 = vpop.f32.mrb[36].mxu1 }
 0x146   : > { %1849 = vst [vmem:[%s2186_s17 + $0x40] sm:$0xff] %v1725_v45   ;;  %1865 = vst [vmem:[%s2186_s17 + $0xc0] sm:$0xff] %v1805_v46   ;;  %v813_v49 = vadd.f32 %v2176_v10, %v812_v47  ;;  %v941_v50 = vadd.f32 %v2176_v10, %v940_v48  ;;  %v814_v51 = vpop.f32.mrb[37].mxu0  ;;  %v942_v52 = vpop.f32.mrb[37].mxu1 }
 0x147   : > { %v815_v53 = vpop.f32.mrb[38].mxu0  ;;  %v943_v54 = vpop.f32.mrb[38].mxu1 }
 0x148   : > { %v816_v55 = vadd.f32 %v2176_v10, %v815_v53  ;;  %v944_v56 = vadd.f32 %v2176_v10, %v943_v54  ;;  %v817_v57 = vpop.f32.mrb[39].mxu0  ;;  %v945_v58 = vpop.f32.mrb[39].mxu1  ;;  %v1013_v59 = vmax.f32 %v813_v49, 0.0  ;;  %v1045_v60 = vmax.f32 %v941_v50, 0.0 }
 0x14a   : > { %v1014_v61 = vmax.f32 %v816_v55, 0.0  ;;  %v1046_v62 = vmax.f32 %v944_v56, 0.0 }
 0x14c   : > { %v1730_v63 = vpack.c.bf16 %v1014_v61, %v1013_v59  ;;  %v1810_v0 = vpack.c.bf16 %v1046_v62, %v1045_v60 }
 0x14d   : > { %v820_v1 = vpop.f32.mrb[40].mxu0  ;;  %v948_v2 = vpop.f32.mrb[40].mxu1 }
 0x14e   : > { %1850 = vst [vmem:[%s2186_s17 + $0x48] sm:$0xff] %v1730_v63   ;;  %1866 = vst [vmem:[%s2186_s17 + $0xc8] sm:$0xff] %v1810_v0   ;;  %v821_v3 = vadd.f32 %v2176_v10, %v820_v1  ;;  %v949_v4 = vadd.f32 %v2176_v10, %v948_v2  ;;  %v822_v5 = vpop.f32.mrb[41].mxu0  ;;  %v950_v6 = vpop.f32.mrb[41].mxu1 }
 0x14f   : > { %v823_v7 = vpop.f32.mrb[42].mxu0  ;;  %v951_v8 = vpop.f32.mrb[42].mxu1 }
 0x150   : > { %v824_v9 = vadd.f32 %v2176_v10, %v823_v7  ;;  %v952_v11 = vadd.f32 %v2176_v10, %v951_v8  ;;  %v825_v12 = vpop.f32.mrb[43].mxu0  ;;  %v953_v13 = vpop.f32.mrb[43].mxu1  ;;  %v1015_v14 = vmax.f32 %v821_v3, 0.0  ;;  %v1047_v15 = vmax.f32 %v949_v4, 0.0 }
 0x152   : > { %v1016_v16 = vmax.f32 %v824_v9, 0.0  ;;  %v1048_v17 = vmax.f32 %v952_v11, 0.0 }
 0x154   : > { %v1735_v18 = vpack.c.bf16 %v1016_v16, %v1015_v14  ;;  %v1815_v19 = vpack.c.bf16 %v1048_v17, %v1047_v15 }
 0x155   : > { %v828_v20 = vpop.f32.mrb[44].mxu0  ;;  %v956_v21 = vpop.f32.mrb[44].mxu1 }
 0x156   : > { %1851 = vst [vmem:[%s2186_s17 + $0x50] sm:$0xff] %v1735_v18   ;;  %1867 = vst [vmem:[%s2186_s17 + $0xd0] sm:$0xff] %v1815_v19   ;;  %v829_v22 = vadd.f32 %v2176_v10, %v828_v20  ;;  %v957_v23 = vadd.f32 %v2176_v10, %v956_v21  ;;  %v830_v24 = vpop.f32.mrb[45].mxu0  ;;  %v958_v25 = vpop.f32.mrb[45].mxu1 }
 0x157   : > { %v831_v26 = vpop.f32.mrb[46].mxu0  ;;  %v959_v27 = vpop.f32.mrb[46].mxu1 }
 0x158   : > { %v832_v28 = vadd.f32 %v2176_v10, %v831_v26  ;;  %v960_v29 = vadd.f32 %v2176_v10, %v959_v27  ;;  %v833_v30 = vpop.f32.mrb[47].mxu0  ;;  %v961_v31 = vpop.f32.mrb[47].mxu1  ;;  %v1017_v32 = vmax.f32 %v829_v22, 0.0  ;;  %v1049_v33 = vmax.f32 %v957_v23, 0.0 }
 0x15a   : > { %v1018_v34 = vmax.f32 %v832_v28, 0.0  ;;  %v1050_v35 = vmax.f32 %v960_v29, 0.0 }
 0x15c   : > { %v1740_v36 = vpack.c.bf16 %v1018_v34, %v1017_v32  ;;  %v1820_v37 = vpack.c.bf16 %v1050_v35, %v1049_v33 }
 0x15d   : > { %v836_v38 = vpop.f32.mrb[48].mxu0  ;;  %v964_v39 = vpop.f32.mrb[48].mxu1 }
 0x15e   : > { %1852 = vst [vmem:[%s2186_s17 + $0x58] sm:$0xff] %v1740_v36   ;;  %1868 = vst [vmem:[%s2186_s17 + $0xd8] sm:$0xff] %v1820_v37   ;;  %v837_v40 = vadd.f32 %v2176_v10, %v836_v38  ;;  %v965_v41 = vadd.f32 %v2176_v10, %v964_v39  ;;  %v838_v42 = vpop.f32.mrb[49].mxu0  ;;  %v966_v43 = vpop.f32.mrb[49].mxu1 }
 0x15f   : > { %v839_v44 = vpop.f32.mrb[50].mxu0  ;;  %v967_v45 = vpop.f32.mrb[50].mxu1 }
 0x160   : > { %v840_v46 = vadd.f32 %v2176_v10, %v839_v44  ;;  %v968_v47 = vadd.f32 %v2176_v10, %v967_v45  ;;  %v841_v48 = vpop.f32.mrb[51].mxu0  ;;  %v969_v49 = vpop.f32.mrb[51].mxu1  ;;  %v1019_v50 = vmax.f32 %v837_v40, 0.0  ;;  %v1051_v51 = vmax.f32 %v965_v41, 0.0 }
 0x162   : > { %v1020_v52 = vmax.f32 %v840_v46, 0.0  ;;  %v1052_v53 = vmax.f32 %v968_v47, 0.0 }
 0x164   : > { %v1745_v54 = vpack.c.bf16 %v1020_v52, %v1019_v50  ;;  %v1825_v55 = vpack.c.bf16 %v1052_v53, %v1051_v51 }
 0x165   : > { %v844_v56 = vpop.f32.mrb[52].mxu0  ;;  %v972_v57 = vpop.f32.mrb[52].mxu1 }
 0x166   : > { %1853 = vst [vmem:[%s2186_s17 + $0x60] sm:$0xff] %v1745_v54   ;;  %1869 = vst [vmem:[%s2186_s17 + $0xe0] sm:$0xff] %v1825_v55   ;;  %v845_v58 = vadd.f32 %v2176_v10, %v844_v56  ;;  %v973_v59 = vadd.f32 %v2176_v10, %v972_v57  ;;  %v846_v60 = vpop.f32.mrb[53].mxu0  ;;  %v974_v61 = vpop.f32.mrb[53].mxu1 }
 0x167   : > { %v847_v62 = vpop.f32.mrb[54].mxu0  ;;  %v975_v63 = vpop.f32.mrb[54].mxu1 }
 0x168   : > { %v848_v0 = vadd.f32 %v2176_v10, %v847_v62  ;;  %v976_v1 = vadd.f32 %v2176_v10, %v975_v63  ;;  %v849_v2 = vpop.f32.mrb[55].mxu0  ;;  %v977_v3 = vpop.f32.mrb[55].mxu1  ;;  %v1021_v4 = vmax.f32 %v845_v58, 0.0  ;;  %v1053_v5 = vmax.f32 %v973_v59, 0.0 }
 0x16a   : > { %v1022_v6 = vmax.f32 %v848_v0, 0.0  ;;  %v1054_v7 = vmax.f32 %v976_v1, 0.0 }
 0x16c   : > { %v1750_v8 = vpack.c.bf16 %v1022_v6, %v1021_v4  ;;  %v1830_v9 = vpack.c.bf16 %v1054_v7, %v1053_v5 }
 0x16d   : > { %v852_v11 = vpop.f32.mrb[56].mxu0  ;;  %v980_v12 = vpop.f32.mrb[56].mxu1 }
 0x16e   : > { %1854 = vst [vmem:[%s2186_s17 + $0x68] sm:$0xff] %v1750_v8   ;;  %1870 = vst [vmem:[%s2186_s17 + $0xe8] sm:$0xff] %v1830_v9   ;;  %v853_v13 = vadd.f32 %v2176_v10, %v852_v11  ;;  %v981_v14 = vadd.f32 %v2176_v10, %v980_v12  ;;  %v854_v15 = vpop.f32.mrb[57].mxu0  ;;  %v982_v16 = vpop.f32.mrb[57].mxu1 }
 0x16f   : > { %v855_v17 = vpop.f32.mrb[58].mxu0  ;;  %v983_v18 = vpop.f32.mrb[58].mxu1 }
 0x170   : > { %v856_v19 = vadd.f32 %v2176_v10, %v855_v17  ;;  %v984_v20 = vadd.f32 %v2176_v10, %v983_v18  ;;  %v857_v21 = vpop.f32.mrb[59].mxu0  ;;  %v985_v22 = vpop.f32.mrb[59].mxu1  ;;  %v1023_v23 = vmax.f32 %v853_v13, 0.0  ;;  %v1055_v24 = vmax.f32 %v981_v14, 0.0 }
 0x172   : > { %v1024_v25 = vmax.f32 %v856_v19, 0.0  ;;  %v1056_v26 = vmax.f32 %v984_v20, 0.0 }
 0x174   : > { %v1755_v27 = vpack.c.bf16 %v1024_v25, %v1023_v23  ;;  %v1835_v28 = vpack.c.bf16 %v1056_v26, %v1055_v24 }
 0x175   : > { %v860_v29 = vpop.f32.mrb[60].mxu0  ;;  %v988_v30 = vpop.f32.mrb[60].mxu1 }
 0x176   : > { %1855 = vst [vmem:[%s2186_s17 + $0x70] sm:$0xff] %v1755_v27   ;;  %1871 = vst [vmem:[%s2186_s17 + $0xf0] sm:$0xff] %v1835_v28   ;;  %v861_v31 = vadd.f32 %v2176_v10, %v860_v29  ;;  %v989_v32 = vadd.f32 %v2176_v10, %v988_v30  ;;  %v862_v33 = vpop.f32.mrb[61].mxu0  ;;  %v990_v34 = vpop.f32.mrb[61].mxu1 }
 0x177   : > { %v863_v35 = vpop.f32.mrb[62].mxu0  ;;  %v991_v36 = vpop.f32.mrb[62].mxu1 }
 0x178   : > { %v864_v37 = vadd.f32 %v2176_v10, %v863_v35  ;;  %v992_v38 = vadd.f32 %v2176_v10, %v991_v36  ;;  %v865_v39 = vpop.f32.mrb[63].mxu0  ;;  %v993_v40 = vpop.f32.mrb[63].mxu1  ;;  %v1025_v41 = vmax.f32 %v861_v31, 0.0  ;;  %v1057_v42 = vmax.f32 %v989_v32, 0.0 }
 0x17a   : > { %v1026_v43 = vmax.f32 %v864_v37, 0.0  ;;  %v1058_v44 = vmax.f32 %v992_v38, 0.0 }
 0x17c   : > { %v1760_v45 = vpack.c.bf16 %v1026_v43, %v1025_v41  ;;  %v1840_v46 = vpack.c.bf16 %v1058_v44, %v1057_v42 }
 0x17e   : > { %1856 = vst [vmem:[%s2186_s17 + $0x78] sm:$0xff] %v1760_v45   ;;  %1872 = vst [vmem:[%s2186_s17 + $0xf8] sm:$0xff] %v1840_v46  }
 0x17f PF: > { %s13_s12 = sadd.s32 1, %s2011_s12  }
 0x180   : > { %p10_p4 = scmp.ge.s32.totalorder %s13_s12, 4  }
 0x182   :  { %12 = sbr.rel (!%p10_p4) target bundleno = 1 (0x1), region = 62 }

// kernel: tsm_retinanet_forward.24
= control target key start
LH: loop header
LB: loop body
LE: loop exit
PB: predicated region body
PF: predicated region fallthrough
CT: control target
= control target key end

     0   :  { %s894_s12 = smov 0   ;;  %s1042_s0 = inlined_call_operand.vmem [shape: bf16[256,216], index: 0, kind: input, shape index: {}]   ;;  %s1043_s1 = inlined_call_operand.vmem [shape: bf16[216,128], index: 1, kind: input, shape index: {}]   ;;  %s1044_s2 = inlined_call_operand.vmem [shape: f32[1,128], index: 2, kind: input, shape index: {}]   ;;  %s1045_s3 = inlined_call_operand.vmem [shape: bf16[256,128], index: 3, kind: output, shape index: {}]  }
   0x1 LB: > { %s659_s13 = sadd.s32 4294967295, %s871_s12   ;;  %p663_p0 = scmp.ge.s32.totalorder %s871_s12, 1  ;;  %s871_s12 = sphi %s894_s12, %s13_s12  }
   0x2   : > { %p139_p1 = scmp.lt.s32.totalorder %s871_s12, 3 }
   0x4   : > { %p140_p2 = pnand %p663_p0, %p139_p1 }
   0x5   : > { %v827_v0 = vld [vmem:[%s1043_s1] sm:$0xff] (!%p140_p2)   ;;  %v873_v1 = vmov (!%p140_p2), 0   ;;  %v828_v2 = vld [vmem:[%s1043_s1 + $0x8] sm:$0xff] (!%p140_p2)   ;;  %s664_s18 = sshll.u32 (!%p140_p2), %s659_s13, 4  ;;  %v829_v3 = vld [vmem:[%s1043_s1 + $0x10] sm:$0xff] (!%p140_p2)   ;;  %vm381_vm0 = vcmask (!%p140_p2), 719872  }
   0x6   : > { %143 = sbr.rel (%p140_p2) target bundleno = 307 (0x133), region = 32  ;;  %410 = vmatprep.subr.bf16.mxu0 (!%p140_p2), %v873_v1  ;;  %790 = vmatprep.subr.bf16.mxu1 (!%p140_p2), %v873_v1  ;;  %p165_p3 = scmp.lt.s32.totalorder (!%p140_p2), %s664_s18, 31  ;;  %v830_v4 = vld [vmem:[%s1043_s1 + $0x18] sm:$0xff] (!%p140_p2)   ;;  %v831_v5 = vld [vmem:[%s1043_s1 + $0x20] sm:$0xff] (!%p140_p2)   ;;  %v832_v8 = vld [vmem:[%s1043_s1 + $0x28] sm:$0xff] (!%p140_p2)   ;;  %vm406_vm1 = vcmask (!%p140_p2), 1043456  }
   0x7   : > { %411 = vmatpush1.bf16.msra.mxu0 (!%p140_p2), %v827_v0  ;;  %804 = vmatpush1.bf16.msra.mxu1 (!%p140_p2), %v827_v0  ;;  %v833_v9 = vld [vmem:[%s1043_s1 + $0x30] sm:$0xff] (!%p140_p2)   ;;  %v834_v10 = vld [vmem:[%s1043_s1 + $0x38] sm:$0xff] (!%p140_p2)   ;;  %v835_v11 = vld [vmem:[%s1043_s1 + $0x40] sm:$0xff] (!%p140_p2)  }
   0x8   : > { %412 = vmatprep.subr.bf16.mxu0 (!%p140_p2), %v873_v1  ;;  %791 = vmatprep.subr.bf16.mxu1 (!%p140_p2), %v873_v1  ;;  %v836_v12 = vld [vmem:[%s1043_s1 + $0x48] sm:$0xff] (!%p140_p2)   ;;  %v837_v13 = vld [vmem:[%s1043_s1 + $0x50] sm:$0xff] (!%p140_p2)   ;;  %v838_v14 = vld [vmem:[%s1043_s1 + $0x58] sm:$0xff] (!%p140_p2)  }
   0x9   : > { %v839_v15 = vld [vmem:[%s1043_s1 + $0x60] sm:$0xff] (!%p140_p2)   ;;  %v840_v16 = vld [vmem:[%s1043_s1 + $0x68] ss:$0 sps:$4 sm:$0xff] (!%p140_p2)  }
   0xa   : > { %v408_v17 = vsel (!%p140_p2), %vm406_vm1, %v840_v16, 0  ;;  %v1007_v32 = vld [vmem:[%s1044_s2] ss:$0 sm:$0xff] (!%p140_p2) }
   0xb   : > { %413 = vmatpush1.bf16.msra.mxu0 (!%p140_p2), %v828_v2  ;;  %805 = vmatpush1.bf16.msra.mxu1 (!%p140_p2), %v828_v2 }
   0xc   : > { %414 = vmatprep.subr.bf16.mxu0 (!%p140_p2), %v873_v1  ;;  %792 = vmatprep.subr.bf16.mxu1 (!%p140_p2), %v873_v1 }
   0xd   : > { %s1047_s18 = smov (!%p165_p3, %s664_s18), 31 }
   0xe   : > { %s726_s21 = sshll.u32 %s1047_s18, 3  ;;  %s668_s24 = sshll.u32 %s1047_s18, 2 }
   0xf   : > { %415 = vmatpush1.bf16.msra.mxu0 %v829_v3  ;;  %806 = vmatpush1.bf16.msra.mxu1 %v829_v3  ;;  %s928_s26 = scalar_lea.vmem %s1042_s0, %s726_s21  ;;  %s1017_s27 = scalar_lea.vmem %s1045_s3, %s668_s24 }
  0x10   : > { %416 = vmatprep.subr.bf16.mxu0 %v873_v1  ;;  %793 = vmatprep.subr.bf16.mxu1 %v873_v1  ;;  %v843_v6 = vld [vmem:[%s928_s26 + $0x4] ss:$8 sps:$4 sm:$0xff]   ;;  %v841_v18 = vld [vmem:[%s928_s26] ss:$8 sps:$4 sm:$0xff]   ;;  %v847_v20 = vld [vmem:[%s928_s26 + $0x14] ss:$8 sps:$4 sm:$0xff]  }
  0x11   : > { %700 = vmatprep.mubr.msk.bf16.mxu0 %vm381_vm0, %v843_v6  ;;  %v846_v7 = vld [vmem:[%s928_s26 + $0x44] ss:$8 sps:$4 sm:$0xff]   ;;  %v844_v19 = vld [vmem:[%s928_s26 + $0x40] ss:$8 sps:$4 sm:$0xff]   ;;  %v849_v21 = vld [vmem:[%s928_s26 + $0x54] ss:$8 sps:$4 sm:$0xff]  }
  0x12   : > { %704 = vmatprep.mubr.msk.bf16.mxu1 %vm381_vm0, %v846_v7  ;;  %v851_v22 = vld [vmem:[%s928_s26 + $0x10] ss:$8 sps:$4 sm:$0xff]   ;;  %v853_v24 = vld [vmem:[%s928_s26 + $0x24] ss:$8 sps:$4 sm:$0xff]   ;;  %v857_v26 = vld [vmem:[%s928_s26 + $0x20] ss:$8 sps:$4 sm:$0xff]  }
  0x13   : > { %417 = vmatpush1.bf16.msra.mxu0 %v830_v4  ;;  %807 = vmatpush1.bf16.msra.mxu1 %v830_v4  ;;  %v852_v23 = vld [vmem:[%s928_s26 + $0x50] ss:$8 sps:$4 sm:$0xff]   ;;  %v855_v25 = vld [vmem:[%s928_s26 + $0x64] ss:$8 sps:$4 sm:$0xff]   ;;  %v858_v27 = vld [vmem:[%s928_s26 + $0x60] ss:$8 sps:$4 sm:$0xff]  }
  0x14   : > { %418 = vmatprep.subr.bf16.mxu0 %v873_v1  ;;  %794 = vmatprep.subr.bf16.mxu1 %v873_v1  ;;  %v859_v28 = vld [vmem:[%s928_s26 + $0x34] ss:$8 sps:$4 sm:$0xff]   ;;  %v863_v30 = vld [vmem:[%s928_s26 + $0x30] ss:$8 sps:$4 sm:$0xff]  }
  0x15   : > { %v861_v29 = vld [vmem:[%s928_s26 + $0x74] ss:$8 sps:$4 sm:$0xff]   ;;  %v864_v31 = vld [vmem:[%s928_s26 + $0x70] ss:$8 sps:$4 sm:$0xff]  }
  0x17   : > { %419 = vmatpush1.bf16.msra.mxu0 %v831_v5  ;;  %808 = vmatpush1.bf16.msra.mxu1 %v831_v5 }
  0x18   : > { %420 = vmatprep.subr.bf16.mxu0 %v873_v1  ;;  %795 = vmatprep.subr.bf16.mxu1 %v873_v1 }
  0x1b   : > { %421 = vmatpush1.bf16.msra.mxu0 %v832_v8  ;;  %809 = vmatpush1.bf16.msra.mxu1 %v832_v8 }
  0x1c   : > { %422 = vmatprep.subr.bf16.mxu0 %v873_v1  ;;  %796 = vmatprep.subr.bf16.mxu1 %v873_v1 }
  0x1f   : > { %423 = vmatpush1.bf16.msra.mxu0 %v833_v9  ;;  %810 = vmatpush1.bf16.msra.mxu1 %v833_v9 }
  0x20   : > { %424 = vmatprep.subr.bf16.mxu0 %v873_v1  ;;  %797 = vmatprep.subr.bf16.mxu1 %v873_v1 }
  0x23   : > { %425 = vmatpush1.bf16.msra.mxu0 %v834_v10  ;;  %811 = vmatpush1.bf16.msra.mxu1 %v834_v10 }
  0x24   : > { %426 = vmatprep.subr.bf16.mxu0 %v873_v1  ;;  %798 = vmatprep.subr.bf16.mxu1 %v873_v1 }
  0x27   : > { %427 = vmatpush1.bf16.msra.mxu0 %v835_v11  ;;  %812 = vmatpush1.bf16.msra.mxu1 %v835_v11 }
  0x28   : > { %428 = vmatprep.subr.bf16.mxu0 %v873_v1  ;;  %799 = vmatprep.subr.bf16.mxu1 %v873_v1 }
  0x2b   : > { %429 = vmatpush1.bf16.msra.mxu0 %v836_v12  ;;  %813 = vmatpush1.bf16.msra.mxu1 %v836_v12 }
  0x2c   : > { %430 = vmatprep.subr.bf16.mxu0 %v873_v1  ;;  %800 = vmatprep.subr.bf16.mxu1 %v873_v1 }
  0x2f   : > { %431 = vmatpush1.bf16.msra.mxu0 %v837_v13  ;;  %814 = vmatpush1.bf16.msra.mxu1 %v837_v13 }
  0x30   : > { %432 = vmatprep.subr.bf16.mxu0 %v873_v1  ;;  %801 = vmatprep.subr.bf16.mxu1 %v873_v1 }
  0x33   : > { %433 = vmatpush1.bf16.msra.mxu0 %v838_v14  ;;  %815 = vmatpush1.bf16.msra.mxu1 %v838_v14 }
  0x34   : > { %434 = vmatprep.subr.bf16.mxu0 %v873_v1  ;;  %802 = vmatprep.subr.bf16.mxu1 %v873_v1 }
  0x37   : > { %435 = vmatpush1.bf16.msra.mxu0 %v839_v15  ;;  %816 = vmatpush1.bf16.msra.mxu1 %v839_v15 }
  0x38   : > { %436 = vmatprep.subr.bf16.mxu0 %v873_v1  ;;  %803 = vmatprep.subr.bf16.mxu1 %v873_v1 }
  0x3b   : > { %437 = vmatpush1.bf16.msra.mxu0 %v408_v17  ;;  %817 = vmatpush1.bf16.msra.mxu1 %v408_v17 }
  0x3e   : > { %443 = vmatmul.mubr.bf16.vlgmr.msra.gmra.mrb[0].mxu0 %v841_v18  ;;  %475 = vmatmul.mubr.bf16.vlgmr.msra.gmra.mrb[0].mxu1 %v844_v19 }
  0x3f   : > { %701 = vmatprep.mubr.msk.bf16.mxu0 %vm381_vm0, %v847_v20  ;;  %705 = vmatprep.mubr.msk.bf16.mxu1 %vm381_vm0, %v849_v21 }
  0x46   : > { %451 = vmatmul.mubr.bf16.gmra.mrb[4].mxu0 %v851_v22  ;;  %483 = vmatmul.mubr.bf16.gmra.mrb[4].mxu1 %v852_v23 }
  0x47   : > { %702 = vmatprep.mubr.msk.bf16.mxu0 %vm381_vm0, %v853_v24  ;;  %706 = vmatprep.mubr.msk.bf16.mxu1 %vm381_vm0, %v855_v25 }
  0x4e   : > { %459 = vmatmul.mubr.bf16.gmra.mrb[8].mxu0 %v857_v26  ;;  %491 = vmatmul.mubr.bf16.gmra.mrb[8].mxu1 %v858_v27 }
  0x4f   : > { %703 = vmatprep.mubr.msk.bf16.mxu0 %vm381_vm0, %v859_v28  ;;  %707 = vmatprep.mubr.msk.bf16.mxu1 %vm381_vm0, %v861_v29 }
  0x56   : > { %467 = vmatmul.mubr.bf16.gmra.mrb[12].mxu0 %v863_v30  ;;  %499 = vmatmul.mubr.bf16.gmra.mrb[12].mxu1 %v864_v31 }
 0x111   : > { %v444_v33 = vpop.f32.mrb[0].mxu0  ;;  %v476_v34 = vpop.f32.mrb[0].mxu1 }
 0x112   : > { %v445_v35 = vadd.f32 %v1007_v32, %v444_v33  ;;  %v477_v36 = vadd.f32 %v1007_v32, %v476_v34  ;;  %v446_v37 = vpop.f32.mrb[1].mxu0  ;;  %v478_v38 = vpop.f32.mrb[1].mxu1 }
 0x113   : > { %v447_v39 = vpop.f32.mrb[2].mxu0  ;;  %v479_v40 = vpop.f32.mrb[2].mxu1 }
 0x114   : > { %v448_v41 = vadd.f32 %v1007_v32, %v447_v39  ;;  %v480_v42 = vadd.f32 %v1007_v32, %v479_v40  ;;  %v449_v43 = vpop.f32.mrb[3].mxu0  ;;  %v481_v44 = vpop.f32.mrb[3].mxu1  ;;  %v507_v45 = vmax.f32 %v445_v35, 0.0  ;;  %v515_v46 = vmax.f32 %v477_v36, 0.0 }
 0x116   : > { %v508_v47 = vmax.f32 %v448_v41, 0.0  ;;  %v516_v48 = vmax.f32 %v480_v42, 0.0 }
 0x118   : > { %v746_v49 = vpack.c.bf16 %v508_v47, %v507_v45  ;;  %v766_v50 = vpack.c.bf16 %v516_v48, %v515_v46 }
 0x119   : > { %v452_v51 = vpop.f32.mrb[4].mxu0  ;;  %v484_v52 = vpop.f32.mrb[4].mxu1 }
 0x11a   : > { %747 = vst [vmem:[%s1017_s27] sm:$0xff] %v746_v49   ;;  %786 = vst [vmem:[%s1017_s27 + $0x20] sm:$0xff] %v766_v50   ;;  %v453_v53 = vadd.f32 %v1007_v32, %v452_v51  ;;  %v485_v54 = vadd.f32 %v1007_v32, %v484_v52  ;;  %v454_v55 = vpop.f32.mrb[5].mxu0  ;;  %v486_v56 = vpop.f32.mrb[5].mxu1 }
 0x11b   : > { %v455_v57 = vpop.f32.mrb[6].mxu0  ;;  %v487_v58 = vpop.f32.mrb[6].mxu1 }
 0x11c   : > { %v456_v59 = vadd.f32 %v1007_v32, %v455_v57  ;;  %v488_v60 = vadd.f32 %v1007_v32, %v487_v58  ;;  %v457_v61 = vpop.f32.mrb[7].mxu0  ;;  %v489_v62 = vpop.f32.mrb[7].mxu1  ;;  %v509_v63 = vmax.f32 %v453_v53, 0.0  ;;  %v517_v0 = vmax.f32 %v485_v54, 0.0 }
 0x11e   : > { %v510_v1 = vmax.f32 %v456_v59, 0.0  ;;  %v518_v2 = vmax.f32 %v488_v60, 0.0 }
 0x120   : > { %v751_v3 = vpack.c.bf16 %v510_v1, %v509_v63  ;;  %v771_v4 = vpack.c.bf16 %v518_v2, %v517_v0 }
 0x121   : > { %v460_v5 = vpop.f32.mrb[8].mxu0  ;;  %v492_v6 = vpop.f32.mrb[8].mxu1 }
 0x122   : > { %783 = vst [vmem:[%s1017_s27 + $0x8] sm:$0xff] %v751_v3   ;;  %787 = vst [vmem:[%s1017_s27 + $0x28] sm:$0xff] %v771_v4   ;;  %v461_v7 = vadd.f32 %v1007_v32, %v460_v5  ;;  %v493_v8 = vadd.f32 %v1007_v32, %v492_v6  ;;  %v462_v9 = vpop.f32.mrb[9].mxu0  ;;  %v494_v10 = vpop.f32.mrb[9].mxu1 }
 0x123   : > { %v463_v11 = vpop.f32.mrb[10].mxu0  ;;  %v495_v12 = vpop.f32.mrb[10].mxu1 }
 0x124   : > { %v464_v13 = vadd.f32 %v1007_v32, %v463_v11  ;;  %v496_v14 = vadd.f32 %v1007_v32, %v495_v12  ;;  %v465_v15 = vpop.f32.mrb[11].mxu0  ;;  %v497_v16 = vpop.f32.mrb[11].mxu1  ;;  %v511_v17 = vmax.f32 %v461_v7, 0.0  ;;  %v519_v18 = vmax.f32 %v493_v8, 0.0 }
 0x126   : > { %v512_v19 = vmax.f32 %v464_v13, 0.0  ;;  %v520_v20 = vmax.f32 %v496_v14, 0.0 }
 0x128   : > { %v756_v21 = vpack.c.bf16 %v512_v19, %v511_v17  ;;  %v776_v22 = vpack.c.bf16 %v520_v20, %v519_v18 }
 0x129   : > { %v468_v23 = vpop.f32.mrb[12].mxu0  ;;  %v500_v24 = vpop.f32.mrb[12].mxu1 }
 0x12a   : > { %784 = vst [vmem:[%s1017_s27 + $0x10] sm:$0xff] %v756_v21   ;;  %788 = vst [vmem:[%s1017_s27 + $0x30] sm:$0xff] %v776_v22   ;;  %v469_v25 = vadd.f32 %v1007_v32, %v468_v23  ;;  %v501_v26 = vadd.f32 %v1007_v32, %v500_v24  ;;  %v470_v27 = vpop.f32.mrb[13].mxu0  ;;  %v502_v28 = vpop.f32.mrb[13].mxu1 }
 0x12b   : > { %v471_v29 = vpop.f32.mrb[14].mxu0  ;;  %v503_v30 = vpop.f32.mrb[14].mxu1 }
 0x12c   : > { %v472_v31 = vadd.f32 %v1007_v32, %v471_v29  ;;  %v504_v33 = vadd.f32 %v1007_v32, %v503_v30  ;;  %v473_v34 = vpop.f32.mrb[15].mxu0  ;;  %v505_v35 = vpop.f32.mrb[15].mxu1  ;;  %v513_v36 = vmax.f32 %v469_v25, 0.0  ;;  %v521_v37 = vmax.f32 %v501_v26, 0.0 }
 0x12e   : > { %v514_v38 = vmax.f32 %v472_v31, 0.0  ;;  %v522_v39 = vmax.f32 %v504_v33, 0.0 }
 0x130   : > { %v761_v40 = vpack.c.bf16 %v514_v38, %v513_v36  ;;  %v781_v41 = vpack.c.bf16 %v522_v39, %v521_v37 }
 0x132   : > { %785 = vst [vmem:[%s1017_s27 + $0x18] sm:$0xff] %v761_v40   ;;  %789 = vst [vmem:[%s1017_s27 + $0x38] sm:$0xff] %v781_v41  }
 0x133 PF: > { %s13_s12 = sadd.s32 1, %s871_s12  }
 0x134   : > { %p10_p4 = scmp.ge.s32.totalorder %s13_s12, 4  }
 0x136   :  { %12 = sbr.rel (!%p10_p4) target bundleno = 1 (0x1), region = 62 }

// kernel: tsm_retinanet_forward.25
= control target key start
LH: loop header
LB: loop body
LE: loop exit
PB: predicated region body
PF: predicated region fallthrough
CT: control target
= control target key end

     0   :  { %vm354_vm0 = vcmask 850944   ;;  %vm379_vm1 = vcmask 1043456   ;;  %s1197_s1 = inlined_call_operand.vmem [shape: bf16[360,128], index: 1, kind: input, shape index: {}]   ;;  %s1198_s0 = inlined_call_operand.vmem [shape: bf16[128,360], index: 0, kind: input, shape index: {}]   ;;  %s1199_s2 = inlined_call_operand.vmem [shape: f32[1,128], index: 2, kind: input, shape index: {}]   ;;  %s1200_s3 = inlined_call_operand.vmem [shape: bf16[128,128], index: 3, kind: output, shape index: {}]  }
   0x1   :  { %v922_v0 = vld [vmem:[%s1197_s1 + $0x40] sm:$0xff]   ;;  %v924_v2 = vld [vmem:[%s1197_s1 + $0x48] sm:$0xff]   ;;  %v926_v4 = vld [vmem:[%s1197_s1 + $0x50] sm:$0xff]  }
   0x2   :  { %v923_v1 = vld [vmem:[%s1197_s1] sm:$0xff]   ;;  %812 = vmatprep.subr.bf16.mxu0 %v922_v0  ;;  %v925_v3 = vld [vmem:[%s1197_s1 + $0x8] sm:$0xff]   ;;  %v928_v6 = vld [vmem:[%s1197_s1 + $0x10] sm:$0xff]  }
   0x3   :  { %813 = vmatpush3.bf16.msra.mxu0 %v923_v1  ;;  %v927_v5 = vld [vmem:[%s1197_s1 + $0x80] sm:$0xff]   ;;  %v929_v7 = vld [vmem:[%s1197_s1 + $0x58] sm:$0xff]   ;;  %v930_v8 = vld [vmem:[%s1197_s1 + $0x88] sm:$0xff]  }
   0x4   :  { %814 = vmatprep.subr.bf16.mxu0 %v924_v2  ;;  %891 = vmatprep.subr.bf16.mxu1 %v927_v5  ;;  %v931_v9 = vld [vmem:[%s1197_s1 + $0x18] sm:$0xff]   ;;  %v933_v10 = vld [vmem:[%s1197_s1 + $0x90] sm:$0xff]   ;;  %v932_v11 = vld [vmem:[%s1197_s1 + $0x60] sm:$0xff]  }
   0x5   :  { %892 = vmatpush3.bf16.msra.mxu1 %v927_v5  ;;  %v936_v12 = vld [vmem:[%s1197_s1 + $0x98] sm:$0xff]   ;;  %v934_v13 = vld [vmem:[%s1197_s1 + $0x20] sm:$0xff]   ;;  %v935_v14 = vld [vmem:[%s1197_s1 + $0x68] sm:$0xff]  }
   0x6   :  { %893 = vmatprep.subr.bf16.mxu1 %v930_v8  ;;  %v939_v15 = vld [vmem:[%s1197_s1 + $0xa0] sm:$0xff]   ;;  %v937_v16 = vld [vmem:[%s1197_s1 + $0x28] sm:$0xff]   ;;  %v938_v17 = vld [vmem:[%s1197_s1 + $0x70] sm:$0xff]  }
   0x7   :  { %815 = vmatpush3.bf16.msra.mxu0 %v925_v3  ;;  %v940_v18 = vld [vmem:[%s1197_s1 + $0x30] sm:$0xff]   ;;  %v942_v19 = vld [vmem:[%s1197_s1 + $0xa8] sm:$0xff]   ;;  %v941_v20 = vld [vmem:[%s1197_s1 + $0x78] sm:$0xff]  }
   0x8   :  { %816 = vmatprep.subr.bf16.mxu0 %v926_v4  ;;  %v946_v21 = vld [vmem:[%s1198_s0 + $0x4] ss:$12 sps:$4 sm:$0xff]   ;;  %v948_v23 = vld [vmem:[%s1198_s0 + $0x8] ss:$12 sps:$4 sm:$0xff]   ;;  %v943_v24 = vld [vmem:[%s1197_s1 + $0x38] sm:$0xff]  }
   0x9   :  { %894 = vmatpush3.bf16.msra.mxu1 %v930_v8  ;;  %v947_v22 = vld [vmem:[%s1197_s1 + $0xb0] ss:$0 sps:$4 sm:$0xff]   ;;  %415 = vmatprep.mubr.bf16.mxu0 %v946_v21  ;;  %v944_v26 = vld [vmem:[%s1198_s0] ss:$12 sps:$4 sm:$0xff]   ;;  %v950_v28 = vld [vmem:[%s1198_s0 + $0x1c] ss:$12 sps:$4 sm:$0xff]  }
   0xa   :  { %895 = vmatprep.subr.bf16.mxu1 %v933_v10  ;;  %905 = vmatprep.mubr.msk.bf16.mxu1 %vm354_vm0, %v948_v23  ;;  %v381_v25 = vsel %vm379_vm1, %v947_v22, 0  ;;  %v949_v27 = vld [vmem:[%s1198_s0 + $0x20] ss:$12 sps:$4 sm:$0xff]   ;;  %v956_v29 = vld [vmem:[%s1198_s0 + $0x38] ss:$12 sps:$4 sm:$0xff]  }
   0xb   :  { %817 = vmatpush3.bf16.msra.mxu0 %v928_v6  ;;  %v952_v30 = vld [vmem:[%s1198_s0 + $0x18] ss:$12 sps:$4 sm:$0xff]   ;;  %v953_v31 = vld [vmem:[%s1198_s0 + $0x34] ss:$12 sps:$4 sm:$0xff]   ;;  %v957_v32 = vld [vmem:[%s1198_s0 + $0x50] ss:$12 sps:$4 sm:$0xff]  }
   0xc   :  { %818 = vmatprep.subr.bf16.mxu0 %v929_v7  ;;  %v964_v33 = vld [vmem:[%s1198_s0 + $0x68] ss:$12 sps:$4 sm:$0xff]   ;;  %v955_v34 = vld [vmem:[%s1198_s0 + $0x30] ss:$12 sps:$4 sm:$0xff]   ;;  %v958_v35 = vld [vmem:[%s1198_s0 + $0x4c] ss:$12 sps:$4 sm:$0xff]  }
   0xd   :  { %896 = vmatpush3.bf16.msra.mxu1 %v933_v10  ;;  %v965_v36 = vld [vmem:[%s1198_s0 + $0x80] ss:$12 sps:$4 sm:$0xff]   ;;  %v972_v37 = vld [vmem:[%s1198_s0 + $0x98] ss:$12 sps:$4 sm:$0xff]   ;;  %v960_v38 = vld [vmem:[%s1198_s0 + $0x48] ss:$12 sps:$4 sm:$0xff]  }
   0xe   :  { %897 = vmatprep.subr.bf16.mxu1 %v936_v12  ;;  %v961_v39 = vld [vmem:[%s1198_s0 + $0x64] ss:$12 sps:$4 sm:$0xff]   ;;  %v963_v41 = vld [vmem:[%s1198_s0 + $0x60] ss:$12 sps:$4 sm:$0xff]   ;;  %v966_v42 = vld [vmem:[%s1198_s0 + $0x7c] ss:$12 sps:$4 sm:$0xff]  }
   0xf   :  { %819 = vmatpush3.bf16.msra.mxu0 %v931_v9  ;;  %v973_v40 = vld [vmem:[%s1198_s0 + $0xb0] ss:$12 sps:$4 sm:$0xff]   ;;  %v968_v43 = vld [vmem:[%s1198_s0 + $0x78] ss:$12 sps:$4 sm:$0xff]   ;;  %v969_v44 = vld [vmem:[%s1198_s0 + $0x94] ss:$12 sps:$4 sm:$0xff]  }
  0x10   :  { %820 = vmatprep.subr.bf16.mxu0 %v932_v11  ;;  %v971_v45 = vld [vmem:[%s1198_s0 + $0x90] ss:$12 sps:$4 sm:$0xff]   ;;  %v974_v46 = vld [vmem:[%s1198_s0 + $0xac] ss:$12 sps:$4 sm:$0xff]   ;;  %v976_v47 = vld [vmem:[%s1198_s0 + $0xa8] ss:$12 sps:$4 sm:$0xff]  }
  0x11   :  { %898 = vmatpush3.bf16.msra.mxu1 %v936_v12  ;;  %v1149_v51 = vld [vmem:[%s1199_s2] ss:$0 sm:$0xff] }
  0x12   :  { %899 = vmatprep.subr.bf16.mxu1 %v939_v15 }
  0x13   :  { %821 = vmatpush3.bf16.msra.mxu0 %v934_v13 }
  0x14   :  { %822 = vmatprep.subr.bf16.mxu0 %v935_v14 }
  0x15   :  { %900 = vmatpush3.bf16.msra.mxu1 %v939_v15 }
  0x16   :  { %901 = vmatprep.subr.bf16.mxu1 %v942_v19 }
  0x17   :  { %823 = vmatpush3.bf16.msra.mxu0 %v937_v16 }
  0x18   :  { %824 = vmatprep.subr.bf16.mxu0 %v938_v17 }
  0x19   :  { %902 = vmatpush3.bf16.msra.mxu1 %v942_v19 }
  0x1a   :  { %921 = vmatprep.subr.msk.bf16.mxu1 %vm379_vm1, %v947_v22 }
  0x1b   :  { %825 = vmatpush3.bf16.msra.mxu0 %v940_v18 }
  0x1c   :  { %826 = vmatprep.subr.bf16.mxu0 %v941_v20 }
  0x1d   :  { %904 = vmatpush3.bf16.msra.mxu1 %v381_v25 }
  0x1f   :  { %827 = vmatpush3.bf16.msra.mxu0 %v943_v24 }
  0x20   :  { %906 = vmatmul.mubr.msk.bf16.vlgmr.msra.gmra.mrb[0].mxu1 %vm354_vm0, %v949_v27 }
  0x21   :  { %909 = vmatprep.mubr.msk.bf16.mxu1 %vm354_vm0, %v956_v29 }
  0x22   :  { %416 = vmatmul.mubr.bf16.vlgmr.msra.gmra.mrb[0].mxu0 %v944_v26 }
  0x23   :  { %423 = vmatprep.mubr.bf16.mxu0 %v950_v28 }
  0x28   :  { %910 = vmatmul.mubr.msk.bf16.gmra.mrb[4].mxu1 %vm354_vm0, %v957_v32 }
  0x29   :  { %913 = vmatprep.mubr.msk.bf16.mxu1 %vm354_vm0, %v964_v33 }
  0x2a   :  { %424 = vmatmul.mubr.bf16.gmra.mrb[4].mxu0 %v952_v30 }
  0x2b   :  { %431 = vmatprep.mubr.bf16.mxu0 %v953_v31 }
  0x30   :  { %914 = vmatmul.mubr.msk.bf16.gmra.mrb[8].mxu1 %vm354_vm0, %v965_v36 }
  0x31   :  { %917 = vmatprep.mubr.msk.bf16.mxu1 %vm354_vm0, %v972_v37 }
  0x32   :  { %432 = vmatmul.mubr.bf16.gmra.mrb[8].mxu0 %v955_v34 }
  0x33   :  { %439 = vmatprep.mubr.bf16.mxu0 %v958_v35 }
  0x38   :  { %918 = vmatmul.mubr.msk.bf16.gmra.mrb[12].mxu1 %vm354_vm0, %v973_v40 }
  0x3a   :  { %440 = vmatmul.mubr.bf16.gmra.mrb[12].mxu0 %v960_v38 }
  0x3b   :  { %447 = vmatprep.mubr.bf16.mxu0 %v961_v39 }
  0x42   :  { %448 = vmatmul.mubr.bf16.gmra.mrb[16].mxu0 %v963_v41 }
  0x43   :  { %455 = vmatprep.mubr.bf16.mxu0 %v966_v42 }
  0x4a   :  { %456 = vmatmul.mubr.bf16.gmra.mrb[20].mxu0 %v968_v43 }
  0x4b   :  { %463 = vmatprep.mubr.bf16.mxu0 %v969_v44 }
  0x52   :  { %464 = vmatmul.mubr.bf16.gmra.mrb[24].mxu0 %v971_v45 }
  0x53   :  { %471 = vmatprep.mubr.bf16.mxu0 %v974_v46 }
  0x5a   :  { %472 = vmatmul.mubr.bf16.gmra.mrb[28].mxu0 %v976_v47 }
  0xf3   :  { %v907_v50 = vpop.f32.mrb[0].mxu1 }
  0xf4   :  { %v514_v54 = vpop.f32.mrb[1].mxu1 }
  0xf5   :  { %v828_v48 = vpop.f32.mrb[0].mxu0  ;;  %v908_v56 = vpop.f32.mrb[2].mxu1 }
  0xf6   :  { %v829_v49 = vpop.f32.mrb[1].mxu0  ;;  %v517_v59 = vpop.f32.mrb[3].mxu1 }
  0xf7   :  { %v830_v52 = vadd.f32 %v829_v49, %v828_v48  ;;  %v831_v53 = vpop.f32.mrb[2].mxu0 }
  0xf8   :  { %v832_v55 = vpop.f32.mrb[3].mxu0 }
  0xf9   :  { %v833_v57 = vadd.f32 %v832_v55, %v831_v53  ;;  %v418_v58 = vadd.f32 %v830_v52, %v1149_v51 }
  0xfb   :  { %v515_v60 = vadd.f32 %v514_v54, %v418_v58  ;;  %v421_v61 = vadd.f32 %v833_v57, %v1149_v51  ;;  %v911_v1 = vpop.f32.mrb[4].mxu1 }
  0xfc   :  { %v530_v6 = vpop.f32.mrb[5].mxu1 }
  0xfd   :  { %v518_v62 = vadd.f32 %v517_v59, %v421_v61  ;;  %v834_v63 = vpop.f32.mrb[4].mxu0  ;;  %v577_v2 = vmax.f32 %v515_v60, 0.0  ;;  %v912_v8 = vpop.f32.mrb[6].mxu1 }
  0xfe   :  { %v835_v0 = vpop.f32.mrb[5].mxu0  ;;  %v533_v12 = vpop.f32.mrb[7].mxu1 }
  0xff   :  { %v578_v3 = vmax.f32 %v518_v62, 0.0  ;;  %v836_v4 = vadd.f32 %v835_v0, %v834_v63  ;;  %v837_v5 = vpop.f32.mrb[6].mxu0 }
 0x100   :  { %v838_v7 = vpop.f32.mrb[7].mxu0 }
 0x101   :  { %v768_v9 = vpack.c.bf16 %v578_v3, %v577_v2  ;;  %v426_v10 = vadd.f32 %v836_v4, %v1149_v51  ;;  %v839_v11 = vadd.f32 %v838_v7, %v837_v5 }
 0x103   :  { %769 = vst [vmem:[%s1200_s3] sm:$0xff] %v768_v9   ;;  %v523_v13 = vadd.f32 %v907_v50, %v426_v10  ;;  %v429_v14 = vadd.f32 %v839_v11, %v1149_v51  ;;  %v915_v18 = vpop.f32.mrb[8].mxu1 }
 0x104   :  { %v546_v23 = vpop.f32.mrb[9].mxu1 }
 0x105   :  { %v526_v15 = vadd.f32 %v908_v56, %v429_v14  ;;  %v840_v16 = vpop.f32.mrb[8].mxu0  ;;  %v579_v19 = vmax.f32 %v523_v13, 0.0  ;;  %v916_v25 = vpop.f32.mrb[10].mxu1 }
 0x106   :  { %v841_v17 = vpop.f32.mrb[9].mxu0  ;;  %v549_v29 = vpop.f32.mrb[11].mxu1 }
 0x107   :  { %v580_v20 = vmax.f32 %v526_v15, 0.0  ;;  %v842_v21 = vadd.f32 %v841_v17, %v840_v16  ;;  %v843_v22 = vpop.f32.mrb[10].mxu0 }
 0x108   :  { %v844_v24 = vpop.f32.mrb[11].mxu0 }
 0x109   :  { %v773_v26 = vpack.c.bf16 %v580_v20, %v579_v19  ;;  %v845_v27 = vadd.f32 %v844_v24, %v843_v22  ;;  %v434_v28 = vadd.f32 %v842_v21, %v1149_v51 }
 0x10b   :  { %805 = vst [vmem:[%s1200_s3 + $0x8] sm:$0xff] %v773_v26   ;;  %v531_v30 = vadd.f32 %v530_v6, %v434_v28  ;;  %v437_v31 = vadd.f32 %v845_v27, %v1149_v51  ;;  %v1163_v35 = vpop.f32.mrb[12].mxu1 }
 0x10c   :  { %v562_v40 = vpop.f32.mrb[13].mxu1 }
 0x10d   :  { %v534_v32 = vadd.f32 %v533_v12, %v437_v31  ;;  %v846_v33 = vpop.f32.mrb[12].mxu0  ;;  %v581_v36 = vmax.f32 %v531_v30, 0.0  ;;  %v1165_v42 = vpop.f32.mrb[14].mxu1 }
 0x10e   :  { %v847_v34 = vpop.f32.mrb[13].mxu0  ;;  %v565_v46 = vpop.f32.mrb[15].mxu1 }
 0x10f   :  { %v582_v37 = vmax.f32 %v534_v32, 0.0  ;;  %v848_v38 = vadd.f32 %v847_v34, %v846_v33  ;;  %v849_v39 = vpop.f32.mrb[14].mxu0 }
 0x110   :  { %v850_v41 = vpop.f32.mrb[15].mxu0 }
 0x111   :  { %v778_v43 = vpack.c.bf16 %v582_v37, %v581_v36  ;;  %v442_v44 = vadd.f32 %v848_v38, %v1149_v51  ;;  %v851_v45 = vadd.f32 %v850_v41, %v849_v39 }
 0x113   :  { %806 = vst [vmem:[%s1200_s3 + $0x10] sm:$0xff] %v778_v43   ;;  %v539_v47 = vadd.f32 %v911_v1, %v442_v44  ;;  %v445_v48 = vadd.f32 %v851_v45, %v1149_v51 }
 0x115   :  { %v542_v49 = vadd.f32 %v912_v8, %v445_v48  ;;  %v852_v50 = vpop.f32.mrb[16].mxu0  ;;  %v583_v53 = vmax.f32 %v539_v47, 0.0 }
 0x116   :  { %v853_v52 = vpop.f32.mrb[17].mxu0 }
 0x117   :  { %v584_v54 = vmax.f32 %v542_v49, 0.0  ;;  %v854_v55 = vadd.f32 %v853_v52, %v852_v50  ;;  %v855_v56 = vpop.f32.mrb[18].mxu0 }
 0x118   :  { %v856_v57 = vpop.f32.mrb[19].mxu0 }
 0x119   :  { %v783_v58 = vpack.c.bf16 %v584_v54, %v583_v53  ;;  %v857_v59 = vadd.f32 %v856_v57, %v855_v56  ;;  %v450_v60 = vadd.f32 %v854_v55, %v1149_v51 }
 0x11b   :  { %807 = vst [vmem:[%s1200_s3 + $0x18] sm:$0xff] %v783_v58   ;;  %v547_v61 = vadd.f32 %v546_v23, %v450_v60  ;;  %v453_v62 = vadd.f32 %v857_v59, %v1149_v51 }
 0x11d   :  { %v550_v63 = vadd.f32 %v549_v29, %v453_v62  ;;  %v858_v0 = vpop.f32.mrb[20].mxu0  ;;  %v585_v2 = vmax.f32 %v547_v61, 0.0 }
 0x11e   :  { %v859_v1 = vpop.f32.mrb[21].mxu0 }
 0x11f   :  { %v586_v3 = vmax.f32 %v550_v63, 0.0  ;;  %v860_v4 = vadd.f32 %v859_v1, %v858_v0  ;;  %v861_v5 = vpop.f32.mrb[22].mxu0 }
 0x120   :  { %v862_v6 = vpop.f32.mrb[23].mxu0 }
 0x121   :  { %v788_v7 = vpack.c.bf16 %v586_v3, %v585_v2  ;;  %v458_v8 = vadd.f32 %v860_v4, %v1149_v51  ;;  %v863_v9 = vadd.f32 %v862_v6, %v861_v5 }
 0x123   :  { %808 = vst [vmem:[%s1200_s3 + $0x20] sm:$0xff] %v788_v7   ;;  %v555_v10 = vadd.f32 %v915_v18, %v458_v8  ;;  %v461_v11 = vadd.f32 %v863_v9, %v1149_v51 }
 0x125   :  { %v558_v12 = vadd.f32 %v916_v25, %v461_v11  ;;  %v864_v13 = vpop.f32.mrb[24].mxu0  ;;  %v587_v15 = vmax.f32 %v555_v10, 0.0 }
 0x126   :  { %v865_v14 = vpop.f32.mrb[25].mxu0 }
 0x127   :  { %v588_v16 = vmax.f32 %v558_v12, 0.0  ;;  %v866_v17 = vadd.f32 %v865_v14, %v864_v13  ;;  %v867_v19 = vpop.f32.mrb[26].mxu0 }
 0x128   :  { %v868_v20 = vpop.f32.mrb[27].mxu0 }
 0x129   :  { %v793_v21 = vpack.c.bf16 %v588_v16, %v587_v15  ;;  %v869_v22 = vadd.f32 %v868_v20, %v867_v19  ;;  %v466_v23 = vadd.f32 %v866_v17, %v1149_v51 }
 0x12b   :  { %809 = vst [vmem:[%s1200_s3 + $0x28] sm:$0xff] %v793_v21   ;;  %v563_v24 = vadd.f32 %v562_v40, %v466_v23  ;;  %v469_v18 = vadd.f32 %v869_v22, %v1149_v51 }
 0x12d   :  { %v566_v26 = vadd.f32 %v565_v46, %v469_v18  ;;  %v870_v25 = vpop.f32.mrb[28].mxu0  ;;  %v589_v28 = vmax.f32 %v563_v24, 0.0 }
 0x12e   :  { %v871_v27 = vpop.f32.mrb[29].mxu0 }
 0x12f   :  { %v590_v29 = vmax.f32 %v566_v26, 0.0  ;;  %v872_v30 = vadd.f32 %v871_v27, %v870_v25  ;;  %v873_v31 = vpop.f32.mrb[30].mxu0 }
 0x130   :  { %v874_v32 = vpop.f32.mrb[31].mxu0 }
 0x131   :  { %v798_v33 = vpack.c.bf16 %v590_v29, %v589_v28  ;;  %v474_v34 = vadd.f32 %v872_v30, %v1149_v51  ;;  %v875_v36 = vadd.f32 %v874_v32, %v873_v31 }
 0x133   :  { %810 = vst [vmem:[%s1200_s3 + $0x30] sm:$0xff] %v798_v33   ;;  %v571_v37 = vadd.f32 %v1163_v35, %v474_v34  ;;  %v477_v38 = vadd.f32 %v875_v36, %v1149_v51 }
 0x135   :  { %v574_v39 = vadd.f32 %v1165_v42, %v477_v38  ;;  %v591_v40 = vmax.f32 %v571_v37, 0.0 }
 0x137   :  { %v592_v41 = vmax.f32 %v574_v39, 0.0 }
 0x139   :  { %v803_v43 = vpack.c.bf16 %v592_v41, %v591_v40 }
 0x13b   :  { %811 = vst [vmem:[%s1200_s3 + $0x38] sm:$0xff] %v803_v43  }

// kernel: tsm_retinanet_forward.29
= control target key start
LH: loop header
LB: loop body
LE: loop exit
PB: predicated region body
PF: predicated region fallthrough
CT: control target
= control target key end

     0   :  { %v589_v0 = vmov 0   ;;  %vm206_vm0 = vcmask 523264   ;;  %s753_s1 = inlined_call_operand.vmem [shape: bf16[192,128], index: 1, kind: input, shape index: {}]   ;;  %s754_s0 = inlined_call_operand.vmem [shape: bf16[128,192], index: 0, kind: input, shape index: {}]   ;;  %s755_s2 = inlined_call_operand.vmem [shape: f32[1,128], index: 2, kind: input, shape index: {}]   ;;  %s756_s3 = inlined_call_operand.vmem [shape: bf16[128,128], index: 3, kind: output, shape index: {}]  }
   0x1   :  { %231 = vmatprep.subr.bf16.mxu0 %v589_v0  ;;  %528 = vmatprep.subr.bf16.mxu1 %v589_v0  ;;  %v553_v1 = vld [vmem:[%s753_s1] sm:$0xff]   ;;  %v554_v2 = vld [vmem:[%s753_s1 + $0x8] sm:$0xff]   ;;  %v555_v3 = vld [vmem:[%s753_s1 + $0x10] sm:$0xff]  }
   0x2   :  { %232 = vmatpush1.bf16.msra.mxu0 %v553_v1  ;;  %540 = vmatpush1.bf16.msra.mxu1 %v553_v1  ;;  %v556_v4 = vld [vmem:[%s753_s1 + $0x18] sm:$0xff]   ;;  %v567_v5 = vld [vmem:[%s754_s0 + $0x4] ss:$8 sps:$4 sm:$0xff]   ;;  %v559_v9 = vld [vmem:[%s753_s1 + $0x30] sm:$0xff]  }
   0x3   :  { %233 = vmatprep.subr.bf16.mxu0 %v589_v0  ;;  %529 = vmatprep.subr.bf16.mxu1 %v589_v0  ;;  %v557_v6 = vld [vmem:[%s753_s1 + $0x20] sm:$0xff]   ;;  %v558_v8 = vld [vmem:[%s753_s1 + $0x28] sm:$0xff]   ;;  %v560_v10 = vld [vmem:[%s753_s1 + $0x38] sm:$0xff]  }
   0x4   :  { %v570_v7 = vld [vmem:[%s754_s0 + $0x44] ss:$8 sps:$4 sm:$0xff]   ;;  %441 = vmatprep.mubr.msk.bf16.mxu0 %vm206_vm0, %v567_v5  ;;  %v563_v13 = vld [vmem:[%s753_s1 + $0x50] sm:$0xff]   ;;  %v564_v14 = vld [vmem:[%s753_s1 + $0x58] sm:$0xff]  }
   0x5   :  { %445 = vmatprep.mubr.msk.bf16.mxu1 %vm206_vm0, %v570_v7  ;;  %v561_v11 = vld [vmem:[%s753_s1 + $0x40] sm:$0xff]   ;;  %v562_v12 = vld [vmem:[%s753_s1 + $0x48] sm:$0xff]   ;;  %v571_v17 = vld [vmem:[%s754_s0 + $0x14] ss:$8 sps:$4 sm:$0xff]  }
   0x6   :  { %234 = vmatpush1.bf16.msra.mxu0 %v554_v2  ;;  %541 = vmatpush1.bf16.msra.mxu1 %v554_v2  ;;  %v565_v15 = vld [vmem:[%s754_s0] ss:$8 sps:$4 sm:$0xff]   ;;  %v573_v18 = vld [vmem:[%s754_s0 + $0x54] ss:$8 sps:$4 sm:$0xff]   ;;  %v575_v19 = vld [vmem:[%s754_s0 + $0x10] ss:$8 sps:$4 sm:$0xff]  }
   0x7   :  { %235 = vmatprep.subr.bf16.mxu0 %v589_v0  ;;  %530 = vmatprep.subr.bf16.mxu1 %v589_v0  ;;  %v568_v16 = vld [vmem:[%s754_s0 + $0x40] ss:$8 sps:$4 sm:$0xff]   ;;  %v576_v20 = vld [vmem:[%s754_s0 + $0x50] ss:$8 sps:$4 sm:$0xff]   ;;  %v577_v21 = vld [vmem:[%s754_s0 + $0x24] ss:$8 sps:$4 sm:$0xff]  }
   0x8   :  { %v579_v22 = vld [vmem:[%s754_s0 + $0x64] ss:$8 sps:$4 sm:$0xff]   ;;  %v581_v23 = vld [vmem:[%s754_s0 + $0x20] ss:$8 sps:$4 sm:$0xff]   ;;  %v583_v25 = vld [vmem:[%s754_s0 + $0x34] ss:$8 sps:$4 sm:$0xff]  }
   0x9   :  { %v582_v24 = vld [vmem:[%s754_s0 + $0x60] ss:$8 sps:$4 sm:$0xff]   ;;  %v585_v26 = vld [vmem:[%s754_s0 + $0x74] ss:$8 sps:$4 sm:$0xff]   ;;  %v587_v27 = vld [vmem:[%s754_s0 + $0x30] ss:$8 sps:$4 sm:$0xff]  }
   0xa   :  { %236 = vmatpush1.bf16.msra.mxu0 %v555_v3  ;;  %542 = vmatpush1.bf16.msra.mxu1 %v555_v3  ;;  %v588_v28 = vld [vmem:[%s754_s0 + $0x70] ss:$8 sps:$4 sm:$0xff]   ;;  %v412_v29 = vld [vmem:[%s755_s2] ss:$0 sm:$0xff] }
   0xb   :  { %237 = vmatprep.subr.bf16.mxu0 %v589_v0  ;;  %531 = vmatprep.subr.bf16.mxu1 %v589_v0 }
   0xe   :  { %238 = vmatpush1.bf16.msra.mxu0 %v556_v4  ;;  %543 = vmatpush1.bf16.msra.mxu1 %v556_v4 }
   0xf   :  { %239 = vmatprep.subr.bf16.mxu0 %v589_v0  ;;  %532 = vmatprep.subr.bf16.mxu1 %v589_v0 }
  0x12   :  { %240 = vmatpush1.bf16.msra.mxu0 %v557_v6  ;;  %544 = vmatpush1.bf16.msra.mxu1 %v557_v6 }
  0x13   :  { %241 = vmatprep.subr.bf16.mxu0 %v589_v0  ;;  %533 = vmatprep.subr.bf16.mxu1 %v589_v0 }
  0x16   :  { %242 = vmatpush1.bf16.msra.mxu0 %v558_v8  ;;  %545 = vmatpush1.bf16.msra.mxu1 %v558_v8 }
  0x17   :  { %243 = vmatprep.subr.bf16.mxu0 %v589_v0  ;;  %534 = vmatprep.subr.bf16.mxu1 %v589_v0 }
  0x1a   :  { %244 = vmatpush1.bf16.msra.mxu0 %v559_v9  ;;  %546 = vmatpush1.bf16.msra.mxu1 %v559_v9 }
  0x1b   :  { %245 = vmatprep.subr.bf16.mxu0 %v589_v0  ;;  %535 = vmatprep.subr.bf16.mxu1 %v589_v0 }
  0x1e   :  { %246 = vmatpush1.bf16.msra.mxu0 %v560_v10  ;;  %547 = vmatpush1.bf16.msra.mxu1 %v560_v10 }
  0x1f   :  { %247 = vmatprep.subr.bf16.mxu0 %v589_v0  ;;  %536 = vmatprep.subr.bf16.mxu1 %v589_v0 }
  0x22   :  { %248 = vmatpush1.bf16.msra.mxu0 %v561_v11  ;;  %548 = vmatpush1.bf16.msra.mxu1 %v561_v11 }
  0x23   :  { %249 = vmatprep.subr.bf16.mxu0 %v589_v0  ;;  %537 = vmatprep.subr.bf16.mxu1 %v589_v0 }
  0x26   :  { %250 = vmatpush1.bf16.msra.mxu0 %v562_v12  ;;  %549 = vmatpush1.bf16.msra.mxu1 %v562_v12 }
  0x27   :  { %251 = vmatprep.subr.bf16.mxu0 %v589_v0  ;;  %538 = vmatprep.subr.bf16.mxu1 %v589_v0 }
  0x2a   :  { %252 = vmatpush1.bf16.msra.mxu0 %v563_v13  ;;  %550 = vmatpush1.bf16.msra.mxu1 %v563_v13 }
  0x2b   :  { %253 = vmatprep.subr.bf16.mxu0 %v589_v0  ;;  %539 = vmatprep.subr.bf16.mxu1 %v589_v0 }
  0x2e   :  { %254 = vmatpush1.bf16.msra.mxu0 %v564_v14  ;;  %551 = vmatpush1.bf16.msra.mxu1 %v564_v14 }
  0x31   :  { %264 = vmatmul.mubr.bf16.vlgmr.msra.gmra.mrb[0].mxu0 %v565_v15  ;;  %296 = vmatmul.mubr.bf16.vlgmr.msra.gmra.mrb[0].mxu1 %v568_v16 }
  0x32   :  { %442 = vmatprep.mubr.msk.bf16.mxu0 %vm206_vm0, %v571_v17  ;;  %446 = vmatprep.mubr.msk.bf16.mxu1 %vm206_vm0, %v573_v18 }
  0x39   :  { %272 = vmatmul.mubr.bf16.gmra.mrb[4].mxu0 %v575_v19  ;;  %304 = vmatmul.mubr.bf16.gmra.mrb[4].mxu1 %v576_v20 }
  0x3a   :  { %443 = vmatprep.mubr.msk.bf16.mxu0 %vm206_vm0, %v577_v21  ;;  %447 = vmatprep.mubr.msk.bf16.mxu1 %vm206_vm0, %v579_v22 }
  0x41   :  { %280 = vmatmul.mubr.bf16.gmra.mrb[8].mxu0 %v581_v23  ;;  %312 = vmatmul.mubr.bf16.gmra.mrb[8].mxu1 %v582_v24 }
  0x42   :  { %444 = vmatprep.mubr.msk.bf16.mxu0 %vm206_vm0, %v583_v25  ;;  %448 = vmatprep.mubr.msk.bf16.mxu1 %vm206_vm0, %v585_v26 }
  0x49   :  { %288 = vmatmul.mubr.bf16.gmra.mrb[12].mxu0 %v587_v27  ;;  %320 = vmatmul.mubr.bf16.gmra.mrb[12].mxu1 %v588_v28 }
 0x104   :  { %v265_v30 = vpop.f32.mrb[0].mxu0  ;;  %v297_v31 = vpop.f32.mrb[0].mxu1 }
 0x105   :  { %v267_v32 = vpop.f32.mrb[1].mxu0  ;;  %v299_v33 = vpop.f32.mrb[1].mxu1  ;;  %v266_v36 = vadd.f32 %v412_v29, %v265_v30  ;;  %v298_v37 = vadd.f32 %v412_v29, %v297_v31 }
 0x106   :  { %v268_v34 = vpop.f32.mrb[2].mxu0  ;;  %v300_v35 = vpop.f32.mrb[2].mxu1 }
 0x107   :  { %v269_v38 = vadd.f32 %v412_v29, %v268_v34  ;;  %v301_v39 = vadd.f32 %v412_v29, %v300_v35  ;;  %v270_v40 = vpop.f32.mrb[3].mxu0  ;;  %v302_v41 = vpop.f32.mrb[3].mxu1 }
 0x109   :  { %v484_v42 = vpack.c.bf16 %v269_v38, %v266_v36  ;;  %v504_v43 = vpack.c.bf16 %v301_v39, %v298_v37 }
 0x10b   :  { %485 = vst [vmem:[%s756_s3] sm:$0xff] %v484_v42   ;;  %524 = vst [vmem:[%s756_s3 + $0x20] sm:$0xff] %v504_v43  }
 0x10c   :  { %v273_v44 = vpop.f32.mrb[4].mxu0  ;;  %v305_v45 = vpop.f32.mrb[4].mxu1 }
 0x10d   :  { %v275_v46 = vpop.f32.mrb[5].mxu0  ;;  %v307_v47 = vpop.f32.mrb[5].mxu1  ;;  %v274_v50 = vadd.f32 %v412_v29, %v273_v44  ;;  %v306_v51 = vadd.f32 %v412_v29, %v305_v45 }
 0x10e   :  { %v276_v48 = vpop.f32.mrb[6].mxu0  ;;  %v308_v49 = vpop.f32.mrb[6].mxu1 }
 0x10f   :  { %v277_v52 = vadd.f32 %v412_v29, %v276_v48  ;;  %v309_v53 = vadd.f32 %v412_v29, %v308_v49  ;;  %v278_v54 = vpop.f32.mrb[7].mxu0  ;;  %v310_v55 = vpop.f32.mrb[7].mxu1 }
 0x111   :  { %v489_v56 = vpack.c.bf16 %v277_v52, %v274_v50  ;;  %v509_v57 = vpack.c.bf16 %v309_v53, %v306_v51 }
 0x113   :  { %521 = vst [vmem:[%s756_s3 + $0x8] sm:$0xff] %v489_v56   ;;  %525 = vst [vmem:[%s756_s3 + $0x28] sm:$0xff] %v509_v57  }
 0x114   :  { %v281_v58 = vpop.f32.mrb[8].mxu0  ;;  %v313_v59 = vpop.f32.mrb[8].mxu1 }
 0x115   :  { %v283_v60 = vpop.f32.mrb[9].mxu0  ;;  %v315_v61 = vpop.f32.mrb[9].mxu1  ;;  %v282_v0 = vadd.f32 %v412_v29, %v281_v58  ;;  %v314_v1 = vadd.f32 %v412_v29, %v313_v59 }
 0x116   :  { %v284_v62 = vpop.f32.mrb[10].mxu0  ;;  %v316_v63 = vpop.f32.mrb[10].mxu1 }
 0x117   :  { %v285_v2 = vadd.f32 %v412_v29, %v284_v62  ;;  %v317_v3 = vadd.f32 %v412_v29, %v316_v63  ;;  %v286_v4 = vpop.f32.mrb[11].mxu0  ;;  %v318_v5 = vpop.f32.mrb[11].mxu1 }
 0x119   :  { %v494_v6 = vpack.c.bf16 %v285_v2, %v282_v0  ;;  %v514_v7 = vpack.c.bf16 %v317_v3, %v314_v1 }
 0x11b   :  { %522 = vst [vmem:[%s756_s3 + $0x10] sm:$0xff] %v494_v6   ;;  %526 = vst [vmem:[%s756_s3 + $0x30] sm:$0xff] %v514_v7  }
 0x11c   :  { %v289_v8 = vpop.f32.mrb[12].mxu0  ;;  %v321_v9 = vpop.f32.mrb[12].mxu1 }
 0x11d   :  { %v291_v10 = vpop.f32.mrb[13].mxu0  ;;  %v323_v11 = vpop.f32.mrb[13].mxu1  ;;  %v290_v14 = vadd.f32 %v412_v29, %v289_v8  ;;  %v322_v15 = vadd.f32 %v412_v29, %v321_v9 }
 0x11e   :  { %v292_v12 = vpop.f32.mrb[14].mxu0  ;;  %v324_v13 = vpop.f32.mrb[14].mxu1 }
 0x11f   :  { %v293_v16 = vadd.f32 %v412_v29, %v292_v12  ;;  %v325_v17 = vadd.f32 %v412_v29, %v324_v13  ;;  %v294_v18 = vpop.f32.mrb[15].mxu0  ;;  %v326_v19 = vpop.f32.mrb[15].mxu1 }
 0x121   :  { %v499_v20 = vpack.c.bf16 %v293_v16, %v290_v14  ;;  %v519_v21 = vpack.c.bf16 %v325_v17, %v322_v15 }
 0x123   :  { %523 = vst [vmem:[%s756_s3 + $0x18] sm:$0xff] %v499_v20   ;;  %527 = vst [vmem:[%s756_s3 + $0x38] sm:$0xff] %v519_v21  }

// kernel: tsm_retinanet_forward.26
= control target key start
LH: loop header
LB: loop body
LE: loop exit
PB: predicated region body
PF: predicated region fallthrough
CT: control target
= control target key end

     0   :  { %vm1159_vm0 = vcmask 916480   ;;  %s3016_s1 = inlined_call_operand.vmem [shape: bf16[1008,256], index: 1, kind: input, shape index: {}]   ;;  %s3017_s0 = inlined_call_operand.vmem [shape: bf16[128,1008], index: 0, kind: input, shape index: {}]   ;;  %s3018_s2 = inlined_call_operand.vmem [shape: f32[1,256], index: 2, kind: input, shape index: {}]   ;;  %s3019_s3 = inlined_call_operand.vmem [shape: bf16[128,256], index: 3, kind: output, shape index: {}]  }
   0x1   :  { %v2142_v0 = vld [vmem:[%s3016_s1 + $0x4] ss:$8 sps:$4 sm:$0xff]   ;;  %v2146_v2 = vld [vmem:[%s3016_s1] ss:$8 sps:$4 sm:$0xff]   ;;  %v2148_v4 = vld [vmem:[%s3016_s1 + $0x14] ss:$8 sps:$4 sm:$0xff]  }
   0x2   :  { %v2144_v1 = vld [vmem:[%s3016_s1 + $0x204] ss:$8 sps:$4 sm:$0xff]   ;;  %1184 = vmatprep.subr.bf16.mxu1 %v2142_v0  ;;  %v2147_v3 = vld [vmem:[%s3016_s1 + $0x200] ss:$8 sps:$4 sm:$0xff]   ;;  %v2150_v5 = vld [vmem:[%s3016_s1 + $0x214] ss:$8 sps:$4 sm:$0xff]  }
   0x3   :  { %1410 = vmatprep.subr.bf16.mxu0 %v2144_v1  ;;  %1185 = vmatpush1.bf16.msra.mxu1 %v2146_v2  ;;  %v2152_v6 = vld [vmem:[%s3016_s1 + $0x10] ss:$8 sps:$4 sm:$0xff]   ;;  %v2154_v8 = vld [vmem:[%s3016_s1 + $0x24] ss:$8 sps:$4 sm:$0xff]   ;;  %v2158_v10 = vld [vmem:[%s3016_s1 + $0x20] ss:$8 sps:$4 sm:$0xff]  }
   0x4   :  { %1411 = vmatpush1.bf16.msra.mxu0 %v2147_v3  ;;  %1186 = vmatprep.subr.bf16.mxu1 %v2148_v4  ;;  %v2153_v7 = vld [vmem:[%s3016_s1 + $0x210] ss:$8 sps:$4 sm:$0xff]   ;;  %v2156_v9 = vld [vmem:[%s3016_s1 + $0x224] ss:$8 sps:$4 sm:$0xff]   ;;  %v2159_v11 = vld [vmem:[%s3016_s1 + $0x220] ss:$8 sps:$4 sm:$0xff]  }
   0x5   :  { %1412 = vmatprep.subr.bf16.mxu0 %v2150_v5  ;;  %v2160_v12 = vld [vmem:[%s3016_s1 + $0x34] ss:$8 sps:$4 sm:$0xff]   ;;  %v2164_v14 = vld [vmem:[%s3016_s1 + $0x30] ss:$8 sps:$4 sm:$0xff]   ;;  %v2166_v16 = vld [vmem:[%s3016_s1 + $0x44] ss:$8 sps:$4 sm:$0xff]  }
   0x6   :  { %v2162_v13 = vld [vmem:[%s3016_s1 + $0x234] ss:$8 sps:$4 sm:$0xff]   ;;  %v2165_v15 = vld [vmem:[%s3016_s1 + $0x230] ss:$8 sps:$4 sm:$0xff]   ;;  %v2168_v17 = vld [vmem:[%s3016_s1 + $0x244] ss:$8 sps:$4 sm:$0xff]  }
   0x7   :  { %1187 = vmatpush1.bf16.msra.mxu1 %v2152_v6  ;;  %v2170_v18 = vld [vmem:[%s3016_s1 + $0x40] ss:$8 sps:$4 sm:$0xff]   ;;  %v2172_v20 = vld [vmem:[%s3016_s1 + $0x54] ss:$8 sps:$4 sm:$0xff]   ;;  %v2176_v22 = vld [vmem:[%s3016_s1 + $0x50] ss:$8 sps:$4 sm:$0xff]  }
   0x8   :  { %1413 = vmatpush1.bf16.msra.mxu0 %v2153_v7  ;;  %1188 = vmatprep.subr.bf16.mxu1 %v2154_v8  ;;  %v2171_v19 = vld [vmem:[%s3016_s1 + $0x240] ss:$8 sps:$4 sm:$0xff]   ;;  %v2174_v21 = vld [vmem:[%s3016_s1 + $0x254] ss:$8 sps:$4 sm:$0xff]   ;;  %v2177_v23 = vld [vmem:[%s3016_s1 + $0x250] ss:$8 sps:$4 sm:$0xff]  }
   0x9   :  { %1414 = vmatprep.subr.bf16.mxu0 %v2156_v9  ;;  %v2178_v24 = vld [vmem:[%s3016_s1 + $0x64] ss:$8 sps:$4 sm:$0xff]   ;;  %v2182_v26 = vld [vmem:[%s3016_s1 + $0x60] ss:$8 sps:$4 sm:$0xff]   ;;  %v2184_v28 = vld [vmem:[%s3016_s1 + $0x74] ss:$8 sps:$4 sm:$0xff]  }
   0xa   :  { %v2180_v25 = vld [vmem:[%s3016_s1 + $0x264] ss:$8 sps:$4 sm:$0xff]   ;;  %v2183_v27 = vld [vmem:[%s3016_s1 + $0x260] ss:$8 sps:$4 sm:$0xff]   ;;  %v2186_v29 = vld [vmem:[%s3016_s1 + $0x274] ss:$8 sps:$4 sm:$0xff]  }
   0xb   :  { %1189 = vmatpush1.bf16.msra.mxu1 %v2158_v10  ;;  %v2188_v30 = vld [vmem:[%s3016_s1 + $0x70] ss:$8 sps:$4 sm:$0xff]   ;;  %v2190_v32 = vld [vmem:[%s3016_s1 + $0x84] ss:$8 sps:$4 sm:$0xff]   ;;  %v2194_v34 = vld [vmem:[%s3016_s1 + $0x80] ss:$8 sps:$4 sm:$0xff]  }
   0xc   :  { %1415 = vmatpush1.bf16.msra.mxu0 %v2159_v11  ;;  %1190 = vmatprep.subr.bf16.mxu1 %v2160_v12  ;;  %v2189_v31 = vld [vmem:[%s3016_s1 + $0x270] ss:$8 sps:$4 sm:$0xff]   ;;  %v2192_v33 = vld [vmem:[%s3016_s1 + $0x284] ss:$8 sps:$4 sm:$0xff]   ;;  %v2195_v35 = vld [vmem:[%s3016_s1 + $0x280] ss:$8 sps:$4 sm:$0xff]  }
   0xd   :  { %1416 = vmatprep.subr.bf16.mxu0 %v2162_v13  ;;  %v2196_v36 = vld [vmem:[%s3016_s1 + $0x94] ss:$8 sps:$4 sm:$0xff]   ;;  %v2200_v38 = vld [vmem:[%s3016_s1 + $0x90] ss:$8 sps:$4 sm:$0xff]   ;;  %v2202_v40 = vld [vmem:[%s3016_s1 + $0xa4] ss:$8 sps:$4 sm:$0xff]  }
   0xe   :  { %v2198_v37 = vld [vmem:[%s3016_s1 + $0x294] ss:$8 sps:$4 sm:$0xff]   ;;  %v2201_v39 = vld [vmem:[%s3016_s1 + $0x290] ss:$8 sps:$4 sm:$0xff]   ;;  %v2204_v41 = vld [vmem:[%s3016_s1 + $0x2a4] ss:$8 sps:$4 sm:$0xff]  }
   0xf   :  { %1191 = vmatpush1.bf16.msra.mxu1 %v2164_v14  ;;  %v2206_v42 = vld [vmem:[%s3016_s1 + $0xa0] ss:$8 sps:$4 sm:$0xff]   ;;  %v2208_v44 = vld [vmem:[%s3016_s1 + $0xb4] ss:$8 sps:$4 sm:$0xff]   ;;  %v2212_v46 = vld [vmem:[%s3016_s1 + $0xb0] ss:$8 sps:$4 sm:$0xff]  }
  0x10   :  { %1417 = vmatpush1.bf16.msra.mxu0 %v2165_v15  ;;  %1192 = vmatprep.subr.bf16.mxu1 %v2166_v16  ;;  %v2207_v43 = vld [vmem:[%s3016_s1 + $0x2a0] ss:$8 sps:$4 sm:$0xff]   ;;  %v2210_v45 = vld [vmem:[%s3016_s1 + $0x2b4] ss:$8 sps:$4 sm:$0xff]   ;;  %v2213_v47 = vld [vmem:[%s3016_s1 + $0x2b0] ss:$8 sps:$4 sm:$0xff]  }
  0x11   :  { %1418 = vmatprep.subr.bf16.mxu0 %v2168_v17  ;;  %v15_v48 = vld [vmem:[%s3017_s0] sm:$0xff]  ;;  %v17_v50 = vld [vmem:[%s3017_s0 + $0x10] sm:$0xff] }
  0x12   :  { %v19_v49 = vld [vmem:[%s3017_s0 + $0x20] sm:$0xff]  ;;  %v21_v51 = vld [vmem:[%s3017_s0 + $0x30] sm:$0xff] }
  0x13   :  { %1193 = vmatpush1.bf16.msra.mxu1 %v2170_v18  ;;  %v2214_v52 = vld [vmem:[%s3016_s1 + $0xc4] ss:$8 sps:$4 sm:$0xff]   ;;  %v1785_v53 = vcombine.high %v15_v48, %v19_v49  ;;  %v1789_v55 = vcombine.high %v17_v50, %v21_v51  ;;  %v2218_v56 = vld [vmem:[%s3016_s1 + $0xc0] ss:$8 sps:$4 sm:$0xff]   ;;  %v2220_v58 = vld [vmem:[%s3016_s1 + $0xd4] ss:$8 sps:$4 sm:$0xff]   ;;  %v1784_v11 = vcombine.low %v15_v48, %v19_v49  ;;  %v1788_v12 = vcombine.low %v17_v50, %v21_v51 }
  0x14   :  { %1419 = vmatpush1.bf16.msra.mxu0 %v2171_v19  ;;  %1194 = vmatprep.subr.bf16.mxu1 %v2172_v20  ;;  %v2216_v54 = vld [vmem:[%s3016_s1 + $0x2c4] ss:$8 sps:$4 sm:$0xff]   ;;  %v2219_v57 = vld [vmem:[%s3016_s1 + $0x2c0] ss:$8 sps:$4 sm:$0xff]   ;;  %v2222_v59 = vld [vmem:[%s3016_s1 + $0x2d4] ss:$8 sps:$4 sm:$0xff]  }
  0x15   :  { %1420 = vmatprep.subr.bf16.mxu0 %v2174_v21  ;;  %1216 = vmatprep.mubr.bf16.mxu1 %v1785_v53  ;;  %v2224_v60 = vld [vmem:[%s3016_s1 + $0xd0] ss:$8 sps:$4 sm:$0xff]   ;;  %v2226_v62 = vld [vmem:[%s3016_s1 + $0xe4] ss:$8 sps:$4 sm:$0xff]   ;;  %v2230_v0 = vld [vmem:[%s3016_s1 + $0xe0] ss:$8 sps:$4 sm:$0xff]  }
  0x16   :  { %1442 = vmatprep.mubr.bf16.mxu0 %v1789_v55  ;;  %v2225_v61 = vld [vmem:[%s3016_s1 + $0x2d0] ss:$8 sps:$4 sm:$0xff]   ;;  %v2228_v63 = vld [vmem:[%s3016_s1 + $0x2e4] ss:$8 sps:$4 sm:$0xff]   ;;  %v2231_v1 = vld [vmem:[%s3016_s1 + $0x2e0] ss:$8 sps:$4 sm:$0xff]  }
  0x17   :  { %1195 = vmatpush1.bf16.msra.mxu1 %v2176_v22  ;;  %v2232_v2 = vld [vmem:[%s3016_s1 + $0xf4] ss:$8 sps:$4 sm:$0xff]   ;;  %v2236_v4 = vld [vmem:[%s3016_s1 + $0xf0] ss:$8 sps:$4 sm:$0xff]   ;;  %v2240_v6 = vld [vmem:[%s3016_s1 + $0x104] ss:$8 sps:$4 sm:$0xff]  }
  0x18   :  { %1421 = vmatpush1.bf16.msra.mxu0 %v2177_v23  ;;  %1196 = vmatprep.subr.bf16.mxu1 %v2178_v24  ;;  %v2234_v3 = vld [vmem:[%s3016_s1 + $0x2f4] ss:$8 sps:$4 sm:$0xff]   ;;  %v2237_v5 = vld [vmem:[%s3016_s1 + $0x2f0] ss:$8 sps:$4 sm:$0xff]   ;;  %v2243_v7 = vld [vmem:[%s3016_s1 + $0x304] ss:$8 sps:$4 sm:$0xff]  }
  0x19   :  { %1422 = vmatprep.subr.bf16.mxu0 %v2180_v25  ;;  %v2238_v8 = vld [vmem:[%s3016_s1 + $0x100] ss:$8 sps:$4 sm:$0xff]   ;;  %v25_v13 = vld [vmem:[%s3017_s0 + $0x50] sm:$0xff]  ;;  %v2252_v22 = vld [vmem:[%s3016_s1 + $0x124] ss:$8 sps:$4 sm:$0xff]  }
  0x1a   :  { %v23_v9 = vld [vmem:[%s3017_s0 + $0x40] sm:$0xff]  ;;  %v29_v14 = vld [vmem:[%s3017_s0 + $0x70] sm:$0xff] }
  0x1b   :  { %1197 = vmatpush1.bf16.msra.mxu1 %v2182_v26  ;;  %v27_v10 = vld [vmem:[%s3017_s0 + $0x60] sm:$0xff]  ;;  %v2246_v16 = vld [vmem:[%s3016_s1 + $0x114] ss:$8 sps:$4 sm:$0xff]   ;;  %v1797_v18 = vcombine.high %v25_v13, %v29_v14  ;;  %v2244_v20 = vld [vmem:[%s3016_s1 + $0x110] ss:$8 sps:$4 sm:$0xff]  }
  0x1c   :  { %1423 = vmatpush1.bf16.msra.mxu0 %v2183_v27  ;;  %1198 = vmatprep.subr.bf16.mxu1 %v2184_v28  ;;  %v2241_v15 = vld [vmem:[%s3016_s1 + $0x300] ss:$8 sps:$4 sm:$0xff]   ;;  %v1793_v17 = vcombine.high %v23_v9, %v27_v10  ;;  %v2249_v19 = vld [vmem:[%s3016_s1 + $0x314] ss:$8 sps:$4 sm:$0xff]   ;;  %v2247_v21 = vld [vmem:[%s3016_s1 + $0x310] ss:$8 sps:$4 sm:$0xff]   ;;  %v1792_v27 = vcombine.low %v23_v9, %v27_v10  ;;  %v1796_v28 = vcombine.low %v25_v13, %v29_v14 }
  0x1d   :  { %1424 = vmatprep.subr.bf16.mxu0 %v2186_v29  ;;  %v2255_v23 = vld [vmem:[%s3016_s1 + $0x324] ss:$8 sps:$4 sm:$0xff]   ;;  %v2250_v24 = vld [vmem:[%s3016_s1 + $0x120] ss:$8 sps:$4 sm:$0xff]   ;;  %v33_v29 = vld [vmem:[%s3017_s0 + $0x90] sm:$0xff] }
  0x1e   :  { %v31_v25 = vld [vmem:[%s3017_s0 + $0x80] sm:$0xff]  ;;  %v2267_v48 = vld [vmem:[%s3016_s1 + $0x154] ss:$8 sps:$4 sm:$0xff]  }
  0x1f   :  { %1199 = vmatpush1.bf16.msra.mxu1 %v2188_v30  ;;  %v35_v26 = vld [vmem:[%s3017_s0 + $0xa0] sm:$0xff]  ;;  %v37_v30 = vld [vmem:[%s3017_s0 + $0xb0] sm:$0xff] }
  0x20   :  { %1425 = vmatpush1.bf16.msra.mxu0 %v2189_v31  ;;  %1200 = vmatprep.subr.bf16.mxu1 %v2190_v32  ;;  %v2253_v31 = vld [vmem:[%s3016_s1 + $0x320] ss:$8 sps:$4 sm:$0xff]   ;;  %v2258_v32 = vld [vmem:[%s3016_s1 + $0x134] ss:$8 sps:$4 sm:$0xff]   ;;  %v2273_v53 = vld [vmem:[%s3016_s1 + $0x164] ss:$8 sps:$4 sm:$0xff]  }
  0x21   :  { %1426 = vmatprep.subr.bf16.mxu0 %v2192_v33  ;;  %v1801_v33 = vcombine.high %v31_v25, %v35_v26  ;;  %v2276_v51 = vld [vmem:[%s3016_s1 + $0x354] ss:$8 sps:$4 sm:$0xff]   ;;  %v2282_v55 = vld [vmem:[%s3016_s1 + $0x364] ss:$8 sps:$4 sm:$0xff]   ;;  %v2283_v14 = vld [vmem:[%s3016_s1 + $0x180] ss:$8 sps:$4 sm:$0xff]  }
  0x22   :  { %v59_v9 = vld [vmem:[%s3017_s0 + $0x160] sm:$0xff]  ;;  %v61_v13 = vld [vmem:[%s3017_s0 + $0x170] sm:$0xff] }
  0x23   :  { %1201 = vmatpush1.bf16.msra.mxu1 %v2194_v34  ;;  %v1805_v34 = vcombine.high %v33_v29, %v37_v30 }
  0x24   :  { %1427 = vmatpush1.bf16.msra.mxu0 %v2195_v35  ;;  %1202 = vmatprep.subr.bf16.mxu1 %v2196_v36  ;;  %v2261_v35 = vld [vmem:[%s3016_s1 + $0x334] ss:$8 sps:$4 sm:$0xff]   ;;  %v2256_v36 = vld [vmem:[%s3016_s1 + $0x130] ss:$8 sps:$4 sm:$0xff]  }
  0x25   :  { %1428 = vmatprep.subr.bf16.mxu0 %v2198_v37  ;;  %v2259_v37 = vld [vmem:[%s3016_s1 + $0x330] ss:$8 sps:$4 sm:$0xff]  }
  0x27   :  { %1203 = vmatpush1.bf16.msra.mxu1 %v2200_v38  ;;  %v2264_v38 = vld [vmem:[%s3016_s1 + $0x144] ss:$8 sps:$4 sm:$0xff]  }
  0x28   :  { %1429 = vmatpush1.bf16.msra.mxu0 %v2201_v39  ;;  %1204 = vmatprep.subr.bf16.mxu1 %v2202_v40  ;;  %v2270_v39 = vld [vmem:[%s3016_s1 + $0x344] ss:$8 sps:$4 sm:$0xff]   ;;  %v2262_v40 = vld [vmem:[%s3016_s1 + $0x140] ss:$8 sps:$4 sm:$0xff]  }
  0x29   :  { %1430 = vmatprep.subr.bf16.mxu0 %v2204_v41  ;;  %v39_v41 = vld [vmem:[%s3017_s0 + $0xc0] sm:$0xff] }
  0x2b   :  { %1205 = vmatpush1.bf16.msra.mxu1 %v2206_v42  ;;  %v43_v42 = vld [vmem:[%s3017_s0 + $0xe0] sm:$0xff] }
  0x2c   :  { %1431 = vmatpush1.bf16.msra.mxu0 %v2207_v43  ;;  %1206 = vmatprep.subr.bf16.mxu1 %v2208_v44  ;;  %v1800_v43 = vcombine.low %v31_v25, %v35_v26  ;;  %v1804_v44 = vcombine.low %v33_v29, %v37_v30  ;;  %v1809_v49 = vcombine.high %v39_v41, %v43_v42  ;;  %v67_v25 = vld [vmem:[%s3017_s0 + $0x1a0] sm:$0xff]  ;;  %v69_v29 = vld [vmem:[%s3017_s0 + $0x1b0] sm:$0xff] }
  0x2d   :  { %1432 = vmatprep.subr.bf16.mxu0 %v2210_v45  ;;  %v41_v45 = vld [vmem:[%s3017_s0 + $0xd0] sm:$0xff]  ;;  %v2295_v30 = vld [vmem:[%s3016_s1 + $0x1a0] ss:$8 sps:$4 sm:$0xff]  }
  0x2f   :  { %1207 = vmatpush1.bf16.msra.mxu1 %v2212_v46  ;;  %v45_v46 = vld [vmem:[%s3017_s0 + $0xf0] sm:$0xff] }
  0x30   :  { %1433 = vmatpush1.bf16.msra.mxu0 %v2213_v47  ;;  %1208 = vmatprep.subr.bf16.mxu1 %v2214_v52  ;;  %v2268_v47 = vld [vmem:[%s3016_s1 + $0x340] ss:$8 sps:$4 sm:$0xff]   ;;  %v1813_v50 = vcombine.high %v41_v45, %v45_v46  ;;  %v2265_v52 = vld [vmem:[%s3016_s1 + $0x150] ss:$8 sps:$4 sm:$0xff]  }
  0x31   :  { %1434 = vmatprep.subr.bf16.mxu0 %v2216_v54  ;;  %v2274_v54 = vld [vmem:[%s3016_s1 + $0x350] ss:$8 sps:$4 sm:$0xff]  }
  0x33   :  { %1209 = vmatpush1.bf16.msra.mxu1 %v2218_v56  ;;  %v47_v56 = vld [vmem:[%s3017_s0 + $0x100] sm:$0xff] }
  0x34   :  { %1435 = vmatpush1.bf16.msra.mxu0 %v2219_v57  ;;  %1210 = vmatprep.subr.bf16.mxu1 %v2220_v58  ;;  %v51_v57 = vld [vmem:[%s3017_s0 + $0x120] sm:$0xff]  ;;  %v1808_v58 = vcombine.low %v39_v41, %v43_v42 }
  0x35   :  { %1436 = vmatprep.subr.bf16.mxu0 %v2222_v59  ;;  %v1812_v59 = vcombine.low %v41_v45, %v45_v46  ;;  %v1816_v10 = vcombine.low %v47_v56, %v51_v57  ;;  %v75_v41 = vld [vmem:[%s3017_s0 + $0x1e0] sm:$0xff]  ;;  %v77_v45 = vld [vmem:[%s3017_s0 + $0x1f0] sm:$0xff] }
  0x36   :  { %v2307_v46 = vld [vmem:[%s3016_s1 + $0x1c0] ss:$8 sps:$4 sm:$0xff]  }
  0x37   :  { %1211 = vmatpush1.bf16.msra.mxu1 %v2224_v60  ;;  %v49_v60 = vld [vmem:[%s3017_s0 + $0x110] sm:$0xff] }
  0x38   :  { %1437 = vmatpush1.bf16.msra.mxu0 %v2225_v61  ;;  %1212 = vmatprep.subr.bf16.mxu1 %v2226_v62  ;;  %v53_v61 = vld [vmem:[%s3017_s0 + $0x130] sm:$0xff]  ;;  %v2271_v62 = vld [vmem:[%s3016_s1 + $0x160] ss:$8 sps:$4 sm:$0xff]  }
  0x39   :  { %1438 = vmatprep.subr.bf16.mxu0 %v2228_v63  ;;  %v2280_v63 = vld [vmem:[%s3016_s1 + $0x360] ss:$8 sps:$4 sm:$0xff]  }
  0x3b   :  { %1213 = vmatpush1.bf16.msra.mxu1 %v2230_v0  ;;  %v2279_v0 = vld [vmem:[%s3016_s1 + $0x174] ss:$8 sps:$4 sm:$0xff]  }
  0x3c   :  { %1439 = vmatpush1.bf16.msra.mxu0 %v2231_v1  ;;  %1214 = vmatprep.subr.bf16.mxu1 %v2232_v2  ;;  %v1817_v1 = vcombine.high %v47_v56, %v51_v57  ;;  %v1821_v2 = vcombine.high %v49_v60, %v53_v61  ;;  %v16_v56 = vld [vmem:[%s3017_s0 + $0x8] sm:$0xff] }
  0x3d   :  { %1440 = vmatprep.subr.bf16.mxu0 %v2234_v3  ;;  %v2288_v3 = vld [vmem:[%s3016_s1 + $0x374] ss:$8 sps:$4 sm:$0xff]   ;;  %v20_v57 = vld [vmem:[%s3017_s0 + $0x28] sm:$0xff] }
  0x3f   :  { %1215 = vmatpush1.bf16.msra.mxu1 %v2236_v4  ;;  %v2277_v4 = vld [vmem:[%s3016_s1 + $0x170] ss:$8 sps:$4 sm:$0xff]  }
  0x40   :  { %1441 = vmatpush1.bf16.msra.mxu0 %v2237_v5  ;;  %1297 = vmatprep.subr.bf16.mxu1 %v2240_v6  ;;  %v2285_v5 = vld [vmem:[%s3016_s1 + $0x184] ss:$8 sps:$4 sm:$0xff]   ;;  %v2286_v6 = vld [vmem:[%s3016_s1 + $0x370] ss:$8 sps:$4 sm:$0xff]  }
  0x41   :  { %1523 = vmatprep.subr.bf16.mxu0 %v2243_v7  ;;  %v2294_v7 = vld [vmem:[%s3016_s1 + $0x384] ss:$8 sps:$4 sm:$0xff]  }
  0x42   :  { %1217 = vmatmul.mubr.bf16.vlgmr.msra.gmra.mrb[0].mxu1 %v1784_v11  ;;  %v1820_v11 = vcombine.low %v49_v60, %v53_v61  ;;  %v18_v60 = vld [vmem:[%s3017_s0 + $0x18] sm:$0xff] }
  0x43   :  { %1443 = vmatmul.mubr.bf16.vlgmr.msra.gmra.mrb[0].mxu0 %v1788_v12  ;;  %1298 = vmatpush1.bf16.msra.mxu1 %v2238_v8  ;;  %v55_v8 = vld [vmem:[%s3017_s0 + $0x140] sm:$0xff]  ;;  %v57_v12 = vld [vmem:[%s3017_s0 + $0x150] sm:$0xff]  ;;  %v22_v61 = vld [vmem:[%s3017_s0 + $0x38] sm:$0xff] }
  0x44   :  { %1524 = vmatpush1.bf16.msra.mxu0 %v2241_v15  ;;  %1299 = vmatprep.subr.bf16.mxu1 %v2246_v16  ;;  %v2292_v15 = vld [vmem:[%s3016_s1 + $0x380] ss:$8 sps:$4 sm:$0xff]   ;;  %v2291_v16 = vld [vmem:[%s3016_s1 + $0x194] ss:$8 sps:$4 sm:$0xff]   ;;  %v1824_v26 = vcombine.low %v55_v8, %v59_v9 }
  0x45   :  { %1226 = vmatprep.mubr.bf16.mxu1 %v1793_v17  ;;  %1452 = vmatprep.mubr.bf16.mxu0 %v1797_v18  ;;  %v1825_v17 = vcombine.high %v55_v8, %v59_v9  ;;  %v1829_v18 = vcombine.high %v57_v12, %v61_v13  ;;  %v1786_v8 = vcombine.low %v16_v56, %v20_v57 }
  0x46   :  { %1525 = vmatprep.subr.bf16.mxu0 %v2249_v19  ;;  %v2300_v19 = vld [vmem:[%s3016_s1 + $0x394] ss:$8 sps:$4 sm:$0xff]   ;;  %v1790_v9 = vcombine.low %v18_v60, %v22_v61 }
  0x47   :  { %1300 = vmatpush1.bf16.msra.mxu1 %v2244_v20  ;;  %v2289_v20 = vld [vmem:[%s3016_s1 + $0x190] ss:$8 sps:$4 sm:$0xff]  }
  0x48   :  { %1526 = vmatpush1.bf16.msra.mxu0 %v2247_v21  ;;  %1301 = vmatprep.subr.bf16.mxu1 %v2252_v22  ;;  %v2298_v21 = vld [vmem:[%s3016_s1 + $0x390] ss:$8 sps:$4 sm:$0xff]   ;;  %v2297_v22 = vld [vmem:[%s3016_s1 + $0x1a4] ss:$8 sps:$4 sm:$0xff]  }
  0x49   :  { %1527 = vmatprep.subr.bf16.mxu0 %v2255_v23  ;;  %v2306_v23 = vld [vmem:[%s3016_s1 + $0x3a4] ss:$8 sps:$4 sm:$0xff]  }
  0x4a   :  { %1227 = vmatmul.mubr.bf16.gmra.mrb[4].mxu1 %v1792_v27  ;;  %v1828_v27 = vcombine.low %v57_v12, %v61_v13  ;;  %v32_v12 = vld [vmem:[%s3017_s0 + $0x88] sm:$0xff] }
  0x4b   :  { %1453 = vmatmul.mubr.bf16.gmra.mrb[4].mxu0 %v1796_v28  ;;  %1302 = vmatpush1.bf16.msra.mxu1 %v2250_v24  ;;  %v63_v24 = vld [vmem:[%s3017_s0 + $0x180] sm:$0xff]  ;;  %v65_v28 = vld [vmem:[%s3017_s0 + $0x190] sm:$0xff]  ;;  %v36_v13 = vld [vmem:[%s3017_s0 + $0xa8] sm:$0xff] }
  0x4c   :  { %1528 = vmatpush1.bf16.msra.mxu0 %v2253_v31  ;;  %1303 = vmatprep.subr.bf16.mxu1 %v2258_v32  ;;  %v2304_v31 = vld [vmem:[%s3016_s1 + $0x3a0] ss:$8 sps:$4 sm:$0xff]   ;;  %v2303_v32 = vld [vmem:[%s3016_s1 + $0x1b4] ss:$8 sps:$4 sm:$0xff]   ;;  %v1832_v42 = vcombine.low %v63_v24, %v67_v25 }
  0x4d   :  { %1236 = vmatprep.mubr.bf16.mxu1 %v1801_v33  ;;  %1462 = vmatprep.mubr.bf16.mxu0 %v1805_v34  ;;  %v1833_v33 = vcombine.high %v63_v24, %v67_v25  ;;  %v1837_v34 = vcombine.high %v65_v28, %v69_v29  ;;  %v1802_v24 = vcombine.low %v32_v12, %v36_v13 }
  0x4e   :  { %1529 = vmatprep.subr.bf16.mxu0 %v2261_v35  ;;  %v2312_v35 = vld [vmem:[%s3016_s1 + $0x3b4] ss:$8 sps:$4 sm:$0xff]  }
  0x4f   :  { %1304 = vmatpush1.bf16.msra.mxu1 %v2256_v36  ;;  %v2301_v36 = vld [vmem:[%s3016_s1 + $0x1b0] ss:$8 sps:$4 sm:$0xff]  }
  0x50   :  { %1530 = vmatpush1.bf16.msra.mxu0 %v2259_v37  ;;  %1305 = vmatprep.subr.bf16.mxu1 %v2264_v38  ;;  %v2310_v37 = vld [vmem:[%s3016_s1 + $0x3b0] ss:$8 sps:$4 sm:$0xff]   ;;  %v2309_v38 = vld [vmem:[%s3016_s1 + $0x1c4] ss:$8 sps:$4 sm:$0xff]  }
  0x51   :  { %1531 = vmatprep.subr.bf16.mxu0 %v2270_v39  ;;  %v2318_v39 = vld [vmem:[%s3016_s1 + $0x3c4] ss:$8 sps:$4 sm:$0xff]  }
  0x52   :  { %1237 = vmatmul.mubr.bf16.gmra.mrb[8].mxu1 %v1800_v43  ;;  %v1836_v43 = vcombine.low %v65_v28, %v69_v29  ;;  %v48_v28 = vld [vmem:[%s3017_s0 + $0x108] sm:$0xff] }
  0x53   :  { %1463 = vmatmul.mubr.bf16.gmra.mrb[8].mxu0 %v1804_v44  ;;  %1306 = vmatpush1.bf16.msra.mxu1 %v2262_v40  ;;  %v71_v40 = vld [vmem:[%s3017_s0 + $0x1c0] sm:$0xff]  ;;  %v73_v44 = vld [vmem:[%s3017_s0 + $0x1d0] sm:$0xff]  ;;  %v52_v29 = vld [vmem:[%s3017_s0 + $0x128] sm:$0xff] }
  0x54   :  { %1532 = vmatpush1.bf16.msra.mxu0 %v2268_v47  ;;  %1307 = vmatprep.subr.bf16.mxu1 %v2267_v48  ;;  %v2316_v47 = vld [vmem:[%s3016_s1 + $0x3c0] ss:$8 sps:$4 sm:$0xff]   ;;  %v2315_v48 = vld [vmem:[%s3016_s1 + $0x1d4] ss:$8 sps:$4 sm:$0xff]  }
  0x55   :  { %1246 = vmatprep.mubr.bf16.mxu1 %v1809_v49  ;;  %1472 = vmatprep.mubr.bf16.mxu0 %v1813_v50  ;;  %v1841_v49 = vcombine.high %v71_v40, %v75_v41  ;;  %v1845_v50 = vcombine.high %v73_v44, %v77_v45 }
  0x56   :  { %1533 = vmatprep.subr.bf16.mxu0 %v2276_v51  ;;  %v2324_v51 = vld [vmem:[%s3016_s1 + $0x3d4] ss:$8 sps:$4 sm:$0xff]  }
  0x57   :  { %1308 = vmatpush1.bf16.msra.mxu1 %v2265_v52  ;;  %v2313_v52 = vld [vmem:[%s3016_s1 + $0x1d0] ss:$8 sps:$4 sm:$0xff]  }
  0x58   :  { %1534 = vmatpush1.bf16.msra.mxu0 %v2274_v54  ;;  %1309 = vmatprep.subr.bf16.mxu1 %v2273_v53  ;;  %v2322_v53 = vld [vmem:[%s3016_s1 + $0x3d0] ss:$8 sps:$4 sm:$0xff]   ;;  %v2321_v54 = vld [vmem:[%s3016_s1 + $0x1e4] ss:$8 sps:$4 sm:$0xff]  }
  0x59   :  { %1535 = vmatprep.subr.bf16.mxu0 %v2282_v55  ;;  %v2330_v55 = vld [vmem:[%s3016_s1 + $0x3e4] ss:$8 sps:$4 sm:$0xff]  }
  0x5a   :  { %1247 = vmatmul.mubr.bf16.gmra.mrb[12].mxu1 %v1808_v58  ;;  %v1840_v58 = vcombine.low %v71_v40, %v75_v41  ;;  %v1818_v40 = vcombine.low %v48_v28, %v52_v29 }
  0x5b   :  { %1473 = vmatmul.mubr.bf16.gmra.mrb[12].mxu0 %v1812_v59  ;;  %1310 = vmatpush1.bf16.msra.mxu1 %v2271_v62  ;;  %v1844_v59 = vcombine.low %v73_v44, %v77_v45  ;;  %v2319_v62 = vld [vmem:[%s3016_s1 + $0x1e0] ss:$8 sps:$4 sm:$0xff]  }
  0x5c   :  { %1536 = vmatpush1.bf16.msra.mxu0 %v2280_v63  ;;  %1311 = vmatprep.subr.bf16.mxu1 %v2279_v0  ;;  %v2328_v63 = vld [vmem:[%s3016_s1 + $0x3e0] ss:$8 sps:$4 sm:$0xff]   ;;  %v2327_v0 = vld [vmem:[%s3016_s1 + $0x1f4] ss:$8 sps:$4 sm:$0xff]  }
  0x5d   :  { %1256 = vmatprep.mubr.bf16.mxu1 %v1817_v1  ;;  %1482 = vmatprep.mubr.bf16.mxu0 %v1821_v2  ;;  %v1787_v1 = vcombine.high %v16_v56, %v20_v57  ;;  %v1791_v2 = vcombine.high %v18_v60, %v22_v61  ;;  %v64_v44 = vld [vmem:[%s3017_s0 + $0x188] sm:$0xff] }
  0x5e   :  { %1537 = vmatprep.subr.bf16.mxu0 %v2288_v3  ;;  %v2325_v3 = vld [vmem:[%s3016_s1 + $0x1f0] ss:$8 sps:$4 sm:$0xff]   ;;  %v68_v45 = vld [vmem:[%s3017_s0 + $0x1a8] sm:$0xff] }
  0x5f   :  { %1312 = vmatpush1.bf16.msra.mxu1 %v2277_v4  ;;  %v24_v4 = vld [vmem:[%s3017_s0 + $0x48] sm:$0xff]  ;;  %v1834_v56 = vcombine.low %v64_v44, %v68_v45 }
  0x60   :  { %1538 = vmatpush1.bf16.msra.mxu0 %v2286_v6  ;;  %1313 = vmatprep.subr.bf16.mxu1 %v2285_v5  ;;  %v28_v5 = vld [vmem:[%s3017_s0 + $0x68] sm:$0xff]  ;;  %v26_v6 = vld [vmem:[%s3017_s0 + $0x58] sm:$0xff] }
  0x61   :  { %1539 = vmatprep.subr.bf16.mxu0 %v2294_v7  ;;  %v30_v7 = vld [vmem:[%s3017_s0 + $0x78] sm:$0xff] }
  0x62   :  { %1257 = vmatmul.mubr.bf16.gmra.mrb[16].mxu1 %v1816_v10  ;;  %v1795_v10 = vcombine.high %v24_v4, %v28_v5 }
  0x63   :  { %1483 = vmatmul.mubr.bf16.gmra.mrb[16].mxu0 %v1820_v11  ;;  %1314 = vmatpush1.bf16.msra.mxu1 %v2283_v14  ;;  %v1799_v11 = vcombine.high %v26_v6, %v30_v7  ;;  %v34_v14 = vld [vmem:[%s3017_s0 + $0x98] sm:$0xff] }
  0x64   :  { %1540 = vmatpush1.bf16.msra.mxu0 %v2292_v15  ;;  %1315 = vmatprep.subr.bf16.mxu1 %v2291_v16  ;;  %v38_v15 = vld [vmem:[%s3017_s0 + $0xb8] sm:$0xff]  ;;  %v1794_v16 = vcombine.low %v24_v4, %v28_v5 }
  0x65   :  { %1266 = vmatprep.mubr.bf16.mxu1 %v1825_v17  ;;  %1492 = vmatprep.mubr.bf16.mxu0 %v1829_v18  ;;  %v1798_v17 = vcombine.low %v26_v6, %v30_v7  ;;  %v1803_v18 = vcombine.high %v32_v12, %v36_v13  ;;  %v1806_v25 = vcombine.low %v34_v14, %v38_v15 }
  0x66   :  { %1541 = vmatprep.subr.bf16.mxu0 %v2300_v19  ;;  %v1807_v19 = vcombine.high %v34_v14, %v38_v15 }
  0x67   :  { %1316 = vmatpush1.bf16.msra.mxu1 %v2289_v20  ;;  %v40_v20 = vld [vmem:[%s3017_s0 + $0xc8] sm:$0xff] }
  0x68   :  { %1542 = vmatpush1.bf16.msra.mxu0 %v2298_v21  ;;  %1317 = vmatprep.subr.bf16.mxu1 %v2297_v22  ;;  %v44_v21 = vld [vmem:[%s3017_s0 + $0xe8] sm:$0xff]  ;;  %v42_v22 = vld [vmem:[%s3017_s0 + $0xd8] sm:$0xff] }
  0x69   :  { %1543 = vmatprep.subr.bf16.mxu0 %v2306_v23  ;;  %v46_v23 = vld [vmem:[%s3017_s0 + $0xf8] sm:$0xff] }
  0x6a   :  { %1267 = vmatmul.mubr.bf16.gmra.mrb[20].mxu1 %v1824_v26  ;;  %v1811_v26 = vcombine.high %v40_v20, %v44_v21 }
  0x6b   :  { %1493 = vmatmul.mubr.bf16.gmra.mrb[20].mxu0 %v1828_v27  ;;  %1318 = vmatpush1.bf16.msra.mxu1 %v2295_v30  ;;  %v1815_v27 = vcombine.high %v42_v22, %v46_v23  ;;  %v50_v30 = vld [vmem:[%s3017_s0 + $0x118] sm:$0xff] }
  0x6c   :  { %1544 = vmatpush1.bf16.msra.mxu0 %v2304_v31  ;;  %1319 = vmatprep.subr.bf16.mxu1 %v2303_v32  ;;  %v54_v31 = vld [vmem:[%s3017_s0 + $0x138] sm:$0xff]  ;;  %v1810_v32 = vcombine.low %v40_v20, %v44_v21 }
  0x6d   :  { %1276 = vmatprep.mubr.bf16.mxu1 %v1833_v33  ;;  %1502 = vmatprep.mubr.bf16.mxu0 %v1837_v34  ;;  %v1814_v33 = vcombine.low %v42_v22, %v46_v23  ;;  %v1819_v34 = vcombine.high %v48_v28, %v52_v29  ;;  %v1822_v41 = vcombine.low %v50_v30, %v54_v31 }
  0x6e   :  { %1545 = vmatprep.subr.bf16.mxu0 %v2312_v35  ;;  %v1823_v35 = vcombine.high %v50_v30, %v54_v31 }
  0x6f   :  { %1320 = vmatpush1.bf16.msra.mxu1 %v2301_v36  ;;  %v56_v36 = vld [vmem:[%s3017_s0 + $0x148] sm:$0xff] }
  0x70   :  { %1546 = vmatpush1.bf16.msra.mxu0 %v2310_v37  ;;  %1321 = vmatprep.subr.bf16.mxu1 %v2309_v38  ;;  %v60_v37 = vld [vmem:[%s3017_s0 + $0x168] sm:$0xff]  ;;  %v58_v38 = vld [vmem:[%s3017_s0 + $0x158] sm:$0xff] }
  0x71   :  { %1547 = vmatprep.subr.bf16.mxu0 %v2318_v39  ;;  %v62_v39 = vld [vmem:[%s3017_s0 + $0x178] sm:$0xff] }
  0x72   :  { %1277 = vmatmul.mubr.bf16.gmra.mrb[24].mxu1 %v1832_v42  ;;  %v1827_v42 = vcombine.high %v56_v36, %v60_v37 }
  0x73   :  { %1503 = vmatmul.mubr.bf16.gmra.mrb[24].mxu0 %v1836_v43  ;;  %1322 = vmatpush1.bf16.msra.mxu1 %v2307_v46  ;;  %v1831_v43 = vcombine.high %v58_v38, %v62_v39  ;;  %v66_v46 = vld [vmem:[%s3017_s0 + $0x198] sm:$0xff] }
  0x74   :  { %1548 = vmatpush1.bf16.msra.mxu0 %v2316_v47  ;;  %1323 = vmatprep.subr.bf16.mxu1 %v2315_v48  ;;  %v70_v47 = vld [vmem:[%s3017_s0 + $0x1b8] sm:$0xff]  ;;  %v1826_v48 = vcombine.low %v56_v36, %v60_v37 }
  0x75   :  { %1286 = vmatprep.mubr.bf16.mxu1 %v1841_v49  ;;  %1512 = vmatprep.mubr.bf16.mxu0 %v1845_v50  ;;  %v1830_v49 = vcombine.low %v58_v38, %v62_v39  ;;  %v1835_v50 = vcombine.high %v64_v44, %v68_v45  ;;  %v1838_v57 = vcombine.low %v66_v46, %v70_v47 }
  0x76   :  { %1549 = vmatprep.subr.bf16.mxu0 %v2324_v51  ;;  %v1839_v51 = vcombine.high %v66_v46, %v70_v47 }
  0x77   :  { %1324 = vmatpush1.bf16.msra.mxu1 %v2313_v52  ;;  %v72_v52 = vld [vmem:[%s3017_s0 + $0x1c8] sm:$0xff] }
  0x78   :  { %1550 = vmatpush1.bf16.msra.mxu0 %v2322_v53  ;;  %1325 = vmatprep.subr.bf16.mxu1 %v2321_v54  ;;  %v76_v53 = vld [vmem:[%s3017_s0 + $0x1e8] sm:$0xff]  ;;  %v74_v54 = vld [vmem:[%s3017_s0 + $0x1d8] sm:$0xff] }
  0x79   :  { %1551 = vmatprep.subr.bf16.mxu0 %v2330_v55  ;;  %v78_v55 = vld [vmem:[%s3017_s0 + $0x1f8] sm:$0xff]  ;;  %v1842_v60 = vcombine.low %v72_v52, %v76_v53 }
  0x7a   :  { %1287 = vmatmul.mubr.bf16.gmra.mrb[28].mxu1 %v1840_v58  ;;  %v1843_v58 = vcombine.high %v72_v52, %v76_v53  ;;  %v1846_v61 = vcombine.low %v74_v54, %v78_v55 }
  0x7b   :  { %1513 = vmatmul.mubr.bf16.gmra.mrb[28].mxu0 %v1844_v59  ;;  %1326 = vmatpush1.bf16.msra.mxu1 %v2319_v62  ;;  %v1847_v59 = vcombine.high %v74_v54, %v78_v55  ;;  %v207_v62 = vlaneseq }
  0x7c   :  { %1552 = vmatpush1.bf16.msra.mxu0 %v2328_v63  ;;  %1327 = vmatprep.subr.bf16.mxu1 %v2327_v0 }
  0x7d   :  { %1329 = vmatprep.mubr.bf16.mxu1 %v1787_v1  ;;  %1974 = vmatprep.mubr.msk.bf16.mxu0 %vm1159_vm0, %v1791_v2  ;;  %v208_v63 = vshrl.u32 %v207_v62, 7  ;;  %v205_v1 = vld [vmem:[%s3018_s2] sm:$0x3] }
  0x7f   :  { %1328 = vmatpush1.bf16.msra.mxu1 %v2325_v3  ;;  %v209_v0 = vsub.s32 0, %v208_v63  ;;  %v213_v2 = vsub.s32 1, %v208_v63 }
  0x81   :  { %v2932_v3 = vrot.slane %v205_v1, %v209_v0  ;;  %v2934_v4 = vrot.slane %v205_v1, %v213_v2 }
  0x82   :  { %1330 = vmatmul.mubr.bf16.vlgmr.msra.gmra.mrb[0].mxu1 %v1786_v8 }
  0x83   :  { %1556 = vmatmul.mubr.bf16.vlgmr.msra.gmra.mrb[0].mxu0 %v1790_v9  ;;  %1339 = vmatprep.mubr.bf16.mxu1 %v1795_v10 }
  0x84   :  { %1975 = vmatprep.mubr.msk.bf16.mxu0 %vm1159_vm0, %v1799_v11 }
  0x8a   :  { %1340 = vmatmul.mubr.bf16.gmra.mrb[4].mxu1 %v1794_v16 }
  0x8b   :  { %1566 = vmatmul.mubr.bf16.gmra.mrb[4].mxu0 %v1798_v17  ;;  %1349 = vmatprep.mubr.bf16.mxu1 %v1803_v18 }
  0x8c   :  { %1976 = vmatprep.mubr.msk.bf16.mxu0 %vm1159_vm0, %v1807_v19 }
  0x92   :  { %1350 = vmatmul.mubr.bf16.gmra.mrb[8].mxu1 %v1802_v24 }
  0x93   :  { %1576 = vmatmul.mubr.bf16.gmra.mrb[8].mxu0 %v1806_v25  ;;  %1359 = vmatprep.mubr.bf16.mxu1 %v1811_v26 }
  0x94   :  { %1977 = vmatprep.mubr.msk.bf16.mxu0 %vm1159_vm0, %v1815_v27 }
  0x9a   :  { %1360 = vmatmul.mubr.bf16.gmra.mrb[12].mxu1 %v1810_v32 }
  0x9b   :  { %1586 = vmatmul.mubr.bf16.gmra.mrb[12].mxu0 %v1814_v33  ;;  %1369 = vmatprep.mubr.bf16.mxu1 %v1819_v34 }
  0x9c   :  { %1978 = vmatprep.mubr.msk.bf16.mxu0 %vm1159_vm0, %v1823_v35 }
  0xa2   :  { %1370 = vmatmul.mubr.bf16.gmra.mrb[16].mxu1 %v1818_v40 }
  0xa3   :  { %1596 = vmatmul.mubr.bf16.gmra.mrb[16].mxu0 %v1822_v41  ;;  %1379 = vmatprep.mubr.bf16.mxu1 %v1827_v42 }
  0xa4   :  { %1979 = vmatprep.mubr.msk.bf16.mxu0 %vm1159_vm0, %v1831_v43 }
  0xaa   :  { %1380 = vmatmul.mubr.bf16.gmra.mrb[20].mxu1 %v1826_v48 }
  0xab   :  { %1606 = vmatmul.mubr.bf16.gmra.mrb[20].mxu0 %v1830_v49  ;;  %1389 = vmatprep.mubr.bf16.mxu1 %v1835_v50 }
  0xac   :  { %1980 = vmatprep.mubr.msk.bf16.mxu0 %vm1159_vm0, %v1839_v51 }
  0xb2   :  { %1390 = vmatmul.mubr.bf16.gmra.mrb[24].mxu1 %v1834_v56 }
  0xb3   :  { %1616 = vmatmul.mubr.bf16.gmra.mrb[24].mxu0 %v1838_v57  ;;  %1399 = vmatprep.mubr.bf16.mxu1 %v1843_v58 }
  0xb4   :  { %1981 = vmatprep.mubr.msk.bf16.mxu0 %vm1159_vm0, %v1847_v59 }
  0xba   :  { %1400 = vmatmul.mubr.bf16.gmra.mrb[28].mxu1 %v1842_v60 }
  0xbb   :  { %1626 = vmatmul.mubr.bf16.gmra.mrb[28].mxu0 %v1846_v61 }
 0x155   :  { %v1331_v5 = vpop.f32.mrb[0].mxu1 }
 0x156   :  { %v1557_v6 = vpop.f32.mrb[0].mxu0  ;;  %v2014_v7 = vadd.f32 %v1331_v5, %v2932_v3  ;;  %v1333_v8 = vpop.f32.mrb[1].mxu1 }
 0x157   :  { %v1559_v9 = vpop.f32.mrb[1].mxu0  ;;  %v2016_v10 = vadd.f32 %v1333_v8, %v2934_v4  ;;  %v1335_v11 = vpop.f32.mrb[2].mxu1 }
 0x158   :  { %v1561_v12 = vpop.f32.mrb[2].mxu0  ;;  %v2015_v13 = vadd.f32 %v2014_v7, %v1557_v6  ;;  %v2018_v14 = vadd.f32 %v1335_v11, %v2932_v3  ;;  %v1337_v15 = vpop.f32.mrb[3].mxu1 }
 0x159   :  { %v1563_v16 = vpop.f32.mrb[3].mxu0  ;;  %v2017_v17 = vadd.f32 %v2016_v10, %v1559_v9  ;;  %v2020_v18 = vadd.f32 %v1337_v15, %v2934_v4 }
 0x15a   :  { %v1636_v19 = vmax.f32 %v2015_v13, 0.0  ;;  %v2019_v20 = vadd.f32 %v2018_v14, %v1561_v12 }
 0x15b   :  { %v1637_v21 = vmax.f32 %v2017_v17, 0.0  ;;  %v2021_v22 = vadd.f32 %v2020_v18, %v1563_v16 }
 0x15c   :  { %v1638_v23 = vmax.f32 %v2019_v20, 0.0 }
 0x15d   :  { %v1998_v24 = vpack.c.bf16 %v1637_v21, %v1636_v19  ;;  %v1639_v25 = vmax.f32 %v2021_v22, 0.0  ;;  %v1341_v26 = vpop.f32.mrb[4].mxu1 }
 0x15e   :  { %v1567_v27 = vpop.f32.mrb[4].mxu0  ;;  %v2022_v28 = vadd.f32 %v1341_v26, %v2932_v3  ;;  %v1343_v29 = vpop.f32.mrb[5].mxu1 }
 0x15f   :  { %v1569_v30 = vpop.f32.mrb[5].mxu0  ;;  %1764 = vst [vmem:[%s3019_s3] sm:$0xff] %v1998_v24  ;;  %v1999_v31 = vpack.c.bf16 %v1639_v25, %v1638_v23  ;;  %v2024_v32 = vadd.f32 %v1343_v29, %v2934_v4  ;;  %v1345_v33 = vpop.f32.mrb[6].mxu1 }
 0x160   :  { %v1571_v34 = vpop.f32.mrb[6].mxu0  ;;  %v2023_v35 = vadd.f32 %v2022_v28, %v1567_v27  ;;  %v2026_v36 = vadd.f32 %v1345_v33, %v2932_v3  ;;  %v1347_v37 = vpop.f32.mrb[7].mxu1 }
 0x161   :  { %v1573_v38 = vpop.f32.mrb[7].mxu0  ;;  %1765 = vst [vmem:[%s3019_s3 + $0x8] sm:$0xff] %v1999_v31  ;;  %v2025_v39 = vadd.f32 %v2024_v32, %v1569_v30  ;;  %v2028_v40 = vadd.f32 %v1347_v37, %v2934_v4 }
 0x162   :  { %v1640_v41 = vmax.f32 %v2023_v35, 0.0  ;;  %v2027_v42 = vadd.f32 %v2026_v36, %v1571_v34 }
 0x163   :  { %v1641_v43 = vmax.f32 %v2025_v39, 0.0  ;;  %v2029_v44 = vadd.f32 %v2028_v40, %v1573_v38 }
 0x164   :  { %v1642_v45 = vmax.f32 %v2027_v42, 0.0 }
 0x165   :  { %v2000_v46 = vpack.c.bf16 %v1641_v43, %v1640_v41  ;;  %v1643_v47 = vmax.f32 %v2029_v44, 0.0  ;;  %v1351_v48 = vpop.f32.mrb[8].mxu1 }
 0x166   :  { %v1577_v49 = vpop.f32.mrb[8].mxu0  ;;  %v2030_v50 = vadd.f32 %v1351_v48, %v2932_v3  ;;  %v1353_v51 = vpop.f32.mrb[9].mxu1 }
 0x167   :  { %v1579_v52 = vpop.f32.mrb[9].mxu0  ;;  %1766 = vst [vmem:[%s3019_s3 + $0x10] sm:$0xff] %v2000_v46  ;;  %v2001_v53 = vpack.c.bf16 %v1643_v47, %v1642_v45  ;;  %v2032_v54 = vadd.f32 %v1353_v51, %v2934_v4  ;;  %v1355_v55 = vpop.f32.mrb[10].mxu1 }
 0x168   :  { %v1581_v56 = vpop.f32.mrb[10].mxu0  ;;  %v2031_v57 = vadd.f32 %v2030_v50, %v1577_v49  ;;  %v2034_v58 = vadd.f32 %v1355_v55, %v2932_v3  ;;  %v1357_v59 = vpop.f32.mrb[11].mxu1 }
 0x169   :  { %v1583_v60 = vpop.f32.mrb[11].mxu0  ;;  %1767 = vst [vmem:[%s3019_s3 + $0x18] sm:$0xff] %v2001_v53  ;;  %v2033_v61 = vadd.f32 %v2032_v54, %v1579_v52  ;;  %v2036_v62 = vadd.f32 %v1357_v59, %v2934_v4 }
 0x16a   :  { %v1644_v63 = vmax.f32 %v2031_v57, 0.0  ;;  %v2035_v0 = vadd.f32 %v2034_v58, %v1581_v56 }
 0x16b   :  { %v1645_v1 = vmax.f32 %v2033_v61, 0.0  ;;  %v2037_v2 = vadd.f32 %v2036_v62, %v1583_v60 }
 0x16c   :  { %v1646_v5 = vmax.f32 %v2035_v0, 0.0 }
 0x16d   :  { %v2002_v6 = vpack.c.bf16 %v1645_v1, %v1644_v63  ;;  %v1647_v7 = vmax.f32 %v2037_v2, 0.0  ;;  %v1361_v8 = vpop.f32.mrb[12].mxu1 }
 0x16e   :  { %v1587_v9 = vpop.f32.mrb[12].mxu0  ;;  %v2038_v10 = vadd.f32 %v1361_v8, %v2932_v3  ;;  %v1363_v11 = vpop.f32.mrb[13].mxu1 }
 0x16f   :  { %v1589_v12 = vpop.f32.mrb[13].mxu0  ;;  %1768 = vst [vmem:[%s3019_s3 + $0x20] sm:$0xff] %v2002_v6  ;;  %v2003_v13 = vpack.c.bf16 %v1647_v7, %v1646_v5  ;;  %v2040_v14 = vadd.f32 %v1363_v11, %v2934_v4  ;;  %v1365_v15 = vpop.f32.mrb[14].mxu1 }
 0x170   :  { %v1591_v16 = vpop.f32.mrb[14].mxu0  ;;  %v2039_v17 = vadd.f32 %v2038_v10, %v1587_v9  ;;  %v2042_v18 = vadd.f32 %v1365_v15, %v2932_v3  ;;  %v1367_v19 = vpop.f32.mrb[15].mxu1 }
 0x171   :  { %v1593_v20 = vpop.f32.mrb[15].mxu0  ;;  %1769 = vst [vmem:[%s3019_s3 + $0x28] sm:$0xff] %v2003_v13  ;;  %v2041_v21 = vadd.f32 %v2040_v14, %v1589_v12  ;;  %v2044_v22 = vadd.f32 %v1367_v19, %v2934_v4 }
 0x172   :  { %v1648_v23 = vmax.f32 %v2039_v17, 0.0  ;;  %v2043_v24 = vadd.f32 %v2042_v18, %v1591_v16 }
 0x173   :  { %v1649_v25 = vmax.f32 %v2041_v21, 0.0  ;;  %v2045_v26 = vadd.f32 %v2044_v22, %v1593_v20 }
 0x174   :  { %v1650_v27 = vmax.f32 %v2043_v24, 0.0 }
 0x175   :  { %v2004_v28 = vpack.c.bf16 %v1649_v25, %v1648_v23  ;;  %v1651_v29 = vmax.f32 %v2045_v26, 0.0  ;;  %v1371_v30 = vpop.f32.mrb[16].mxu1 }
 0x176   :  { %v1597_v31 = vpop.f32.mrb[16].mxu0  ;;  %v2046_v32 = vadd.f32 %v1371_v30, %v2932_v3  ;;  %v1373_v33 = vpop.f32.mrb[17].mxu1 }
 0x177   :  { %v1599_v34 = vpop.f32.mrb[17].mxu0  ;;  %1770 = vst [vmem:[%s3019_s3 + $0x30] sm:$0xff] %v2004_v28  ;;  %v2005_v35 = vpack.c.bf16 %v1651_v29, %v1650_v27  ;;  %v2048_v36 = vadd.f32 %v1373_v33, %v2934_v4  ;;  %v1375_v37 = vpop.f32.mrb[18].mxu1 }
 0x178   :  { %v1601_v38 = vpop.f32.mrb[18].mxu0  ;;  %v2047_v39 = vadd.f32 %v2046_v32, %v1597_v31  ;;  %v2050_v40 = vadd.f32 %v1375_v37, %v2932_v3  ;;  %v1377_v41 = vpop.f32.mrb[19].mxu1 }
 0x179   :  { %v1603_v42 = vpop.f32.mrb[19].mxu0  ;;  %1771 = vst [vmem:[%s3019_s3 + $0x38] sm:$0xff] %v2005_v35  ;;  %v2049_v43 = vadd.f32 %v2048_v36, %v1599_v34  ;;  %v2052_v44 = vadd.f32 %v1377_v41, %v2934_v4 }
 0x17a   :  { %v1652_v45 = vmax.f32 %v2047_v39, 0.0  ;;  %v2051_v46 = vadd.f32 %v2050_v40, %v1601_v38 }
 0x17b   :  { %v1653_v47 = vmax.f32 %v2049_v43, 0.0  ;;  %v2053_v48 = vadd.f32 %v2052_v44, %v1603_v42 }
 0x17c   :  { %v1654_v49 = vmax.f32 %v2051_v46, 0.0 }
 0x17d   :  { %v2006_v50 = vpack.c.bf16 %v1653_v47, %v1652_v45  ;;  %v1655_v51 = vmax.f32 %v2053_v48, 0.0  ;;  %v1381_v52 = vpop.f32.mrb[20].mxu1 }
 0x17e   :  { %v1607_v53 = vpop.f32.mrb[20].mxu0  ;;  %v2054_v54 = vadd.f32 %v1381_v52, %v2932_v3  ;;  %v1383_v55 = vpop.f32.mrb[21].mxu1 }
 0x17f   :  { %v1609_v56 = vpop.f32.mrb[21].mxu0  ;;  %1772 = vst [vmem:[%s3019_s3 + $0x40] sm:$0xff] %v2006_v50  ;;  %v2007_v57 = vpack.c.bf16 %v1655_v51, %v1654_v49  ;;  %v2056_v58 = vadd.f32 %v1383_v55, %v2934_v4  ;;  %v1385_v59 = vpop.f32.mrb[22].mxu1 }
 0x180   :  { %v1611_v60 = vpop.f32.mrb[22].mxu0  ;;  %v2055_v61 = vadd.f32 %v2054_v54, %v1607_v53  ;;  %v2058_v62 = vadd.f32 %v1385_v59, %v2932_v3  ;;  %v1387_v63 = vpop.f32.mrb[23].mxu1 }
 0x181   :  { %v1613_v0 = vpop.f32.mrb[23].mxu0  ;;  %1773 = vst [vmem:[%s3019_s3 + $0x48] sm:$0xff] %v2007_v57  ;;  %v2057_v1 = vadd.f32 %v2056_v58, %v1609_v56  ;;  %v2060_v2 = vadd.f32 %v1387_v63, %v2934_v4 }
 0x182   :  { %v1656_v5 = vmax.f32 %v2055_v61, 0.0  ;;  %v2059_v6 = vadd.f32 %v2058_v62, %v1611_v60 }
 0x183   :  { %v1657_v7 = vmax.f32 %v2057_v1, 0.0  ;;  %v2061_v8 = vadd.f32 %v2060_v2, %v1613_v0 }
 0x184   :  { %v1658_v9 = vmax.f32 %v2059_v6, 0.0 }
 0x185   :  { %v2008_v10 = vpack.c.bf16 %v1657_v7, %v1656_v5  ;;  %v1659_v11 = vmax.f32 %v2061_v8, 0.0  ;;  %v1391_v12 = vpop.f32.mrb[24].mxu1 }
 0x186   :  { %v1617_v13 = vpop.f32.mrb[24].mxu0  ;;  %v2062_v14 = vadd.f32 %v1391_v12, %v2932_v3  ;;  %v1393_v15 = vpop.f32.mrb[25].mxu1 }
 0x187   :  { %v1619_v16 = vpop.f32.mrb[25].mxu0  ;;  %1774 = vst [vmem:[%s3019_s3 + $0x50] sm:$0xff] %v2008_v10  ;;  %v2009_v17 = vpack.c.bf16 %v1659_v11, %v1658_v9  ;;  %v2064_v18 = vadd.f32 %v1393_v15, %v2934_v4  ;;  %v1395_v19 = vpop.f32.mrb[26].mxu1 }
 0x188   :  { %v1621_v20 = vpop.f32.mrb[26].mxu0  ;;  %v2063_v21 = vadd.f32 %v2062_v14, %v1617_v13  ;;  %v2066_v22 = vadd.f32 %v1395_v19, %v2932_v3  ;;  %v1397_v23 = vpop.f32.mrb[27].mxu1 }
 0x189   :  { %v1623_v24 = vpop.f32.mrb[27].mxu0  ;;  %1775 = vst [vmem:[%s3019_s3 + $0x58] sm:$0xff] %v2009_v17  ;;  %v2065_v25 = vadd.f32 %v2064_v18, %v1619_v16  ;;  %v2068_v26 = vadd.f32 %v1397_v23, %v2934_v4 }
 0x18a   :  { %v1660_v27 = vmax.f32 %v2063_v21, 0.0  ;;  %v2067_v28 = vadd.f32 %v2066_v22, %v1621_v20 }
 0x18b   :  { %v1661_v29 = vmax.f32 %v2065_v25, 0.0  ;;  %v2069_v30 = vadd.f32 %v2068_v26, %v1623_v24 }
 0x18c   :  { %v1662_v31 = vmax.f32 %v2067_v28, 0.0 }
 0x18d   :  { %v2010_v32 = vpack.c.bf16 %v1661_v29, %v1660_v27  ;;  %v1663_v33 = vmax.f32 %v2069_v30, 0.0  ;;  %v1401_v34 = vpop.f32.mrb[28].mxu1 }
 0x18e   :  { %v1627_v35 = vpop.f32.mrb[28].mxu0  ;;  %v2070_v36 = vadd.f32 %v1401_v34, %v2932_v3  ;;  %v1403_v37 = vpop.f32.mrb[29].mxu1 }
 0x18f   :  { %v1629_v38 = vpop.f32.mrb[29].mxu0  ;;  %1776 = vst [vmem:[%s3019_s3 + $0x60] sm:$0xff] %v2010_v32  ;;  %v2011_v39 = vpack.c.bf16 %v1663_v33, %v1662_v31  ;;  %v2072_v40 = vadd.f32 %v1403_v37, %v2934_v4  ;;  %v1405_v41 = vpop.f32.mrb[30].mxu1 }
 0x190   :  { %v1631_v42 = vpop.f32.mrb[30].mxu0  ;;  %v2071_v43 = vadd.f32 %v2070_v36, %v1627_v35  ;;  %v2074_v44 = vadd.f32 %v1405_v41, %v2932_v3  ;;  %v1407_v45 = vpop.f32.mrb[31].mxu1 }
 0x191   :  { %v1633_v46 = vpop.f32.mrb[31].mxu0  ;;  %1777 = vst [vmem:[%s3019_s3 + $0x68] sm:$0xff] %v2011_v39  ;;  %v2073_v47 = vadd.f32 %v2072_v40, %v1629_v38  ;;  %v2076_v48 = vadd.f32 %v1407_v45, %v2934_v4 }
 0x192   :  { %v1664_v49 = vmax.f32 %v2071_v43, 0.0  ;;  %v2075_v50 = vadd.f32 %v2074_v44, %v1631_v42 }
 0x193   :  { %v1665_v51 = vmax.f32 %v2073_v47, 0.0  ;;  %v2077_v52 = vadd.f32 %v2076_v48, %v1633_v46 }
 0x194   :  { %v1666_v53 = vmax.f32 %v2075_v50, 0.0 }
 0x195   :  { %v2012_v54 = vpack.c.bf16 %v1665_v51, %v1664_v49  ;;  %v1667_v55 = vmax.f32 %v2077_v52, 0.0 }
 0x197   :  { %1778 = vst [vmem:[%s3019_s3 + $0x70] sm:$0xff] %v2012_v54  ;;  %v2013_v3 = vpack.c.bf16 %v1667_v55, %v1666_v53 }
 0x199   :  { %1779 = vst [vmem:[%s3019_s3 + $0x78] sm:$0xff] %v2013_v3 }

// kernel: tsm_retinanet_forward.28
= control target key start
LH: loop header
LB: loop body
LE: loop exit
PB: predicated region body
PF: predicated region fallthrough
CT: control target
= control target key end

     0   :  { %vm134_vm0 = vcmask 916480   ;;  %s617_s1 = inlined_call_operand.vmem [shape: bf16[112,128], index: 1, kind: input, shape index: {}]   ;;  %s618_s0 = inlined_call_operand.vmem [shape: bf16[128,112], index: 0, kind: input, shape index: {}]   ;;  %s619_s2 = inlined_call_operand.vmem [shape: f32[1,128], index: 2, kind: input, shape index: {}]   ;;  %s620_s3 = inlined_call_operand.vmem [shape: bf16[128,128], index: 3, kind: output, shape index: {}]  }
   0x1   :  { %v502_v0 = vld [vmem:[%s617_s1] sm:$0xff]   ;;  %v503_v1 = vld [vmem:[%s617_s1 + $0x8] sm:$0xff]   ;;  %v504_v2 = vld [vmem:[%s617_s1 + $0x10] sm:$0xff]  }
   0x2   :  { %458 = vmatprep.subr.bf16.mxu0 %v502_v0  ;;  %488 = vmatprep.subr.bf16.mxu1 %v502_v0  ;;  %v505_v3 = vld [vmem:[%s617_s1 + $0x18] sm:$0xff]   ;;  %v509_v4 = vld [vmem:[%s618_s0] sm:$0xff]   ;;  %v507_v7 = vld [vmem:[%s617_s1 + $0x28] sm:$0xff]  }
   0x3   :  { %459 = vmatpush3.bf16.msra.mxu0 %v502_v0  ;;  %495 = vmatpush3.bf16.msra.mxu1 %v502_v0  ;;  %v510_v5 = vld [vmem:[%s618_s0 + $0x20] sm:$0xff]   ;;  %v508_v8 = vld [vmem:[%s617_s1 + $0x30] sm:$0xff]   ;;  %v511_v9 = vld [vmem:[%s618_s0 + $0x8] sm:$0xff]  }
   0x4   :  { %460 = vmatprep.subr.bf16.mxu0 %v503_v1  ;;  %489 = vmatprep.subr.bf16.mxu1 %v503_v1  ;;  %v506_v6 = vld [vmem:[%s617_s1 + $0x20] sm:$0xff]   ;;  %v512_v10 = vld [vmem:[%s618_s0 + $0x28] sm:$0xff]   ;;  %v513_v11 = vld [vmem:[%s618_s0 + $0x10] sm:$0xff]  }
   0x5   :  { %472 = vmatprep.mubr.msk.bf16.mxu0 %vm134_vm0, %v509_v4  ;;  %480 = vmatprep.mubr.msk.bf16.mxu1 %vm134_vm0, %v510_v5  ;;  %v514_v12 = vld [vmem:[%s618_s0 + $0x30] sm:$0xff]   ;;  %v515_v13 = vld [vmem:[%s618_s0 + $0x18] sm:$0xff]   ;;  %v340_v16 = vld [vmem:[%s619_s2] ss:$0 sm:$0xff] }
   0x6   :  { %v516_v14 = vld [vmem:[%s618_s0 + $0x38] sm:$0xff]  }
   0x7   :  { %461 = vmatpush3.bf16.msra.mxu0 %v503_v1  ;;  %496 = vmatpush3.bf16.msra.mxu1 %v503_v1 }
   0x8   :  { %462 = vmatprep.subr.bf16.mxu0 %v504_v2  ;;  %490 = vmatprep.subr.bf16.mxu1 %v504_v2 }
   0xb   :  { %463 = vmatpush3.bf16.msra.mxu0 %v504_v2  ;;  %497 = vmatpush3.bf16.msra.mxu1 %v504_v2 }
   0xc   :  { %464 = vmatprep.subr.bf16.mxu0 %v505_v3  ;;  %491 = vmatprep.subr.bf16.mxu1 %v505_v3 }
   0xf   :  { %465 = vmatpush3.bf16.msra.mxu0 %v505_v3  ;;  %498 = vmatpush3.bf16.msra.mxu1 %v505_v3 }
  0x10   :  { %466 = vmatprep.subr.bf16.mxu0 %v506_v6  ;;  %492 = vmatprep.subr.bf16.mxu1 %v506_v6 }
  0x13   :  { %467 = vmatpush3.bf16.msra.mxu0 %v506_v6  ;;  %499 = vmatpush3.bf16.msra.mxu1 %v506_v6 }
  0x14   :  { %468 = vmatprep.subr.bf16.mxu0 %v507_v7  ;;  %493 = vmatprep.subr.bf16.mxu1 %v507_v7 }
  0x17   :  { %469 = vmatpush3.bf16.msra.mxu0 %v507_v7  ;;  %500 = vmatpush3.bf16.msra.mxu1 %v507_v7 }
  0x18   :  { %470 = vmatprep.subr.bf16.mxu0 %v508_v8  ;;  %494 = vmatprep.subr.bf16.mxu1 %v508_v8 }
  0x1b   :  { %471 = vmatpush3.bf16.msra.mxu0 %v508_v8  ;;  %501 = vmatpush3.bf16.msra.mxu1 %v508_v8 }
  0x1e   :  { %473 = vmatmul.mubr.msk.bf16.vlgmr.msra.gmra.mrb[0].mxu0 %vm134_vm0, %v511_v9  ;;  %481 = vmatmul.mubr.msk.bf16.vlgmr.msra.gmra.mrb[0].mxu1 %vm134_vm0, %v512_v10 }
  0x1f   :  { %476 = vmatprep.mubr.msk.bf16.mxu0 %vm134_vm0, %v513_v11  ;;  %484 = vmatprep.mubr.msk.bf16.mxu1 %vm134_vm0, %v514_v12 }
  0x26   :  { %477 = vmatmul.mubr.msk.bf16.gmra.mrb[4].mxu0 %vm134_vm0, %v515_v13  ;;  %485 = vmatmul.mubr.msk.bf16.gmra.mrb[4].mxu1 %vm134_vm0, %v516_v14 }
  0xf1   :  { %v474_v15 = vpop.f32.mrb[0].mxu0  ;;  %v482_v17 = vpop.f32.mrb[0].mxu1 }
  0xf2   :  { %v193_v18 = vpop.f32.mrb[1].mxu0  ;;  %v225_v19 = vpop.f32.mrb[1].mxu1  ;;  %v202_v22 = vadd.f32 %v474_v15, %v340_v16  ;;  %v234_v23 = vadd.f32 %v482_v17, %v340_v16 }
  0xf3   :  { %v475_v20 = vpop.f32.mrb[2].mxu0  ;;  %v483_v21 = vpop.f32.mrb[2].mxu1  ;;  %v194_v28 = vadd.f32 %v340_v16, %v193_v18  ;;  %v226_v29 = vadd.f32 %v340_v16, %v225_v19 }
  0xf4   :  { %v205_v24 = vadd.f32 %v475_v20, %v340_v16  ;;  %v237_v25 = vadd.f32 %v483_v21, %v340_v16  ;;  %v196_v26 = vpop.f32.mrb[3].mxu0  ;;  %v228_v27 = vpop.f32.mrb[3].mxu1 }
  0xf5   :  { %v197_v30 = vadd.f32 %v340_v16, %v196_v26  ;;  %v229_v31 = vadd.f32 %v340_v16, %v228_v27 }
  0xf6   :  { %v404_v32 = vpack.c.bf16 %v205_v24, %v202_v22  ;;  %v424_v33 = vpack.c.bf16 %v237_v25, %v234_v23 }
  0xf7   :  { %v399_v34 = vpack.c.bf16 %v197_v30, %v194_v28  ;;  %v419_v35 = vpack.c.bf16 %v229_v31, %v226_v29 }
  0xf8   :  { %436 = vst [vmem:[%s620_s3 + $0x8] sm:$0xff] %v404_v32   ;;  %440 = vst [vmem:[%s620_s3 + $0x28] sm:$0xff] %v424_v33  }
  0xf9   :  { %400 = vst [vmem:[%s620_s3] sm:$0xff] %v399_v34   ;;  %439 = vst [vmem:[%s620_s3 + $0x20] sm:$0xff] %v419_v35   ;;  %v478_v36 = vpop.f32.mrb[4].mxu0  ;;  %v486_v37 = vpop.f32.mrb[4].mxu1 }
  0xfa   :  { %v209_v38 = vpop.f32.mrb[5].mxu0  ;;  %v241_v39 = vpop.f32.mrb[5].mxu1  ;;  %v218_v42 = vadd.f32 %v478_v36, %v340_v16  ;;  %v250_v43 = vadd.f32 %v486_v37, %v340_v16 }
  0xfb   :  { %v479_v40 = vpop.f32.mrb[6].mxu0  ;;  %v487_v41 = vpop.f32.mrb[6].mxu1  ;;  %v210_v48 = vadd.f32 %v340_v16, %v209_v38  ;;  %v242_v49 = vadd.f32 %v340_v16, %v241_v39 }
  0xfc   :  { %v221_v44 = vadd.f32 %v479_v40, %v340_v16  ;;  %v253_v45 = vadd.f32 %v487_v41, %v340_v16  ;;  %v212_v46 = vpop.f32.mrb[7].mxu0  ;;  %v244_v47 = vpop.f32.mrb[7].mxu1 }
  0xfd   :  { %v213_v50 = vadd.f32 %v340_v16, %v212_v46  ;;  %v245_v51 = vadd.f32 %v340_v16, %v244_v47 }
  0xfe   :  { %v414_v52 = vpack.c.bf16 %v221_v44, %v218_v42  ;;  %v434_v53 = vpack.c.bf16 %v253_v45, %v250_v43 }
  0xff   :  { %v409_v54 = vpack.c.bf16 %v213_v50, %v210_v48  ;;  %v429_v55 = vpack.c.bf16 %v245_v51, %v242_v49 }
 0x100   :  { %438 = vst [vmem:[%s620_s3 + $0x18] sm:$0xff] %v414_v52   ;;  %442 = vst [vmem:[%s620_s3 + $0x38] sm:$0xff] %v434_v53  }
 0x101   :  { %437 = vst [vmem:[%s620_s3 + $0x10] sm:$0xff] %v409_v54   ;;  %441 = vst [vmem:[%s620_s3 + $0x30] sm:$0xff] %v429_v55  }

// kernel: tsm_retinanet_forward.27
= control target key start
LH: loop header
LB: loop body
LE: loop exit
PB: predicated region body
PF: predicated region fallthrough
CT: control target
= control target key end

     0   :  { %s718_s12 = smov 0   ;;  %s772_s0 = inlined_call_operand.vmem [shape: bf16[256,40], index: 0, kind: input, shape index: {}]   ;;  %s773_s1 = inlined_call_operand.vmem [shape: bf16[40,128], index: 1, kind: input, shape index: {}]   ;;  %s774_s2 = inlined_call_operand.vmem [shape: f32[1,128], index: 2, kind: input, shape index: {}]   ;;  %s775_s3 = inlined_call_operand.vmem [shape: bf16[256,128], index: 3, kind: output, shape index: {}]  }
   0x1 LB: > { %s520_s13 = sadd.s32 4294967295, %s696_s12   ;;  %p524_p0 = scmp.ge.s32.totalorder %s696_s12, 1  ;;  %s696_s12 = sphi %s718_s12, %s13_s12  }
   0x2   : > { %p138_p1 = scmp.lt.s32.totalorder %s696_s12, 3 }
   0x4   : > { %p139_p2 = pnand %p524_p0, %p138_p1 }
   0x5   : > { %v679_v0 = vld [vmem:[%s773_s1] sm:$0xff] (!%p139_p2)   ;;  %v680_v1 = vld [vmem:[%s773_s1 + $0x8] sm:$0xff] (!%p139_p2)   ;;  %s525_s18 = sshll.u32 (!%p139_p2), %s520_s13, 4  ;;  %v681_v2 = vld [vmem:[%s773_s1 + $0x10] ss:$0 sps:$4 sm:$0xff] (!%p139_p2)   ;;  %vm283_vm0 = vcmask (!%p139_p2), 1043456  }
   0x6   : > { %142 = sbr.rel (%p139_p2) target bundleno = 247 (0xf7), region = 32  ;;  %641 = vmatprep.subr.bf16.mxu0 (!%p139_p2), %v679_v0  ;;  %663 = vmatprep.subr.bf16.mxu1 (!%p139_p2), %v679_v0  ;;  %p163_p3 = scmp.lt.s32.totalorder (!%p139_p2), %s525_s18, 31  ;;  %vm258_vm1 = vcmask (!%p139_p2), 326656   ;;  %v285_v3 = vsel (!%p139_p2), %vm283_vm0, %v681_v2, 0  ;;  %v529_v13 = vld [vmem:[%s774_s2] ss:$0 sm:$0xff] (!%p139_p2) }
   0x7   : > { %642 = vmatpush3.bf16.msra.mxu0 (!%p139_p2), %v679_v0  ;;  %666 = vmatpush3.bf16.msra.mxu1 (!%p139_p2), %v679_v0 }
   0x8   : > { %643 = vmatprep.subr.bf16.mxu0 (!%p139_p2), %v680_v1  ;;  %664 = vmatprep.subr.bf16.mxu1 (!%p139_p2), %v680_v1 }
   0xb   : > { %644 = vmatpush3.bf16.msra.mxu0 (!%p139_p2), %v680_v1  ;;  %667 = vmatpush3.bf16.msra.mxu1 (!%p139_p2), %v680_v1 }
   0xc   : > { %669 = vmatprep.subr.msk.bf16.mxu0 (!%p139_p2), %vm283_vm0, %v681_v2  ;;  %670 = vmatprep.subr.msk.bf16.mxu1 (!%p139_p2), %vm283_vm0, %v681_v2 }
   0xd   : > { %s777_s18 = smov (!%p163_p3, %s525_s18), 31 }
   0xe   : > { %s526_s21 = sshll.u32 %s777_s18, 2 }
   0xf   : > { %s166_s24 = scalar_lea.vmem %s772_s0, %s526_s21  ;;  %646 = vmatpush3.bf16.msra.mxu0 %v285_v3  ;;  %668 = vmatpush3.bf16.msra.mxu1 %v285_v3  ;;  %s759_s29 = scalar_lea.vmem %s775_s3, %s526_s21 }
  0x10   : > { %v682_v4 = vld [vmem:[%s166_s24] sm:$0xff]   ;;  %v684_v6 = vld [vmem:[%s166_s24 + $0x8] sm:$0xff]   ;;  %v686_v8 = vld [vmem:[%s166_s24 + $0x10] sm:$0xff]  }
  0x11   : > { %v683_v5 = vld [vmem:[%s166_s24 + $0x20] sm:$0xff]   ;;  %647 = vmatprep.mubr.msk.bf16.mxu0 %vm258_vm1, %v682_v4  ;;  %v685_v7 = vld [vmem:[%s166_s24 + $0x28] sm:$0xff]   ;;  %v687_v9 = vld [vmem:[%s166_s24 + $0x30] sm:$0xff]  }
  0x12   : > { %655 = vmatprep.mubr.msk.bf16.mxu1 %vm258_vm1, %v683_v5  ;;  %648 = vmatmul.mubr.msk.bf16.vlgmr.msra.gmra.mrb[0].mxu0 %vm258_vm1, %v684_v6  ;;  %v688_v10 = vld [vmem:[%s166_s24 + $0x18] sm:$0xff]  }
  0x13   : > { %656 = vmatmul.mubr.msk.bf16.vlgmr.msra.gmra.mrb[0].mxu1 %vm258_vm1, %v685_v7  ;;  %651 = vmatprep.mubr.msk.bf16.mxu0 %vm258_vm1, %v686_v8  ;;  %v689_v11 = vld [vmem:[%s166_s24 + $0x38] sm:$0xff]  }
  0x14   : > { %659 = vmatprep.mubr.msk.bf16.mxu1 %vm258_vm1, %v687_v9 }
  0x1a   : > { %652 = vmatmul.mubr.msk.bf16.gmra.mrb[4].mxu0 %vm258_vm1, %v688_v10 }
  0x1b   : > { %660 = vmatmul.mubr.msk.bf16.gmra.mrb[4].mxu1 %vm258_vm1, %v689_v11 }
  0xe5   : > { %v649_v12 = vpop.f32.mrb[0].mxu0 }
  0xe6   : > { %v657_v14 = vpop.f32.mrb[0].mxu1  ;;  %v321_v15 = vpop.f32.mrb[1].mxu0  ;;  %v330_v19 = vadd.f32 %v649_v12, %v529_v13 }
  0xe7   : > { %v353_v16 = vpop.f32.mrb[1].mxu1  ;;  %v650_v17 = vpop.f32.mrb[2].mxu0  ;;  %v362_v20 = vadd.f32 %v657_v14, %v529_v13  ;;  %v322_v25 = vadd.f32 %v529_v13, %v321_v15 }
  0xe8   : > { %v658_v18 = vpop.f32.mrb[2].mxu1  ;;  %v333_v21 = vadd.f32 %v650_v17, %v529_v13  ;;  %v324_v23 = vpop.f32.mrb[3].mxu0  ;;  %v354_v26 = vadd.f32 %v529_v13, %v353_v16 }
  0xe9   : > { %v365_v22 = vadd.f32 %v658_v18, %v529_v13  ;;  %v356_v24 = vpop.f32.mrb[3].mxu1  ;;  %v325_v27 = vadd.f32 %v529_v13, %v324_v23 }
  0xea   : > { %v357_v28 = vadd.f32 %v529_v13, %v356_v24  ;;  %v591_v29 = vpack.c.bf16 %v333_v21, %v330_v19 }
  0xeb   : > { %v611_v30 = vpack.c.bf16 %v365_v22, %v362_v20  ;;  %v586_v31 = vpack.c.bf16 %v325_v27, %v322_v25 }
  0xec   : > { %v606_v32 = vpack.c.bf16 %v357_v28, %v354_v26  ;;  %623 = vst [vmem:[%s759_s29 + $0x8] sm:$0xff] %v591_v29  }
  0xed   : > { %627 = vst [vmem:[%s759_s29 + $0x28] sm:$0xff] %v611_v30   ;;  %587 = vst [vmem:[%s759_s29] sm:$0xff] %v586_v31   ;;  %v653_v33 = vpop.f32.mrb[4].mxu0 }
  0xee   : > { %626 = vst [vmem:[%s759_s29 + $0x20] sm:$0xff] %v606_v32   ;;  %v661_v34 = vpop.f32.mrb[4].mxu1  ;;  %v337_v35 = vpop.f32.mrb[5].mxu0  ;;  %v346_v39 = vadd.f32 %v653_v33, %v529_v13 }
  0xef   : > { %v369_v36 = vpop.f32.mrb[5].mxu1  ;;  %v654_v37 = vpop.f32.mrb[6].mxu0  ;;  %v378_v40 = vadd.f32 %v661_v34, %v529_v13  ;;  %v338_v45 = vadd.f32 %v529_v13, %v337_v35 }
  0xf0   : > { %v662_v38 = vpop.f32.mrb[6].mxu1  ;;  %v349_v41 = vadd.f32 %v654_v37, %v529_v13  ;;  %v340_v43 = vpop.f32.mrb[7].mxu0  ;;  %v370_v46 = vadd.f32 %v529_v13, %v369_v36 }
  0xf1   : > { %v381_v42 = vadd.f32 %v662_v38, %v529_v13  ;;  %v372_v44 = vpop.f32.mrb[7].mxu1  ;;  %v341_v47 = vadd.f32 %v529_v13, %v340_v43 }
  0xf2   : > { %v373_v48 = vadd.f32 %v529_v13, %v372_v44  ;;  %v601_v49 = vpack.c.bf16 %v349_v41, %v346_v39 }
  0xf3   : > { %v621_v50 = vpack.c.bf16 %v381_v42, %v378_v40  ;;  %v596_v51 = vpack.c.bf16 %v341_v47, %v338_v45 }
  0xf4   : > { %v616_v52 = vpack.c.bf16 %v373_v48, %v370_v46  ;;  %625 = vst [vmem:[%s759_s29 + $0x18] sm:$0xff] %v601_v49  }
  0xf5   : > { %629 = vst [vmem:[%s759_s29 + $0x38] sm:$0xff] %v621_v50   ;;  %624 = vst [vmem:[%s759_s29 + $0x10] sm:$0xff] %v596_v51  }
  0xf6   : > { %628 = vst [vmem:[%s759_s29 + $0x30] sm:$0xff] %v616_v52  }
  0xf7 PF: > { %s13_s12 = sadd.s32 1, %s696_s12  }
  0xf8   : > { %p10_p4 = scmp.ge.s32.totalorder %s13_s12, 4  }
  0xfa   :  { %12 = sbr.rel (!%p10_p4) target bundleno = 1 (0x1), region = 62 }

// kernel: tsm_retinanet_forward.32
= control target key start
LH: loop header
LB: loop body
LE: loop exit
PB: predicated region body
PF: predicated region fallthrough
CT: control target
= control target key end

     0   :  { %s2598_s12 = smov 0   ;;  %s3017_s0 = inlined_call_operand.vmem [shape: bf16[256,1152], index: 0, kind: input, shape index: {}]   ;;  %s3018_s1 = inlined_call_operand.vmem [shape: bf16[1152,128], index: 1, kind: input, shape index: {}]   ;;  %s3019_s2 = inlined_call_operand.vmem [shape: f32[1,128], index: 2, kind: input, shape index: {}]   ;;  %s3020_s3 = inlined_call_operand.vmem [shape: bf16[256,128], index: 3, kind: output, shape index: {}]  }
   0x1 LB: > { %s1830_s13 = sadd.s32 4294967295, %s2576_s12   ;;  %p1834_p0 = scmp.ge.s32.totalorder %s2576_s12, 1  ;;  %s2576_s12 = sphi %s2598_s12, %s13_s12  }
   0x2   : > { %p139_p1 = scmp.lt.s32.totalorder %s2576_s12, 3 }
   0x4   : > { %p140_p2 = pnand %p1834_p0, %p139_p1 }
   0x5   : > { %v2394_v0 = vld [vmem:[%s3018_s1 + $0x40] sm:$0xff] (!%p140_p2)   ;;  %v2398_v4 = vld [vmem:[%s3018_s1 + $0x48] sm:$0xff] (!%p140_p2)   ;;  %v2402_v8 = vld [vmem:[%s3018_s1 + $0x50] sm:$0xff] (!%p140_p2)   ;;  %s1835_s19 = sshll.u32 (!%p140_p2), %s1830_s13, 4 }
   0x6   : > { %143 = sbr.rel (%p140_p2) target bundleno = 396 (0x18c), region = 32  ;;  %v2395_v1 = vld [vmem:[%s3018_s1 + $0xc0] sm:$0xff] (!%p140_p2)   ;;  %2065 = vmatprep.subr.bf16.mxu0 (!%p140_p2), %v2394_v0  ;;  %v2399_v5 = vld [vmem:[%s3018_s1 + $0xc8] sm:$0xff] (!%p140_p2)   ;;  %v2403_v9 = vld [vmem:[%s3018_s1 + $0xd0] sm:$0xff] (!%p140_p2)   ;;  %p165_p3 = scmp.lt.s32.totalorder (!%p140_p2), %s1835_s19, 31 }
   0x7   : > { %v2396_v2 = vld [vmem:[%s3018_s1] sm:$0xff] (!%p140_p2)   ;;  %2129 = vmatprep.subr.bf16.mxu1 (!%p140_p2), %v2395_v1  ;;  %v2400_v6 = vld [vmem:[%s3018_s1 + $0x8] sm:$0xff] (!%p140_p2)   ;;  %v2404_v10 = vld [vmem:[%s3018_s1 + $0x10] sm:$0xff] (!%p140_p2)  }
   0x8   : > { %v2397_v3 = vld [vmem:[%s3018_s1 + $0x80] sm:$0xff] (!%p140_p2)   ;;  %2066 = vmatpush3.bf16.msra.mxu0 (!%p140_p2), %v2396_v2  ;;  %v2401_v7 = vld [vmem:[%s3018_s1 + $0x88] sm:$0xff] (!%p140_p2)   ;;  %v2405_v11 = vld [vmem:[%s3018_s1 + $0x90] sm:$0xff] (!%p140_p2)  }
   0x9   : > { %2130 = vmatpush3.bf16.msra.mxu1 (!%p140_p2), %v2397_v3  ;;  %2067 = vmatprep.subr.bf16.mxu0 (!%p140_p2), %v2398_v4  ;;  %v2406_v12 = vld [vmem:[%s3018_s1 + $0x58] sm:$0xff] (!%p140_p2)   ;;  %v2410_v16 = vld [vmem:[%s3018_s1 + $0x60] sm:$0xff] (!%p140_p2)   ;;  %v2414_v20 = vld [vmem:[%s3018_s1 + $0x68] sm:$0xff] (!%p140_p2)  }
   0xa   : > { %2131 = vmatprep.subr.bf16.mxu1 (!%p140_p2), %v2399_v5  ;;  %v2407_v13 = vld [vmem:[%s3018_s1 + $0xd8] sm:$0xff] (!%p140_p2)   ;;  %v2411_v17 = vld [vmem:[%s3018_s1 + $0xe0] sm:$0xff] (!%p140_p2)   ;;  %v2415_v21 = vld [vmem:[%s3018_s1 + $0xe8] sm:$0xff] (!%p140_p2)  }
   0xb   : > { %v2408_v14 = vld [vmem:[%s3018_s1 + $0x18] sm:$0xff] (!%p140_p2)   ;;  %v2412_v18 = vld [vmem:[%s3018_s1 + $0x20] sm:$0xff] (!%p140_p2)   ;;  %v2416_v22 = vld [vmem:[%s3018_s1 + $0x28] sm:$0xff] (!%p140_p2)  }
   0xc   : > { %2068 = vmatpush3.bf16.msra.mxu0 (!%p140_p2), %v2400_v6  ;;  %v2409_v15 = vld [vmem:[%s3018_s1 + $0x98] sm:$0xff] (!%p140_p2)   ;;  %v2413_v19 = vld [vmem:[%s3018_s1 + $0xa0] sm:$0xff] (!%p140_p2)   ;;  %v2417_v23 = vld [vmem:[%s3018_s1 + $0xa8] sm:$0xff] (!%p140_p2)  }
   0xd   : > { %2132 = vmatpush3.bf16.msra.mxu1 %v2401_v7  ;;  %2069 = vmatprep.subr.bf16.mxu0 %v2402_v8  ;;  %s3022_s19 = smov (!%p165_p3, %s1835_s19), 31  ;;  %v2418_v24 = vld [vmem:[%s3018_s1 + $0x70] sm:$0xff]   ;;  %v2422_v28 = vld [vmem:[%s3018_s1 + $0x78] sm:$0xff]   ;;  %v2432_v36 = vld [vmem:[%s3018_s1 + $0x140] sm:$0xff]  }
   0xe   : > { %2133 = vmatprep.subr.bf16.mxu1 %v2403_v9  ;;  %v2419_v25 = vld [vmem:[%s3018_s1 + $0xf0] sm:$0xff]   ;;  %s2385_s16 = smul.u32 36, %s3022_s19  ;;  %v2423_v29 = vld [vmem:[%s3018_s1 + $0xf8] sm:$0xff]   ;;  %v2433_v37 = vld [vmem:[%s3018_s1 + $0x1c0] sm:$0xff]  }
   0xf   : > { %v2420_v26 = vld [vmem:[%s3018_s1 + $0x30] sm:$0xff]   ;;  %v2424_v30 = vld [vmem:[%s3018_s1 + $0x38] sm:$0xff]   ;;  %v2434_v38 = vld [vmem:[%s3018_s1 + $0x100] sm:$0xff]  }
  0x10   : > { %2070 = vmatpush3.bf16.msra.mxu0 %v2404_v10  ;;  %v2421_v27 = vld [vmem:[%s3018_s1 + $0xb0] sm:$0xff]   ;;  %s2704_s13 = scalar_lea.vmem %s3017_s0, %s2385_s16  ;;  %v2425_v31 = vld [vmem:[%s3018_s1 + $0xb8] sm:$0xff]   ;;  %v2435_v39 = vld [vmem:[%s3018_s1 + $0x180] sm:$0xff]  }
  0x11   : > { %2134 = vmatpush3.bf16.msra.mxu1 %v2405_v11  ;;  %2071 = vmatprep.subr.bf16.mxu0 %v2406_v12  ;;  %v2426_v32 = vld [vmem:[%s2704_s13] ss:$36 sps:$4 sm:$0xff]   ;;  %v2429_v34 = vld [vmem:[%s2704_s13 + $0x8] ss:$36 sps:$4 sm:$0xff]   ;;  %v2438_v41 = vld [vmem:[%s2704_s13 + $0x54] ss:$36 sps:$4 sm:$0xff]  }
  0x12   : > { %2135 = vmatprep.subr.bf16.mxu1 %v2407_v13  ;;  %v2428_v33 = vld [vmem:[%s2704_s13 + $0x4] ss:$36 sps:$4 sm:$0xff]   ;;  %v2431_v35 = vld [vmem:[%s2704_s13 + $0xc] ss:$36 sps:$4 sm:$0xff]   ;;  %v2446_v48 = vld [vmem:[%s2704_s13 + $0x94] ss:$36 sps:$4 sm:$0xff]  }
  0x13   : > { %1241 = vmatprep.mubr.bf16.mxu0 %v2428_v33  ;;  %1338 = vmatprep.mubr.bf16.mxu1 %v2431_v35  ;;  %v2436_v40 = vld [vmem:[%s2704_s13 + $0x4c] ss:$36 sps:$4 sm:$0xff]   ;;  %v2448_v49 = vld [vmem:[%s2704_s13 + $0x9c] ss:$36 sps:$4 sm:$0xff]   ;;  %v2458_v57 = vld [vmem:[%s2704_s13 + $0xe4] ss:$36 sps:$4 sm:$0xff]  }
  0x14   : > { %2072 = vmatpush3.bf16.msra.mxu0 %v2408_v14  ;;  %v2440_v42 = vld [vmem:[%s2704_s13 + $0x48] ss:$36 sps:$4 sm:$0xff]   ;;  %v2441_v43 = vld [vmem:[%s2704_s13 + $0x50] ss:$36 sps:$4 sm:$0xff]   ;;  %v2451_v51 = vld [vmem:[%s2704_s13 + $0x98] ss:$36 sps:$4 sm:$0xff]  }
  0x15   : > { %2136 = vmatpush3.bf16.msra.mxu1 %v2409_v15  ;;  %2073 = vmatprep.subr.bf16.mxu0 %v2410_v16  ;;  %v2442_v44 = vld [vmem:[%s3018_s1 + $0x148] sm:$0xff]   ;;  %v2450_v50 = vld [vmem:[%s2704_s13 + $0x90] ss:$36 sps:$4 sm:$0xff]   ;;  %v2456_v56 = vld [vmem:[%s2704_s13 + $0xdc] ss:$36 sps:$4 sm:$0xff]  }
  0x16   : > { %2137 = vmatprep.subr.bf16.mxu1 %v2411_v17  ;;  %v2443_v45 = vld [vmem:[%s3018_s1 + $0x1c8] sm:$0xff]   ;;  %v2452_v52 = vld [vmem:[%s3018_s1 + $0x150] sm:$0xff]   ;;  %v2460_v58 = vld [vmem:[%s2704_s13 + $0xd8] ss:$36 sps:$4 sm:$0xff]  }
  0x17   : > { %v2444_v46 = vld [vmem:[%s3018_s1 + $0x108] sm:$0xff]   ;;  %v2453_v53 = vld [vmem:[%s3018_s1 + $0x1d0] sm:$0xff]   ;;  %v2461_v59 = vld [vmem:[%s2704_s13 + $0xe0] ss:$36 sps:$4 sm:$0xff]  }
  0x18   : > { %2074 = vmatpush3.bf16.msra.mxu0 %v2412_v18  ;;  %v2445_v47 = vld [vmem:[%s3018_s1 + $0x188] sm:$0xff]   ;;  %v2454_v54 = vld [vmem:[%s3018_s1 + $0x110] sm:$0xff]   ;;  %v2462_v60 = vld [vmem:[%s3018_s1 + $0x158] sm:$0xff]  }
  0x19   : > { %2138 = vmatpush3.bf16.msra.mxu1 %v2413_v19  ;;  %2075 = vmatprep.subr.bf16.mxu0 %v2414_v20  ;;  %v2455_v55 = vld [vmem:[%s3018_s1 + $0x190] sm:$0xff]   ;;  %v2463_v61 = vld [vmem:[%s3018_s1 + $0x1d8] sm:$0xff]   ;;  %v2466_v0 = vld [vmem:[%s2704_s13 + $0x124] ss:$36 sps:$4 sm:$0xff]  }
  0x1a   : > { %2139 = vmatprep.subr.bf16.mxu1 %v2415_v21  ;;  %v2464_v62 = vld [vmem:[%s3018_s1 + $0x118] sm:$0xff]   ;;  %v2468_v1 = vld [vmem:[%s2704_s13 + $0x12c] ss:$36 sps:$4 sm:$0xff]   ;;  %v2470_v2 = vld [vmem:[%s2704_s13 + $0x120] ss:$36 sps:$4 sm:$0xff]  }
  0x1b   : > { %v2465_v63 = vld [vmem:[%s3018_s1 + $0x198] sm:$0xff]   ;;  %v2472_v3 = vld [vmem:[%s3018_s1 + $0x160] sm:$0xff]   ;;  %v2471_v4 = vld [vmem:[%s2704_s13 + $0x128] ss:$36 sps:$4 sm:$0xff]  }
  0x1c   : > { %2076 = vmatpush3.bf16.msra.mxu0 %v2416_v22  ;;  %v2473_v5 = vld [vmem:[%s3018_s1 + $0x1e0] sm:$0xff]   ;;  %v2476_v8 = vld [vmem:[%s2704_s13 + $0x16c] ss:$36 sps:$4 sm:$0xff]   ;;  %v2478_v9 = vld [vmem:[%s2704_s13 + $0x174] ss:$36 sps:$4 sm:$0xff]  }
  0x1d   : > { %2140 = vmatpush3.bf16.msra.mxu1 %v2417_v23  ;;  %2077 = vmatprep.subr.bf16.mxu0 %v2418_v24  ;;  %v2474_v6 = vld [vmem:[%s3018_s1 + $0x120] sm:$0xff]   ;;  %v2482_v10 = vld [vmem:[%s3018_s1 + $0x168] sm:$0xff]   ;;  %v2481_v15 = vld [vmem:[%s2704_s13 + $0x170] ss:$36 sps:$4 sm:$0xff]  }
  0x1e   : > { %2141 = vmatprep.subr.bf16.mxu1 %v2419_v25  ;;  %v2475_v7 = vld [vmem:[%s3018_s1 + $0x1a0] sm:$0xff]   ;;  %v2483_v11 = vld [vmem:[%s3018_s1 + $0x1e8] sm:$0xff]   ;;  %v2486_v16 = vld [vmem:[%s2704_s13 + $0x1b4] ss:$36 sps:$4 sm:$0xff]  }
  0x1f   : > { %v2480_v12 = vld [vmem:[%s2704_s13 + $0x168] ss:$36 sps:$4 sm:$0xff]   ;;  %v2488_v17 = vld [vmem:[%s2704_s13 + $0x1bc] ss:$36 sps:$4 sm:$0xff]   ;;  %v2492_v18 = vld [vmem:[%s3018_s1 + $0x170] sm:$0xff]  }
  0x20   : > { %2078 = vmatpush3.bf16.msra.mxu0 %v2420_v26  ;;  %v2484_v13 = vld [vmem:[%s3018_s1 + $0x128] sm:$0xff]   ;;  %v2493_v19 = vld [vmem:[%s3018_s1 + $0x1f0] sm:$0xff]   ;;  %v2491_v23 = vld [vmem:[%s2704_s13 + $0x1b8] ss:$36 sps:$4 sm:$0xff]  }
  0x21   : > { %2142 = vmatpush3.bf16.msra.mxu1 %v2421_v27  ;;  %2079 = vmatprep.subr.bf16.mxu0 %v2422_v28  ;;  %v2485_v14 = vld [vmem:[%s3018_s1 + $0x1a8] sm:$0xff]   ;;  %v2494_v20 = vld [vmem:[%s3018_s1 + $0x130] sm:$0xff]   ;;  %v2496_v24 = vld [vmem:[%s2704_s13 + $0x1fc] ss:$36 sps:$4 sm:$0xff]  }
  0x22   : > { %2143 = vmatprep.subr.bf16.mxu1 %v2423_v29  ;;  %v2495_v21 = vld [vmem:[%s3018_s1 + $0x1b0] sm:$0xff]   ;;  %v2498_v25 = vld [vmem:[%s2704_s13 + $0x204] ss:$36 sps:$4 sm:$0xff]   ;;  %v2502_v26 = vld [vmem:[%s3018_s1 + $0x178] sm:$0xff]  }
  0x23   : > { %v2490_v22 = vld [vmem:[%s2704_s13 + $0x1b0] ss:$36 sps:$4 sm:$0xff]   ;;  %v2503_v27 = vld [vmem:[%s3018_s1 + $0x1f8] sm:$0xff]  }
  0x24   : > { %2080 = vmatpush3.bf16.msra.mxu0 %v2424_v30  ;;  %v2504_v28 = vld [vmem:[%s3018_s1 + $0x138] sm:$0xff]   ;;  %v2506_v35 = vld [vmem:[%s2704_s13 + $0x10] ss:$36 sps:$4 sm:$0xff]  }
  0x25   : > { %2144 = vmatpush3.bf16.msra.mxu1 %v2425_v31  ;;  %2193 = vmatprep.subr.bf16.mxu0 %v2432_v36  ;;  %v2505_v29 = vld [vmem:[%s3018_s1 + $0x1b8] sm:$0xff]   ;;  %v2501_v31 = vld [vmem:[%s2704_s13 + $0x200] ss:$36 sps:$4 sm:$0xff]  }
  0x26   : > { %2257 = vmatprep.subr.bf16.mxu1 %v2433_v37  ;;  %v2500_v30 = vld [vmem:[%s2704_s13 + $0x1f8] ss:$36 sps:$4 sm:$0xff]  }
  0x27   : > { %1242 = vmatmul.mubr.bf16.vlgmr.msra.gmra.mrb[0].mxu0 %v2426_v32  ;;  %v2512_v32 = vld [vmem:[%s3018_s1 + $0x200] sm:$0xff]   ;;  %v2508_v33 = vld [vmem:[%s2704_s13 + $0x14] ss:$36 sps:$4 sm:$0xff]  }
  0x28   : > { %1339 = vmatmul.mubr.bf16.vlgmr.msra.gmra.mrb[0].mxu1 %v2429_v34  ;;  %2194 = vmatpush3.bf16.msra.mxu0 %v2434_v38  ;;  %v2511_v34 = vld [vmem:[%s2704_s13 + $0x1c] ss:$36 sps:$4 sm:$0xff]   ;;  %v2515_v38 = vld [vmem:[%s2704_s13 + $0x64] ss:$36 sps:$4 sm:$0xff]  }
  0x29   : > { %2258 = vmatpush3.bf16.msra.mxu1 %v2435_v39  ;;  %1249 = vmatprep.mubr.bf16.mxu0 %v2436_v40  ;;  %v2509_v36 = vld [vmem:[%s2704_s13 + $0x18] ss:$36 sps:$4 sm:$0xff]   ;;  %v2519_v39 = vld [vmem:[%s3018_s1 + $0x208] sm:$0xff]   ;;  %v2526_v40 = vld [vmem:[%s3018_s1 + $0x210] sm:$0xff]  }
  0x2a   : > { %1346 = vmatprep.mubr.bf16.mxu1 %v2438_v41  ;;  %2195 = vmatprep.subr.bf16.mxu0 %v2442_v44  ;;  %v2513_v37 = vld [vmem:[%s2704_s13 + $0x5c] ss:$36 sps:$4 sm:$0xff]   ;;  %v2522_v44 = vld [vmem:[%s2704_s13 + $0xac] ss:$36 sps:$4 sm:$0xff]  }
  0x2b   : > { %2259 = vmatprep.subr.bf16.mxu1 %v2443_v45  ;;  %v2517_v41 = vld [vmem:[%s2704_s13 + $0x58] ss:$36 sps:$4 sm:$0xff]  }
  0x2c   : > { %2196 = vmatpush3.bf16.msra.mxu0 %v2444_v46  ;;  %v2533_v45 = vld [vmem:[%s3018_s1 + $0x218] sm:$0xff]   ;;  %v2540_v46 = vld [vmem:[%s3018_s1 + $0x220] sm:$0xff]  }
  0x2d   : > { %2260 = vmatpush3.bf16.msra.mxu1 %v2445_v47  ;;  %2197 = vmatprep.subr.bf16.mxu0 %v2452_v52  ;;  %v2524_v47 = vld [vmem:[%s2704_s13 + $0xa0] ss:$36 sps:$4 sm:$0xff]   ;;  %v2531_v52 = vld [vmem:[%s2704_s13 + $0xe8] ss:$36 sps:$4 sm:$0xff]  }
  0x2e   : > { %2261 = vmatprep.subr.bf16.mxu1 %v2453_v53  ;;  %v2554_v53 = vld [vmem:[%s3018_s1 + $0x230] sm:$0xff]  }
  0x2f   : > { %1250 = vmatmul.mubr.bf16.gmra.mrb[4].mxu0 %v2440_v42  ;;  %v2518_v42 = vld [vmem:[%s2704_s13 + $0x60] ss:$36 sps:$4 sm:$0xff]  }
  0x30   : > { %1347 = vmatmul.mubr.bf16.gmra.mrb[4].mxu1 %v2441_v43  ;;  %1257 = vmatprep.mubr.bf16.mxu0 %v2446_v48  ;;  %v2520_v43 = vld [vmem:[%s2704_s13 + $0xa4] ss:$36 sps:$4 sm:$0xff]  }
  0x31   : > { %1354 = vmatprep.mubr.bf16.mxu1 %v2448_v49  ;;  %2198 = vmatpush3.bf16.msra.mxu0 %v2454_v54  ;;  %v2525_v48 = vld [vmem:[%s2704_s13 + $0xa8] ss:$36 sps:$4 sm:$0xff]   ;;  %v2532_v54 = vld [vmem:[%s2704_s13 + $0xf0] ss:$36 sps:$4 sm:$0xff]  }
  0x32   : > { %2262 = vmatpush3.bf16.msra.mxu1 %v2455_v55  ;;  %2199 = vmatprep.subr.bf16.mxu0 %v2462_v60  ;;  %v2527_v49 = vld [vmem:[%s2704_s13 + $0xec] ss:$36 sps:$4 sm:$0xff]   ;;  %v2534_v55 = vld [vmem:[%s2704_s13 + $0x134] ss:$36 sps:$4 sm:$0xff]   ;;  %v2541_v60 = vld [vmem:[%s2704_s13 + $0x17c] ss:$36 sps:$4 sm:$0xff]  }
  0x33   : > { %2263 = vmatprep.subr.bf16.mxu1 %v2463_v61  ;;  %v2543_v61 = vld [vmem:[%s2704_s13 + $0x184] ss:$36 sps:$4 sm:$0xff]  }
  0x35   : > { %2200 = vmatpush3.bf16.msra.mxu0 %v2464_v62  ;;  %v2545_v62 = vld [vmem:[%s2704_s13 + $0x178] ss:$36 sps:$4 sm:$0xff]  }
  0x36   : > { %2264 = vmatpush3.bf16.msra.mxu1 %v2465_v63  ;;  %2201 = vmatprep.subr.bf16.mxu0 %v2472_v3  ;;  %v2546_v63 = vld [vmem:[%s2704_s13 + $0x180] ss:$36 sps:$4 sm:$0xff]   ;;  %v2553_v3 = vld [vmem:[%s2704_s13 + $0x1c8] ss:$36 sps:$4 sm:$0xff]  }
  0x37   : > { %1258 = vmatmul.mubr.bf16.gmra.mrb[8].mxu0 %v2450_v50  ;;  %2265 = vmatprep.subr.bf16.mxu1 %v2473_v5  ;;  %v2529_v50 = vld [vmem:[%s2704_s13 + $0xf4] ss:$36 sps:$4 sm:$0xff]  }
  0x38   : > { %1355 = vmatmul.mubr.bf16.gmra.mrb[8].mxu1 %v2451_v51  ;;  %1265 = vmatprep.mubr.bf16.mxu0 %v2456_v56  ;;  %v2547_v51 = vld [vmem:[%s3018_s1 + $0x228] sm:$0xff]   ;;  %v2536_v56 = vld [vmem:[%s2704_s13 + $0x13c] ss:$36 sps:$4 sm:$0xff]   ;;  %v2557_v5 = vld [vmem:[%s2704_s13 + $0x214] ss:$36 sps:$4 sm:$0xff]  }
  0x39   : > { %1362 = vmatprep.mubr.bf16.mxu1 %v2458_v57  ;;  %2202 = vmatpush3.bf16.msra.mxu0 %v2474_v6  ;;  %v2561_v57 = vld [vmem:[%s3018_s1 + $0x238] sm:$0xff]   ;;  %v2559_v6 = vld [vmem:[%s2704_s13 + $0x208] ss:$36 sps:$4 sm:$0xff]  }
  0x3a   : > { %2266 = vmatpush3.bf16.msra.mxu1 %v2475_v7  ;;  %2203 = vmatprep.subr.bf16.mxu0 %v2482_v10  ;;  %v2560_v7 = vld [vmem:[%s2704_s13 + $0x210] ss:$36 sps:$4 sm:$0xff]   ;;  %v2564_v10 = vld [vmem:[%s2704_s13 + $0x68] ss:$36 sps:$4 sm:$0xff]  }
  0x3b   : > { %2267 = vmatprep.subr.bf16.mxu1 %v2483_v11  ;;  %v2565_v11 = vld [vmem:[%s2704_s13 + $0x188] ss:$36 sps:$4 sm:$0xff]  }
  0x3d   : > { %2204 = vmatpush3.bf16.msra.mxu0 %v2484_v13  ;;  %v2567_v13 = vld [vmem:[%s2704_s13 + $0x1d0] ss:$36 sps:$4 sm:$0xff]  }
  0x3e   : > { %2268 = vmatpush3.bf16.msra.mxu1 %v2485_v14  ;;  %2205 = vmatprep.subr.bf16.mxu0 %v2492_v18  ;;  %v2568_v14 = vld [vmem:[%s2704_s13 + $0xf8] ss:$36 sps:$4 sm:$0xff]   ;;  %v2907_v18 = vld [vmem:[%s3019_s2] ss:$0 sm:$0xff] }
  0x3f   : > { %1266 = vmatmul.mubr.bf16.gmra.mrb[12].mxu0 %v2460_v58  ;;  %2269 = vmatprep.subr.bf16.mxu1 %v2493_v19  ;;  %v2538_v58 = vld [vmem:[%s2704_s13 + $0x130] ss:$36 sps:$4 sm:$0xff]  }
  0x40   : > { %1363 = vmatmul.mubr.bf16.gmra.mrb[12].mxu1 %v2461_v59  ;;  %1273 = vmatprep.mubr.bf16.mxu0 %v2466_v0  ;;  %v2539_v59 = vld [vmem:[%s2704_s13 + $0x138] ss:$36 sps:$4 sm:$0xff]   ;;  %v2548_v0 = vld [vmem:[%s2704_s13 + $0x1c4] ss:$36 sps:$4 sm:$0xff]  }
  0x41   : > { %1370 = vmatprep.mubr.bf16.mxu1 %v2468_v1  ;;  %2206 = vmatpush3.bf16.msra.mxu0 %v2494_v20  ;;  %v2550_v1 = vld [vmem:[%s2704_s13 + $0x1cc] ss:$36 sps:$4 sm:$0xff]  }
  0x42   : > { %2270 = vmatpush3.bf16.msra.mxu1 %v2495_v21  ;;  %2207 = vmatprep.subr.bf16.mxu0 %v2502_v26 }
  0x43   : > { %2271 = vmatprep.subr.bf16.mxu1 %v2503_v27 }
  0x45   : > { %2208 = vmatpush3.bf16.msra.mxu0 %v2504_v28 }
  0x46   : > { %2272 = vmatpush3.bf16.msra.mxu1 %v2505_v29  ;;  %2337 = vmatprep.subr.bf16.mxu0 %v2512_v32 }
  0x47   : > { %1274 = vmatmul.mubr.bf16.gmra.mrb[16].mxu0 %v2470_v2  ;;  %2369 = vmatprep.subr.bf16.mxu1 %v2512_v32  ;;  %v2552_v2 = vld [vmem:[%s2704_s13 + $0x1c0] ss:$36 sps:$4 sm:$0xff]  }
  0x48   : > { %1371 = vmatmul.mubr.bf16.gmra.mrb[16].mxu1 %v2471_v4  ;;  %1281 = vmatprep.mubr.bf16.mxu0 %v2476_v8  ;;  %v2555_v4 = vld [vmem:[%s2704_s13 + $0x20c] ss:$36 sps:$4 sm:$0xff]   ;;  %v2562_v8 = vld [vmem:[%s2704_s13 + $0x20] ss:$36 sps:$4 sm:$0xff]  }
  0x49   : > { %1378 = vmatprep.mubr.bf16.mxu1 %v2478_v9  ;;  %v2563_v9 = vld [vmem:[%s2704_s13 + $0x140] ss:$36 sps:$4 sm:$0xff]  }
  0x4f   : > { %1282 = vmatmul.mubr.bf16.gmra.mrb[20].mxu0 %v2480_v12  ;;  %v2566_v12 = vld [vmem:[%s2704_s13 + $0xb0] ss:$36 sps:$4 sm:$0xff]  }
  0x50   : > { %1379 = vmatmul.mubr.bf16.gmra.mrb[20].mxu1 %v2481_v15  ;;  %1289 = vmatprep.mubr.bf16.mxu0 %v2486_v16  ;;  %v2569_v15 = vld [vmem:[%s2704_s13 + $0x218] ss:$36 sps:$4 sm:$0xff]   ;;  %s1838_s13 = sshll.u32 %s3022_s19, 2 }
  0x51   : > { %1386 = vmatprep.mubr.bf16.mxu1 %v2488_v17  ;;  %s2998_s20 = scalar_lea.vmem %s3020_s3, %s1838_s13 }
  0x57   : > { %1290 = vmatmul.mubr.bf16.gmra.mrb[24].mxu0 %v2490_v22 }
  0x58   : > { %1387 = vmatmul.mubr.bf16.gmra.mrb[24].mxu1 %v2491_v23  ;;  %1297 = vmatprep.mubr.bf16.mxu0 %v2496_v24 }
  0x59   : > { %1394 = vmatprep.mubr.bf16.mxu1 %v2498_v25 }
  0x5f   : > { %1298 = vmatmul.mubr.bf16.gmra.mrb[28].mxu0 %v2500_v30 }
  0x60   : > { %1395 = vmatmul.mubr.bf16.gmra.mrb[28].mxu1 %v2501_v31  ;;  %1435 = vmatprep.mubr.bf16.mxu0 %v2508_v33 }
  0x61   : > { %1532 = vmatprep.mubr.bf16.mxu1 %v2511_v34 }
  0x67   : > { %1436 = vmatmul.mubr.bf16.vlgmr.msra.gmra.mrb[32].mxu0 %v2506_v35 }
  0x68   : > { %1533 = vmatmul.mubr.bf16.vlgmr.msra.gmra.mrb[32].mxu1 %v2509_v36  ;;  %2338 = vmatpush3.bf16.msra.mxu0 %v2512_v32 }
  0x69   : > { %2377 = vmatpush3.bf16.msra.mxu1 %v2512_v32  ;;  %1443 = vmatprep.mubr.bf16.mxu0 %v2513_v37 }
  0x6a   : > { %1540 = vmatprep.mubr.bf16.mxu1 %v2515_v38  ;;  %2339 = vmatprep.subr.bf16.mxu0 %v2519_v39 }
  0x6b   : > { %2370 = vmatprep.subr.bf16.mxu1 %v2519_v39 }
  0x6c   : > { %2340 = vmatpush3.bf16.msra.mxu0 %v2519_v39 }
  0x6d   : > { %2378 = vmatpush3.bf16.msra.mxu1 %v2519_v39  ;;  %2341 = vmatprep.subr.bf16.mxu0 %v2526_v40 }
  0x6e   : > { %2371 = vmatprep.subr.bf16.mxu1 %v2526_v40 }
  0x6f   : > { %1444 = vmatmul.mubr.bf16.gmra.mrb[36].mxu0 %v2517_v41 }
  0x70   : > { %1541 = vmatmul.mubr.bf16.gmra.mrb[36].mxu1 %v2518_v42  ;;  %1451 = vmatprep.mubr.bf16.mxu0 %v2520_v43 }
  0x71   : > { %1548 = vmatprep.mubr.bf16.mxu1 %v2522_v44  ;;  %2342 = vmatpush3.bf16.msra.mxu0 %v2526_v40 }
  0x72   : > { %2379 = vmatpush3.bf16.msra.mxu1 %v2526_v40  ;;  %2343 = vmatprep.subr.bf16.mxu0 %v2533_v45 }
  0x73   : > { %2372 = vmatprep.subr.bf16.mxu1 %v2533_v45 }
  0x75   : > { %2344 = vmatpush3.bf16.msra.mxu0 %v2533_v45 }
  0x76   : > { %2380 = vmatpush3.bf16.msra.mxu1 %v2533_v45  ;;  %2345 = vmatprep.subr.bf16.mxu0 %v2540_v46 }
  0x77   : > { %1452 = vmatmul.mubr.bf16.gmra.mrb[40].mxu0 %v2524_v47  ;;  %2373 = vmatprep.subr.bf16.mxu1 %v2540_v46 }
  0x78   : > { %1549 = vmatmul.mubr.bf16.gmra.mrb[40].mxu1 %v2525_v48  ;;  %1459 = vmatprep.mubr.bf16.mxu0 %v2527_v49 }
  0x79   : > { %1556 = vmatprep.mubr.bf16.mxu1 %v2529_v50  ;;  %2346 = vmatpush3.bf16.msra.mxu0 %v2540_v46 }
  0x7a   : > { %2381 = vmatpush3.bf16.msra.mxu1 %v2540_v46  ;;  %2347 = vmatprep.subr.bf16.mxu0 %v2547_v51 }
  0x7b   : > { %2374 = vmatprep.subr.bf16.mxu1 %v2547_v51 }
  0x7d   : > { %2348 = vmatpush3.bf16.msra.mxu0 %v2547_v51 }
  0x7e   : > { %2382 = vmatpush3.bf16.msra.mxu1 %v2547_v51  ;;  %2349 = vmatprep.subr.bf16.mxu0 %v2554_v53 }
  0x7f   : > { %1460 = vmatmul.mubr.bf16.gmra.mrb[44].mxu0 %v2531_v52  ;;  %2375 = vmatprep.subr.bf16.mxu1 %v2554_v53 }
  0x80   : > { %1557 = vmatmul.mubr.bf16.gmra.mrb[44].mxu1 %v2532_v54  ;;  %1467 = vmatprep.mubr.bf16.mxu0 %v2534_v55 }
  0x81   : > { %1564 = vmatprep.mubr.bf16.mxu1 %v2536_v56  ;;  %2350 = vmatpush3.bf16.msra.mxu0 %v2554_v53 }
  0x82   : > { %2383 = vmatpush3.bf16.msra.mxu1 %v2554_v53  ;;  %2351 = vmatprep.subr.bf16.mxu0 %v2561_v57 }
  0x83   : > { %2376 = vmatprep.subr.bf16.mxu1 %v2561_v57 }
  0x85   : > { %2352 = vmatpush3.bf16.msra.mxu0 %v2561_v57 }
  0x86   : > { %2384 = vmatpush3.bf16.msra.mxu1 %v2561_v57 }
  0x87   : > { %1468 = vmatmul.mubr.bf16.gmra.mrb[48].mxu0 %v2538_v58 }
  0x88   : > { %1565 = vmatmul.mubr.bf16.gmra.mrb[48].mxu1 %v2539_v59  ;;  %1475 = vmatprep.mubr.bf16.mxu0 %v2541_v60 }
  0x89   : > { %1572 = vmatprep.mubr.bf16.mxu1 %v2543_v61 }
  0x8f   : > { %1476 = vmatmul.mubr.bf16.gmra.mrb[52].mxu0 %v2545_v62 }
  0x90   : > { %1573 = vmatmul.mubr.bf16.gmra.mrb[52].mxu1 %v2546_v63  ;;  %1483 = vmatprep.mubr.bf16.mxu0 %v2548_v0 }
  0x91   : > { %1580 = vmatprep.mubr.bf16.mxu1 %v2550_v1 }
  0x97   : > { %1484 = vmatmul.mubr.bf16.gmra.mrb[56].mxu0 %v2552_v2 }
  0x98   : > { %1581 = vmatmul.mubr.bf16.gmra.mrb[56].mxu1 %v2553_v3  ;;  %1491 = vmatprep.mubr.bf16.mxu0 %v2555_v4 }
  0x99   : > { %1588 = vmatprep.mubr.bf16.mxu1 %v2557_v5 }
  0x9f   : > { %1492 = vmatmul.mubr.bf16.gmra.mrb[60].mxu0 %v2559_v6 }
  0xa0   : > { %1589 = vmatmul.mubr.bf16.gmra.mrb[60].mxu1 %v2560_v7  ;;  %2353 = vmatprep.mubr.bf16.mxu0 %v2562_v8 }
  0xa1   : > { %2361 = vmatprep.mubr.bf16.mxu1 %v2563_v9 }
  0xa7   : > { %2354 = vmatmul.mubr.bf16.vlgmr.msra.gmra.mrb[64].mxu0 %v2564_v10 }
  0xa8   : > { %2362 = vmatmul.mubr.bf16.vlgmr.msra.gmra.mrb[64].mxu1 %v2565_v11  ;;  %2357 = vmatprep.mubr.bf16.mxu0 %v2566_v12 }
  0xa9   : > { %2365 = vmatprep.mubr.bf16.mxu1 %v2567_v13 }
  0xaf   : > { %2358 = vmatmul.mubr.bf16.gmra.mrb[68].mxu0 %v2568_v14 }
  0xb0   : > { %2366 = vmatmul.mubr.bf16.gmra.mrb[68].mxu1 %v2569_v15 }
  0xfa   : > { %v2081_v16 = vpop.f32.mrb[0].mxu0 }
  0xfb   : > { %v2145_v17 = vpop.f32.mrb[0].mxu1  ;;  %v2082_v19 = vpop.f32.mrb[1].mxu0 }
  0xfc   : > { %v2083_v20 = vadd.f32 %v2082_v19, %v2081_v16  ;;  %v2146_v21 = vpop.f32.mrb[1].mxu1  ;;  %v2084_v22 = vpop.f32.mrb[2].mxu0 }
  0xfd   : > { %v2147_v23 = vadd.f32 %v2146_v21, %v2145_v17  ;;  %v2148_v24 = vpop.f32.mrb[2].mxu1  ;;  %v2085_v25 = vpop.f32.mrb[3].mxu0 }
  0xfe   : > { %v1244_v26 = vadd.f32 %v2083_v20, %v2907_v18  ;;  %v2086_v27 = vadd.f32 %v2085_v25, %v2084_v22  ;;  %v2149_v28 = vpop.f32.mrb[3].mxu1 }
  0xff   : > { %v2150_v29 = vadd.f32 %v2149_v28, %v2148_v24 }
 0x100   : > { %v2910_v30 = vadd.f32 %v2147_v23, %v1244_v26  ;;  %v1247_v31 = vadd.f32 %v2086_v27, %v2907_v18 }
 0x102   : > { %v2913_v32 = vadd.f32 %v2150_v29, %v1247_v31  ;;  %v2087_v33 = vpop.f32.mrb[4].mxu0 }
 0x103   : > { %v2151_v34 = vpop.f32.mrb[4].mxu1  ;;  %v2088_v35 = vpop.f32.mrb[5].mxu0 }
 0x104   : > { %v2089_v36 = vadd.f32 %v2088_v35, %v2087_v33  ;;  %v2152_v37 = vpop.f32.mrb[5].mxu1  ;;  %v2090_v38 = vpop.f32.mrb[6].mxu0 }
 0x105   : > { %v2153_v39 = vadd.f32 %v2152_v37, %v2151_v34  ;;  %v2154_v40 = vpop.f32.mrb[6].mxu1  ;;  %v2091_v41 = vpop.f32.mrb[7].mxu0 }
 0x106   : > { %v1252_v42 = vadd.f32 %v2089_v36, %v2907_v18  ;;  %v2092_v43 = vadd.f32 %v2091_v41, %v2090_v38  ;;  %v2155_v44 = vpop.f32.mrb[7].mxu1 }
 0x107   : > { %v2156_v45 = vadd.f32 %v2155_v44, %v2154_v40 }
 0x108   : > { %v2916_v46 = vadd.f32 %v2153_v39, %v1252_v42  ;;  %v1255_v47 = vadd.f32 %v2092_v43, %v2907_v18 }
 0x10a   : > { %v2919_v48 = vadd.f32 %v2156_v45, %v1255_v47  ;;  %v2093_v49 = vpop.f32.mrb[8].mxu0 }
 0x10b   : > { %v2157_v50 = vpop.f32.mrb[8].mxu1  ;;  %v2094_v51 = vpop.f32.mrb[9].mxu0 }
 0x10c   : > { %v2095_v52 = vadd.f32 %v2094_v51, %v2093_v49  ;;  %v2158_v53 = vpop.f32.mrb[9].mxu1  ;;  %v2096_v54 = vpop.f32.mrb[10].mxu0 }
 0x10d   : > { %v2159_v55 = vadd.f32 %v2158_v53, %v2157_v50  ;;  %v2160_v56 = vpop.f32.mrb[10].mxu1  ;;  %v2097_v57 = vpop.f32.mrb[11].mxu0 }
 0x10e   : > { %v1260_v58 = vadd.f32 %v2095_v52, %v2907_v18  ;;  %v2098_v59 = vadd.f32 %v2097_v57, %v2096_v54  ;;  %v2161_v60 = vpop.f32.mrb[11].mxu1 }
 0x10f   : > { %v2162_v61 = vadd.f32 %v2161_v60, %v2160_v56 }
 0x110   : > { %v2922_v62 = vadd.f32 %v2159_v55, %v1260_v58  ;;  %v1263_v63 = vadd.f32 %v2098_v59, %v2907_v18 }
 0x112   : > { %v2925_v0 = vadd.f32 %v2162_v61, %v1263_v63  ;;  %v2099_v1 = vpop.f32.mrb[12].mxu0 }
 0x113   : > { %v2163_v2 = vpop.f32.mrb[12].mxu1  ;;  %v2100_v3 = vpop.f32.mrb[13].mxu0 }
 0x114   : > { %v2101_v4 = vadd.f32 %v2100_v3, %v2099_v1  ;;  %v2164_v5 = vpop.f32.mrb[13].mxu1  ;;  %v2102_v6 = vpop.f32.mrb[14].mxu0 }
 0x115   : > { %v2165_v7 = vadd.f32 %v2164_v5, %v2163_v2  ;;  %v2166_v8 = vpop.f32.mrb[14].mxu1  ;;  %v2103_v9 = vpop.f32.mrb[15].mxu0 }
 0x116   : > { %v1268_v10 = vadd.f32 %v2101_v4, %v2907_v18  ;;  %v2104_v11 = vadd.f32 %v2103_v9, %v2102_v6  ;;  %v2167_v12 = vpop.f32.mrb[15].mxu1 }
 0x117   : > { %v2168_v13 = vadd.f32 %v2167_v12, %v2166_v8 }
 0x118   : > { %v2928_v14 = vadd.f32 %v2165_v7, %v1268_v10  ;;  %v1271_v15 = vadd.f32 %v2104_v11, %v2907_v18 }
 0x11a   : > { %v2931_v16 = vadd.f32 %v2168_v13, %v1271_v15  ;;  %v2105_v17 = vpop.f32.mrb[16].mxu0 }
 0x11b   : > { %v2169_v19 = vpop.f32.mrb[16].mxu1  ;;  %v2106_v20 = vpop.f32.mrb[17].mxu0 }
 0x11c   : > { %v2107_v21 = vadd.f32 %v2106_v20, %v2105_v17  ;;  %v2170_v22 = vpop.f32.mrb[17].mxu1  ;;  %v2108_v23 = vpop.f32.mrb[18].mxu0 }
 0x11d   : > { %v2171_v24 = vadd.f32 %v2170_v22, %v2169_v19  ;;  %v2172_v25 = vpop.f32.mrb[18].mxu1  ;;  %v2109_v26 = vpop.f32.mrb[19].mxu0 }
 0x11e   : > { %v1276_v27 = vadd.f32 %v2107_v21, %v2907_v18  ;;  %v2110_v28 = vadd.f32 %v2109_v26, %v2108_v23  ;;  %v2173_v29 = vpop.f32.mrb[19].mxu1 }
 0x11f   : > { %v2174_v31 = vadd.f32 %v2173_v29, %v2172_v25 }
 0x120   : > { %v2934_v33 = vadd.f32 %v2171_v24, %v1276_v27  ;;  %v1279_v34 = vadd.f32 %v2110_v28, %v2907_v18 }
 0x122   : > { %v2937_v35 = vadd.f32 %v2174_v31, %v1279_v34  ;;  %v2111_v36 = vpop.f32.mrb[20].mxu0 }
 0x123   : > { %v2175_v37 = vpop.f32.mrb[20].mxu1  ;;  %v2112_v38 = vpop.f32.mrb[21].mxu0 }
 0x124   : > { %v2113_v39 = vadd.f32 %v2112_v38, %v2111_v36  ;;  %v2176_v40 = vpop.f32.mrb[21].mxu1  ;;  %v2114_v41 = vpop.f32.mrb[22].mxu0 }
 0x125   : > { %v2177_v42 = vadd.f32 %v2176_v40, %v2175_v37  ;;  %v2178_v43 = vpop.f32.mrb[22].mxu1  ;;  %v2115_v44 = vpop.f32.mrb[23].mxu0 }
 0x126   : > { %v1284_v45 = vadd.f32 %v2113_v39, %v2907_v18  ;;  %v2116_v47 = vadd.f32 %v2115_v44, %v2114_v41  ;;  %v2179_v49 = vpop.f32.mrb[23].mxu1 }
 0x127   : > { %v2180_v50 = vadd.f32 %v2179_v49, %v2178_v43 }
 0x128   : > { %v2940_v51 = vadd.f32 %v2177_v42, %v1284_v45  ;;  %v1287_v52 = vadd.f32 %v2116_v47, %v2907_v18 }
 0x12a   : > { %v2943_v53 = vadd.f32 %v2180_v50, %v1287_v52  ;;  %v2117_v54 = vpop.f32.mrb[24].mxu0 }
 0x12b   : > { %v2181_v55 = vpop.f32.mrb[24].mxu1  ;;  %v2118_v56 = vpop.f32.mrb[25].mxu0 }
 0x12c   : > { %v2119_v57 = vadd.f32 %v2118_v56, %v2117_v54  ;;  %v2182_v58 = vpop.f32.mrb[25].mxu1  ;;  %v2120_v59 = vpop.f32.mrb[26].mxu0 }
 0x12d   : > { %v2183_v60 = vadd.f32 %v2182_v58, %v2181_v55  ;;  %v2184_v61 = vpop.f32.mrb[26].mxu1  ;;  %v2121_v63 = vpop.f32.mrb[27].mxu0 }
 0x12e   : > { %v1292_v1 = vadd.f32 %v2119_v57, %v2907_v18  ;;  %v2122_v2 = vadd.f32 %v2121_v63, %v2120_v59  ;;  %v2185_v3 = vpop.f32.mrb[27].mxu1 }
 0x12f   : > { %v2186_v4 = vadd.f32 %v2185_v3, %v2184_v61 }
 0x130   : > { %v2946_v5 = vadd.f32 %v2183_v60, %v1292_v1  ;;  %v1295_v6 = vadd.f32 %v2122_v2, %v2907_v18 }
 0x132   : > { %v2949_v7 = vadd.f32 %v2186_v4, %v1295_v6  ;;  %v2123_v8 = vpop.f32.mrb[28].mxu0 }
 0x133   : > { %v2187_v9 = vpop.f32.mrb[28].mxu1  ;;  %v2124_v10 = vpop.f32.mrb[29].mxu0 }
 0x134   : > { %v2125_v11 = vadd.f32 %v2124_v10, %v2123_v8  ;;  %v2188_v12 = vpop.f32.mrb[29].mxu1  ;;  %v2126_v13 = vpop.f32.mrb[30].mxu0 }
 0x135   : > { %v2189_v15 = vadd.f32 %v2188_v12, %v2187_v9  ;;  %v2190_v17 = vpop.f32.mrb[30].mxu1  ;;  %v2127_v19 = vpop.f32.mrb[31].mxu0 }
 0x136   : > { %v1300_v20 = vadd.f32 %v2125_v11, %v2907_v18  ;;  %v2128_v21 = vadd.f32 %v2127_v19, %v2126_v13  ;;  %v2191_v22 = vpop.f32.mrb[31].mxu1 }
 0x137   : > { %v2192_v23 = vadd.f32 %v2191_v22, %v2190_v17 }
 0x138   : > { %v2952_v24 = vadd.f32 %v2189_v15, %v1300_v20  ;;  %v1303_v25 = vadd.f32 %v2128_v21, %v2907_v18 }
 0x13a   : > { %v2955_v26 = vadd.f32 %v2192_v23, %v1303_v25  ;;  %v2209_v27 = vpop.f32.mrb[32].mxu0 }
 0x13b   : > { %v2273_v28 = vpop.f32.mrb[32].mxu1  ;;  %v2210_v29 = vpop.f32.mrb[33].mxu0 }
 0x13c   : > { %v2211_v31 = vadd.f32 %v2210_v29, %v2209_v27  ;;  %v2274_v34 = vpop.f32.mrb[33].mxu1  ;;  %v2212_v36 = vpop.f32.mrb[34].mxu0 }
 0x13d   : > { %v2275_v37 = vadd.f32 %v2274_v34, %v2273_v28  ;;  %v2276_v38 = vpop.f32.mrb[34].mxu1  ;;  %v2213_v39 = vpop.f32.mrb[35].mxu0 }
 0x13e   : > { %v1438_v40 = vadd.f32 %v2211_v31, %v2910_v30  ;;  %v2214_v41 = vadd.f32 %v2213_v39, %v2212_v36  ;;  %v2277_v42 = vpop.f32.mrb[35].mxu1 }
 0x13f   : > { %v2278_v43 = vadd.f32 %v2277_v42, %v2276_v38 }
 0x140   : > { %v1441_v44 = vadd.f32 %v2214_v41, %v2913_v32  ;;  %v2959_v45 = vadd.f32 %v2275_v37, %v1438_v40 }
 0x142   : > { %v2215_v18 = vpop.f32.mrb[36].mxu0  ;;  %v2961_v47 = vadd.f32 %v2278_v43, %v1441_v44 }
 0x143   : > { %v2279_v49 = vpop.f32.mrb[36].mxu1  ;;  %v2216_v50 = vpop.f32.mrb[37].mxu0 }
 0x144   : > { %v2217_v52 = vadd.f32 %v2216_v50, %v2215_v18  ;;  %v2280_v54 = vpop.f32.mrb[37].mxu1  ;;  %v2218_v55 = vpop.f32.mrb[38].mxu0 }
 0x145   : > { %v2281_v56 = vadd.f32 %v2280_v54, %v2279_v49  ;;  %v2282_v57 = vpop.f32.mrb[38].mxu1  ;;  %v2219_v58 = vpop.f32.mrb[39].mxu0 }
 0x146   : > { %v1446_v30 = vadd.f32 %v2217_v52, %v2916_v46  ;;  %v2220_v59 = vadd.f32 %v2219_v58, %v2218_v55  ;;  %v2283_v60 = vpop.f32.mrb[39].mxu1 }
 0x147   : > { %v2284_v61 = vadd.f32 %v2283_v60, %v2282_v57 }
 0x148   : > { %v1449_v32 = vadd.f32 %v2220_v59, %v2919_v48  ;;  %v2965_v63 = vadd.f32 %v2281_v56, %v1446_v30 }
 0x14a   : > { %v2221_v1 = vpop.f32.mrb[40].mxu0  ;;  %v2967_v2 = vadd.f32 %v2284_v61, %v1449_v32 }
 0x14b   : > { %v2285_v3 = vpop.f32.mrb[40].mxu1  ;;  %v2222_v4 = vpop.f32.mrb[41].mxu0 }
 0x14c   : > { %v2223_v6 = vadd.f32 %v2222_v4, %v2221_v1  ;;  %v2286_v8 = vpop.f32.mrb[41].mxu1  ;;  %v2224_v9 = vpop.f32.mrb[42].mxu0 }
 0x14d   : > { %v2287_v10 = vadd.f32 %v2286_v8, %v2285_v3  ;;  %v2288_v11 = vpop.f32.mrb[42].mxu1  ;;  %v2225_v12 = vpop.f32.mrb[43].mxu0 }
 0x14e   : > { %v1454_v46 = vadd.f32 %v2223_v6, %v2922_v62  ;;  %v2226_v13 = vadd.f32 %v2225_v12, %v2224_v9  ;;  %v2289_v15 = vpop.f32.mrb[43].mxu1 }
 0x14f   : > { %v2290_v17 = vadd.f32 %v2289_v15, %v2288_v11 }
 0x150   : > { %v1457_v48 = vadd.f32 %v2226_v13, %v2925_v0  ;;  %v2971_v19 = vadd.f32 %v2287_v10, %v1454_v46 }
 0x152   : > { %v2227_v20 = vpop.f32.mrb[44].mxu0  ;;  %v2973_v21 = vadd.f32 %v2290_v17, %v1457_v48 }
 0x153   : > { %v2291_v22 = vpop.f32.mrb[44].mxu1  ;;  %v2228_v23 = vpop.f32.mrb[45].mxu0 }
 0x154   : > { %v2229_v25 = vadd.f32 %v2228_v23, %v2227_v20  ;;  %v2292_v27 = vpop.f32.mrb[45].mxu1  ;;  %v2230_v28 = vpop.f32.mrb[46].mxu0 }
 0x155   : > { %v2293_v29 = vadd.f32 %v2292_v27, %v2291_v22  ;;  %v2294_v31 = vpop.f32.mrb[46].mxu1  ;;  %v2231_v34 = vpop.f32.mrb[47].mxu0 }
 0x156   : > { %v1462_v62 = vadd.f32 %v2229_v25, %v2928_v14  ;;  %v2232_v36 = vadd.f32 %v2231_v34, %v2230_v28  ;;  %v2295_v37 = vpop.f32.mrb[47].mxu1 }
 0x157   : > { %v2296_v38 = vadd.f32 %v2295_v37, %v2294_v31 }
 0x158   : > { %v1465_v0 = vadd.f32 %v2232_v36, %v2931_v16  ;;  %v2977_v39 = vadd.f32 %v2293_v29, %v1462_v62 }
 0x15a   : > { %v2233_v40 = vpop.f32.mrb[48].mxu0  ;;  %v2979_v41 = vadd.f32 %v2296_v38, %v1465_v0 }
 0x15b   : > { %v2297_v42 = vpop.f32.mrb[48].mxu1  ;;  %v2234_v43 = vpop.f32.mrb[49].mxu0 }
 0x15c   : > { %v2235_v44 = vadd.f32 %v2234_v43, %v2233_v40  ;;  %v2298_v18 = vpop.f32.mrb[49].mxu1  ;;  %v2236_v49 = vpop.f32.mrb[50].mxu0 }
 0x15d   : > { %v2299_v50 = vadd.f32 %v2298_v18, %v2297_v42  ;;  %v2300_v52 = vpop.f32.mrb[50].mxu1  ;;  %v2237_v54 = vpop.f32.mrb[51].mxu0 }
 0x15e   : > { %v1470_v14 = vadd.f32 %v2235_v44, %v2934_v33  ;;  %v2238_v55 = vadd.f32 %v2237_v54, %v2236_v49  ;;  %v2301_v56 = vpop.f32.mrb[51].mxu1 }
 0x15f   : > { %v2302_v57 = vadd.f32 %v2301_v56, %v2300_v52 }
 0x160   : > { %v1473_v16 = vadd.f32 %v2238_v55, %v2937_v35  ;;  %v1567_v58 = vadd.f32 %v2299_v50, %v1470_v14 }
 0x162   : > { %v2239_v30 = vpop.f32.mrb[52].mxu0  ;;  %v2983_v59 = vadd.f32 %v2302_v57, %v1473_v16 }
 0x163   : > { %v2303_v60 = vpop.f32.mrb[52].mxu1  ;;  %v2240_v61 = vpop.f32.mrb[53].mxu0 }
 0x164   : > { %v2241_v32 = vadd.f32 %v2240_v61, %v2239_v30  ;;  %v2304_v1 = vpop.f32.mrb[53].mxu1  ;;  %v2242_v3 = vpop.f32.mrb[54].mxu0 }
 0x165   : > { %v2305_v4 = vadd.f32 %v2304_v1, %v2303_v60  ;;  %v2306_v6 = vpop.f32.mrb[54].mxu1  ;;  %v2243_v8 = vpop.f32.mrb[55].mxu0 }
 0x166   : > { %v1478_v9 = vadd.f32 %v2241_v32, %v2940_v51  ;;  %v2244_v33 = vadd.f32 %v2243_v8, %v2242_v3  ;;  %v2307_v10 = vpop.f32.mrb[55].mxu1 }
 0x167   : > { %v2308_v11 = vadd.f32 %v2307_v10, %v2306_v6 }
 0x168   : > { %v1481_v12 = vadd.f32 %v2244_v33, %v2943_v53  ;;  %v1575_v35 = vadd.f32 %v2305_v4, %v1478_v9 }
 0x16a   : > { %v2245_v46 = vpop.f32.mrb[56].mxu0  ;;  %v1578_v13 = vadd.f32 %v2308_v11, %v1481_v12 }
 0x16b   : > { %v2309_v15 = vpop.f32.mrb[56].mxu1  ;;  %v2246_v17 = vpop.f32.mrb[57].mxu0 }
 0x16c   : > { %v2247_v48 = vadd.f32 %v2246_v17, %v2245_v46  ;;  %v2310_v20 = vpop.f32.mrb[57].mxu1  ;;  %v2248_v22 = vpop.f32.mrb[58].mxu0 }
 0x16d   : > { %v2311_v23 = vadd.f32 %v2310_v20, %v2309_v15  ;;  %v2312_v25 = vpop.f32.mrb[58].mxu1  ;;  %v2249_v27 = vpop.f32.mrb[59].mxu0 }
 0x16e   : > { %v1486_v28 = vadd.f32 %v2247_v48, %v2946_v5  ;;  %v2250_v29 = vadd.f32 %v2249_v27, %v2248_v22  ;;  %v2313_v51 = vpop.f32.mrb[59].mxu1 }
 0x16f   : > { %v2314_v31 = vadd.f32 %v2313_v51, %v2312_v25 }
 0x170   : > { %v1489_v34 = vadd.f32 %v2250_v29, %v2949_v7  ;;  %v1583_v62 = vadd.f32 %v2311_v23, %v1486_v28 }
 0x172   : > { %v2251_v53 = vpop.f32.mrb[60].mxu0  ;;  %v1586_v36 = vadd.f32 %v2314_v31, %v1489_v34 }
 0x173   : > { %v2315_v37 = vpop.f32.mrb[60].mxu1  ;;  %v2252_v38 = vpop.f32.mrb[61].mxu0 }
 0x174   : > { %v2253_v0 = vadd.f32 %v2252_v38, %v2251_v53  ;;  %v2316_v40 = vpop.f32.mrb[61].mxu1  ;;  %v2254_v42 = vpop.f32.mrb[62].mxu0 }
 0x175   : > { %v2317_v43 = vadd.f32 %v2316_v40, %v2315_v37  ;;  %v2318_v44 = vpop.f32.mrb[62].mxu1  ;;  %v2255_v18 = vpop.f32.mrb[63].mxu0 }
 0x176   : > { %v1494_v49 = vadd.f32 %v2253_v0, %v2952_v24  ;;  %v2256_v5 = vadd.f32 %v2255_v18, %v2254_v42  ;;  %v2319_v50 = vpop.f32.mrb[63].mxu1 }
 0x177   : > { %v2320_v52 = vadd.f32 %v2319_v50, %v2318_v44 }
 0x178   : > { %v1497_v54 = vadd.f32 %v2256_v5, %v2955_v26  ;;  %v1591_v7 = vadd.f32 %v2317_v43, %v1494_v49 }
 0x17a   : > { %v2355_v14 = vpop.f32.mrb[64].mxu0  ;;  %v1594_v55 = vadd.f32 %v2320_v52, %v1497_v54 }
 0x17b   : > { %v1640_v56 = vadd.f32 %v2355_v14, %v2965_v63  ;;  %v2363_v57 = vpop.f32.mrb[64].mxu1  ;;  %v1631_v16 = vpop.f32.mrb[65].mxu0 }
 0x17c   : > { %v1672_v30 = vadd.f32 %v2363_v57, %v1575_v35  ;;  %v1632_v60 = vadd.f32 %v1631_v16, %v2959_v45  ;;  %v1663_v61 = vpop.f32.mrb[65].mxu1  ;;  %v2356_v32 = vpop.f32.mrb[66].mxu0 }
 0x17d   : > { %v1664_v1 = vadd.f32 %v1663_v61, %v1567_v58  ;;  %v1643_v24 = vadd.f32 %v2356_v32, %v2967_v2  ;;  %v2364_v3 = vpop.f32.mrb[66].mxu1  ;;  %v1634_v4 = vpop.f32.mrb[67].mxu0 }
 0x17e   : > { %v1675_v26 = vadd.f32 %v2364_v3, %v1578_v13  ;;  %v1635_v63 = vadd.f32 %v1634_v4, %v2961_v47  ;;  %v1666_v45 = vpop.f32.mrb[67].mxu1 }
 0x17f   : > { %v2026_v6 = vpack.c.bf16 %v1643_v24, %v1640_v56  ;;  %v1667_v58 = vadd.f32 %v1666_v45, %v2983_v59 }
 0x180   : > { %v2046_v8 = vpack.c.bf16 %v1675_v26, %v1672_v30  ;;  %v2021_v2 = vpack.c.bf16 %v1635_v63, %v1632_v60 }
 0x181   : > { %2058 = vst [vmem:[%s2998_s20 + $0x8] sm:$0xff] %v2026_v6   ;;  %v2041_v9 = vpack.c.bf16 %v1667_v58, %v1664_v1 }
 0x182   : > { %2062 = vst [vmem:[%s2998_s20 + $0x28] sm:$0xff] %v2046_v8   ;;  %2022 = vst [vmem:[%s2998_s20] sm:$0xff] %v2021_v2   ;;  %v2359_v33 = vpop.f32.mrb[68].mxu0 }
 0x183   : > { %2061 = vst [vmem:[%s2998_s20 + $0x20] sm:$0xff] %v2041_v9   ;;  %v1656_v10 = vadd.f32 %v2359_v33, %v2977_v39  ;;  %v2367_v11 = vpop.f32.mrb[68].mxu1  ;;  %v1647_v12 = vpop.f32.mrb[69].mxu0 }
 0x184   : > { %v1688_v35 = vadd.f32 %v2367_v11, %v1591_v7  ;;  %v1648_v47 = vadd.f32 %v1647_v12, %v2971_v19  ;;  %v1679_v46 = vpop.f32.mrb[69].mxu1  ;;  %v2360_v59 = vpop.f32.mrb[70].mxu0 }
 0x185   : > { %v1680_v13 = vadd.f32 %v1679_v46, %v1583_v62  ;;  %v1659_v15 = vadd.f32 %v2360_v59, %v2979_v41  ;;  %v2368_v17 = vpop.f32.mrb[70].mxu1  ;;  %v1650_v48 = vpop.f32.mrb[71].mxu0 }
 0x186   : > { %v1691_v20 = vadd.f32 %v2368_v17, %v1594_v55  ;;  %v1651_v22 = vadd.f32 %v1650_v48, %v2973_v21  ;;  %v1682_v39 = vpop.f32.mrb[71].mxu1 }
 0x187   : > { %v2036_v23 = vpack.c.bf16 %v1659_v15, %v1656_v10  ;;  %v1683_v25 = vadd.f32 %v1682_v39, %v1586_v36 }
 0x188   : > { %v2056_v27 = vpack.c.bf16 %v1691_v20, %v1688_v35  ;;  %v2031_v28 = vpack.c.bf16 %v1651_v22, %v1648_v47 }
 0x189   : > { %2060 = vst [vmem:[%s2998_s20 + $0x18] sm:$0xff] %v2036_v23   ;;  %v2051_v19 = vpack.c.bf16 %v1683_v25, %v1680_v13 }
 0x18a   : > { %2064 = vst [vmem:[%s2998_s20 + $0x38] sm:$0xff] %v2056_v27   ;;  %2059 = vst [vmem:[%s2998_s20 + $0x10] sm:$0xff] %v2031_v28  }
 0x18b   : > { %2063 = vst [vmem:[%s2998_s20 + $0x30] sm:$0xff] %v2051_v19  }
 0x18c PF: > { %s13_s12 = sadd.s32 1, %s2576_s12  }
 0x18d   : > { %p10_p4 = scmp.ge.s32.totalorder %s13_s12, 4  }
 0x18f   :  { %12 = sbr.rel (!%p10_p4) target bundleno = 1 (0x1), region = 62 }

// kernel: tsm_retinanet_forward.31
= control target key start
LH: loop header
LB: loop body
LE: loop exit
PB: predicated region body
PF: predicated region fallthrough
CT: control target
= control target key end

     0   :  { %s2907_s1 = inlined_call_operand.vmem [shape: bf16[1152,128], index: 1, kind: input, shape index: {}]   ;;  %s2908_s0 = inlined_call_operand.vmem [shape: bf16[128,1152], index: 0, kind: input, shape index: {}]   ;;  %s2909_s2 = inlined_call_operand.vmem [shape: f32[1,128], index: 2, kind: input, shape index: {}]   ;;  %s2910_s3 = inlined_call_operand.vmem [shape: bf16[128,128], index: 3, kind: output, shape index: {}]  }
   0x1   :  { %v2159_v0 = vld [vmem:[%s2907_s1 + $0x40] sm:$0xff]   ;;  %v2163_v4 = vld [vmem:[%s2907_s1 + $0x48] sm:$0xff]   ;;  %v2167_v8 = vld [vmem:[%s2907_s1 + $0x50] sm:$0xff]  }
   0x2   :  { %v2160_v1 = vld [vmem:[%s2907_s1 + $0xc0] sm:$0xff]   ;;  %1839 = vmatprep.subr.bf16.mxu0 %v2159_v0  ;;  %v2164_v5 = vld [vmem:[%s2907_s1 + $0xc8] sm:$0xff]   ;;  %v2168_v9 = vld [vmem:[%s2907_s1 + $0xd0] sm:$0xff]  }
   0x3   :  { %v2161_v2 = vld [vmem:[%s2907_s1] sm:$0xff]   ;;  %1903 = vmatprep.subr.bf16.mxu1 %v2160_v1  ;;  %v2165_v6 = vld [vmem:[%s2907_s1 + $0x8] sm:$0xff]   ;;  %v2169_v10 = vld [vmem:[%s2907_s1 + $0x10] sm:$0xff]  }
   0x4   :  { %v2162_v3 = vld [vmem:[%s2907_s1 + $0x80] sm:$0xff]   ;;  %1840 = vmatpush3.bf16.msra.mxu0 %v2161_v2  ;;  %v2166_v7 = vld [vmem:[%s2907_s1 + $0x88] sm:$0xff]   ;;  %v2170_v11 = vld [vmem:[%s2907_s1 + $0x90] sm:$0xff]  }
   0x5   :  { %1904 = vmatpush3.bf16.msra.mxu1 %v2162_v3  ;;  %1841 = vmatprep.subr.bf16.mxu0 %v2163_v4  ;;  %v2171_v12 = vld [vmem:[%s2907_s1 + $0x58] sm:$0xff]   ;;  %v2175_v16 = vld [vmem:[%s2907_s1 + $0x60] sm:$0xff]   ;;  %v2179_v20 = vld [vmem:[%s2907_s1 + $0x68] sm:$0xff]  }
   0x6   :  { %1905 = vmatprep.subr.bf16.mxu1 %v2164_v5  ;;  %v2172_v13 = vld [vmem:[%s2907_s1 + $0xd8] sm:$0xff]   ;;  %v2176_v17 = vld [vmem:[%s2907_s1 + $0xe0] sm:$0xff]   ;;  %v2180_v21 = vld [vmem:[%s2907_s1 + $0xe8] sm:$0xff]  }
   0x7   :  { %v2173_v14 = vld [vmem:[%s2907_s1 + $0x18] sm:$0xff]   ;;  %v2177_v18 = vld [vmem:[%s2907_s1 + $0x20] sm:$0xff]   ;;  %v2181_v22 = vld [vmem:[%s2907_s1 + $0x28] sm:$0xff]  }
   0x8   :  { %1842 = vmatpush3.bf16.msra.mxu0 %v2165_v6  ;;  %v2174_v15 = vld [vmem:[%s2907_s1 + $0x98] sm:$0xff]   ;;  %v2178_v19 = vld [vmem:[%s2907_s1 + $0xa0] sm:$0xff]   ;;  %v2182_v23 = vld [vmem:[%s2907_s1 + $0xa8] sm:$0xff]  }
   0x9   :  { %1906 = vmatpush3.bf16.msra.mxu1 %v2166_v7  ;;  %1843 = vmatprep.subr.bf16.mxu0 %v2167_v8  ;;  %v2183_v24 = vld [vmem:[%s2907_s1 + $0x70] sm:$0xff]   ;;  %v2187_v28 = vld [vmem:[%s2907_s1 + $0x78] sm:$0xff]   ;;  %v2191_v32 = vld [vmem:[%s2908_s0] ss:$36 sps:$4 sm:$0xff]  }
   0xa   :  { %1907 = vmatprep.subr.bf16.mxu1 %v2168_v9  ;;  %v2184_v25 = vld [vmem:[%s2907_s1 + $0xf0] sm:$0xff]   ;;  %v2188_v29 = vld [vmem:[%s2907_s1 + $0xf8] sm:$0xff]   ;;  %v2193_v33 = vld [vmem:[%s2908_s0 + $0x4] ss:$36 sps:$4 sm:$0xff]  }
   0xb   :  { %v2185_v26 = vld [vmem:[%s2907_s1 + $0x30] sm:$0xff]   ;;  %v2189_v30 = vld [vmem:[%s2907_s1 + $0x38] sm:$0xff]   ;;  %v2194_v34 = vld [vmem:[%s2908_s0 + $0x8] ss:$36 sps:$4 sm:$0xff]   ;;  %1078 = vmatprep.mubr.bf16.mxu0 %v2193_v33 }
   0xc   :  { %1844 = vmatpush3.bf16.msra.mxu0 %v2169_v10  ;;  %v2186_v27 = vld [vmem:[%s2907_s1 + $0xb0] sm:$0xff]   ;;  %v2190_v31 = vld [vmem:[%s2907_s1 + $0xb8] sm:$0xff]   ;;  %v2197_v36 = vld [vmem:[%s2907_s1 + $0x140] sm:$0xff]  }
   0xd   :  { %1908 = vmatpush3.bf16.msra.mxu1 %v2170_v11  ;;  %1845 = vmatprep.subr.bf16.mxu0 %v2171_v12  ;;  %v2196_v35 = vld [vmem:[%s2908_s0 + $0xc] ss:$36 sps:$4 sm:$0xff]   ;;  %v2198_v37 = vld [vmem:[%s2907_s1 + $0x1c0] sm:$0xff]   ;;  %v2203_v41 = vld [vmem:[%s2908_s0 + $0x54] ss:$36 sps:$4 sm:$0xff]  }
   0xe   :  { %1909 = vmatprep.subr.bf16.mxu1 %v2172_v13  ;;  %1175 = vmatprep.mubr.bf16.mxu1 %v2196_v35  ;;  %v2199_v38 = vld [vmem:[%s2907_s1 + $0x100] sm:$0xff]   ;;  %v2201_v40 = vld [vmem:[%s2908_s0 + $0x4c] ss:$36 sps:$4 sm:$0xff]   ;;  %v2211_v48 = vld [vmem:[%s2908_s0 + $0x94] ss:$36 sps:$4 sm:$0xff]  }
   0xf   :  { %v2200_v39 = vld [vmem:[%s2907_s1 + $0x180] sm:$0xff]   ;;  %v2205_v42 = vld [vmem:[%s2908_s0 + $0x48] ss:$36 sps:$4 sm:$0xff]   ;;  %v2206_v43 = vld [vmem:[%s2908_s0 + $0x50] ss:$36 sps:$4 sm:$0xff]  }
  0x10   :  { %1846 = vmatpush3.bf16.msra.mxu0 %v2173_v14  ;;  %v2207_v44 = vld [vmem:[%s2907_s1 + $0x148] sm:$0xff]   ;;  %v2213_v49 = vld [vmem:[%s2908_s0 + $0x9c] ss:$36 sps:$4 sm:$0xff]   ;;  %v2215_v50 = vld [vmem:[%s2908_s0 + $0x90] ss:$36 sps:$4 sm:$0xff]  }
  0x11   :  { %1910 = vmatpush3.bf16.msra.mxu1 %v2174_v15  ;;  %1847 = vmatprep.subr.bf16.mxu0 %v2175_v16  ;;  %v2208_v45 = vld [vmem:[%s2907_s1 + $0x1c8] sm:$0xff]   ;;  %v2216_v51 = vld [vmem:[%s2908_s0 + $0x98] ss:$36 sps:$4 sm:$0xff]   ;;  %v2217_v52 = vld [vmem:[%s2907_s1 + $0x150] sm:$0xff]  }
  0x12   :  { %1911 = vmatprep.subr.bf16.mxu1 %v2176_v17  ;;  %v2209_v46 = vld [vmem:[%s2907_s1 + $0x108] sm:$0xff]   ;;  %v2218_v53 = vld [vmem:[%s2907_s1 + $0x1d0] sm:$0xff]   ;;  %v2221_v56 = vld [vmem:[%s2908_s0 + $0xdc] ss:$36 sps:$4 sm:$0xff]  }
  0x13   :  { %v2210_v47 = vld [vmem:[%s2907_s1 + $0x188] sm:$0xff]   ;;  %v2219_v54 = vld [vmem:[%s2907_s1 + $0x110] sm:$0xff]   ;;  %v2225_v58 = vld [vmem:[%s2908_s0 + $0xd8] ss:$36 sps:$4 sm:$0xff]  }
  0x14   :  { %1848 = vmatpush3.bf16.msra.mxu0 %v2177_v18  ;;  %v2220_v55 = vld [vmem:[%s2907_s1 + $0x190] sm:$0xff]   ;;  %v2223_v57 = vld [vmem:[%s2908_s0 + $0xe4] ss:$36 sps:$4 sm:$0xff]   ;;  %v2227_v60 = vld [vmem:[%s2907_s1 + $0x158] sm:$0xff]  }
  0x15   :  { %1912 = vmatpush3.bf16.msra.mxu1 %v2178_v19  ;;  %1849 = vmatprep.subr.bf16.mxu0 %v2179_v20  ;;  %v2226_v59 = vld [vmem:[%s2908_s0 + $0xe0] ss:$36 sps:$4 sm:$0xff]   ;;  %v2228_v61 = vld [vmem:[%s2907_s1 + $0x1d8] sm:$0xff]   ;;  %v2233_v1 = vld [vmem:[%s2908_s0 + $0x12c] ss:$36 sps:$4 sm:$0xff]  }
  0x16   :  { %1913 = vmatprep.subr.bf16.mxu1 %v2180_v21  ;;  %v2229_v62 = vld [vmem:[%s2907_s1 + $0x118] sm:$0xff]   ;;  %v2231_v0 = vld [vmem:[%s2908_s0 + $0x124] ss:$36 sps:$4 sm:$0xff]   ;;  %v2241_v8 = vld [vmem:[%s2908_s0 + $0x16c] ss:$36 sps:$4 sm:$0xff]  }
  0x17   :  { %v2230_v63 = vld [vmem:[%s2907_s1 + $0x198] sm:$0xff]   ;;  %v2235_v2 = vld [vmem:[%s2908_s0 + $0x120] ss:$36 sps:$4 sm:$0xff]   ;;  %v2236_v4 = vld [vmem:[%s2908_s0 + $0x128] ss:$36 sps:$4 sm:$0xff]  }
  0x18   :  { %1850 = vmatpush3.bf16.msra.mxu0 %v2181_v22  ;;  %v2237_v3 = vld [vmem:[%s2907_s1 + $0x160] sm:$0xff]   ;;  %v2243_v9 = vld [vmem:[%s2908_s0 + $0x174] ss:$36 sps:$4 sm:$0xff]   ;;  %v2247_v10 = vld [vmem:[%s2907_s1 + $0x168] sm:$0xff]  }
  0x19   :  { %1914 = vmatpush3.bf16.msra.mxu1 %v2182_v23  ;;  %1851 = vmatprep.subr.bf16.mxu0 %v2183_v24  ;;  %v2238_v5 = vld [vmem:[%s2907_s1 + $0x1e0] sm:$0xff]   ;;  %v2248_v11 = vld [vmem:[%s2907_s1 + $0x1e8] sm:$0xff]   ;;  %v2246_v15 = vld [vmem:[%s2908_s0 + $0x170] ss:$36 sps:$4 sm:$0xff]  }
  0x1a   :  { %1915 = vmatprep.subr.bf16.mxu1 %v2184_v25  ;;  %v2239_v6 = vld [vmem:[%s2907_s1 + $0x120] sm:$0xff]   ;;  %v2245_v12 = vld [vmem:[%s2908_s0 + $0x168] ss:$36 sps:$4 sm:$0xff]   ;;  %v2251_v16 = vld [vmem:[%s2908_s0 + $0x1b4] ss:$36 sps:$4 sm:$0xff]  }
  0x1b   :  { %v2240_v7 = vld [vmem:[%s2907_s1 + $0x1a0] sm:$0xff]   ;;  %v2249_v13 = vld [vmem:[%s2907_s1 + $0x128] sm:$0xff]   ;;  %v2257_v18 = vld [vmem:[%s2907_s1 + $0x170] sm:$0xff]  }
  0x1c   :  { %1852 = vmatpush3.bf16.msra.mxu0 %v2185_v26  ;;  %v2250_v14 = vld [vmem:[%s2907_s1 + $0x1a8] sm:$0xff]   ;;  %v2253_v17 = vld [vmem:[%s2908_s0 + $0x1bc] ss:$36 sps:$4 sm:$0xff]   ;;  %v2258_v19 = vld [vmem:[%s2907_s1 + $0x1f0] sm:$0xff]  }
  0x1d   :  { %1916 = vmatpush3.bf16.msra.mxu1 %v2186_v27  ;;  %1853 = vmatprep.subr.bf16.mxu0 %v2187_v28  ;;  %v2259_v20 = vld [vmem:[%s2907_s1 + $0x130] sm:$0xff]   ;;  %v2256_v23 = vld [vmem:[%s2908_s0 + $0x1b8] ss:$36 sps:$4 sm:$0xff]   ;;  %v2263_v25 = vld [vmem:[%s2908_s0 + $0x204] ss:$36 sps:$4 sm:$0xff]  }
  0x1e   :  { %1917 = vmatprep.subr.bf16.mxu1 %v2188_v29  ;;  %v2260_v21 = vld [vmem:[%s2907_s1 + $0x1b0] sm:$0xff]   ;;  %v2261_v24 = vld [vmem:[%s2908_s0 + $0x1fc] ss:$36 sps:$4 sm:$0xff]  }
  0x1f   :  { %v2255_v22 = vld [vmem:[%s2908_s0 + $0x1b0] ss:$36 sps:$4 sm:$0xff]   ;;  %v2267_v26 = vld [vmem:[%s2907_s1 + $0x178] sm:$0xff]  }
  0x20   :  { %1854 = vmatpush3.bf16.msra.mxu0 %v2189_v30  ;;  %v2268_v27 = vld [vmem:[%s2907_s1 + $0x1f8] sm:$0xff]   ;;  %v2271_v35 = vld [vmem:[%s2908_s0 + $0x10] ss:$36 sps:$4 sm:$0xff]  }
  0x21   :  { %1918 = vmatpush3.bf16.msra.mxu1 %v2190_v31  ;;  %1967 = vmatprep.subr.bf16.mxu0 %v2197_v36  ;;  %v2269_v28 = vld [vmem:[%s2907_s1 + $0x138] sm:$0xff]   ;;  %v2266_v31 = vld [vmem:[%s2908_s0 + $0x200] ss:$36 sps:$4 sm:$0xff]  }
  0x22   :  { %2031 = vmatprep.subr.bf16.mxu1 %v2198_v37  ;;  %v2270_v29 = vld [vmem:[%s2907_s1 + $0x1b8] sm:$0xff]  }
  0x23   :  { %1079 = vmatmul.mubr.bf16.vlgmr.msra.gmra.mrb[0].mxu0 %v2191_v32  ;;  %v2265_v30 = vld [vmem:[%s2908_s0 + $0x1f8] ss:$36 sps:$4 sm:$0xff]   ;;  %v2277_v32 = vld [vmem:[%s2907_s1 + $0x200] sm:$0xff]  }
  0x24   :  { %1176 = vmatmul.mubr.bf16.vlgmr.msra.gmra.mrb[0].mxu1 %v2194_v34  ;;  %1968 = vmatpush3.bf16.msra.mxu0 %v2199_v38  ;;  %v2273_v33 = vld [vmem:[%s2908_s0 + $0x14] ss:$36 sps:$4 sm:$0xff]   ;;  %v2276_v34 = vld [vmem:[%s2908_s0 + $0x1c] ss:$36 sps:$4 sm:$0xff]   ;;  %v2280_v38 = vld [vmem:[%s2908_s0 + $0x64] ss:$36 sps:$4 sm:$0xff]  }
  0x25   :  { %2032 = vmatpush3.bf16.msra.mxu1 %v2200_v39  ;;  %1086 = vmatprep.mubr.bf16.mxu0 %v2201_v40  ;;  %v2274_v36 = vld [vmem:[%s2908_s0 + $0x18] ss:$36 sps:$4 sm:$0xff]   ;;  %v2284_v39 = vld [vmem:[%s2907_s1 + $0x208] sm:$0xff]   ;;  %v2291_v40 = vld [vmem:[%s2907_s1 + $0x210] sm:$0xff]  }
  0x26   :  { %1183 = vmatprep.mubr.bf16.mxu1 %v2203_v41  ;;  %1969 = vmatprep.subr.bf16.mxu0 %v2207_v44  ;;  %v2278_v37 = vld [vmem:[%s2908_s0 + $0x5c] ss:$36 sps:$4 sm:$0xff]   ;;  %v2287_v44 = vld [vmem:[%s2908_s0 + $0xac] ss:$36 sps:$4 sm:$0xff]  }
  0x27   :  { %2033 = vmatprep.subr.bf16.mxu1 %v2208_v45  ;;  %v2282_v41 = vld [vmem:[%s2908_s0 + $0x58] ss:$36 sps:$4 sm:$0xff]  }
  0x28   :  { %1970 = vmatpush3.bf16.msra.mxu0 %v2209_v46  ;;  %v2298_v45 = vld [vmem:[%s2907_s1 + $0x218] sm:$0xff]   ;;  %v2305_v46 = vld [vmem:[%s2907_s1 + $0x220] sm:$0xff]  }
  0x29   :  { %2034 = vmatpush3.bf16.msra.mxu1 %v2210_v47  ;;  %1971 = vmatprep.subr.bf16.mxu0 %v2217_v52  ;;  %v2289_v47 = vld [vmem:[%s2908_s0 + $0xa0] ss:$36 sps:$4 sm:$0xff]   ;;  %v2296_v52 = vld [vmem:[%s2908_s0 + $0xe8] ss:$36 sps:$4 sm:$0xff]  }
  0x2a   :  { %2035 = vmatprep.subr.bf16.mxu1 %v2218_v53  ;;  %v2319_v53 = vld [vmem:[%s2907_s1 + $0x230] sm:$0xff]  }
  0x2b   :  { %1087 = vmatmul.mubr.bf16.gmra.mrb[4].mxu0 %v2205_v42  ;;  %v2283_v42 = vld [vmem:[%s2908_s0 + $0x60] ss:$36 sps:$4 sm:$0xff]  }
  0x2c   :  { %1184 = vmatmul.mubr.bf16.gmra.mrb[4].mxu1 %v2206_v43  ;;  %1094 = vmatprep.mubr.bf16.mxu0 %v2211_v48  ;;  %v2285_v43 = vld [vmem:[%s2908_s0 + $0xa4] ss:$36 sps:$4 sm:$0xff]  }
  0x2d   :  { %1191 = vmatprep.mubr.bf16.mxu1 %v2213_v49  ;;  %1972 = vmatpush3.bf16.msra.mxu0 %v2219_v54  ;;  %v2290_v48 = vld [vmem:[%s2908_s0 + $0xa8] ss:$36 sps:$4 sm:$0xff]   ;;  %v2297_v54 = vld [vmem:[%s2908_s0 + $0xf0] ss:$36 sps:$4 sm:$0xff]  }
  0x2e   :  { %2036 = vmatpush3.bf16.msra.mxu1 %v2220_v55  ;;  %1973 = vmatprep.subr.bf16.mxu0 %v2227_v60  ;;  %v2292_v49 = vld [vmem:[%s2908_s0 + $0xec] ss:$36 sps:$4 sm:$0xff]   ;;  %v2299_v55 = vld [vmem:[%s2908_s0 + $0x134] ss:$36 sps:$4 sm:$0xff]   ;;  %v2306_v60 = vld [vmem:[%s2908_s0 + $0x17c] ss:$36 sps:$4 sm:$0xff]  }
  0x2f   :  { %2037 = vmatprep.subr.bf16.mxu1 %v2228_v61  ;;  %v2308_v61 = vld [vmem:[%s2908_s0 + $0x184] ss:$36 sps:$4 sm:$0xff]  }
  0x31   :  { %1974 = vmatpush3.bf16.msra.mxu0 %v2229_v62  ;;  %v2310_v62 = vld [vmem:[%s2908_s0 + $0x178] ss:$36 sps:$4 sm:$0xff]  }
  0x32   :  { %2038 = vmatpush3.bf16.msra.mxu1 %v2230_v63  ;;  %1975 = vmatprep.subr.bf16.mxu0 %v2237_v3  ;;  %v2311_v63 = vld [vmem:[%s2908_s0 + $0x180] ss:$36 sps:$4 sm:$0xff]   ;;  %v2318_v3 = vld [vmem:[%s2908_s0 + $0x1c8] ss:$36 sps:$4 sm:$0xff]  }
  0x33   :  { %1095 = vmatmul.mubr.bf16.gmra.mrb[8].mxu0 %v2215_v50  ;;  %2039 = vmatprep.subr.bf16.mxu1 %v2238_v5  ;;  %v2294_v50 = vld [vmem:[%s2908_s0 + $0xf4] ss:$36 sps:$4 sm:$0xff]  }
  0x34   :  { %1192 = vmatmul.mubr.bf16.gmra.mrb[8].mxu1 %v2216_v51  ;;  %1102 = vmatprep.mubr.bf16.mxu0 %v2221_v56  ;;  %v2312_v51 = vld [vmem:[%s2907_s1 + $0x228] sm:$0xff]   ;;  %v2301_v56 = vld [vmem:[%s2908_s0 + $0x13c] ss:$36 sps:$4 sm:$0xff]   ;;  %v2322_v5 = vld [vmem:[%s2908_s0 + $0x214] ss:$36 sps:$4 sm:$0xff]  }
  0x35   :  { %1199 = vmatprep.mubr.bf16.mxu1 %v2223_v57  ;;  %1976 = vmatpush3.bf16.msra.mxu0 %v2239_v6  ;;  %v2326_v57 = vld [vmem:[%s2907_s1 + $0x238] sm:$0xff]   ;;  %v2324_v6 = vld [vmem:[%s2908_s0 + $0x208] ss:$36 sps:$4 sm:$0xff]  }
  0x36   :  { %2040 = vmatpush3.bf16.msra.mxu1 %v2240_v7  ;;  %1977 = vmatprep.subr.bf16.mxu0 %v2247_v10  ;;  %v2325_v7 = vld [vmem:[%s2908_s0 + $0x210] ss:$36 sps:$4 sm:$0xff]   ;;  %v2329_v10 = vld [vmem:[%s2908_s0 + $0x68] ss:$36 sps:$4 sm:$0xff]  }
  0x37   :  { %2041 = vmatprep.subr.bf16.mxu1 %v2248_v11  ;;  %v2330_v11 = vld [vmem:[%s2908_s0 + $0x188] ss:$36 sps:$4 sm:$0xff]  }
  0x39   :  { %1978 = vmatpush3.bf16.msra.mxu0 %v2249_v13  ;;  %v2332_v13 = vld [vmem:[%s2908_s0 + $0x1d0] ss:$36 sps:$4 sm:$0xff]  }
  0x3a   :  { %2042 = vmatpush3.bf16.msra.mxu1 %v2250_v14  ;;  %1979 = vmatprep.subr.bf16.mxu0 %v2257_v18  ;;  %v2333_v14 = vld [vmem:[%s2908_s0 + $0xf8] ss:$36 sps:$4 sm:$0xff]   ;;  %v2790_v18 = vld [vmem:[%s2909_s2] ss:$0 sm:$0xff] }
  0x3b   :  { %1103 = vmatmul.mubr.bf16.gmra.mrb[12].mxu0 %v2225_v58  ;;  %2043 = vmatprep.subr.bf16.mxu1 %v2258_v19  ;;  %v2303_v58 = vld [vmem:[%s2908_s0 + $0x130] ss:$36 sps:$4 sm:$0xff]  }
  0x3c   :  { %1200 = vmatmul.mubr.bf16.gmra.mrb[12].mxu1 %v2226_v59  ;;  %1110 = vmatprep.mubr.bf16.mxu0 %v2231_v0  ;;  %v2304_v59 = vld [vmem:[%s2908_s0 + $0x138] ss:$36 sps:$4 sm:$0xff]   ;;  %v2313_v0 = vld [vmem:[%s2908_s0 + $0x1c4] ss:$36 sps:$4 sm:$0xff]  }
  0x3d   :  { %1207 = vmatprep.mubr.bf16.mxu1 %v2233_v1  ;;  %1980 = vmatpush3.bf16.msra.mxu0 %v2259_v20  ;;  %v2315_v1 = vld [vmem:[%s2908_s0 + $0x1cc] ss:$36 sps:$4 sm:$0xff]  }
  0x3e   :  { %2044 = vmatpush3.bf16.msra.mxu1 %v2260_v21  ;;  %1981 = vmatprep.subr.bf16.mxu0 %v2267_v26 }
  0x3f   :  { %2045 = vmatprep.subr.bf16.mxu1 %v2268_v27 }
  0x41   :  { %1982 = vmatpush3.bf16.msra.mxu0 %v2269_v28 }
  0x42   :  { %2046 = vmatpush3.bf16.msra.mxu1 %v2270_v29  ;;  %2111 = vmatprep.subr.bf16.mxu0 %v2277_v32 }
  0x43   :  { %1111 = vmatmul.mubr.bf16.gmra.mrb[16].mxu0 %v2235_v2  ;;  %2143 = vmatprep.subr.bf16.mxu1 %v2277_v32  ;;  %v2317_v2 = vld [vmem:[%s2908_s0 + $0x1c0] ss:$36 sps:$4 sm:$0xff]  }
  0x44   :  { %1208 = vmatmul.mubr.bf16.gmra.mrb[16].mxu1 %v2236_v4  ;;  %1118 = vmatprep.mubr.bf16.mxu0 %v2241_v8  ;;  %v2320_v4 = vld [vmem:[%s2908_s0 + $0x20c] ss:$36 sps:$4 sm:$0xff]   ;;  %v2327_v8 = vld [vmem:[%s2908_s0 + $0x20] ss:$36 sps:$4 sm:$0xff]  }
  0x45   :  { %1215 = vmatprep.mubr.bf16.mxu1 %v2243_v9  ;;  %v2328_v9 = vld [vmem:[%s2908_s0 + $0x140] ss:$36 sps:$4 sm:$0xff]  }
  0x4b   :  { %1119 = vmatmul.mubr.bf16.gmra.mrb[20].mxu0 %v2245_v12  ;;  %v2331_v12 = vld [vmem:[%s2908_s0 + $0xb0] ss:$36 sps:$4 sm:$0xff]  }
  0x4c   :  { %1216 = vmatmul.mubr.bf16.gmra.mrb[20].mxu1 %v2246_v15  ;;  %1126 = vmatprep.mubr.bf16.mxu0 %v2251_v16  ;;  %v2334_v15 = vld [vmem:[%s2908_s0 + $0x218] ss:$36 sps:$4 sm:$0xff]  }
  0x4d   :  { %1223 = vmatprep.mubr.bf16.mxu1 %v2253_v17 }
  0x53   :  { %1127 = vmatmul.mubr.bf16.gmra.mrb[24].mxu0 %v2255_v22 }
  0x54   :  { %1224 = vmatmul.mubr.bf16.gmra.mrb[24].mxu1 %v2256_v23  ;;  %1134 = vmatprep.mubr.bf16.mxu0 %v2261_v24 }
  0x55   :  { %1231 = vmatprep.mubr.bf16.mxu1 %v2263_v25 }
  0x5b   :  { %1135 = vmatmul.mubr.bf16.gmra.mrb[28].mxu0 %v2265_v30 }
  0x5c   :  { %1232 = vmatmul.mubr.bf16.gmra.mrb[28].mxu1 %v2266_v31  ;;  %1272 = vmatprep.mubr.bf16.mxu0 %v2273_v33 }
  0x5d   :  { %1369 = vmatprep.mubr.bf16.mxu1 %v2276_v34 }
  0x63   :  { %1273 = vmatmul.mubr.bf16.vlgmr.msra.gmra.mrb[32].mxu0 %v2271_v35 }
  0x64   :  { %1370 = vmatmul.mubr.bf16.vlgmr.msra.gmra.mrb[32].mxu1 %v2274_v36  ;;  %2112 = vmatpush3.bf16.msra.mxu0 %v2277_v32 }
  0x65   :  { %2151 = vmatpush3.bf16.msra.mxu1 %v2277_v32  ;;  %1280 = vmatprep.mubr.bf16.mxu0 %v2278_v37 }
  0x66   :  { %1377 = vmatprep.mubr.bf16.mxu1 %v2280_v38  ;;  %2113 = vmatprep.subr.bf16.mxu0 %v2284_v39 }
  0x67   :  { %2144 = vmatprep.subr.bf16.mxu1 %v2284_v39 }
  0x68   :  { %2114 = vmatpush3.bf16.msra.mxu0 %v2284_v39 }
  0x69   :  { %2152 = vmatpush3.bf16.msra.mxu1 %v2284_v39  ;;  %2115 = vmatprep.subr.bf16.mxu0 %v2291_v40 }
  0x6a   :  { %2145 = vmatprep.subr.bf16.mxu1 %v2291_v40 }
  0x6b   :  { %1281 = vmatmul.mubr.bf16.gmra.mrb[36].mxu0 %v2282_v41 }
  0x6c   :  { %1378 = vmatmul.mubr.bf16.gmra.mrb[36].mxu1 %v2283_v42  ;;  %1288 = vmatprep.mubr.bf16.mxu0 %v2285_v43 }
  0x6d   :  { %1385 = vmatprep.mubr.bf16.mxu1 %v2287_v44  ;;  %2116 = vmatpush3.bf16.msra.mxu0 %v2291_v40 }
  0x6e   :  { %2153 = vmatpush3.bf16.msra.mxu1 %v2291_v40  ;;  %2117 = vmatprep.subr.bf16.mxu0 %v2298_v45 }
  0x6f   :  { %2146 = vmatprep.subr.bf16.mxu1 %v2298_v45 }
  0x71   :  { %2118 = vmatpush3.bf16.msra.mxu0 %v2298_v45 }
  0x72   :  { %2154 = vmatpush3.bf16.msra.mxu1 %v2298_v45  ;;  %2119 = vmatprep.subr.bf16.mxu0 %v2305_v46 }
  0x73   :  { %1289 = vmatmul.mubr.bf16.gmra.mrb[40].mxu0 %v2289_v47  ;;  %2147 = vmatprep.subr.bf16.mxu1 %v2305_v46 }
  0x74   :  { %1386 = vmatmul.mubr.bf16.gmra.mrb[40].mxu1 %v2290_v48  ;;  %1296 = vmatprep.mubr.bf16.mxu0 %v2292_v49 }
  0x75   :  { %1393 = vmatprep.mubr.bf16.mxu1 %v2294_v50  ;;  %2120 = vmatpush3.bf16.msra.mxu0 %v2305_v46 }
  0x76   :  { %2155 = vmatpush3.bf16.msra.mxu1 %v2305_v46  ;;  %2121 = vmatprep.subr.bf16.mxu0 %v2312_v51 }
  0x77   :  { %2148 = vmatprep.subr.bf16.mxu1 %v2312_v51 }
  0x79   :  { %2122 = vmatpush3.bf16.msra.mxu0 %v2312_v51 }
  0x7a   :  { %2156 = vmatpush3.bf16.msra.mxu1 %v2312_v51  ;;  %2123 = vmatprep.subr.bf16.mxu0 %v2319_v53 }
  0x7b   :  { %1297 = vmatmul.mubr.bf16.gmra.mrb[44].mxu0 %v2296_v52  ;;  %2149 = vmatprep.subr.bf16.mxu1 %v2319_v53 }
  0x7c   :  { %1394 = vmatmul.mubr.bf16.gmra.mrb[44].mxu1 %v2297_v54  ;;  %1304 = vmatprep.mubr.bf16.mxu0 %v2299_v55 }
  0x7d   :  { %1401 = vmatprep.mubr.bf16.mxu1 %v2301_v56  ;;  %2124 = vmatpush3.bf16.msra.mxu0 %v2319_v53 }
  0x7e   :  { %2157 = vmatpush3.bf16.msra.mxu1 %v2319_v53  ;;  %2125 = vmatprep.subr.bf16.mxu0 %v2326_v57 }
  0x7f   :  { %2150 = vmatprep.subr.bf16.mxu1 %v2326_v57 }
  0x81   :  { %2126 = vmatpush3.bf16.msra.mxu0 %v2326_v57 }
  0x82   :  { %2158 = vmatpush3.bf16.msra.mxu1 %v2326_v57 }
  0x83   :  { %1305 = vmatmul.mubr.bf16.gmra.mrb[48].mxu0 %v2303_v58 }
  0x84   :  { %1402 = vmatmul.mubr.bf16.gmra.mrb[48].mxu1 %v2304_v59  ;;  %1312 = vmatprep.mubr.bf16.mxu0 %v2306_v60 }
  0x85   :  { %1409 = vmatprep.mubr.bf16.mxu1 %v2308_v61 }
  0x8b   :  { %1313 = vmatmul.mubr.bf16.gmra.mrb[52].mxu0 %v2310_v62 }
  0x8c   :  { %1410 = vmatmul.mubr.bf16.gmra.mrb[52].mxu1 %v2311_v63  ;;  %1320 = vmatprep.mubr.bf16.mxu0 %v2313_v0 }
  0x8d   :  { %1417 = vmatprep.mubr.bf16.mxu1 %v2315_v1 }
  0x93   :  { %1321 = vmatmul.mubr.bf16.gmra.mrb[56].mxu0 %v2317_v2 }
  0x94   :  { %1418 = vmatmul.mubr.bf16.gmra.mrb[56].mxu1 %v2318_v3  ;;  %1328 = vmatprep.mubr.bf16.mxu0 %v2320_v4 }
  0x95   :  { %1425 = vmatprep.mubr.bf16.mxu1 %v2322_v5 }
  0x9b   :  { %1329 = vmatmul.mubr.bf16.gmra.mrb[60].mxu0 %v2324_v6 }
  0x9c   :  { %1426 = vmatmul.mubr.bf16.gmra.mrb[60].mxu1 %v2325_v7  ;;  %2127 = vmatprep.mubr.bf16.mxu0 %v2327_v8 }
  0x9d   :  { %2135 = vmatprep.mubr.bf16.mxu1 %v2328_v9 }
  0xa3   :  { %2128 = vmatmul.mubr.bf16.vlgmr.msra.gmra.mrb[64].mxu0 %v2329_v10 }
  0xa4   :  { %2136 = vmatmul.mubr.bf16.vlgmr.msra.gmra.mrb[64].mxu1 %v2330_v11  ;;  %2131 = vmatprep.mubr.bf16.mxu0 %v2331_v12 }
  0xa5   :  { %2139 = vmatprep.mubr.bf16.mxu1 %v2332_v13 }
  0xab   :  { %2132 = vmatmul.mubr.bf16.gmra.mrb[68].mxu0 %v2333_v14 }
  0xac   :  { %2140 = vmatmul.mubr.bf16.gmra.mrb[68].mxu1 %v2334_v15 }
  0xf6   :  { %v1855_v16 = vpop.f32.mrb[0].mxu0 }
  0xf7   :  { %v1919_v17 = vpop.f32.mrb[0].mxu1  ;;  %v1856_v19 = vpop.f32.mrb[1].mxu0 }
  0xf8   :  { %v1857_v20 = vadd.f32 %v1856_v19, %v1855_v16  ;;  %v1920_v21 = vpop.f32.mrb[1].mxu1  ;;  %v1858_v22 = vpop.f32.mrb[2].mxu0 }
  0xf9   :  { %v1921_v23 = vadd.f32 %v1920_v21, %v1919_v17  ;;  %v1922_v24 = vpop.f32.mrb[2].mxu1  ;;  %v1859_v25 = vpop.f32.mrb[3].mxu0 }
  0xfa   :  { %v1081_v26 = vadd.f32 %v1857_v20, %v2790_v18  ;;  %v1860_v27 = vadd.f32 %v1859_v25, %v1858_v22  ;;  %v1923_v28 = vpop.f32.mrb[3].mxu1 }
  0xfb   :  { %v1924_v29 = vadd.f32 %v1923_v28, %v1922_v24 }
  0xfc   :  { %v2793_v30 = vadd.f32 %v1921_v23, %v1081_v26  ;;  %v1084_v31 = vadd.f32 %v1860_v27, %v2790_v18 }
  0xfe   :  { %v2796_v32 = vadd.f32 %v1924_v29, %v1084_v31  ;;  %v1861_v33 = vpop.f32.mrb[4].mxu0 }
  0xff   :  { %v1925_v34 = vpop.f32.mrb[4].mxu1  ;;  %v1862_v35 = vpop.f32.mrb[5].mxu0 }
 0x100   :  { %v1863_v36 = vadd.f32 %v1862_v35, %v1861_v33  ;;  %v1926_v37 = vpop.f32.mrb[5].mxu1  ;;  %v1864_v38 = vpop.f32.mrb[6].mxu0 }
 0x101   :  { %v1927_v39 = vadd.f32 %v1926_v37, %v1925_v34  ;;  %v1928_v40 = vpop.f32.mrb[6].mxu1  ;;  %v1865_v41 = vpop.f32.mrb[7].mxu0 }
 0x102   :  { %v1089_v42 = vadd.f32 %v1863_v36, %v2790_v18  ;;  %v1866_v43 = vadd.f32 %v1865_v41, %v1864_v38  ;;  %v1929_v44 = vpop.f32.mrb[7].mxu1 }
 0x103   :  { %v1930_v45 = vadd.f32 %v1929_v44, %v1928_v40 }
 0x104   :  { %v2799_v46 = vadd.f32 %v1927_v39, %v1089_v42  ;;  %v1092_v47 = vadd.f32 %v1866_v43, %v2790_v18 }
 0x106   :  { %v2802_v48 = vadd.f32 %v1930_v45, %v1092_v47  ;;  %v1867_v49 = vpop.f32.mrb[8].mxu0 }
 0x107   :  { %v1931_v50 = vpop.f32.mrb[8].mxu1  ;;  %v1868_v51 = vpop.f32.mrb[9].mxu0 }
 0x108   :  { %v1869_v52 = vadd.f32 %v1868_v51, %v1867_v49  ;;  %v1932_v53 = vpop.f32.mrb[9].mxu1  ;;  %v1870_v54 = vpop.f32.mrb[10].mxu0 }
 0x109   :  { %v1933_v55 = vadd.f32 %v1932_v53, %v1931_v50  ;;  %v1934_v56 = vpop.f32.mrb[10].mxu1  ;;  %v1871_v57 = vpop.f32.mrb[11].mxu0 }
 0x10a   :  { %v1097_v58 = vadd.f32 %v1869_v52, %v2790_v18  ;;  %v1872_v59 = vadd.f32 %v1871_v57, %v1870_v54  ;;  %v1935_v60 = vpop.f32.mrb[11].mxu1 }
 0x10b   :  { %v1936_v61 = vadd.f32 %v1935_v60, %v1934_v56 }
 0x10c   :  { %v2805_v62 = vadd.f32 %v1933_v55, %v1097_v58  ;;  %v1100_v63 = vadd.f32 %v1872_v59, %v2790_v18 }
 0x10e   :  { %v2808_v0 = vadd.f32 %v1936_v61, %v1100_v63  ;;  %v1873_v1 = vpop.f32.mrb[12].mxu0 }
 0x10f   :  { %v1937_v2 = vpop.f32.mrb[12].mxu1  ;;  %v1874_v3 = vpop.f32.mrb[13].mxu0 }
 0x110   :  { %v1875_v4 = vadd.f32 %v1874_v3, %v1873_v1  ;;  %v1938_v5 = vpop.f32.mrb[13].mxu1  ;;  %v1876_v6 = vpop.f32.mrb[14].mxu0 }
 0x111   :  { %v1939_v7 = vadd.f32 %v1938_v5, %v1937_v2  ;;  %v1940_v8 = vpop.f32.mrb[14].mxu1  ;;  %v1877_v9 = vpop.f32.mrb[15].mxu0 }
 0x112   :  { %v1105_v10 = vadd.f32 %v1875_v4, %v2790_v18  ;;  %v1878_v11 = vadd.f32 %v1877_v9, %v1876_v6  ;;  %v1941_v12 = vpop.f32.mrb[15].mxu1 }
 0x113   :  { %v1942_v13 = vadd.f32 %v1941_v12, %v1940_v8 }
 0x114   :  { %v2811_v14 = vadd.f32 %v1939_v7, %v1105_v10  ;;  %v1108_v15 = vadd.f32 %v1878_v11, %v2790_v18 }
 0x116   :  { %v2814_v16 = vadd.f32 %v1942_v13, %v1108_v15  ;;  %v1879_v17 = vpop.f32.mrb[16].mxu0 }
 0x117   :  { %v1943_v19 = vpop.f32.mrb[16].mxu1  ;;  %v1880_v20 = vpop.f32.mrb[17].mxu0 }
 0x118   :  { %v1881_v21 = vadd.f32 %v1880_v20, %v1879_v17  ;;  %v1944_v22 = vpop.f32.mrb[17].mxu1  ;;  %v1882_v23 = vpop.f32.mrb[18].mxu0 }
 0x119   :  { %v1945_v24 = vadd.f32 %v1944_v22, %v1943_v19  ;;  %v1946_v25 = vpop.f32.mrb[18].mxu1  ;;  %v1883_v26 = vpop.f32.mrb[19].mxu0 }
 0x11a   :  { %v1113_v27 = vadd.f32 %v1881_v21, %v2790_v18  ;;  %v1884_v28 = vadd.f32 %v1883_v26, %v1882_v23  ;;  %v1947_v29 = vpop.f32.mrb[19].mxu1 }
 0x11b   :  { %v1948_v31 = vadd.f32 %v1947_v29, %v1946_v25 }
 0x11c   :  { %v2817_v33 = vadd.f32 %v1945_v24, %v1113_v27  ;;  %v1116_v34 = vadd.f32 %v1884_v28, %v2790_v18 }
 0x11e   :  { %v2820_v35 = vadd.f32 %v1948_v31, %v1116_v34  ;;  %v1885_v36 = vpop.f32.mrb[20].mxu0 }
 0x11f   :  { %v1949_v37 = vpop.f32.mrb[20].mxu1  ;;  %v1886_v38 = vpop.f32.mrb[21].mxu0 }
 0x120   :  { %v1887_v39 = vadd.f32 %v1886_v38, %v1885_v36  ;;  %v1950_v40 = vpop.f32.mrb[21].mxu1  ;;  %v1888_v41 = vpop.f32.mrb[22].mxu0 }
 0x121   :  { %v1951_v42 = vadd.f32 %v1950_v40, %v1949_v37  ;;  %v1952_v43 = vpop.f32.mrb[22].mxu1  ;;  %v1889_v44 = vpop.f32.mrb[23].mxu0 }
 0x122   :  { %v1121_v45 = vadd.f32 %v1887_v39, %v2790_v18  ;;  %v1890_v47 = vadd.f32 %v1889_v44, %v1888_v41  ;;  %v1953_v49 = vpop.f32.mrb[23].mxu1 }
 0x123   :  { %v1954_v50 = vadd.f32 %v1953_v49, %v1952_v43 }
 0x124   :  { %v2823_v51 = vadd.f32 %v1951_v42, %v1121_v45  ;;  %v1124_v52 = vadd.f32 %v1890_v47, %v2790_v18 }
 0x126   :  { %v2826_v53 = vadd.f32 %v1954_v50, %v1124_v52  ;;  %v1891_v54 = vpop.f32.mrb[24].mxu0 }
 0x127   :  { %v1955_v55 = vpop.f32.mrb[24].mxu1  ;;  %v1892_v56 = vpop.f32.mrb[25].mxu0 }
 0x128   :  { %v1893_v57 = vadd.f32 %v1892_v56, %v1891_v54  ;;  %v1956_v58 = vpop.f32.mrb[25].mxu1  ;;  %v1894_v59 = vpop.f32.mrb[26].mxu0 }
 0x129   :  { %v1957_v60 = vadd.f32 %v1956_v58, %v1955_v55  ;;  %v1958_v61 = vpop.f32.mrb[26].mxu1  ;;  %v1895_v63 = vpop.f32.mrb[27].mxu0 }
 0x12a   :  { %v1129_v1 = vadd.f32 %v1893_v57, %v2790_v18  ;;  %v1896_v2 = vadd.f32 %v1895_v63, %v1894_v59  ;;  %v1959_v3 = vpop.f32.mrb[27].mxu1 }
 0x12b   :  { %v1960_v4 = vadd.f32 %v1959_v3, %v1958_v61 }
 0x12c   :  { %v2829_v5 = vadd.f32 %v1957_v60, %v1129_v1  ;;  %v1132_v6 = vadd.f32 %v1896_v2, %v2790_v18 }
 0x12e   :  { %v2832_v7 = vadd.f32 %v1960_v4, %v1132_v6  ;;  %v1897_v8 = vpop.f32.mrb[28].mxu0 }
 0x12f   :  { %v1961_v9 = vpop.f32.mrb[28].mxu1  ;;  %v1898_v10 = vpop.f32.mrb[29].mxu0 }
 0x130   :  { %v1899_v11 = vadd.f32 %v1898_v10, %v1897_v8  ;;  %v1962_v12 = vpop.f32.mrb[29].mxu1  ;;  %v1900_v13 = vpop.f32.mrb[30].mxu0 }
 0x131   :  { %v1963_v15 = vadd.f32 %v1962_v12, %v1961_v9  ;;  %v1964_v17 = vpop.f32.mrb[30].mxu1  ;;  %v1901_v19 = vpop.f32.mrb[31].mxu0 }
 0x132   :  { %v1137_v20 = vadd.f32 %v1899_v11, %v2790_v18  ;;  %v1902_v21 = vadd.f32 %v1901_v19, %v1900_v13  ;;  %v1965_v22 = vpop.f32.mrb[31].mxu1 }
 0x133   :  { %v1966_v23 = vadd.f32 %v1965_v22, %v1964_v17 }
 0x134   :  { %v2835_v24 = vadd.f32 %v1963_v15, %v1137_v20  ;;  %v1140_v25 = vadd.f32 %v1902_v21, %v2790_v18 }
 0x136   :  { %v2838_v26 = vadd.f32 %v1966_v23, %v1140_v25  ;;  %v1983_v27 = vpop.f32.mrb[32].mxu0 }
 0x137   :  { %v2047_v28 = vpop.f32.mrb[32].mxu1  ;;  %v1984_v29 = vpop.f32.mrb[33].mxu0 }
 0x138   :  { %v1985_v31 = vadd.f32 %v1984_v29, %v1983_v27  ;;  %v2048_v34 = vpop.f32.mrb[33].mxu1  ;;  %v1986_v36 = vpop.f32.mrb[34].mxu0 }
 0x139   :  { %v2049_v37 = vadd.f32 %v2048_v34, %v2047_v28  ;;  %v2050_v38 = vpop.f32.mrb[34].mxu1  ;;  %v1987_v39 = vpop.f32.mrb[35].mxu0 }
 0x13a   :  { %v1275_v40 = vadd.f32 %v1985_v31, %v2793_v30  ;;  %v1988_v41 = vadd.f32 %v1987_v39, %v1986_v36  ;;  %v2051_v42 = vpop.f32.mrb[35].mxu1 }
 0x13b   :  { %v2052_v43 = vadd.f32 %v2051_v42, %v2050_v38 }
 0x13c   :  { %v1278_v44 = vadd.f32 %v1988_v41, %v2796_v32  ;;  %v2842_v45 = vadd.f32 %v2049_v37, %v1275_v40 }
 0x13e   :  { %v1989_v18 = vpop.f32.mrb[36].mxu0  ;;  %v2844_v47 = vadd.f32 %v2052_v43, %v1278_v44 }
 0x13f   :  { %v2053_v49 = vpop.f32.mrb[36].mxu1  ;;  %v1990_v50 = vpop.f32.mrb[37].mxu0 }
 0x140   :  { %v1991_v52 = vadd.f32 %v1990_v50, %v1989_v18  ;;  %v2054_v54 = vpop.f32.mrb[37].mxu1  ;;  %v1992_v55 = vpop.f32.mrb[38].mxu0 }
 0x141   :  { %v2055_v56 = vadd.f32 %v2054_v54, %v2053_v49  ;;  %v2056_v57 = vpop.f32.mrb[38].mxu1  ;;  %v1993_v58 = vpop.f32.mrb[39].mxu0 }
 0x142   :  { %v1283_v30 = vadd.f32 %v1991_v52, %v2799_v46  ;;  %v1994_v59 = vadd.f32 %v1993_v58, %v1992_v55  ;;  %v2057_v60 = vpop.f32.mrb[39].mxu1 }
 0x143   :  { %v2058_v61 = vadd.f32 %v2057_v60, %v2056_v57 }
 0x144   :  { %v1286_v32 = vadd.f32 %v1994_v59, %v2802_v48  ;;  %v2848_v63 = vadd.f32 %v2055_v56, %v1283_v30 }
 0x146   :  { %v1995_v1 = vpop.f32.mrb[40].mxu0  ;;  %v2850_v2 = vadd.f32 %v2058_v61, %v1286_v32 }
 0x147   :  { %v2059_v3 = vpop.f32.mrb[40].mxu1  ;;  %v1996_v4 = vpop.f32.mrb[41].mxu0 }
 0x148   :  { %v1997_v6 = vadd.f32 %v1996_v4, %v1995_v1  ;;  %v2060_v8 = vpop.f32.mrb[41].mxu1  ;;  %v1998_v9 = vpop.f32.mrb[42].mxu0 }
 0x149   :  { %v2061_v10 = vadd.f32 %v2060_v8, %v2059_v3  ;;  %v2062_v11 = vpop.f32.mrb[42].mxu1  ;;  %v1999_v12 = vpop.f32.mrb[43].mxu0 }
 0x14a   :  { %v1291_v46 = vadd.f32 %v1997_v6, %v2805_v62  ;;  %v2000_v13 = vadd.f32 %v1999_v12, %v1998_v9  ;;  %v2063_v15 = vpop.f32.mrb[43].mxu1 }
 0x14b   :  { %v2064_v17 = vadd.f32 %v2063_v15, %v2062_v11 }
 0x14c   :  { %v1294_v48 = vadd.f32 %v2000_v13, %v2808_v0  ;;  %v2854_v19 = vadd.f32 %v2061_v10, %v1291_v46 }
 0x14e   :  { %v2001_v20 = vpop.f32.mrb[44].mxu0  ;;  %v2856_v21 = vadd.f32 %v2064_v17, %v1294_v48 }
 0x14f   :  { %v2065_v22 = vpop.f32.mrb[44].mxu1  ;;  %v2002_v23 = vpop.f32.mrb[45].mxu0 }
 0x150   :  { %v2003_v25 = vadd.f32 %v2002_v23, %v2001_v20  ;;  %v2066_v27 = vpop.f32.mrb[45].mxu1  ;;  %v2004_v28 = vpop.f32.mrb[46].mxu0 }
 0x151   :  { %v2067_v29 = vadd.f32 %v2066_v27, %v2065_v22  ;;  %v2068_v31 = vpop.f32.mrb[46].mxu1  ;;  %v2005_v34 = vpop.f32.mrb[47].mxu0 }
 0x152   :  { %v1299_v62 = vadd.f32 %v2003_v25, %v2811_v14  ;;  %v2006_v36 = vadd.f32 %v2005_v34, %v2004_v28  ;;  %v2069_v37 = vpop.f32.mrb[47].mxu1 }
 0x153   :  { %v2070_v38 = vadd.f32 %v2069_v37, %v2068_v31 }
 0x154   :  { %v1302_v0 = vadd.f32 %v2006_v36, %v2814_v16  ;;  %v2860_v39 = vadd.f32 %v2067_v29, %v1299_v62 }
 0x156   :  { %v2007_v40 = vpop.f32.mrb[48].mxu0  ;;  %v2862_v41 = vadd.f32 %v2070_v38, %v1302_v0 }
 0x157   :  { %v2071_v42 = vpop.f32.mrb[48].mxu1  ;;  %v2008_v43 = vpop.f32.mrb[49].mxu0 }
 0x158   :  { %v2009_v44 = vadd.f32 %v2008_v43, %v2007_v40  ;;  %v2072_v18 = vpop.f32.mrb[49].mxu1  ;;  %v2010_v49 = vpop.f32.mrb[50].mxu0 }
 0x159   :  { %v2073_v50 = vadd.f32 %v2072_v18, %v2071_v42  ;;  %v2074_v52 = vpop.f32.mrb[50].mxu1  ;;  %v2011_v54 = vpop.f32.mrb[51].mxu0 }
 0x15a   :  { %v1307_v14 = vadd.f32 %v2009_v44, %v2817_v33  ;;  %v2012_v55 = vadd.f32 %v2011_v54, %v2010_v49  ;;  %v2075_v56 = vpop.f32.mrb[51].mxu1 }
 0x15b   :  { %v2076_v57 = vadd.f32 %v2075_v56, %v2074_v52 }
 0x15c   :  { %v1310_v16 = vadd.f32 %v2012_v55, %v2820_v35  ;;  %v1404_v58 = vadd.f32 %v2073_v50, %v1307_v14 }
 0x15e   :  { %v2013_v30 = vpop.f32.mrb[52].mxu0  ;;  %v2866_v59 = vadd.f32 %v2076_v57, %v1310_v16 }
 0x15f   :  { %v2077_v60 = vpop.f32.mrb[52].mxu1  ;;  %v2014_v61 = vpop.f32.mrb[53].mxu0 }
 0x160   :  { %v2015_v32 = vadd.f32 %v2014_v61, %v2013_v30  ;;  %v2078_v1 = vpop.f32.mrb[53].mxu1  ;;  %v2016_v3 = vpop.f32.mrb[54].mxu0 }
 0x161   :  { %v2079_v4 = vadd.f32 %v2078_v1, %v2077_v60  ;;  %v2080_v6 = vpop.f32.mrb[54].mxu1  ;;  %v2017_v8 = vpop.f32.mrb[55].mxu0 }
 0x162   :  { %v1315_v9 = vadd.f32 %v2015_v32, %v2823_v51  ;;  %v2018_v33 = vadd.f32 %v2017_v8, %v2016_v3  ;;  %v2081_v10 = vpop.f32.mrb[55].mxu1 }
 0x163   :  { %v2082_v11 = vadd.f32 %v2081_v10, %v2080_v6 }
 0x164   :  { %v1318_v12 = vadd.f32 %v2018_v33, %v2826_v53  ;;  %v1412_v35 = vadd.f32 %v2079_v4, %v1315_v9 }
 0x166   :  { %v2019_v46 = vpop.f32.mrb[56].mxu0  ;;  %v1415_v13 = vadd.f32 %v2082_v11, %v1318_v12 }
 0x167   :  { %v2083_v15 = vpop.f32.mrb[56].mxu1  ;;  %v2020_v17 = vpop.f32.mrb[57].mxu0 }
 0x168   :  { %v2021_v48 = vadd.f32 %v2020_v17, %v2019_v46  ;;  %v2084_v20 = vpop.f32.mrb[57].mxu1  ;;  %v2022_v22 = vpop.f32.mrb[58].mxu0 }
 0x169   :  { %v2085_v23 = vadd.f32 %v2084_v20, %v2083_v15  ;;  %v2086_v25 = vpop.f32.mrb[58].mxu1  ;;  %v2023_v27 = vpop.f32.mrb[59].mxu0 }
 0x16a   :  { %v1323_v28 = vadd.f32 %v2021_v48, %v2829_v5  ;;  %v2024_v29 = vadd.f32 %v2023_v27, %v2022_v22  ;;  %v2087_v51 = vpop.f32.mrb[59].mxu1 }
 0x16b   :  { %v2088_v31 = vadd.f32 %v2087_v51, %v2086_v25 }
 0x16c   :  { %v1326_v34 = vadd.f32 %v2024_v29, %v2832_v7  ;;  %v1420_v62 = vadd.f32 %v2085_v23, %v1323_v28 }
 0x16e   :  { %v2025_v53 = vpop.f32.mrb[60].mxu0  ;;  %v1423_v36 = vadd.f32 %v2088_v31, %v1326_v34 }
 0x16f   :  { %v2089_v37 = vpop.f32.mrb[60].mxu1  ;;  %v2026_v38 = vpop.f32.mrb[61].mxu0 }
 0x170   :  { %v2027_v0 = vadd.f32 %v2026_v38, %v2025_v53  ;;  %v2090_v40 = vpop.f32.mrb[61].mxu1  ;;  %v2028_v42 = vpop.f32.mrb[62].mxu0 }
 0x171   :  { %v2091_v43 = vadd.f32 %v2090_v40, %v2089_v37  ;;  %v2092_v44 = vpop.f32.mrb[62].mxu1  ;;  %v2029_v18 = vpop.f32.mrb[63].mxu0 }
 0x172   :  { %v1331_v49 = vadd.f32 %v2027_v0, %v2835_v24  ;;  %v2030_v50 = vadd.f32 %v2029_v18, %v2028_v42  ;;  %v2093_v5 = vpop.f32.mrb[63].mxu1 }
 0x173   :  { %v2094_v52 = vadd.f32 %v2093_v5, %v2092_v44 }
 0x174   :  { %v1334_v54 = vadd.f32 %v2030_v50, %v2838_v26  ;;  %v1428_v14 = vadd.f32 %v2091_v43, %v1331_v49 }
 0x176   :  { %v2129_v7 = vpop.f32.mrb[64].mxu0  ;;  %v1431_v55 = vadd.f32 %v2094_v52, %v1334_v54 }
 0x177   :  { %v1477_v56 = vadd.f32 %v2129_v7, %v2848_v63  ;;  %v2137_v57 = vpop.f32.mrb[64].mxu1  ;;  %v1468_v16 = vpop.f32.mrb[65].mxu0 }
 0x178   :  { %v1509_v30 = vadd.f32 %v2137_v57, %v1412_v35  ;;  %v1469_v60 = vadd.f32 %v1468_v16, %v2842_v45  ;;  %v1500_v61 = vpop.f32.mrb[65].mxu1  ;;  %v2130_v32 = vpop.f32.mrb[66].mxu0 }
 0x179   :  { %v1501_v1 = vadd.f32 %v1500_v61, %v1404_v58  ;;  %v1480_v24 = vadd.f32 %v2130_v32, %v2850_v2  ;;  %v2138_v3 = vpop.f32.mrb[66].mxu1  ;;  %v1471_v4 = vpop.f32.mrb[67].mxu0 }
 0x17a   :  { %v1512_v6 = vadd.f32 %v2138_v3, %v1415_v13  ;;  %v1472_v26 = vadd.f32 %v1471_v4, %v2844_v47  ;;  %v1503_v8 = vpop.f32.mrb[67].mxu1 }
 0x17b   :  { %v1800_v9 = vpack.c.bf16 %v1480_v24, %v1477_v56  ;;  %v1504_v33 = vadd.f32 %v1503_v8, %v2866_v59 }
 0x17c   :  { %v1820_v63 = vpack.c.bf16 %v1512_v6, %v1509_v30  ;;  %v1795_v10 = vpack.c.bf16 %v1472_v26, %v1469_v60 }
 0x17d   :  { %1832 = vst [vmem:[%s2910_s3 + $0x8] sm:$0xff] %v1800_v9   ;;  %v1815_v45 = vpack.c.bf16 %v1504_v33, %v1501_v1 }
 0x17e   :  { %1836 = vst [vmem:[%s2910_s3 + $0x28] sm:$0xff] %v1820_v63   ;;  %1796 = vst [vmem:[%s2910_s3] sm:$0xff] %v1795_v10   ;;  %v2133_v47 = vpop.f32.mrb[68].mxu0 }
 0x17f   :  { %1835 = vst [vmem:[%s2910_s3 + $0x20] sm:$0xff] %v1815_v45   ;;  %v1493_v2 = vadd.f32 %v2133_v47, %v2860_v39  ;;  %v2141_v58 = vpop.f32.mrb[68].mxu1  ;;  %v1484_v59 = vpop.f32.mrb[69].mxu0 }
 0x180   :  { %v1525_v11 = vadd.f32 %v2141_v58, %v1428_v14  ;;  %v1485_v12 = vadd.f32 %v1484_v59, %v2854_v19  ;;  %v1516_v35 = vpop.f32.mrb[69].mxu1  ;;  %v2134_v46 = vpop.f32.mrb[70].mxu0 }
 0x181   :  { %v1517_v13 = vadd.f32 %v1516_v35, %v1420_v62  ;;  %v1496_v15 = vadd.f32 %v2134_v46, %v2862_v41  ;;  %v2142_v17 = vpop.f32.mrb[70].mxu1  ;;  %v1487_v48 = vpop.f32.mrb[71].mxu0 }
 0x182   :  { %v1528_v20 = vadd.f32 %v2142_v17, %v1431_v55  ;;  %v1488_v22 = vadd.f32 %v1487_v48, %v2856_v21  ;;  %v1519_v23 = vpop.f32.mrb[71].mxu1 }
 0x183   :  { %v1810_v25 = vpack.c.bf16 %v1496_v15, %v1493_v2  ;;  %v1520_v27 = vadd.f32 %v1519_v23, %v1423_v36 }
 0x184   :  { %v1830_v28 = vpack.c.bf16 %v1528_v20, %v1525_v11  ;;  %v1805_v39 = vpack.c.bf16 %v1488_v22, %v1485_v12 }
 0x185   :  { %1834 = vst [vmem:[%s2910_s3 + $0x18] sm:$0xff] %v1810_v25   ;;  %v1825_v19 = vpack.c.bf16 %v1520_v27, %v1517_v13 }
 0x186   :  { %1838 = vst [vmem:[%s2910_s3 + $0x38] sm:$0xff] %v1830_v28   ;;  %1833 = vst [vmem:[%s2910_s3 + $0x10] sm:$0xff] %v1805_v39  }
 0x187   :  { %1837 = vst [vmem:[%s2910_s3 + $0x30] sm:$0xff] %v1825_v19  }

// kernel: tsm_retinanet_forward.34
= control target key start
LH: loop header
LB: loop body
LE: loop exit
PB: predicated region body
PF: predicated region fallthrough
CT: control target
= control target key end

     0   :  { %s2614_s12 = smov 0   ;;  %s3036_s0 = inlined_call_operand.vmem [shape: bf16[384,1152], index: 0, kind: input, shape index: {}]   ;;  %s3037_s1 = inlined_call_operand.vmem [shape: bf16[1152,128], index: 1, kind: input, shape index: {}]   ;;  %s3038_s2 = inlined_call_operand.vmem [shape: f32[1,128], index: 2, kind: input, shape index: {}]   ;;  %s3039_s3 = inlined_call_operand.vmem [shape: bf16[384,128], index: 3, kind: output, shape index: {}]  }
   0x1 LB: > { %s1846_s13 = sadd.s32 4294967295, %s2592_s12   ;;  %p1850_p0 = scmp.ge.s32.totalorder %s2592_s12, 1  ;;  %s2592_s12 = sphi %s2614_s12, %s13_s12  }
   0x2   : > { %p139_p1 = scmp.lt.s32.totalorder %s2592_s12, 4 }
   0x4   : > { %p140_p2 = pnand %p1850_p0, %p139_p1 }
   0x5   : > { %v2410_v0 = vld [vmem:[%s3037_s1 + $0x40] sm:$0xff] (!%p140_p2)   ;;  %v2414_v4 = vld [vmem:[%s3037_s1 + $0x48] sm:$0xff] (!%p140_p2)   ;;  %v2418_v8 = vld [vmem:[%s3037_s1 + $0x50] sm:$0xff] (!%p140_p2)   ;;  %s1851_s19 = sshll.u32 (!%p140_p2), %s1846_s13, 4 }
   0x6   : > { %143 = sbr.rel (%p140_p2) target bundleno = 398 (0x18e), region = 32  ;;  %v2411_v1 = vld [vmem:[%s3037_s1 + $0xc0] sm:$0xff] (!%p140_p2)   ;;  %2081 = vmatprep.subr.bf16.mxu0 (!%p140_p2), %v2410_v0  ;;  %v2415_v5 = vld [vmem:[%s3037_s1 + $0xc8] sm:$0xff] (!%p140_p2)   ;;  %v2419_v9 = vld [vmem:[%s3037_s1 + $0xd0] sm:$0xff] (!%p140_p2)   ;;  %p165_p3 = scmp.lt.s32.totalorder (!%p140_p2), %s1851_s19, 47 }
   0x7   : > { %v2412_v2 = vld [vmem:[%s3037_s1] sm:$0xff] (!%p140_p2)   ;;  %2145 = vmatprep.subr.bf16.mxu1 (!%p140_p2), %v2411_v1  ;;  %v2416_v6 = vld [vmem:[%s3037_s1 + $0x8] sm:$0xff] (!%p140_p2)   ;;  %v2420_v10 = vld [vmem:[%s3037_s1 + $0x10] sm:$0xff] (!%p140_p2)  }
   0x8   : > { %v2413_v3 = vld [vmem:[%s3037_s1 + $0x80] sm:$0xff] (!%p140_p2)   ;;  %2082 = vmatpush3.bf16.msra.mxu0 (!%p140_p2), %v2412_v2  ;;  %v2417_v7 = vld [vmem:[%s3037_s1 + $0x88] sm:$0xff] (!%p140_p2)   ;;  %v2421_v11 = vld [vmem:[%s3037_s1 + $0x90] sm:$0xff] (!%p140_p2)  }
   0x9   : > { %2146 = vmatpush3.bf16.msra.mxu1 (!%p140_p2), %v2413_v3  ;;  %2083 = vmatprep.subr.bf16.mxu0 (!%p140_p2), %v2414_v4  ;;  %v2422_v12 = vld [vmem:[%s3037_s1 + $0x58] sm:$0xff] (!%p140_p2)   ;;  %v2426_v16 = vld [vmem:[%s3037_s1 + $0x60] sm:$0xff] (!%p140_p2)   ;;  %v2430_v20 = vld [vmem:[%s3037_s1 + $0x68] sm:$0xff] (!%p140_p2)  }
   0xa   : > { %2147 = vmatprep.subr.bf16.mxu1 (!%p140_p2), %v2415_v5  ;;  %v2423_v13 = vld [vmem:[%s3037_s1 + $0xd8] sm:$0xff] (!%p140_p2)   ;;  %v2427_v17 = vld [vmem:[%s3037_s1 + $0xe0] sm:$0xff] (!%p140_p2)   ;;  %v2431_v21 = vld [vmem:[%s3037_s1 + $0xe8] sm:$0xff] (!%p140_p2)  }
   0xb   : > { %v2424_v14 = vld [vmem:[%s3037_s1 + $0x18] sm:$0xff] (!%p140_p2)   ;;  %v2428_v18 = vld [vmem:[%s3037_s1 + $0x20] sm:$0xff] (!%p140_p2)   ;;  %v2432_v22 = vld [vmem:[%s3037_s1 + $0x28] sm:$0xff] (!%p140_p2)  }
   0xc   : > { %2084 = vmatpush3.bf16.msra.mxu0 (!%p140_p2), %v2416_v6  ;;  %v2425_v15 = vld [vmem:[%s3037_s1 + $0x98] sm:$0xff] (!%p140_p2)   ;;  %v2429_v19 = vld [vmem:[%s3037_s1 + $0xa0] sm:$0xff] (!%p140_p2)   ;;  %v2433_v23 = vld [vmem:[%s3037_s1 + $0xa8] sm:$0xff] (!%p140_p2)  }
   0xd   : > { %2148 = vmatpush3.bf16.msra.mxu1 %v2417_v7  ;;  %2085 = vmatprep.subr.bf16.mxu0 %v2418_v8  ;;  %s3041_s19 = smov (!%p165_p3, %s1851_s19), 47  ;;  %v2434_v24 = vld [vmem:[%s3037_s1 + $0x70] sm:$0xff]   ;;  %v2438_v28 = vld [vmem:[%s3037_s1 + $0x78] sm:$0xff]   ;;  %v2448_v36 = vld [vmem:[%s3037_s1 + $0x140] sm:$0xff]  }
   0xe   : > { %2149 = vmatprep.subr.bf16.mxu1 %v2419_v9  ;;  %v2435_v25 = vld [vmem:[%s3037_s1 + $0xf0] sm:$0xff]   ;;  %s2401_s16 = smul.u32 36, %s3041_s19  ;;  %v2439_v29 = vld [vmem:[%s3037_s1 + $0xf8] sm:$0xff]   ;;  %v2449_v37 = vld [vmem:[%s3037_s1 + $0x1c0] sm:$0xff]  }
   0xf   : > { %v2436_v26 = vld [vmem:[%s3037_s1 + $0x30] sm:$0xff]   ;;  %v2440_v30 = vld [vmem:[%s3037_s1 + $0x38] sm:$0xff]   ;;  %v2450_v38 = vld [vmem:[%s3037_s1 + $0x100] sm:$0xff]  }
  0x10   : > { %2086 = vmatpush3.bf16.msra.mxu0 %v2420_v10  ;;  %v2437_v27 = vld [vmem:[%s3037_s1 + $0xb0] sm:$0xff]   ;;  %s2720_s13 = scalar_lea.vmem %s3036_s0, %s2401_s16  ;;  %v2441_v31 = vld [vmem:[%s3037_s1 + $0xb8] sm:$0xff]   ;;  %v2451_v39 = vld [vmem:[%s3037_s1 + $0x180] sm:$0xff]  }
  0x11   : > { %2150 = vmatpush3.bf16.msra.mxu1 %v2421_v11  ;;  %2087 = vmatprep.subr.bf16.mxu0 %v2422_v12  ;;  %v2442_v32 = vld [vmem:[%s2720_s13] ss:$36 sps:$4 sm:$0xff]   ;;  %v2445_v34 = vld [vmem:[%s2720_s13 + $0x8] ss:$36 sps:$4 sm:$0xff]   ;;  %v2454_v41 = vld [vmem:[%s2720_s13 + $0x54] ss:$36 sps:$4 sm:$0xff]  }
  0x12   : > { %2151 = vmatprep.subr.bf16.mxu1 %v2423_v13  ;;  %v2444_v33 = vld [vmem:[%s2720_s13 + $0x4] ss:$36 sps:$4 sm:$0xff]   ;;  %v2447_v35 = vld [vmem:[%s2720_s13 + $0xc] ss:$36 sps:$4 sm:$0xff]   ;;  %v2462_v48 = vld [vmem:[%s2720_s13 + $0x94] ss:$36 sps:$4 sm:$0xff]  }
  0x13   : > { %1241 = vmatprep.mubr.bf16.mxu0 %v2444_v33  ;;  %1338 = vmatprep.mubr.bf16.mxu1 %v2447_v35  ;;  %v2452_v40 = vld [vmem:[%s2720_s13 + $0x4c] ss:$36 sps:$4 sm:$0xff]   ;;  %v2464_v49 = vld [vmem:[%s2720_s13 + $0x9c] ss:$36 sps:$4 sm:$0xff]   ;;  %v2474_v57 = vld [vmem:[%s2720_s13 + $0xe4] ss:$36 sps:$4 sm:$0xff]  }
  0x14   : > { %2088 = vmatpush3.bf16.msra.mxu0 %v2424_v14  ;;  %v2456_v42 = vld [vmem:[%s2720_s13 + $0x48] ss:$36 sps:$4 sm:$0xff]   ;;  %v2457_v43 = vld [vmem:[%s2720_s13 + $0x50] ss:$36 sps:$4 sm:$0xff]   ;;  %v2467_v51 = vld [vmem:[%s2720_s13 + $0x98] ss:$36 sps:$4 sm:$0xff]  }
  0x15   : > { %2152 = vmatpush3.bf16.msra.mxu1 %v2425_v15  ;;  %2089 = vmatprep.subr.bf16.mxu0 %v2426_v16  ;;  %v2458_v44 = vld [vmem:[%s3037_s1 + $0x148] sm:$0xff]   ;;  %v2466_v50 = vld [vmem:[%s2720_s13 + $0x90] ss:$36 sps:$4 sm:$0xff]   ;;  %v2472_v56 = vld [vmem:[%s2720_s13 + $0xdc] ss:$36 sps:$4 sm:$0xff]  }
  0x16   : > { %2153 = vmatprep.subr.bf16.mxu1 %v2427_v17  ;;  %v2459_v45 = vld [vmem:[%s3037_s1 + $0x1c8] sm:$0xff]   ;;  %v2468_v52 = vld [vmem:[%s3037_s1 + $0x150] sm:$0xff]   ;;  %v2476_v58 = vld [vmem:[%s2720_s13 + $0xd8] ss:$36 sps:$4 sm:$0xff]  }
  0x17   : > { %v2460_v46 = vld [vmem:[%s3037_s1 + $0x108] sm:$0xff]   ;;  %v2469_v53 = vld [vmem:[%s3037_s1 + $0x1d0] sm:$0xff]   ;;  %v2477_v59 = vld [vmem:[%s2720_s13 + $0xe0] ss:$36 sps:$4 sm:$0xff]  }
  0x18   : > { %2090 = vmatpush3.bf16.msra.mxu0 %v2428_v18  ;;  %v2461_v47 = vld [vmem:[%s3037_s1 + $0x188] sm:$0xff]   ;;  %v2470_v54 = vld [vmem:[%s3037_s1 + $0x110] sm:$0xff]   ;;  %v2478_v60 = vld [vmem:[%s3037_s1 + $0x158] sm:$0xff]  }
  0x19   : > { %2154 = vmatpush3.bf16.msra.mxu1 %v2429_v19  ;;  %2091 = vmatprep.subr.bf16.mxu0 %v2430_v20  ;;  %v2471_v55 = vld [vmem:[%s3037_s1 + $0x190] sm:$0xff]   ;;  %v2479_v61 = vld [vmem:[%s3037_s1 + $0x1d8] sm:$0xff]   ;;  %v2482_v0 = vld [vmem:[%s2720_s13 + $0x124] ss:$36 sps:$4 sm:$0xff]  }
  0x1a   : > { %2155 = vmatprep.subr.bf16.mxu1 %v2431_v21  ;;  %v2480_v62 = vld [vmem:[%s3037_s1 + $0x118] sm:$0xff]   ;;  %v2484_v1 = vld [vmem:[%s2720_s13 + $0x12c] ss:$36 sps:$4 sm:$0xff]   ;;  %v2486_v2 = vld [vmem:[%s2720_s13 + $0x120] ss:$36 sps:$4 sm:$0xff]  }
  0x1b   : > { %v2481_v63 = vld [vmem:[%s3037_s1 + $0x198] sm:$0xff]   ;;  %v2488_v3 = vld [vmem:[%s3037_s1 + $0x160] sm:$0xff]   ;;  %v2487_v4 = vld [vmem:[%s2720_s13 + $0x128] ss:$36 sps:$4 sm:$0xff]  }
  0x1c   : > { %2092 = vmatpush3.bf16.msra.mxu0 %v2432_v22  ;;  %v2489_v5 = vld [vmem:[%s3037_s1 + $0x1e0] sm:$0xff]   ;;  %v2492_v8 = vld [vmem:[%s2720_s13 + $0x16c] ss:$36 sps:$4 sm:$0xff]   ;;  %v2494_v9 = vld [vmem:[%s2720_s13 + $0x174] ss:$36 sps:$4 sm:$0xff]  }
  0x1d   : > { %2156 = vmatpush3.bf16.msra.mxu1 %v2433_v23  ;;  %2093 = vmatprep.subr.bf16.mxu0 %v2434_v24  ;;  %v2490_v6 = vld [vmem:[%s3037_s1 + $0x120] sm:$0xff]   ;;  %v2498_v10 = vld [vmem:[%s3037_s1 + $0x168] sm:$0xff]   ;;  %v2497_v15 = vld [vmem:[%s2720_s13 + $0x170] ss:$36 sps:$4 sm:$0xff]  }
  0x1e   : > { %2157 = vmatprep.subr.bf16.mxu1 %v2435_v25  ;;  %v2491_v7 = vld [vmem:[%s3037_s1 + $0x1a0] sm:$0xff]   ;;  %v2499_v11 = vld [vmem:[%s3037_s1 + $0x1e8] sm:$0xff]   ;;  %v2502_v16 = vld [vmem:[%s2720_s13 + $0x1b4] ss:$36 sps:$4 sm:$0xff]  }
  0x1f   : > { %v2496_v12 = vld [vmem:[%s2720_s13 + $0x168] ss:$36 sps:$4 sm:$0xff]   ;;  %v2504_v17 = vld [vmem:[%s2720_s13 + $0x1bc] ss:$36 sps:$4 sm:$0xff]   ;;  %v2508_v18 = vld [vmem:[%s3037_s1 + $0x170] sm:$0xff]  }
  0x20   : > { %2094 = vmatpush3.bf16.msra.mxu0 %v2436_v26  ;;  %v2500_v13 = vld [vmem:[%s3037_s1 + $0x128] sm:$0xff]   ;;  %v2509_v19 = vld [vmem:[%s3037_s1 + $0x1f0] sm:$0xff]   ;;  %v2507_v23 = vld [vmem:[%s2720_s13 + $0x1b8] ss:$36 sps:$4 sm:$0xff]  }
  0x21   : > { %2158 = vmatpush3.bf16.msra.mxu1 %v2437_v27  ;;  %2095 = vmatprep.subr.bf16.mxu0 %v2438_v28  ;;  %v2501_v14 = vld [vmem:[%s3037_s1 + $0x1a8] sm:$0xff]   ;;  %v2510_v20 = vld [vmem:[%s3037_s1 + $0x130] sm:$0xff]   ;;  %v2512_v24 = vld [vmem:[%s2720_s13 + $0x1fc] ss:$36 sps:$4 sm:$0xff]  }
  0x22   : > { %2159 = vmatprep.subr.bf16.mxu1 %v2439_v29  ;;  %v2511_v21 = vld [vmem:[%s3037_s1 + $0x1b0] sm:$0xff]   ;;  %v2514_v25 = vld [vmem:[%s2720_s13 + $0x204] ss:$36 sps:$4 sm:$0xff]   ;;  %v2518_v26 = vld [vmem:[%s3037_s1 + $0x178] sm:$0xff]  }
  0x23   : > { %v2506_v22 = vld [vmem:[%s2720_s13 + $0x1b0] ss:$36 sps:$4 sm:$0xff]   ;;  %v2519_v27 = vld [vmem:[%s3037_s1 + $0x1f8] sm:$0xff]  }
  0x24   : > { %2096 = vmatpush3.bf16.msra.mxu0 %v2440_v30  ;;  %v2520_v28 = vld [vmem:[%s3037_s1 + $0x138] sm:$0xff]   ;;  %v2522_v35 = vld [vmem:[%s2720_s13 + $0x10] ss:$36 sps:$4 sm:$0xff]  }
  0x25   : > { %2160 = vmatpush3.bf16.msra.mxu1 %v2441_v31  ;;  %2209 = vmatprep.subr.bf16.mxu0 %v2448_v36  ;;  %v2521_v29 = vld [vmem:[%s3037_s1 + $0x1b8] sm:$0xff]   ;;  %v2517_v31 = vld [vmem:[%s2720_s13 + $0x200] ss:$36 sps:$4 sm:$0xff]  }
  0x26   : > { %2273 = vmatprep.subr.bf16.mxu1 %v2449_v37  ;;  %v2516_v30 = vld [vmem:[%s2720_s13 + $0x1f8] ss:$36 sps:$4 sm:$0xff]  }
  0x27   : > { %1242 = vmatmul.mubr.bf16.vlgmr.msra.gmra.mrb[0].mxu0 %v2442_v32  ;;  %v2528_v32 = vld [vmem:[%s3037_s1 + $0x200] sm:$0xff]   ;;  %v2524_v33 = vld [vmem:[%s2720_s13 + $0x14] ss:$36 sps:$4 sm:$0xff]  }
  0x28   : > { %1339 = vmatmul.mubr.bf16.vlgmr.msra.gmra.mrb[0].mxu1 %v2445_v34  ;;  %2210 = vmatpush3.bf16.msra.mxu0 %v2450_v38  ;;  %v2527_v34 = vld [vmem:[%s2720_s13 + $0x1c] ss:$36 sps:$4 sm:$0xff]   ;;  %v2531_v38 = vld [vmem:[%s2720_s13 + $0x64] ss:$36 sps:$4 sm:$0xff]  }
  0x29   : > { %2274 = vmatpush3.bf16.msra.mxu1 %v2451_v39  ;;  %1249 = vmatprep.mubr.bf16.mxu0 %v2452_v40  ;;  %v2525_v36 = vld [vmem:[%s2720_s13 + $0x18] ss:$36 sps:$4 sm:$0xff]   ;;  %v2535_v39 = vld [vmem:[%s3037_s1 + $0x208] sm:$0xff]   ;;  %v2542_v40 = vld [vmem:[%s3037_s1 + $0x210] sm:$0xff]  }
  0x2a   : > { %1346 = vmatprep.mubr.bf16.mxu1 %v2454_v41  ;;  %2211 = vmatprep.subr.bf16.mxu0 %v2458_v44  ;;  %v2529_v37 = vld [vmem:[%s2720_s13 + $0x5c] ss:$36 sps:$4 sm:$0xff]   ;;  %v2538_v44 = vld [vmem:[%s2720_s13 + $0xac] ss:$36 sps:$4 sm:$0xff]  }
  0x2b   : > { %2275 = vmatprep.subr.bf16.mxu1 %v2459_v45  ;;  %v2533_v41 = vld [vmem:[%s2720_s13 + $0x58] ss:$36 sps:$4 sm:$0xff]  }
  0x2c   : > { %2212 = vmatpush3.bf16.msra.mxu0 %v2460_v46  ;;  %v2549_v45 = vld [vmem:[%s3037_s1 + $0x218] sm:$0xff]   ;;  %v2556_v46 = vld [vmem:[%s3037_s1 + $0x220] sm:$0xff]  }
  0x2d   : > { %2276 = vmatpush3.bf16.msra.mxu1 %v2461_v47  ;;  %2213 = vmatprep.subr.bf16.mxu0 %v2468_v52  ;;  %v2540_v47 = vld [vmem:[%s2720_s13 + $0xa0] ss:$36 sps:$4 sm:$0xff]   ;;  %v2547_v52 = vld [vmem:[%s2720_s13 + $0xe8] ss:$36 sps:$4 sm:$0xff]  }
  0x2e   : > { %2277 = vmatprep.subr.bf16.mxu1 %v2469_v53  ;;  %v2570_v53 = vld [vmem:[%s3037_s1 + $0x230] sm:$0xff]  }
  0x2f   : > { %1250 = vmatmul.mubr.bf16.gmra.mrb[4].mxu0 %v2456_v42  ;;  %v2534_v42 = vld [vmem:[%s2720_s13 + $0x60] ss:$36 sps:$4 sm:$0xff]  }
  0x30   : > { %1347 = vmatmul.mubr.bf16.gmra.mrb[4].mxu1 %v2457_v43  ;;  %1257 = vmatprep.mubr.bf16.mxu0 %v2462_v48  ;;  %v2536_v43 = vld [vmem:[%s2720_s13 + $0xa4] ss:$36 sps:$4 sm:$0xff]  }
  0x31   : > { %1354 = vmatprep.mubr.bf16.mxu1 %v2464_v49  ;;  %2214 = vmatpush3.bf16.msra.mxu0 %v2470_v54  ;;  %v2541_v48 = vld [vmem:[%s2720_s13 + $0xa8] ss:$36 sps:$4 sm:$0xff]   ;;  %v2548_v54 = vld [vmem:[%s2720_s13 + $0xf0] ss:$36 sps:$4 sm:$0xff]  }
  0x32   : > { %2278 = vmatpush3.bf16.msra.mxu1 %v2471_v55  ;;  %2215 = vmatprep.subr.bf16.mxu0 %v2478_v60  ;;  %v2543_v49 = vld [vmem:[%s2720_s13 + $0xec] ss:$36 sps:$4 sm:$0xff]   ;;  %v2550_v55 = vld [vmem:[%s2720_s13 + $0x134] ss:$36 sps:$4 sm:$0xff]   ;;  %v2557_v60 = vld [vmem:[%s2720_s13 + $0x17c] ss:$36 sps:$4 sm:$0xff]  }
  0x33   : > { %2279 = vmatprep.subr.bf16.mxu1 %v2479_v61  ;;  %v2559_v61 = vld [vmem:[%s2720_s13 + $0x184] ss:$36 sps:$4 sm:$0xff]  }
  0x35   : > { %2216 = vmatpush3.bf16.msra.mxu0 %v2480_v62  ;;  %v2561_v62 = vld [vmem:[%s2720_s13 + $0x178] ss:$36 sps:$4 sm:$0xff]  }
  0x36   : > { %2280 = vmatpush3.bf16.msra.mxu1 %v2481_v63  ;;  %2217 = vmatprep.subr.bf16.mxu0 %v2488_v3  ;;  %v2562_v63 = vld [vmem:[%s2720_s13 + $0x180] ss:$36 sps:$4 sm:$0xff]   ;;  %v2569_v3 = vld [vmem:[%s2720_s13 + $0x1c8] ss:$36 sps:$4 sm:$0xff]  }
  0x37   : > { %1258 = vmatmul.mubr.bf16.gmra.mrb[8].mxu0 %v2466_v50  ;;  %2281 = vmatprep.subr.bf16.mxu1 %v2489_v5  ;;  %v2545_v50 = vld [vmem:[%s2720_s13 + $0xf4] ss:$36 sps:$4 sm:$0xff]  }
  0x38   : > { %1355 = vmatmul.mubr.bf16.gmra.mrb[8].mxu1 %v2467_v51  ;;  %1265 = vmatprep.mubr.bf16.mxu0 %v2472_v56  ;;  %v2563_v51 = vld [vmem:[%s3037_s1 + $0x228] sm:$0xff]   ;;  %v2552_v56 = vld [vmem:[%s2720_s13 + $0x13c] ss:$36 sps:$4 sm:$0xff]   ;;  %v2573_v5 = vld [vmem:[%s2720_s13 + $0x214] ss:$36 sps:$4 sm:$0xff]  }
  0x39   : > { %1362 = vmatprep.mubr.bf16.mxu1 %v2474_v57  ;;  %2218 = vmatpush3.bf16.msra.mxu0 %v2490_v6  ;;  %v2577_v57 = vld [vmem:[%s3037_s1 + $0x238] sm:$0xff]   ;;  %v2575_v6 = vld [vmem:[%s2720_s13 + $0x208] ss:$36 sps:$4 sm:$0xff]  }
  0x3a   : > { %2282 = vmatpush3.bf16.msra.mxu1 %v2491_v7  ;;  %2219 = vmatprep.subr.bf16.mxu0 %v2498_v10  ;;  %v2576_v7 = vld [vmem:[%s2720_s13 + $0x210] ss:$36 sps:$4 sm:$0xff]   ;;  %v2580_v10 = vld [vmem:[%s2720_s13 + $0x68] ss:$36 sps:$4 sm:$0xff]  }
  0x3b   : > { %2283 = vmatprep.subr.bf16.mxu1 %v2499_v11  ;;  %v2581_v11 = vld [vmem:[%s2720_s13 + $0x188] ss:$36 sps:$4 sm:$0xff]  }
  0x3d   : > { %2220 = vmatpush3.bf16.msra.mxu0 %v2500_v13  ;;  %v2583_v13 = vld [vmem:[%s2720_s13 + $0x1d0] ss:$36 sps:$4 sm:$0xff]  }
  0x3e   : > { %2284 = vmatpush3.bf16.msra.mxu1 %v2501_v14  ;;  %2221 = vmatprep.subr.bf16.mxu0 %v2508_v18  ;;  %v2584_v14 = vld [vmem:[%s2720_s13 + $0xf8] ss:$36 sps:$4 sm:$0xff]   ;;  %v2923_v18 = vld [vmem:[%s3038_s2] ss:$0 sm:$0xff] }
  0x3f   : > { %1266 = vmatmul.mubr.bf16.gmra.mrb[12].mxu0 %v2476_v58  ;;  %2285 = vmatprep.subr.bf16.mxu1 %v2509_v19  ;;  %v2554_v58 = vld [vmem:[%s2720_s13 + $0x130] ss:$36 sps:$4 sm:$0xff]  }
  0x40   : > { %1363 = vmatmul.mubr.bf16.gmra.mrb[12].mxu1 %v2477_v59  ;;  %1273 = vmatprep.mubr.bf16.mxu0 %v2482_v0  ;;  %v2555_v59 = vld [vmem:[%s2720_s13 + $0x138] ss:$36 sps:$4 sm:$0xff]   ;;  %v2564_v0 = vld [vmem:[%s2720_s13 + $0x1c4] ss:$36 sps:$4 sm:$0xff]  }
  0x41   : > { %1370 = vmatprep.mubr.bf16.mxu1 %v2484_v1  ;;  %2222 = vmatpush3.bf16.msra.mxu0 %v2510_v20  ;;  %v2566_v1 = vld [vmem:[%s2720_s13 + $0x1cc] ss:$36 sps:$4 sm:$0xff]  }
  0x42   : > { %2286 = vmatpush3.bf16.msra.mxu1 %v2511_v21  ;;  %2223 = vmatprep.subr.bf16.mxu0 %v2518_v26 }
  0x43   : > { %2287 = vmatprep.subr.bf16.mxu1 %v2519_v27 }
  0x45   : > { %2224 = vmatpush3.bf16.msra.mxu0 %v2520_v28 }
  0x46   : > { %2288 = vmatpush3.bf16.msra.mxu1 %v2521_v29  ;;  %2353 = vmatprep.subr.bf16.mxu0 %v2528_v32 }
  0x47   : > { %1274 = vmatmul.mubr.bf16.gmra.mrb[16].mxu0 %v2486_v2  ;;  %2385 = vmatprep.subr.bf16.mxu1 %v2528_v32  ;;  %v2568_v2 = vld [vmem:[%s2720_s13 + $0x1c0] ss:$36 sps:$4 sm:$0xff]  }
  0x48   : > { %1371 = vmatmul.mubr.bf16.gmra.mrb[16].mxu1 %v2487_v4  ;;  %1281 = vmatprep.mubr.bf16.mxu0 %v2492_v8  ;;  %v2571_v4 = vld [vmem:[%s2720_s13 + $0x20c] ss:$36 sps:$4 sm:$0xff]   ;;  %v2578_v8 = vld [vmem:[%s2720_s13 + $0x20] ss:$36 sps:$4 sm:$0xff]  }
  0x49   : > { %1378 = vmatprep.mubr.bf16.mxu1 %v2494_v9  ;;  %v2579_v9 = vld [vmem:[%s2720_s13 + $0x140] ss:$36 sps:$4 sm:$0xff]  }
  0x4f   : > { %1282 = vmatmul.mubr.bf16.gmra.mrb[20].mxu0 %v2496_v12  ;;  %v2582_v12 = vld [vmem:[%s2720_s13 + $0xb0] ss:$36 sps:$4 sm:$0xff]  }
  0x50   : > { %1379 = vmatmul.mubr.bf16.gmra.mrb[20].mxu1 %v2497_v15  ;;  %1289 = vmatprep.mubr.bf16.mxu0 %v2502_v16  ;;  %v2585_v15 = vld [vmem:[%s2720_s13 + $0x218] ss:$36 sps:$4 sm:$0xff]   ;;  %s1854_s13 = sshll.u32 %s3041_s19, 2 }
  0x51   : > { %1386 = vmatprep.mubr.bf16.mxu1 %v2504_v17  ;;  %s3018_s20 = scalar_lea.vmem %s3039_s3, %s1854_s13 }
  0x57   : > { %1290 = vmatmul.mubr.bf16.gmra.mrb[24].mxu0 %v2506_v22 }
  0x58   : > { %1387 = vmatmul.mubr.bf16.gmra.mrb[24].mxu1 %v2507_v23  ;;  %1297 = vmatprep.mubr.bf16.mxu0 %v2512_v24 }
  0x59   : > { %1394 = vmatprep.mubr.bf16.mxu1 %v2514_v25 }
  0x5f   : > { %1298 = vmatmul.mubr.bf16.gmra.mrb[28].mxu0 %v2516_v30 }
  0x60   : > { %1395 = vmatmul.mubr.bf16.gmra.mrb[28].mxu1 %v2517_v31  ;;  %1435 = vmatprep.mubr.bf16.mxu0 %v2524_v33 }
  0x61   : > { %1532 = vmatprep.mubr.bf16.mxu1 %v2527_v34 }
  0x67   : > { %1436 = vmatmul.mubr.bf16.vlgmr.msra.gmra.mrb[32].mxu0 %v2522_v35 }
  0x68   : > { %1533 = vmatmul.mubr.bf16.vlgmr.msra.gmra.mrb[32].mxu1 %v2525_v36  ;;  %2354 = vmatpush3.bf16.msra.mxu0 %v2528_v32 }
  0x69   : > { %2393 = vmatpush3.bf16.msra.mxu1 %v2528_v32  ;;  %1443 = vmatprep.mubr.bf16.mxu0 %v2529_v37 }
  0x6a   : > { %1540 = vmatprep.mubr.bf16.mxu1 %v2531_v38  ;;  %2355 = vmatprep.subr.bf16.mxu0 %v2535_v39 }
  0x6b   : > { %2386 = vmatprep.subr.bf16.mxu1 %v2535_v39 }
  0x6c   : > { %2356 = vmatpush3.bf16.msra.mxu0 %v2535_v39 }
  0x6d   : > { %2394 = vmatpush3.bf16.msra.mxu1 %v2535_v39  ;;  %2357 = vmatprep.subr.bf16.mxu0 %v2542_v40 }
  0x6e   : > { %2387 = vmatprep.subr.bf16.mxu1 %v2542_v40 }
  0x6f   : > { %1444 = vmatmul.mubr.bf16.gmra.mrb[36].mxu0 %v2533_v41 }
  0x70   : > { %1541 = vmatmul.mubr.bf16.gmra.mrb[36].mxu1 %v2534_v42  ;;  %1451 = vmatprep.mubr.bf16.mxu0 %v2536_v43 }
  0x71   : > { %1548 = vmatprep.mubr.bf16.mxu1 %v2538_v44  ;;  %2358 = vmatpush3.bf16.msra.mxu0 %v2542_v40 }
  0x72   : > { %2395 = vmatpush3.bf16.msra.mxu1 %v2542_v40  ;;  %2359 = vmatprep.subr.bf16.mxu0 %v2549_v45 }
  0x73   : > { %2388 = vmatprep.subr.bf16.mxu1 %v2549_v45 }
  0x75   : > { %2360 = vmatpush3.bf16.msra.mxu0 %v2549_v45 }
  0x76   : > { %2396 = vmatpush3.bf16.msra.mxu1 %v2549_v45  ;;  %2361 = vmatprep.subr.bf16.mxu0 %v2556_v46 }
  0x77   : > { %1452 = vmatmul.mubr.bf16.gmra.mrb[40].mxu0 %v2540_v47  ;;  %2389 = vmatprep.subr.bf16.mxu1 %v2556_v46 }
  0x78   : > { %1549 = vmatmul.mubr.bf16.gmra.mrb[40].mxu1 %v2541_v48  ;;  %1459 = vmatprep.mubr.bf16.mxu0 %v2543_v49 }
  0x79   : > { %1556 = vmatprep.mubr.bf16.mxu1 %v2545_v50  ;;  %2362 = vmatpush3.bf16.msra.mxu0 %v2556_v46 }
  0x7a   : > { %2397 = vmatpush3.bf16.msra.mxu1 %v2556_v46  ;;  %2363 = vmatprep.subr.bf16.mxu0 %v2563_v51 }
  0x7b   : > { %2390 = vmatprep.subr.bf16.mxu1 %v2563_v51 }
  0x7d   : > { %2364 = vmatpush3.bf16.msra.mxu0 %v2563_v51 }
  0x7e   : > { %2398 = vmatpush3.bf16.msra.mxu1 %v2563_v51  ;;  %2365 = vmatprep.subr.bf16.mxu0 %v2570_v53 }
  0x7f   : > { %1460 = vmatmul.mubr.bf16.gmra.mrb[44].mxu0 %v2547_v52  ;;  %2391 = vmatprep.subr.bf16.mxu1 %v2570_v53 }
  0x80   : > { %1557 = vmatmul.mubr.bf16.gmra.mrb[44].mxu1 %v2548_v54  ;;  %1467 = vmatprep.mubr.bf16.mxu0 %v2550_v55 }
  0x81   : > { %1564 = vmatprep.mubr.bf16.mxu1 %v2552_v56  ;;  %2366 = vmatpush3.bf16.msra.mxu0 %v2570_v53 }
  0x82   : > { %2399 = vmatpush3.bf16.msra.mxu1 %v2570_v53  ;;  %2367 = vmatprep.subr.bf16.mxu0 %v2577_v57 }
  0x83   : > { %2392 = vmatprep.subr.bf16.mxu1 %v2577_v57 }
  0x85   : > { %2368 = vmatpush3.bf16.msra.mxu0 %v2577_v57 }
  0x86   : > { %2400 = vmatpush3.bf16.msra.mxu1 %v2577_v57 }
  0x87   : > { %1468 = vmatmul.mubr.bf16.gmra.mrb[48].mxu0 %v2554_v58 }
  0x88   : > { %1565 = vmatmul.mubr.bf16.gmra.mrb[48].mxu1 %v2555_v59  ;;  %1475 = vmatprep.mubr.bf16.mxu0 %v2557_v60 }
  0x89   : > { %1572 = vmatprep.mubr.bf16.mxu1 %v2559_v61 }
  0x8f   : > { %1476 = vmatmul.mubr.bf16.gmra.mrb[52].mxu0 %v2561_v62 }
  0x90   : > { %1573 = vmatmul.mubr.bf16.gmra.mrb[52].mxu1 %v2562_v63  ;;  %1483 = vmatprep.mubr.bf16.mxu0 %v2564_v0 }
  0x91   : > { %1580 = vmatprep.mubr.bf16.mxu1 %v2566_v1 }
  0x97   : > { %1484 = vmatmul.mubr.bf16.gmra.mrb[56].mxu0 %v2568_v2 }
  0x98   : > { %1581 = vmatmul.mubr.bf16.gmra.mrb[56].mxu1 %v2569_v3  ;;  %1491 = vmatprep.mubr.bf16.mxu0 %v2571_v4 }
  0x99   : > { %1588 = vmatprep.mubr.bf16.mxu1 %v2573_v5 }
  0x9f   : > { %1492 = vmatmul.mubr.bf16.gmra.mrb[60].mxu0 %v2575_v6 }
  0xa0   : > { %1589 = vmatmul.mubr.bf16.gmra.mrb[60].mxu1 %v2576_v7  ;;  %2369 = vmatprep.mubr.bf16.mxu0 %v2578_v8 }
  0xa1   : > { %2377 = vmatprep.mubr.bf16.mxu1 %v2579_v9 }
  0xa7   : > { %2370 = vmatmul.mubr.bf16.vlgmr.msra.gmra.mrb[64].mxu0 %v2580_v10 }
  0xa8   : > { %2378 = vmatmul.mubr.bf16.vlgmr.msra.gmra.mrb[64].mxu1 %v2581_v11  ;;  %2373 = vmatprep.mubr.bf16.mxu0 %v2582_v12 }
  0xa9   : > { %2381 = vmatprep.mubr.bf16.mxu1 %v2583_v13 }
  0xaf   : > { %2374 = vmatmul.mubr.bf16.gmra.mrb[68].mxu0 %v2584_v14 }
  0xb0   : > { %2382 = vmatmul.mubr.bf16.gmra.mrb[68].mxu1 %v2585_v15 }
  0xfa   : > { %v2097_v16 = vpop.f32.mrb[0].mxu0 }
  0xfb   : > { %v2161_v17 = vpop.f32.mrb[0].mxu1  ;;  %v2098_v19 = vpop.f32.mrb[1].mxu0 }
  0xfc   : > { %v2099_v20 = vadd.f32 %v2098_v19, %v2097_v16  ;;  %v2162_v21 = vpop.f32.mrb[1].mxu1  ;;  %v2100_v22 = vpop.f32.mrb[2].mxu0 }
  0xfd   : > { %v2163_v23 = vadd.f32 %v2162_v21, %v2161_v17  ;;  %v2164_v24 = vpop.f32.mrb[2].mxu1  ;;  %v2101_v25 = vpop.f32.mrb[3].mxu0 }
  0xfe   : > { %v1244_v26 = vadd.f32 %v2099_v20, %v2923_v18  ;;  %v2102_v27 = vadd.f32 %v2101_v25, %v2100_v22  ;;  %v2165_v28 = vpop.f32.mrb[3].mxu1 }
  0xff   : > { %v2166_v29 = vadd.f32 %v2165_v28, %v2164_v24 }
 0x100   : > { %v2926_v30 = vadd.f32 %v2163_v23, %v1244_v26  ;;  %v1247_v31 = vadd.f32 %v2102_v27, %v2923_v18 }
 0x102   : > { %v2929_v32 = vadd.f32 %v2166_v29, %v1247_v31  ;;  %v2103_v33 = vpop.f32.mrb[4].mxu0 }
 0x103   : > { %v2167_v34 = vpop.f32.mrb[4].mxu1  ;;  %v2104_v35 = vpop.f32.mrb[5].mxu0 }
 0x104   : > { %v2105_v36 = vadd.f32 %v2104_v35, %v2103_v33  ;;  %v2168_v37 = vpop.f32.mrb[5].mxu1  ;;  %v2106_v38 = vpop.f32.mrb[6].mxu0 }
 0x105   : > { %v2169_v39 = vadd.f32 %v2168_v37, %v2167_v34  ;;  %v2170_v40 = vpop.f32.mrb[6].mxu1  ;;  %v2107_v41 = vpop.f32.mrb[7].mxu0 }
 0x106   : > { %v1252_v42 = vadd.f32 %v2105_v36, %v2923_v18  ;;  %v2108_v43 = vadd.f32 %v2107_v41, %v2106_v38  ;;  %v2171_v44 = vpop.f32.mrb[7].mxu1 }
 0x107   : > { %v2172_v45 = vadd.f32 %v2171_v44, %v2170_v40 }
 0x108   : > { %v2932_v46 = vadd.f32 %v2169_v39, %v1252_v42  ;;  %v1255_v47 = vadd.f32 %v2108_v43, %v2923_v18 }
 0x10a   : > { %v2935_v48 = vadd.f32 %v2172_v45, %v1255_v47  ;;  %v2109_v49 = vpop.f32.mrb[8].mxu0 }
 0x10b   : > { %v2173_v50 = vpop.f32.mrb[8].mxu1  ;;  %v2110_v51 = vpop.f32.mrb[9].mxu0 }
 0x10c   : > { %v2111_v52 = vadd.f32 %v2110_v51, %v2109_v49  ;;  %v2174_v53 = vpop.f32.mrb[9].mxu1  ;;  %v2112_v54 = vpop.f32.mrb[10].mxu0 }
 0x10d   : > { %v2175_v55 = vadd.f32 %v2174_v53, %v2173_v50  ;;  %v2176_v56 = vpop.f32.mrb[10].mxu1  ;;  %v2113_v57 = vpop.f32.mrb[11].mxu0 }
 0x10e   : > { %v1260_v58 = vadd.f32 %v2111_v52, %v2923_v18  ;;  %v2114_v59 = vadd.f32 %v2113_v57, %v2112_v54  ;;  %v2177_v60 = vpop.f32.mrb[11].mxu1 }
 0x10f   : > { %v2178_v61 = vadd.f32 %v2177_v60, %v2176_v56 }
 0x110   : > { %v2938_v62 = vadd.f32 %v2175_v55, %v1260_v58  ;;  %v1263_v63 = vadd.f32 %v2114_v59, %v2923_v18 }
 0x112   : > { %v2941_v0 = vadd.f32 %v2178_v61, %v1263_v63  ;;  %v2115_v1 = vpop.f32.mrb[12].mxu0 }
 0x113   : > { %v2179_v2 = vpop.f32.mrb[12].mxu1  ;;  %v2116_v3 = vpop.f32.mrb[13].mxu0 }
 0x114   : > { %v2117_v4 = vadd.f32 %v2116_v3, %v2115_v1  ;;  %v2180_v5 = vpop.f32.mrb[13].mxu1  ;;  %v2118_v6 = vpop.f32.mrb[14].mxu0 }
 0x115   : > { %v2181_v7 = vadd.f32 %v2180_v5, %v2179_v2  ;;  %v2182_v8 = vpop.f32.mrb[14].mxu1  ;;  %v2119_v9 = vpop.f32.mrb[15].mxu0 }
 0x116   : > { %v1268_v10 = vadd.f32 %v2117_v4, %v2923_v18  ;;  %v2120_v11 = vadd.f32 %v2119_v9, %v2118_v6  ;;  %v2183_v12 = vpop.f32.mrb[15].mxu1 }
 0x117   : > { %v2184_v13 = vadd.f32 %v2183_v12, %v2182_v8 }
 0x118   : > { %v2944_v14 = vadd.f32 %v2181_v7, %v1268_v10  ;;  %v1271_v15 = vadd.f32 %v2120_v11, %v2923_v18 }
 0x11a   : > { %v2947_v16 = vadd.f32 %v2184_v13, %v1271_v15  ;;  %v2121_v17 = vpop.f32.mrb[16].mxu0 }
 0x11b   : > { %v2185_v19 = vpop.f32.mrb[16].mxu1  ;;  %v2122_v20 = vpop.f32.mrb[17].mxu0 }
 0x11c   : > { %v2123_v21 = vadd.f32 %v2122_v20, %v2121_v17  ;;  %v2186_v22 = vpop.f32.mrb[17].mxu1  ;;  %v2124_v23 = vpop.f32.mrb[18].mxu0 }
 0x11d   : > { %v2187_v24 = vadd.f32 %v2186_v22, %v2185_v19  ;;  %v2188_v25 = vpop.f32.mrb[18].mxu1  ;;  %v2125_v26 = vpop.f32.mrb[19].mxu0 }
 0x11e   : > { %v1276_v27 = vadd.f32 %v2123_v21, %v2923_v18  ;;  %v2126_v28 = vadd.f32 %v2125_v26, %v2124_v23  ;;  %v2189_v29 = vpop.f32.mrb[19].mxu1 }
 0x11f   : > { %v2190_v31 = vadd.f32 %v2189_v29, %v2188_v25 }
 0x120   : > { %v2950_v33 = vadd.f32 %v2187_v24, %v1276_v27  ;;  %v1279_v34 = vadd.f32 %v2126_v28, %v2923_v18 }
 0x122   : > { %v2953_v35 = vadd.f32 %v2190_v31, %v1279_v34  ;;  %v2127_v36 = vpop.f32.mrb[20].mxu0 }
 0x123   : > { %v2191_v37 = vpop.f32.mrb[20].mxu1  ;;  %v2128_v38 = vpop.f32.mrb[21].mxu0 }
 0x124   : > { %v2129_v39 = vadd.f32 %v2128_v38, %v2127_v36  ;;  %v2192_v40 = vpop.f32.mrb[21].mxu1  ;;  %v2130_v41 = vpop.f32.mrb[22].mxu0 }
 0x125   : > { %v2193_v42 = vadd.f32 %v2192_v40, %v2191_v37  ;;  %v2194_v43 = vpop.f32.mrb[22].mxu1  ;;  %v2131_v44 = vpop.f32.mrb[23].mxu0 }
 0x126   : > { %v1284_v45 = vadd.f32 %v2129_v39, %v2923_v18  ;;  %v2132_v47 = vadd.f32 %v2131_v44, %v2130_v41  ;;  %v2195_v49 = vpop.f32.mrb[23].mxu1 }
 0x127   : > { %v2196_v50 = vadd.f32 %v2195_v49, %v2194_v43 }
 0x128   : > { %v2956_v51 = vadd.f32 %v2193_v42, %v1284_v45  ;;  %v1287_v52 = vadd.f32 %v2132_v47, %v2923_v18 }
 0x12a   : > { %v2959_v53 = vadd.f32 %v2196_v50, %v1287_v52  ;;  %v2133_v54 = vpop.f32.mrb[24].mxu0 }
 0x12b   : > { %v2197_v55 = vpop.f32.mrb[24].mxu1  ;;  %v2134_v56 = vpop.f32.mrb[25].mxu0 }
 0x12c   : > { %v2135_v57 = vadd.f32 %v2134_v56, %v2133_v54  ;;  %v2198_v58 = vpop.f32.mrb[25].mxu1  ;;  %v2136_v59 = vpop.f32.mrb[26].mxu0 }
 0x12d   : > { %v2199_v60 = vadd.f32 %v2198_v58, %v2197_v55  ;;  %v2200_v61 = vpop.f32.mrb[26].mxu1  ;;  %v2137_v63 = vpop.f32.mrb[27].mxu0 }
 0x12e   : > { %v1292_v1 = vadd.f32 %v2135_v57, %v2923_v18  ;;  %v2138_v2 = vadd.f32 %v2137_v63, %v2136_v59  ;;  %v2201_v3 = vpop.f32.mrb[27].mxu1 }
 0x12f   : > { %v2202_v4 = vadd.f32 %v2201_v3, %v2200_v61 }
 0x130   : > { %v2962_v5 = vadd.f32 %v2199_v60, %v1292_v1  ;;  %v1295_v6 = vadd.f32 %v2138_v2, %v2923_v18 }
 0x132   : > { %v2965_v7 = vadd.f32 %v2202_v4, %v1295_v6  ;;  %v2139_v8 = vpop.f32.mrb[28].mxu0 }
 0x133   : > { %v2203_v9 = vpop.f32.mrb[28].mxu1  ;;  %v2140_v10 = vpop.f32.mrb[29].mxu0 }
 0x134   : > { %v2141_v11 = vadd.f32 %v2140_v10, %v2139_v8  ;;  %v2204_v12 = vpop.f32.mrb[29].mxu1  ;;  %v2142_v13 = vpop.f32.mrb[30].mxu0 }
 0x135   : > { %v2205_v15 = vadd.f32 %v2204_v12, %v2203_v9  ;;  %v2206_v17 = vpop.f32.mrb[30].mxu1  ;;  %v2143_v19 = vpop.f32.mrb[31].mxu0 }
 0x136   : > { %v1300_v20 = vadd.f32 %v2141_v11, %v2923_v18  ;;  %v2144_v21 = vadd.f32 %v2143_v19, %v2142_v13  ;;  %v2207_v22 = vpop.f32.mrb[31].mxu1 }
 0x137   : > { %v2208_v23 = vadd.f32 %v2207_v22, %v2206_v17 }
 0x138   : > { %v2968_v24 = vadd.f32 %v2205_v15, %v1300_v20  ;;  %v1303_v25 = vadd.f32 %v2144_v21, %v2923_v18 }
 0x13a   : > { %v2971_v26 = vadd.f32 %v2208_v23, %v1303_v25  ;;  %v2225_v27 = vpop.f32.mrb[32].mxu0 }
 0x13b   : > { %v2289_v28 = vpop.f32.mrb[32].mxu1  ;;  %v2226_v29 = vpop.f32.mrb[33].mxu0 }
 0x13c   : > { %v2227_v31 = vadd.f32 %v2226_v29, %v2225_v27  ;;  %v2290_v34 = vpop.f32.mrb[33].mxu1  ;;  %v2228_v36 = vpop.f32.mrb[34].mxu0 }
 0x13d   : > { %v2291_v37 = vadd.f32 %v2290_v34, %v2289_v28  ;;  %v2292_v38 = vpop.f32.mrb[34].mxu1  ;;  %v2229_v39 = vpop.f32.mrb[35].mxu0 }
 0x13e   : > { %v1438_v40 = vadd.f32 %v2227_v31, %v2926_v30  ;;  %v2230_v41 = vadd.f32 %v2229_v39, %v2228_v36  ;;  %v2293_v42 = vpop.f32.mrb[35].mxu1 }
 0x13f   : > { %v2294_v43 = vadd.f32 %v2293_v42, %v2292_v38 }
 0x140   : > { %v1441_v44 = vadd.f32 %v2230_v41, %v2929_v32  ;;  %v2975_v45 = vadd.f32 %v2291_v37, %v1438_v40 }
 0x142   : > { %v2231_v18 = vpop.f32.mrb[36].mxu0  ;;  %v2977_v47 = vadd.f32 %v2294_v43, %v1441_v44 }
 0x143   : > { %v2295_v49 = vpop.f32.mrb[36].mxu1  ;;  %v2232_v50 = vpop.f32.mrb[37].mxu0 }
 0x144   : > { %v2233_v52 = vadd.f32 %v2232_v50, %v2231_v18  ;;  %v2296_v54 = vpop.f32.mrb[37].mxu1  ;;  %v2234_v55 = vpop.f32.mrb[38].mxu0 }
 0x145   : > { %v2297_v56 = vadd.f32 %v2296_v54, %v2295_v49  ;;  %v2298_v57 = vpop.f32.mrb[38].mxu1  ;;  %v2235_v58 = vpop.f32.mrb[39].mxu0 }
 0x146   : > { %v1446_v30 = vadd.f32 %v2233_v52, %v2932_v46  ;;  %v2236_v59 = vadd.f32 %v2235_v58, %v2234_v55  ;;  %v2299_v60 = vpop.f32.mrb[39].mxu1 }
 0x147   : > { %v2300_v61 = vadd.f32 %v2299_v60, %v2298_v57 }
 0x148   : > { %v1449_v32 = vadd.f32 %v2236_v59, %v2935_v48  ;;  %v2981_v63 = vadd.f32 %v2297_v56, %v1446_v30 }
 0x14a   : > { %v2237_v1 = vpop.f32.mrb[40].mxu0  ;;  %v2983_v2 = vadd.f32 %v2300_v61, %v1449_v32 }
 0x14b   : > { %v2301_v3 = vpop.f32.mrb[40].mxu1  ;;  %v2238_v4 = vpop.f32.mrb[41].mxu0 }
 0x14c   : > { %v2239_v6 = vadd.f32 %v2238_v4, %v2237_v1  ;;  %v2302_v8 = vpop.f32.mrb[41].mxu1  ;;  %v2240_v9 = vpop.f32.mrb[42].mxu0 }
 0x14d   : > { %v2303_v10 = vadd.f32 %v2302_v8, %v2301_v3  ;;  %v2304_v11 = vpop.f32.mrb[42].mxu1  ;;  %v2241_v12 = vpop.f32.mrb[43].mxu0 }
 0x14e   : > { %v1454_v46 = vadd.f32 %v2239_v6, %v2938_v62  ;;  %v2242_v13 = vadd.f32 %v2241_v12, %v2240_v9  ;;  %v2305_v15 = vpop.f32.mrb[43].mxu1 }
 0x14f   : > { %v2306_v17 = vadd.f32 %v2305_v15, %v2304_v11 }
 0x150   : > { %v1457_v48 = vadd.f32 %v2242_v13, %v2941_v0  ;;  %v2987_v19 = vadd.f32 %v2303_v10, %v1454_v46 }
 0x152   : > { %v2243_v20 = vpop.f32.mrb[44].mxu0  ;;  %v2989_v21 = vadd.f32 %v2306_v17, %v1457_v48 }
 0x153   : > { %v2307_v22 = vpop.f32.mrb[44].mxu1  ;;  %v2244_v23 = vpop.f32.mrb[45].mxu0 }
 0x154   : > { %v2245_v25 = vadd.f32 %v2244_v23, %v2243_v20  ;;  %v2308_v27 = vpop.f32.mrb[45].mxu1  ;;  %v2246_v28 = vpop.f32.mrb[46].mxu0 }
 0x155   : > { %v2309_v29 = vadd.f32 %v2308_v27, %v2307_v22  ;;  %v2310_v31 = vpop.f32.mrb[46].mxu1  ;;  %v2247_v34 = vpop.f32.mrb[47].mxu0 }
 0x156   : > { %v1462_v62 = vadd.f32 %v2245_v25, %v2944_v14  ;;  %v2248_v36 = vadd.f32 %v2247_v34, %v2246_v28  ;;  %v2311_v37 = vpop.f32.mrb[47].mxu1 }
 0x157   : > { %v2312_v38 = vadd.f32 %v2311_v37, %v2310_v31 }
 0x158   : > { %v1465_v0 = vadd.f32 %v2248_v36, %v2947_v16  ;;  %v2993_v39 = vadd.f32 %v2309_v29, %v1462_v62 }
 0x15a   : > { %v2249_v40 = vpop.f32.mrb[48].mxu0  ;;  %v2995_v41 = vadd.f32 %v2312_v38, %v1465_v0 }
 0x15b   : > { %v2313_v42 = vpop.f32.mrb[48].mxu1  ;;  %v2250_v43 = vpop.f32.mrb[49].mxu0 }
 0x15c   : > { %v2251_v44 = vadd.f32 %v2250_v43, %v2249_v40  ;;  %v2314_v18 = vpop.f32.mrb[49].mxu1  ;;  %v2252_v49 = vpop.f32.mrb[50].mxu0 }
 0x15d   : > { %v2315_v50 = vadd.f32 %v2314_v18, %v2313_v42  ;;  %v2316_v52 = vpop.f32.mrb[50].mxu1  ;;  %v2253_v54 = vpop.f32.mrb[51].mxu0 }
 0x15e   : > { %v1470_v14 = vadd.f32 %v2251_v44, %v2950_v33  ;;  %v2254_v55 = vadd.f32 %v2253_v54, %v2252_v49  ;;  %v2317_v56 = vpop.f32.mrb[51].mxu1 }
 0x15f   : > { %v2318_v57 = vadd.f32 %v2317_v56, %v2316_v52 }
 0x160   : > { %v1473_v16 = vadd.f32 %v2254_v55, %v2953_v35  ;;  %v1567_v58 = vadd.f32 %v2315_v50, %v1470_v14 }
 0x162   : > { %v2255_v30 = vpop.f32.mrb[52].mxu0  ;;  %v2999_v59 = vadd.f32 %v2318_v57, %v1473_v16 }
 0x163   : > { %v2319_v60 = vpop.f32.mrb[52].mxu1  ;;  %v2256_v61 = vpop.f32.mrb[53].mxu0 }
 0x164   : > { %v2257_v32 = vadd.f32 %v2256_v61, %v2255_v30  ;;  %v2320_v1 = vpop.f32.mrb[53].mxu1  ;;  %v2258_v3 = vpop.f32.mrb[54].mxu0 }
 0x165   : > { %v2321_v4 = vadd.f32 %v2320_v1, %v2319_v60  ;;  %v2322_v6 = vpop.f32.mrb[54].mxu1  ;;  %v2259_v8 = vpop.f32.mrb[55].mxu0 }
 0x166   : > { %v1478_v9 = vadd.f32 %v2257_v32, %v2956_v51  ;;  %v2260_v33 = vadd.f32 %v2259_v8, %v2258_v3  ;;  %v2323_v10 = vpop.f32.mrb[55].mxu1 }
 0x167   : > { %v2324_v11 = vadd.f32 %v2323_v10, %v2322_v6 }
 0x168   : > { %v1481_v12 = vadd.f32 %v2260_v33, %v2959_v53  ;;  %v1575_v35 = vadd.f32 %v2321_v4, %v1478_v9 }
 0x16a   : > { %v2261_v46 = vpop.f32.mrb[56].mxu0  ;;  %v1578_v13 = vadd.f32 %v2324_v11, %v1481_v12 }
 0x16b   : > { %v2325_v15 = vpop.f32.mrb[56].mxu1  ;;  %v2262_v17 = vpop.f32.mrb[57].mxu0 }
 0x16c   : > { %v2263_v48 = vadd.f32 %v2262_v17, %v2261_v46  ;;  %v2326_v20 = vpop.f32.mrb[57].mxu1  ;;  %v2264_v22 = vpop.f32.mrb[58].mxu0 }
 0x16d   : > { %v2327_v23 = vadd.f32 %v2326_v20, %v2325_v15  ;;  %v2328_v25 = vpop.f32.mrb[58].mxu1  ;;  %v2265_v27 = vpop.f32.mrb[59].mxu0 }
 0x16e   : > { %v1486_v28 = vadd.f32 %v2263_v48, %v2962_v5  ;;  %v2266_v29 = vadd.f32 %v2265_v27, %v2264_v22  ;;  %v2329_v51 = vpop.f32.mrb[59].mxu1 }
 0x16f   : > { %v2330_v31 = vadd.f32 %v2329_v51, %v2328_v25 }
 0x170   : > { %v1489_v34 = vadd.f32 %v2266_v29, %v2965_v7  ;;  %v1583_v62 = vadd.f32 %v2327_v23, %v1486_v28 }
 0x172   : > { %v2267_v53 = vpop.f32.mrb[60].mxu0  ;;  %v3005_v36 = vadd.f32 %v2330_v31, %v1489_v34 }
 0x173   : > { %v2331_v37 = vpop.f32.mrb[60].mxu1  ;;  %v2268_v38 = vpop.f32.mrb[61].mxu0 }
 0x174   : > { %v2269_v0 = vadd.f32 %v2268_v38, %v2267_v53  ;;  %v2332_v40 = vpop.f32.mrb[61].mxu1  ;;  %v2270_v42 = vpop.f32.mrb[62].mxu0 }
 0x175   : > { %v2333_v43 = vadd.f32 %v2332_v40, %v2331_v37  ;;  %v2334_v44 = vpop.f32.mrb[62].mxu1  ;;  %v2271_v18 = vpop.f32.mrb[63].mxu0 }
 0x176   : > { %v1494_v49 = vadd.f32 %v2269_v0, %v2968_v24  ;;  %v2272_v5 = vadd.f32 %v2271_v18, %v2270_v42  ;;  %v2335_v50 = vpop.f32.mrb[63].mxu1 }
 0x177   : > { %v2336_v52 = vadd.f32 %v2335_v50, %v2334_v44 }
 0x178   : > { %v1497_v7 = vadd.f32 %v2272_v5, %v2971_v26  ;;  %v1591_v54 = vadd.f32 %v2333_v43, %v1494_v49 }
 0x17a   : > { %v2371_v14 = vpop.f32.mrb[64].mxu0  ;;  %v1594_v55 = vadd.f32 %v2336_v52, %v1497_v7 }
 0x17b   : > { %v1640_v56 = vadd.f32 %v2371_v14, %v2981_v63  ;;  %v2379_v57 = vpop.f32.mrb[64].mxu1  ;;  %v1631_v16 = vpop.f32.mrb[65].mxu0 }
 0x17c   : > { %v1672_v30 = vadd.f32 %v2379_v57, %v1575_v35  ;;  %v1632_v60 = vadd.f32 %v1631_v16, %v2975_v45  ;;  %v1663_v61 = vpop.f32.mrb[65].mxu1  ;;  %v2372_v32 = vpop.f32.mrb[66].mxu0 }
 0x17d   : > { %v1664_v1 = vadd.f32 %v1663_v61, %v1567_v58  ;;  %v1643_v24 = vadd.f32 %v2372_v32, %v2983_v2  ;;  %v2380_v3 = vpop.f32.mrb[66].mxu1  ;;  %v1634_v4 = vpop.f32.mrb[67].mxu0  ;;  %v1696_v9 = vmax.f32 %v1640_v56, 0.0 }
 0x17e   : > { %v1675_v6 = vadd.f32 %v2380_v3, %v1578_v13  ;;  %v1635_v26 = vadd.f32 %v1634_v4, %v2977_v47  ;;  %v1666_v8 = vpop.f32.mrb[67].mxu1  ;;  %v1704_v10 = vmax.f32 %v1672_v30, 0.0  ;;  %v1694_v11 = vmax.f32 %v1632_v60, 0.0 }
 0x17f   : > { %v1697_v33 = vmax.f32 %v1643_v24, 0.0  ;;  %v1667_v63 = vadd.f32 %v1666_v8, %v2999_v59  ;;  %v1702_v58 = vmax.f32 %v1664_v1, 0.0 }
 0x180   : > { %v1705_v45 = vmax.f32 %v1675_v6, 0.0  ;;  %v1695_v2 = vmax.f32 %v1635_v26, 0.0 }
 0x181   : > { %v2042_v12 = vpack.c.bf16 %v1697_v33, %v1696_v9  ;;  %v1703_v47 = vmax.f32 %v1667_v63, 0.0 }
 0x182   : > { %v2062_v35 = vpack.c.bf16 %v1705_v45, %v1704_v10  ;;  %v2037_v46 = vpack.c.bf16 %v1695_v2, %v1694_v11  ;;  %v2375_v13 = vpop.f32.mrb[68].mxu0 }
 0x183   : > { %2074 = vst [vmem:[%s3018_s20 + $0x8] sm:$0xff] %v2042_v12   ;;  %v2057_v59 = vpack.c.bf16 %v1703_v47, %v1702_v58  ;;  %v1656_v15 = vadd.f32 %v2375_v13, %v2993_v39  ;;  %v2383_v17 = vpop.f32.mrb[68].mxu1  ;;  %v1647_v48 = vpop.f32.mrb[69].mxu0 }
 0x184   : > { %2078 = vst [vmem:[%s3018_s20 + $0x28] sm:$0xff] %v2062_v35   ;;  %2038 = vst [vmem:[%s3018_s20] sm:$0xff] %v2037_v46   ;;  %v1688_v20 = vadd.f32 %v2383_v17, %v1591_v54  ;;  %v1648_v22 = vadd.f32 %v1647_v48, %v2987_v19  ;;  %v1679_v23 = vpop.f32.mrb[69].mxu1  ;;  %v2376_v25 = vpop.f32.mrb[70].mxu0 }
 0x185   : > { %2077 = vst [vmem:[%s3018_s20 + $0x20] sm:$0xff] %v2057_v59   ;;  %v1680_v27 = vadd.f32 %v1679_v23, %v1583_v62  ;;  %v1659_v28 = vadd.f32 %v2376_v25, %v2995_v41  ;;  %v2384_v29 = vpop.f32.mrb[70].mxu1  ;;  %v1650_v51 = vpop.f32.mrb[71].mxu0  ;;  %v1700_v53 = vmax.f32 %v1656_v15, 0.0 }
 0x186   : > { %v1691_v31 = vadd.f32 %v2384_v29, %v1594_v55  ;;  %v1651_v34 = vadd.f32 %v1650_v51, %v2989_v21  ;;  %v1682_v39 = vpop.f32.mrb[71].mxu1  ;;  %v1708_v38 = vmax.f32 %v1688_v20, 0.0  ;;  %v1698_v0 = vmax.f32 %v1648_v22, 0.0 }
 0x187   : > { %v1701_v37 = vmax.f32 %v1659_v28, 0.0  ;;  %v1683_v19 = vadd.f32 %v1682_v39, %v3005_v36  ;;  %v1706_v42 = vmax.f32 %v1680_v27, 0.0 }
 0x188   : > { %v1709_v40 = vmax.f32 %v1691_v31, 0.0  ;;  %v1699_v62 = vmax.f32 %v1651_v34, 0.0 }
 0x189   : > { %v2052_v41 = vpack.c.bf16 %v1701_v37, %v1700_v53  ;;  %v1707_v43 = vmax.f32 %v1683_v19, 0.0 }
 0x18a   : > { %v2072_v44 = vpack.c.bf16 %v1709_v40, %v1708_v38  ;;  %v2047_v18 = vpack.c.bf16 %v1699_v62, %v1698_v0 }
 0x18b   : > { %2076 = vst [vmem:[%s3018_s20 + $0x18] sm:$0xff] %v2052_v41   ;;  %v2067_v49 = vpack.c.bf16 %v1707_v43, %v1706_v42 }
 0x18c   : > { %2080 = vst [vmem:[%s3018_s20 + $0x38] sm:$0xff] %v2072_v44   ;;  %2075 = vst [vmem:[%s3018_s20 + $0x10] sm:$0xff] %v2047_v18  }
 0x18d   : > { %2079 = vst [vmem:[%s3018_s20 + $0x30] sm:$0xff] %v2067_v49  }
 0x18e PF: > { %s13_s12 = sadd.s32 1, %s2592_s12  }
 0x18f   : > { %p10_p4 = scmp.ge.s32.totalorder %s13_s12, 5  }
 0x191   :  { %12 = sbr.rel (!%p10_p4) target bundleno = 1 (0x1), region = 62 }

// kernel: tsm_retinanet_forward.42
= control target key start
LH: loop header
LB: loop body
LE: loop exit
PB: predicated region body
PF: predicated region fallthrough
CT: control target
= control target key end

     0   :  { %s2455_s12 = smov 0   ;;  %s2882_s0 = inlined_call_operand.vmem [shape: bf16[384,1152], index: 0, kind: input, shape index: {}]   ;;  %s2883_s1 = inlined_call_operand.vmem [shape: bf16[1152,128], index: 1, kind: input, shape index: {}]   ;;  %s2884_s2 = inlined_call_operand.vmem [shape: f32[1,128], index: 2, kind: input, shape index: {}]   ;;  %s2885_s3 = inlined_call_operand.vmem [shape: f32[384,128], index: 3, kind: output, shape index: {}]  }
   0x1 LB: > { %s1766_s13 = sadd.s32 4294967295, %s2433_s12   ;;  %p1770_p0 = scmp.ge.s32.totalorder %s2433_s12, 1  ;;  %s2433_s12 = sphi %s2455_s12, %s13_s12  }
   0x2   : > { %p139_p1 = scmp.lt.s32.totalorder %s2433_s12, 4 }
   0x4   : > { %p140_p2 = pnand %p1770_p0, %p139_p1 }
   0x5   : > { %v2251_v0 = vld [vmem:[%s2883_s1 + $0x40] sm:$0xff] (!%p140_p2)   ;;  %v2255_v4 = vld [vmem:[%s2883_s1 + $0x48] sm:$0xff] (!%p140_p2)   ;;  %v2259_v8 = vld [vmem:[%s2883_s1 + $0x50] sm:$0xff] (!%p140_p2)   ;;  %s1771_s19 = sshll.u32 (!%p140_p2), %s1766_s13, 4 }
   0x6   : > { %143 = sbr.rel (%p140_p2) target bundleno = 394 (0x18a), region = 32  ;;  %v2252_v1 = vld [vmem:[%s2883_s1 + $0xc0] sm:$0xff] (!%p140_p2)   ;;  %1922 = vmatprep.subr.bf16.mxu0 (!%p140_p2), %v2251_v0  ;;  %v2256_v5 = vld [vmem:[%s2883_s1 + $0xc8] sm:$0xff] (!%p140_p2)   ;;  %v2260_v9 = vld [vmem:[%s2883_s1 + $0xd0] sm:$0xff] (!%p140_p2)   ;;  %p165_p3 = scmp.lt.s32.totalorder (!%p140_p2), %s1771_s19, 47 }
   0x7   : > { %v2253_v2 = vld [vmem:[%s2883_s1] sm:$0xff] (!%p140_p2)   ;;  %1986 = vmatprep.subr.bf16.mxu1 (!%p140_p2), %v2252_v1  ;;  %v2257_v6 = vld [vmem:[%s2883_s1 + $0x8] sm:$0xff] (!%p140_p2)   ;;  %v2261_v10 = vld [vmem:[%s2883_s1 + $0x10] sm:$0xff] (!%p140_p2)  }
   0x8   : > { %v2254_v3 = vld [vmem:[%s2883_s1 + $0x80] sm:$0xff] (!%p140_p2)   ;;  %1923 = vmatpush3.bf16.msra.mxu0 (!%p140_p2), %v2253_v2  ;;  %v2258_v7 = vld [vmem:[%s2883_s1 + $0x88] sm:$0xff] (!%p140_p2)   ;;  %v2262_v11 = vld [vmem:[%s2883_s1 + $0x90] sm:$0xff] (!%p140_p2)  }
   0x9   : > { %1987 = vmatpush3.bf16.msra.mxu1 (!%p140_p2), %v2254_v3  ;;  %1924 = vmatprep.subr.bf16.mxu0 (!%p140_p2), %v2255_v4  ;;  %v2263_v12 = vld [vmem:[%s2883_s1 + $0x58] sm:$0xff] (!%p140_p2)   ;;  %v2267_v16 = vld [vmem:[%s2883_s1 + $0x60] sm:$0xff] (!%p140_p2)   ;;  %v2271_v20 = vld [vmem:[%s2883_s1 + $0x68] sm:$0xff] (!%p140_p2)  }
   0xa   : > { %1988 = vmatprep.subr.bf16.mxu1 (!%p140_p2), %v2256_v5  ;;  %v2264_v13 = vld [vmem:[%s2883_s1 + $0xd8] sm:$0xff] (!%p140_p2)   ;;  %v2268_v17 = vld [vmem:[%s2883_s1 + $0xe0] sm:$0xff] (!%p140_p2)   ;;  %v2272_v21 = vld [vmem:[%s2883_s1 + $0xe8] sm:$0xff] (!%p140_p2)  }
   0xb   : > { %v2265_v14 = vld [vmem:[%s2883_s1 + $0x18] sm:$0xff] (!%p140_p2)   ;;  %v2269_v18 = vld [vmem:[%s2883_s1 + $0x20] sm:$0xff] (!%p140_p2)   ;;  %v2273_v22 = vld [vmem:[%s2883_s1 + $0x28] sm:$0xff] (!%p140_p2)  }
   0xc   : > { %1925 = vmatpush3.bf16.msra.mxu0 (!%p140_p2), %v2257_v6  ;;  %v2266_v15 = vld [vmem:[%s2883_s1 + $0x98] sm:$0xff] (!%p140_p2)   ;;  %v2270_v19 = vld [vmem:[%s2883_s1 + $0xa0] sm:$0xff] (!%p140_p2)   ;;  %v2274_v23 = vld [vmem:[%s2883_s1 + $0xa8] sm:$0xff] (!%p140_p2)  }
   0xd   : > { %1989 = vmatpush3.bf16.msra.mxu1 %v2258_v7  ;;  %1926 = vmatprep.subr.bf16.mxu0 %v2259_v8  ;;  %s2887_s19 = smov (!%p165_p3, %s1771_s19), 47  ;;  %v2275_v24 = vld [vmem:[%s2883_s1 + $0x70] sm:$0xff]   ;;  %v2279_v28 = vld [vmem:[%s2883_s1 + $0x78] sm:$0xff]   ;;  %v2289_v36 = vld [vmem:[%s2883_s1 + $0x140] sm:$0xff]  }
   0xe   : > { %1990 = vmatprep.subr.bf16.mxu1 %v2260_v9  ;;  %v2276_v25 = vld [vmem:[%s2883_s1 + $0xf0] sm:$0xff]   ;;  %s2242_s16 = smul.u32 36, %s2887_s19  ;;  %v2280_v29 = vld [vmem:[%s2883_s1 + $0xf8] sm:$0xff]   ;;  %v2290_v37 = vld [vmem:[%s2883_s1 + $0x1c0] sm:$0xff]  }
   0xf   : > { %v2277_v26 = vld [vmem:[%s2883_s1 + $0x30] sm:$0xff]   ;;  %v2281_v30 = vld [vmem:[%s2883_s1 + $0x38] sm:$0xff]   ;;  %v2291_v38 = vld [vmem:[%s2883_s1 + $0x100] sm:$0xff]  }
  0x10   : > { %1927 = vmatpush3.bf16.msra.mxu0 %v2261_v10  ;;  %v2278_v27 = vld [vmem:[%s2883_s1 + $0xb0] sm:$0xff]   ;;  %s2561_s13 = scalar_lea.vmem %s2882_s0, %s2242_s16  ;;  %v2282_v31 = vld [vmem:[%s2883_s1 + $0xb8] sm:$0xff]   ;;  %v2292_v39 = vld [vmem:[%s2883_s1 + $0x180] sm:$0xff]  }
  0x11   : > { %1991 = vmatpush3.bf16.msra.mxu1 %v2262_v11  ;;  %1928 = vmatprep.subr.bf16.mxu0 %v2263_v12  ;;  %v2283_v32 = vld [vmem:[%s2561_s13] ss:$36 sps:$4 sm:$0xff]   ;;  %v2286_v34 = vld [vmem:[%s2561_s13 + $0x8] ss:$36 sps:$4 sm:$0xff]   ;;  %v2295_v41 = vld [vmem:[%s2561_s13 + $0x54] ss:$36 sps:$4 sm:$0xff]  }
  0x12   : > { %1992 = vmatprep.subr.bf16.mxu1 %v2264_v13  ;;  %v2285_v33 = vld [vmem:[%s2561_s13 + $0x4] ss:$36 sps:$4 sm:$0xff]   ;;  %v2288_v35 = vld [vmem:[%s2561_s13 + $0xc] ss:$36 sps:$4 sm:$0xff]   ;;  %v2303_v48 = vld [vmem:[%s2561_s13 + $0x94] ss:$36 sps:$4 sm:$0xff]  }
  0x13   : > { %1241 = vmatprep.mubr.bf16.mxu0 %v2285_v33  ;;  %1338 = vmatprep.mubr.bf16.mxu1 %v2288_v35  ;;  %v2293_v40 = vld [vmem:[%s2561_s13 + $0x4c] ss:$36 sps:$4 sm:$0xff]   ;;  %v2305_v49 = vld [vmem:[%s2561_s13 + $0x9c] ss:$36 sps:$4 sm:$0xff]   ;;  %v2315_v57 = vld [vmem:[%s2561_s13 + $0xe4] ss:$36 sps:$4 sm:$0xff]  }
  0x14   : > { %1929 = vmatpush3.bf16.msra.mxu0 %v2265_v14  ;;  %v2297_v42 = vld [vmem:[%s2561_s13 + $0x48] ss:$36 sps:$4 sm:$0xff]   ;;  %v2298_v43 = vld [vmem:[%s2561_s13 + $0x50] ss:$36 sps:$4 sm:$0xff]   ;;  %v2308_v51 = vld [vmem:[%s2561_s13 + $0x98] ss:$36 sps:$4 sm:$0xff]  }
  0x15   : > { %1993 = vmatpush3.bf16.msra.mxu1 %v2266_v15  ;;  %1930 = vmatprep.subr.bf16.mxu0 %v2267_v16  ;;  %v2299_v44 = vld [vmem:[%s2883_s1 + $0x148] sm:$0xff]   ;;  %v2307_v50 = vld [vmem:[%s2561_s13 + $0x90] ss:$36 sps:$4 sm:$0xff]   ;;  %v2313_v56 = vld [vmem:[%s2561_s13 + $0xdc] ss:$36 sps:$4 sm:$0xff]  }
  0x16   : > { %1994 = vmatprep.subr.bf16.mxu1 %v2268_v17  ;;  %v2300_v45 = vld [vmem:[%s2883_s1 + $0x1c8] sm:$0xff]   ;;  %v2309_v52 = vld [vmem:[%s2883_s1 + $0x150] sm:$0xff]   ;;  %v2317_v58 = vld [vmem:[%s2561_s13 + $0xd8] ss:$36 sps:$4 sm:$0xff]  }
  0x17   : > { %v2301_v46 = vld [vmem:[%s2883_s1 + $0x108] sm:$0xff]   ;;  %v2310_v53 = vld [vmem:[%s2883_s1 + $0x1d0] sm:$0xff]   ;;  %v2318_v59 = vld [vmem:[%s2561_s13 + $0xe0] ss:$36 sps:$4 sm:$0xff]  }
  0x18   : > { %1931 = vmatpush3.bf16.msra.mxu0 %v2269_v18  ;;  %v2302_v47 = vld [vmem:[%s2883_s1 + $0x188] sm:$0xff]   ;;  %v2311_v54 = vld [vmem:[%s2883_s1 + $0x110] sm:$0xff]   ;;  %v2319_v60 = vld [vmem:[%s2883_s1 + $0x158] sm:$0xff]  }
  0x19   : > { %1995 = vmatpush3.bf16.msra.mxu1 %v2270_v19  ;;  %1932 = vmatprep.subr.bf16.mxu0 %v2271_v20  ;;  %v2312_v55 = vld [vmem:[%s2883_s1 + $0x190] sm:$0xff]   ;;  %v2320_v61 = vld [vmem:[%s2883_s1 + $0x1d8] sm:$0xff]   ;;  %v2323_v0 = vld [vmem:[%s2561_s13 + $0x124] ss:$36 sps:$4 sm:$0xff]  }
  0x1a   : > { %1996 = vmatprep.subr.bf16.mxu1 %v2272_v21  ;;  %v2321_v62 = vld [vmem:[%s2883_s1 + $0x118] sm:$0xff]   ;;  %v2325_v1 = vld [vmem:[%s2561_s13 + $0x12c] ss:$36 sps:$4 sm:$0xff]   ;;  %v2327_v2 = vld [vmem:[%s2561_s13 + $0x120] ss:$36 sps:$4 sm:$0xff]  }
  0x1b   : > { %v2322_v63 = vld [vmem:[%s2883_s1 + $0x198] sm:$0xff]   ;;  %v2329_v3 = vld [vmem:[%s2883_s1 + $0x160] sm:$0xff]   ;;  %v2328_v4 = vld [vmem:[%s2561_s13 + $0x128] ss:$36 sps:$4 sm:$0xff]  }
  0x1c   : > { %1933 = vmatpush3.bf16.msra.mxu0 %v2273_v22  ;;  %v2330_v5 = vld [vmem:[%s2883_s1 + $0x1e0] sm:$0xff]   ;;  %v2333_v8 = vld [vmem:[%s2561_s13 + $0x16c] ss:$36 sps:$4 sm:$0xff]   ;;  %v2335_v9 = vld [vmem:[%s2561_s13 + $0x174] ss:$36 sps:$4 sm:$0xff]  }
  0x1d   : > { %1997 = vmatpush3.bf16.msra.mxu1 %v2274_v23  ;;  %1934 = vmatprep.subr.bf16.mxu0 %v2275_v24  ;;  %v2331_v6 = vld [vmem:[%s2883_s1 + $0x120] sm:$0xff]   ;;  %v2339_v10 = vld [vmem:[%s2883_s1 + $0x168] sm:$0xff]   ;;  %v2338_v15 = vld [vmem:[%s2561_s13 + $0x170] ss:$36 sps:$4 sm:$0xff]  }
  0x1e   : > { %1998 = vmatprep.subr.bf16.mxu1 %v2276_v25  ;;  %v2332_v7 = vld [vmem:[%s2883_s1 + $0x1a0] sm:$0xff]   ;;  %v2340_v11 = vld [vmem:[%s2883_s1 + $0x1e8] sm:$0xff]   ;;  %v2343_v16 = vld [vmem:[%s2561_s13 + $0x1b4] ss:$36 sps:$4 sm:$0xff]  }
  0x1f   : > { %v2337_v12 = vld [vmem:[%s2561_s13 + $0x168] ss:$36 sps:$4 sm:$0xff]   ;;  %v2345_v17 = vld [vmem:[%s2561_s13 + $0x1bc] ss:$36 sps:$4 sm:$0xff]   ;;  %v2349_v18 = vld [vmem:[%s2883_s1 + $0x170] sm:$0xff]  }
  0x20   : > { %1935 = vmatpush3.bf16.msra.mxu0 %v2277_v26  ;;  %v2341_v13 = vld [vmem:[%s2883_s1 + $0x128] sm:$0xff]   ;;  %v2350_v19 = vld [vmem:[%s2883_s1 + $0x1f0] sm:$0xff]   ;;  %v2348_v23 = vld [vmem:[%s2561_s13 + $0x1b8] ss:$36 sps:$4 sm:$0xff]  }
  0x21   : > { %1999 = vmatpush3.bf16.msra.mxu1 %v2278_v27  ;;  %1936 = vmatprep.subr.bf16.mxu0 %v2279_v28  ;;  %v2342_v14 = vld [vmem:[%s2883_s1 + $0x1a8] sm:$0xff]   ;;  %v2351_v20 = vld [vmem:[%s2883_s1 + $0x130] sm:$0xff]   ;;  %v2353_v24 = vld [vmem:[%s2561_s13 + $0x1fc] ss:$36 sps:$4 sm:$0xff]  }
  0x22   : > { %2000 = vmatprep.subr.bf16.mxu1 %v2280_v29  ;;  %v2352_v21 = vld [vmem:[%s2883_s1 + $0x1b0] sm:$0xff]   ;;  %v2355_v25 = vld [vmem:[%s2561_s13 + $0x204] ss:$36 sps:$4 sm:$0xff]   ;;  %v2359_v26 = vld [vmem:[%s2883_s1 + $0x178] sm:$0xff]  }
  0x23   : > { %v2347_v22 = vld [vmem:[%s2561_s13 + $0x1b0] ss:$36 sps:$4 sm:$0xff]   ;;  %v2360_v27 = vld [vmem:[%s2883_s1 + $0x1f8] sm:$0xff]  }
  0x24   : > { %1937 = vmatpush3.bf16.msra.mxu0 %v2281_v30  ;;  %v2361_v28 = vld [vmem:[%s2883_s1 + $0x138] sm:$0xff]   ;;  %v2363_v35 = vld [vmem:[%s2561_s13 + $0x10] ss:$36 sps:$4 sm:$0xff]  }
  0x25   : > { %2001 = vmatpush3.bf16.msra.mxu1 %v2282_v31  ;;  %2050 = vmatprep.subr.bf16.mxu0 %v2289_v36  ;;  %v2362_v29 = vld [vmem:[%s2883_s1 + $0x1b8] sm:$0xff]   ;;  %v2358_v31 = vld [vmem:[%s2561_s13 + $0x200] ss:$36 sps:$4 sm:$0xff]  }
  0x26   : > { %2114 = vmatprep.subr.bf16.mxu1 %v2290_v37  ;;  %v2357_v30 = vld [vmem:[%s2561_s13 + $0x1f8] ss:$36 sps:$4 sm:$0xff]  }
  0x27   : > { %1242 = vmatmul.mubr.bf16.vlgmr.msra.gmra.mrb[0].mxu0 %v2283_v32  ;;  %v2369_v32 = vld [vmem:[%s2883_s1 + $0x200] sm:$0xff]   ;;  %v2365_v33 = vld [vmem:[%s2561_s13 + $0x14] ss:$36 sps:$4 sm:$0xff]  }
  0x28   : > { %1339 = vmatmul.mubr.bf16.vlgmr.msra.gmra.mrb[0].mxu1 %v2286_v34  ;;  %2051 = vmatpush3.bf16.msra.mxu0 %v2291_v38  ;;  %v2368_v34 = vld [vmem:[%s2561_s13 + $0x1c] ss:$36 sps:$4 sm:$0xff]   ;;  %v2372_v38 = vld [vmem:[%s2561_s13 + $0x64] ss:$36 sps:$4 sm:$0xff]  }
  0x29   : > { %2115 = vmatpush3.bf16.msra.mxu1 %v2292_v39  ;;  %1249 = vmatprep.mubr.bf16.mxu0 %v2293_v40  ;;  %v2366_v36 = vld [vmem:[%s2561_s13 + $0x18] ss:$36 sps:$4 sm:$0xff]   ;;  %v2376_v39 = vld [vmem:[%s2883_s1 + $0x208] sm:$0xff]   ;;  %v2383_v40 = vld [vmem:[%s2883_s1 + $0x210] sm:$0xff]  }
  0x2a   : > { %1346 = vmatprep.mubr.bf16.mxu1 %v2295_v41  ;;  %2052 = vmatprep.subr.bf16.mxu0 %v2299_v44  ;;  %v2370_v37 = vld [vmem:[%s2561_s13 + $0x5c] ss:$36 sps:$4 sm:$0xff]   ;;  %v2379_v44 = vld [vmem:[%s2561_s13 + $0xac] ss:$36 sps:$4 sm:$0xff]  }
  0x2b   : > { %2116 = vmatprep.subr.bf16.mxu1 %v2300_v45  ;;  %v2374_v41 = vld [vmem:[%s2561_s13 + $0x58] ss:$36 sps:$4 sm:$0xff]  }
  0x2c   : > { %2053 = vmatpush3.bf16.msra.mxu0 %v2301_v46  ;;  %v2390_v45 = vld [vmem:[%s2883_s1 + $0x218] sm:$0xff]   ;;  %v2397_v46 = vld [vmem:[%s2883_s1 + $0x220] sm:$0xff]  }
  0x2d   : > { %2117 = vmatpush3.bf16.msra.mxu1 %v2302_v47  ;;  %2054 = vmatprep.subr.bf16.mxu0 %v2309_v52  ;;  %v2381_v47 = vld [vmem:[%s2561_s13 + $0xa0] ss:$36 sps:$4 sm:$0xff]   ;;  %v2388_v52 = vld [vmem:[%s2561_s13 + $0xe8] ss:$36 sps:$4 sm:$0xff]  }
  0x2e   : > { %2118 = vmatprep.subr.bf16.mxu1 %v2310_v53  ;;  %v2411_v53 = vld [vmem:[%s2883_s1 + $0x230] sm:$0xff]  }
  0x2f   : > { %1250 = vmatmul.mubr.bf16.gmra.mrb[4].mxu0 %v2297_v42  ;;  %v2375_v42 = vld [vmem:[%s2561_s13 + $0x60] ss:$36 sps:$4 sm:$0xff]  }
  0x30   : > { %1347 = vmatmul.mubr.bf16.gmra.mrb[4].mxu1 %v2298_v43  ;;  %1257 = vmatprep.mubr.bf16.mxu0 %v2303_v48  ;;  %v2377_v43 = vld [vmem:[%s2561_s13 + $0xa4] ss:$36 sps:$4 sm:$0xff]  }
  0x31   : > { %1354 = vmatprep.mubr.bf16.mxu1 %v2305_v49  ;;  %2055 = vmatpush3.bf16.msra.mxu0 %v2311_v54  ;;  %v2382_v48 = vld [vmem:[%s2561_s13 + $0xa8] ss:$36 sps:$4 sm:$0xff]   ;;  %v2389_v54 = vld [vmem:[%s2561_s13 + $0xf0] ss:$36 sps:$4 sm:$0xff]  }
  0x32   : > { %2119 = vmatpush3.bf16.msra.mxu1 %v2312_v55  ;;  %2056 = vmatprep.subr.bf16.mxu0 %v2319_v60  ;;  %v2384_v49 = vld [vmem:[%s2561_s13 + $0xec] ss:$36 sps:$4 sm:$0xff]   ;;  %v2391_v55 = vld [vmem:[%s2561_s13 + $0x134] ss:$36 sps:$4 sm:$0xff]   ;;  %v2398_v60 = vld [vmem:[%s2561_s13 + $0x17c] ss:$36 sps:$4 sm:$0xff]  }
  0x33   : > { %2120 = vmatprep.subr.bf16.mxu1 %v2320_v61  ;;  %v2400_v61 = vld [vmem:[%s2561_s13 + $0x184] ss:$36 sps:$4 sm:$0xff]  }
  0x35   : > { %2057 = vmatpush3.bf16.msra.mxu0 %v2321_v62  ;;  %v2402_v62 = vld [vmem:[%s2561_s13 + $0x178] ss:$36 sps:$4 sm:$0xff]  }
  0x36   : > { %2121 = vmatpush3.bf16.msra.mxu1 %v2322_v63  ;;  %2058 = vmatprep.subr.bf16.mxu0 %v2329_v3  ;;  %v2403_v63 = vld [vmem:[%s2561_s13 + $0x180] ss:$36 sps:$4 sm:$0xff]   ;;  %v2410_v3 = vld [vmem:[%s2561_s13 + $0x1c8] ss:$36 sps:$4 sm:$0xff]  }
  0x37   : > { %1258 = vmatmul.mubr.bf16.gmra.mrb[8].mxu0 %v2307_v50  ;;  %2122 = vmatprep.subr.bf16.mxu1 %v2330_v5  ;;  %v2386_v50 = vld [vmem:[%s2561_s13 + $0xf4] ss:$36 sps:$4 sm:$0xff]  }
  0x38   : > { %1355 = vmatmul.mubr.bf16.gmra.mrb[8].mxu1 %v2308_v51  ;;  %1265 = vmatprep.mubr.bf16.mxu0 %v2313_v56  ;;  %v2404_v51 = vld [vmem:[%s2883_s1 + $0x228] sm:$0xff]   ;;  %v2393_v56 = vld [vmem:[%s2561_s13 + $0x13c] ss:$36 sps:$4 sm:$0xff]   ;;  %v2414_v5 = vld [vmem:[%s2561_s13 + $0x214] ss:$36 sps:$4 sm:$0xff]  }
  0x39   : > { %1362 = vmatprep.mubr.bf16.mxu1 %v2315_v57  ;;  %2059 = vmatpush3.bf16.msra.mxu0 %v2331_v6  ;;  %v2418_v57 = vld [vmem:[%s2883_s1 + $0x238] sm:$0xff]   ;;  %v2416_v6 = vld [vmem:[%s2561_s13 + $0x208] ss:$36 sps:$4 sm:$0xff]  }
  0x3a   : > { %2123 = vmatpush3.bf16.msra.mxu1 %v2332_v7  ;;  %2060 = vmatprep.subr.bf16.mxu0 %v2339_v10  ;;  %v2417_v7 = vld [vmem:[%s2561_s13 + $0x210] ss:$36 sps:$4 sm:$0xff]   ;;  %v2421_v10 = vld [vmem:[%s2561_s13 + $0x68] ss:$36 sps:$4 sm:$0xff]  }
  0x3b   : > { %2124 = vmatprep.subr.bf16.mxu1 %v2340_v11  ;;  %v2422_v11 = vld [vmem:[%s2561_s13 + $0x188] ss:$36 sps:$4 sm:$0xff]  }
  0x3d   : > { %2061 = vmatpush3.bf16.msra.mxu0 %v2341_v13  ;;  %v2424_v13 = vld [vmem:[%s2561_s13 + $0x1d0] ss:$36 sps:$4 sm:$0xff]  }
  0x3e   : > { %2125 = vmatpush3.bf16.msra.mxu1 %v2342_v14  ;;  %2062 = vmatprep.subr.bf16.mxu0 %v2349_v18  ;;  %v2425_v14 = vld [vmem:[%s2561_s13 + $0xf8] ss:$36 sps:$4 sm:$0xff]   ;;  %v2764_v18 = vld [vmem:[%s2884_s2] ss:$0 sm:$0xff] }
  0x3f   : > { %1266 = vmatmul.mubr.bf16.gmra.mrb[12].mxu0 %v2317_v58  ;;  %2126 = vmatprep.subr.bf16.mxu1 %v2350_v19  ;;  %v2395_v58 = vld [vmem:[%s2561_s13 + $0x130] ss:$36 sps:$4 sm:$0xff]  }
  0x40   : > { %1363 = vmatmul.mubr.bf16.gmra.mrb[12].mxu1 %v2318_v59  ;;  %1273 = vmatprep.mubr.bf16.mxu0 %v2323_v0  ;;  %v2396_v59 = vld [vmem:[%s2561_s13 + $0x138] ss:$36 sps:$4 sm:$0xff]   ;;  %v2405_v0 = vld [vmem:[%s2561_s13 + $0x1c4] ss:$36 sps:$4 sm:$0xff]  }
  0x41   : > { %1370 = vmatprep.mubr.bf16.mxu1 %v2325_v1  ;;  %2063 = vmatpush3.bf16.msra.mxu0 %v2351_v20  ;;  %v2407_v1 = vld [vmem:[%s2561_s13 + $0x1cc] ss:$36 sps:$4 sm:$0xff]  }
  0x42   : > { %2127 = vmatpush3.bf16.msra.mxu1 %v2352_v21  ;;  %2064 = vmatprep.subr.bf16.mxu0 %v2359_v26 }
  0x43   : > { %2128 = vmatprep.subr.bf16.mxu1 %v2360_v27 }
  0x45   : > { %2065 = vmatpush3.bf16.msra.mxu0 %v2361_v28 }
  0x46   : > { %2129 = vmatpush3.bf16.msra.mxu1 %v2362_v29  ;;  %2194 = vmatprep.subr.bf16.mxu0 %v2369_v32 }
  0x47   : > { %1274 = vmatmul.mubr.bf16.gmra.mrb[16].mxu0 %v2327_v2  ;;  %2226 = vmatprep.subr.bf16.mxu1 %v2369_v32  ;;  %v2409_v2 = vld [vmem:[%s2561_s13 + $0x1c0] ss:$36 sps:$4 sm:$0xff]  }
  0x48   : > { %1371 = vmatmul.mubr.bf16.gmra.mrb[16].mxu1 %v2328_v4  ;;  %1281 = vmatprep.mubr.bf16.mxu0 %v2333_v8  ;;  %v2412_v4 = vld [vmem:[%s2561_s13 + $0x20c] ss:$36 sps:$4 sm:$0xff]   ;;  %v2419_v8 = vld [vmem:[%s2561_s13 + $0x20] ss:$36 sps:$4 sm:$0xff]  }
  0x49   : > { %1378 = vmatprep.mubr.bf16.mxu1 %v2335_v9  ;;  %v2420_v9 = vld [vmem:[%s2561_s13 + $0x140] ss:$36 sps:$4 sm:$0xff]  }
  0x4f   : > { %1282 = vmatmul.mubr.bf16.gmra.mrb[20].mxu0 %v2337_v12  ;;  %v2423_v12 = vld [vmem:[%s2561_s13 + $0xb0] ss:$36 sps:$4 sm:$0xff]  }
  0x50   : > { %1379 = vmatmul.mubr.bf16.gmra.mrb[20].mxu1 %v2338_v15  ;;  %1289 = vmatprep.mubr.bf16.mxu0 %v2343_v16  ;;  %v2426_v15 = vld [vmem:[%s2561_s13 + $0x218] ss:$36 sps:$4 sm:$0xff]   ;;  %s1774_s13 = sshll.u32 %s2887_s19, 3 }
  0x51   : > { %1386 = vmatprep.mubr.bf16.mxu1 %v2345_v17  ;;  %s2852_s20 = scalar_lea.vmem %s2885_s3, %s1774_s13 }
  0x57   : > { %1290 = vmatmul.mubr.bf16.gmra.mrb[24].mxu0 %v2347_v22 }
  0x58   : > { %1387 = vmatmul.mubr.bf16.gmra.mrb[24].mxu1 %v2348_v23  ;;  %1297 = vmatprep.mubr.bf16.mxu0 %v2353_v24 }
  0x59   : > { %1394 = vmatprep.mubr.bf16.mxu1 %v2355_v25 }
  0x5f   : > { %1298 = vmatmul.mubr.bf16.gmra.mrb[28].mxu0 %v2357_v30 }
  0x60   : > { %1395 = vmatmul.mubr.bf16.gmra.mrb[28].mxu1 %v2358_v31  ;;  %1435 = vmatprep.mubr.bf16.mxu0 %v2365_v33 }
  0x61   : > { %1532 = vmatprep.mubr.bf16.mxu1 %v2368_v34 }
  0x67   : > { %1436 = vmatmul.mubr.bf16.vlgmr.msra.gmra.mrb[32].mxu0 %v2363_v35 }
  0x68   : > { %1533 = vmatmul.mubr.bf16.vlgmr.msra.gmra.mrb[32].mxu1 %v2366_v36  ;;  %2195 = vmatpush3.bf16.msra.mxu0 %v2369_v32 }
  0x69   : > { %2234 = vmatpush3.bf16.msra.mxu1 %v2369_v32  ;;  %1443 = vmatprep.mubr.bf16.mxu0 %v2370_v37 }
  0x6a   : > { %1540 = vmatprep.mubr.bf16.mxu1 %v2372_v38  ;;  %2196 = vmatprep.subr.bf16.mxu0 %v2376_v39 }
  0x6b   : > { %2227 = vmatprep.subr.bf16.mxu1 %v2376_v39 }
  0x6c   : > { %2197 = vmatpush3.bf16.msra.mxu0 %v2376_v39 }
  0x6d   : > { %2235 = vmatpush3.bf16.msra.mxu1 %v2376_v39  ;;  %2198 = vmatprep.subr.bf16.mxu0 %v2383_v40 }
  0x6e   : > { %2228 = vmatprep.subr.bf16.mxu1 %v2383_v40 }
  0x6f   : > { %1444 = vmatmul.mubr.bf16.gmra.mrb[36].mxu0 %v2374_v41 }
  0x70   : > { %1541 = vmatmul.mubr.bf16.gmra.mrb[36].mxu1 %v2375_v42  ;;  %1451 = vmatprep.mubr.bf16.mxu0 %v2377_v43 }
  0x71   : > { %1548 = vmatprep.mubr.bf16.mxu1 %v2379_v44  ;;  %2199 = vmatpush3.bf16.msra.mxu0 %v2383_v40 }
  0x72   : > { %2236 = vmatpush3.bf16.msra.mxu1 %v2383_v40  ;;  %2200 = vmatprep.subr.bf16.mxu0 %v2390_v45 }
  0x73   : > { %2229 = vmatprep.subr.bf16.mxu1 %v2390_v45 }
  0x75   : > { %2201 = vmatpush3.bf16.msra.mxu0 %v2390_v45 }
  0x76   : > { %2237 = vmatpush3.bf16.msra.mxu1 %v2390_v45  ;;  %2202 = vmatprep.subr.bf16.mxu0 %v2397_v46 }
  0x77   : > { %1452 = vmatmul.mubr.bf16.gmra.mrb[40].mxu0 %v2381_v47  ;;  %2230 = vmatprep.subr.bf16.mxu1 %v2397_v46 }
  0x78   : > { %1549 = vmatmul.mubr.bf16.gmra.mrb[40].mxu1 %v2382_v48  ;;  %1459 = vmatprep.mubr.bf16.mxu0 %v2384_v49 }
  0x79   : > { %1556 = vmatprep.mubr.bf16.mxu1 %v2386_v50  ;;  %2203 = vmatpush3.bf16.msra.mxu0 %v2397_v46 }
  0x7a   : > { %2238 = vmatpush3.bf16.msra.mxu1 %v2397_v46  ;;  %2204 = vmatprep.subr.bf16.mxu0 %v2404_v51 }
  0x7b   : > { %2231 = vmatprep.subr.bf16.mxu1 %v2404_v51 }
  0x7d   : > { %2205 = vmatpush3.bf16.msra.mxu0 %v2404_v51 }
  0x7e   : > { %2239 = vmatpush3.bf16.msra.mxu1 %v2404_v51  ;;  %2206 = vmatprep.subr.bf16.mxu0 %v2411_v53 }
  0x7f   : > { %1460 = vmatmul.mubr.bf16.gmra.mrb[44].mxu0 %v2388_v52  ;;  %2232 = vmatprep.subr.bf16.mxu1 %v2411_v53 }
  0x80   : > { %1557 = vmatmul.mubr.bf16.gmra.mrb[44].mxu1 %v2389_v54  ;;  %1467 = vmatprep.mubr.bf16.mxu0 %v2391_v55 }
  0x81   : > { %1564 = vmatprep.mubr.bf16.mxu1 %v2393_v56  ;;  %2207 = vmatpush3.bf16.msra.mxu0 %v2411_v53 }
  0x82   : > { %2240 = vmatpush3.bf16.msra.mxu1 %v2411_v53  ;;  %2208 = vmatprep.subr.bf16.mxu0 %v2418_v57 }
  0x83   : > { %2233 = vmatprep.subr.bf16.mxu1 %v2418_v57 }
  0x85   : > { %2209 = vmatpush3.bf16.msra.mxu0 %v2418_v57 }
  0x86   : > { %2241 = vmatpush3.bf16.msra.mxu1 %v2418_v57 }
  0x87   : > { %1468 = vmatmul.mubr.bf16.gmra.mrb[48].mxu0 %v2395_v58 }
  0x88   : > { %1565 = vmatmul.mubr.bf16.gmra.mrb[48].mxu1 %v2396_v59  ;;  %1475 = vmatprep.mubr.bf16.mxu0 %v2398_v60 }
  0x89   : > { %1572 = vmatprep.mubr.bf16.mxu1 %v2400_v61 }
  0x8f   : > { %1476 = vmatmul.mubr.bf16.gmra.mrb[52].mxu0 %v2402_v62 }
  0x90   : > { %1573 = vmatmul.mubr.bf16.gmra.mrb[52].mxu1 %v2403_v63  ;;  %1483 = vmatprep.mubr.bf16.mxu0 %v2405_v0 }
  0x91   : > { %1580 = vmatprep.mubr.bf16.mxu1 %v2407_v1 }
  0x97   : > { %1484 = vmatmul.mubr.bf16.gmra.mrb[56].mxu0 %v2409_v2 }
  0x98   : > { %1581 = vmatmul.mubr.bf16.gmra.mrb[56].mxu1 %v2410_v3  ;;  %1491 = vmatprep.mubr.bf16.mxu0 %v2412_v4 }
  0x99   : > { %1588 = vmatprep.mubr.bf16.mxu1 %v2414_v5 }
  0x9f   : > { %1492 = vmatmul.mubr.bf16.gmra.mrb[60].mxu0 %v2416_v6 }
  0xa0   : > { %1589 = vmatmul.mubr.bf16.gmra.mrb[60].mxu1 %v2417_v7  ;;  %2210 = vmatprep.mubr.bf16.mxu0 %v2419_v8 }
  0xa1   : > { %2218 = vmatprep.mubr.bf16.mxu1 %v2420_v9 }
  0xa7   : > { %2211 = vmatmul.mubr.bf16.vlgmr.msra.gmra.mrb[64].mxu0 %v2421_v10 }
  0xa8   : > { %2219 = vmatmul.mubr.bf16.vlgmr.msra.gmra.mrb[64].mxu1 %v2422_v11  ;;  %2214 = vmatprep.mubr.bf16.mxu0 %v2423_v12 }
  0xa9   : > { %2222 = vmatprep.mubr.bf16.mxu1 %v2424_v13 }
  0xaf   : > { %2215 = vmatmul.mubr.bf16.gmra.mrb[68].mxu0 %v2425_v14 }
  0xb0   : > { %2223 = vmatmul.mubr.bf16.gmra.mrb[68].mxu1 %v2426_v15 }
  0xfa   : > { %v1938_v16 = vpop.f32.mrb[0].mxu0 }
  0xfb   : > { %v2002_v17 = vpop.f32.mrb[0].mxu1  ;;  %v1939_v19 = vpop.f32.mrb[1].mxu0 }
  0xfc   : > { %v1940_v20 = vadd.f32 %v1939_v19, %v1938_v16  ;;  %v2003_v21 = vpop.f32.mrb[1].mxu1  ;;  %v1941_v22 = vpop.f32.mrb[2].mxu0 }
  0xfd   : > { %v2004_v23 = vadd.f32 %v2003_v21, %v2002_v17  ;;  %v2005_v24 = vpop.f32.mrb[2].mxu1  ;;  %v1942_v25 = vpop.f32.mrb[3].mxu0 }
  0xfe   : > { %v1244_v26 = vadd.f32 %v1940_v20, %v2764_v18  ;;  %v1943_v27 = vadd.f32 %v1942_v25, %v1941_v22  ;;  %v2006_v28 = vpop.f32.mrb[3].mxu1 }
  0xff   : > { %v2007_v29 = vadd.f32 %v2006_v28, %v2005_v24 }
 0x100   : > { %v2767_v30 = vadd.f32 %v2004_v23, %v1244_v26  ;;  %v1247_v31 = vadd.f32 %v1943_v27, %v2764_v18 }
 0x102   : > { %v2770_v32 = vadd.f32 %v2007_v29, %v1247_v31  ;;  %v1944_v33 = vpop.f32.mrb[4].mxu0 }
 0x103   : > { %v2008_v34 = vpop.f32.mrb[4].mxu1  ;;  %v1945_v35 = vpop.f32.mrb[5].mxu0 }
 0x104   : > { %v1946_v36 = vadd.f32 %v1945_v35, %v1944_v33  ;;  %v2009_v37 = vpop.f32.mrb[5].mxu1  ;;  %v1947_v38 = vpop.f32.mrb[6].mxu0 }
 0x105   : > { %v2010_v39 = vadd.f32 %v2009_v37, %v2008_v34  ;;  %v2011_v40 = vpop.f32.mrb[6].mxu1  ;;  %v1948_v41 = vpop.f32.mrb[7].mxu0 }
 0x106   : > { %v1252_v42 = vadd.f32 %v1946_v36, %v2764_v18  ;;  %v1949_v43 = vadd.f32 %v1948_v41, %v1947_v38  ;;  %v2012_v44 = vpop.f32.mrb[7].mxu1 }
 0x107   : > { %v2013_v45 = vadd.f32 %v2012_v44, %v2011_v40 }
 0x108   : > { %v2773_v46 = vadd.f32 %v2010_v39, %v1252_v42  ;;  %v1255_v47 = vadd.f32 %v1949_v43, %v2764_v18 }
 0x10a   : > { %v2776_v48 = vadd.f32 %v2013_v45, %v1255_v47  ;;  %v1950_v49 = vpop.f32.mrb[8].mxu0 }
 0x10b   : > { %v2014_v50 = vpop.f32.mrb[8].mxu1  ;;  %v1951_v51 = vpop.f32.mrb[9].mxu0 }
 0x10c   : > { %v1952_v52 = vadd.f32 %v1951_v51, %v1950_v49  ;;  %v2015_v53 = vpop.f32.mrb[9].mxu1  ;;  %v1953_v54 = vpop.f32.mrb[10].mxu0 }
 0x10d   : > { %v2016_v55 = vadd.f32 %v2015_v53, %v2014_v50  ;;  %v2017_v56 = vpop.f32.mrb[10].mxu1  ;;  %v1954_v57 = vpop.f32.mrb[11].mxu0 }
 0x10e   : > { %v1260_v58 = vadd.f32 %v1952_v52, %v2764_v18  ;;  %v1955_v59 = vadd.f32 %v1954_v57, %v1953_v54  ;;  %v2018_v60 = vpop.f32.mrb[11].mxu1 }
 0x10f   : > { %v2019_v61 = vadd.f32 %v2018_v60, %v2017_v56 }
 0x110   : > { %v2779_v62 = vadd.f32 %v2016_v55, %v1260_v58  ;;  %v1263_v63 = vadd.f32 %v1955_v59, %v2764_v18 }
 0x112   : > { %v2782_v0 = vadd.f32 %v2019_v61, %v1263_v63  ;;  %v1956_v1 = vpop.f32.mrb[12].mxu0 }
 0x113   : > { %v2020_v2 = vpop.f32.mrb[12].mxu1  ;;  %v1957_v3 = vpop.f32.mrb[13].mxu0 }
 0x114   : > { %v1958_v4 = vadd.f32 %v1957_v3, %v1956_v1  ;;  %v2021_v5 = vpop.f32.mrb[13].mxu1  ;;  %v1959_v6 = vpop.f32.mrb[14].mxu0 }
 0x115   : > { %v2022_v7 = vadd.f32 %v2021_v5, %v2020_v2  ;;  %v2023_v8 = vpop.f32.mrb[14].mxu1  ;;  %v1960_v9 = vpop.f32.mrb[15].mxu0 }
 0x116   : > { %v1268_v10 = vadd.f32 %v1958_v4, %v2764_v18  ;;  %v1961_v11 = vadd.f32 %v1960_v9, %v1959_v6  ;;  %v2024_v12 = vpop.f32.mrb[15].mxu1 }
 0x117   : > { %v2025_v13 = vadd.f32 %v2024_v12, %v2023_v8 }
 0x118   : > { %v2785_v14 = vadd.f32 %v2022_v7, %v1268_v10  ;;  %v1271_v15 = vadd.f32 %v1961_v11, %v2764_v18 }
 0x11a   : > { %v2788_v16 = vadd.f32 %v2025_v13, %v1271_v15  ;;  %v1962_v17 = vpop.f32.mrb[16].mxu0 }
 0x11b   : > { %v2026_v19 = vpop.f32.mrb[16].mxu1  ;;  %v1963_v20 = vpop.f32.mrb[17].mxu0 }
 0x11c   : > { %v1964_v21 = vadd.f32 %v1963_v20, %v1962_v17  ;;  %v2027_v22 = vpop.f32.mrb[17].mxu1  ;;  %v1965_v23 = vpop.f32.mrb[18].mxu0 }
 0x11d   : > { %v2028_v24 = vadd.f32 %v2027_v22, %v2026_v19  ;;  %v2029_v25 = vpop.f32.mrb[18].mxu1  ;;  %v1966_v26 = vpop.f32.mrb[19].mxu0 }
 0x11e   : > { %v1276_v27 = vadd.f32 %v1964_v21, %v2764_v18  ;;  %v1967_v28 = vadd.f32 %v1966_v26, %v1965_v23  ;;  %v2030_v29 = vpop.f32.mrb[19].mxu1 }
 0x11f   : > { %v2031_v31 = vadd.f32 %v2030_v29, %v2029_v25 }
 0x120   : > { %v2791_v33 = vadd.f32 %v2028_v24, %v1276_v27  ;;  %v1279_v34 = vadd.f32 %v1967_v28, %v2764_v18 }
 0x122   : > { %v2794_v35 = vadd.f32 %v2031_v31, %v1279_v34  ;;  %v1968_v36 = vpop.f32.mrb[20].mxu0 }
 0x123   : > { %v2032_v37 = vpop.f32.mrb[20].mxu1  ;;  %v1969_v38 = vpop.f32.mrb[21].mxu0 }
 0x124   : > { %v1970_v39 = vadd.f32 %v1969_v38, %v1968_v36  ;;  %v2033_v40 = vpop.f32.mrb[21].mxu1  ;;  %v1971_v41 = vpop.f32.mrb[22].mxu0 }
 0x125   : > { %v2034_v42 = vadd.f32 %v2033_v40, %v2032_v37  ;;  %v2035_v43 = vpop.f32.mrb[22].mxu1  ;;  %v1972_v44 = vpop.f32.mrb[23].mxu0 }
 0x126   : > { %v1284_v45 = vadd.f32 %v1970_v39, %v2764_v18  ;;  %v1973_v47 = vadd.f32 %v1972_v44, %v1971_v41  ;;  %v2036_v49 = vpop.f32.mrb[23].mxu1 }
 0x127   : > { %v2037_v50 = vadd.f32 %v2036_v49, %v2035_v43 }
 0x128   : > { %v2797_v51 = vadd.f32 %v2034_v42, %v1284_v45  ;;  %v1287_v52 = vadd.f32 %v1973_v47, %v2764_v18 }
 0x12a   : > { %v2800_v53 = vadd.f32 %v2037_v50, %v1287_v52  ;;  %v1974_v54 = vpop.f32.mrb[24].mxu0 }
 0x12b   : > { %v2038_v55 = vpop.f32.mrb[24].mxu1  ;;  %v1975_v56 = vpop.f32.mrb[25].mxu0 }
 0x12c   : > { %v1976_v57 = vadd.f32 %v1975_v56, %v1974_v54  ;;  %v2039_v58 = vpop.f32.mrb[25].mxu1  ;;  %v1977_v59 = vpop.f32.mrb[26].mxu0 }
 0x12d   : > { %v2040_v60 = vadd.f32 %v2039_v58, %v2038_v55  ;;  %v2041_v61 = vpop.f32.mrb[26].mxu1  ;;  %v1978_v63 = vpop.f32.mrb[27].mxu0 }
 0x12e   : > { %v1292_v1 = vadd.f32 %v1976_v57, %v2764_v18  ;;  %v1979_v2 = vadd.f32 %v1978_v63, %v1977_v59  ;;  %v2042_v3 = vpop.f32.mrb[27].mxu1 }
 0x12f   : > { %v2043_v4 = vadd.f32 %v2042_v3, %v2041_v61 }
 0x130   : > { %v2803_v5 = vadd.f32 %v2040_v60, %v1292_v1  ;;  %v1295_v6 = vadd.f32 %v1979_v2, %v2764_v18 }
 0x132   : > { %v2806_v7 = vadd.f32 %v2043_v4, %v1295_v6  ;;  %v1980_v8 = vpop.f32.mrb[28].mxu0 }
 0x133   : > { %v2044_v9 = vpop.f32.mrb[28].mxu1  ;;  %v1981_v10 = vpop.f32.mrb[29].mxu0 }
 0x134   : > { %v1982_v11 = vadd.f32 %v1981_v10, %v1980_v8  ;;  %v2045_v12 = vpop.f32.mrb[29].mxu1  ;;  %v1983_v13 = vpop.f32.mrb[30].mxu0 }
 0x135   : > { %v2046_v15 = vadd.f32 %v2045_v12, %v2044_v9  ;;  %v2047_v17 = vpop.f32.mrb[30].mxu1  ;;  %v1984_v19 = vpop.f32.mrb[31].mxu0 }
 0x136   : > { %v1300_v20 = vadd.f32 %v1982_v11, %v2764_v18  ;;  %v1985_v21 = vadd.f32 %v1984_v19, %v1983_v13  ;;  %v2048_v22 = vpop.f32.mrb[31].mxu1 }
 0x137   : > { %v2049_v23 = vadd.f32 %v2048_v22, %v2047_v17 }
 0x138   : > { %v2809_v24 = vadd.f32 %v2046_v15, %v1300_v20  ;;  %v1303_v25 = vadd.f32 %v1985_v21, %v2764_v18 }
 0x13a   : > { %v2812_v26 = vadd.f32 %v2049_v23, %v1303_v25  ;;  %v2066_v27 = vpop.f32.mrb[32].mxu0 }
 0x13b   : > { %v2130_v28 = vpop.f32.mrb[32].mxu1  ;;  %v2067_v29 = vpop.f32.mrb[33].mxu0 }
 0x13c   : > { %v2068_v31 = vadd.f32 %v2067_v29, %v2066_v27  ;;  %v2131_v34 = vpop.f32.mrb[33].mxu1  ;;  %v2069_v36 = vpop.f32.mrb[34].mxu0 }
 0x13d   : > { %v2132_v37 = vadd.f32 %v2131_v34, %v2130_v28  ;;  %v2133_v38 = vpop.f32.mrb[34].mxu1  ;;  %v2070_v39 = vpop.f32.mrb[35].mxu0 }
 0x13e   : > { %v1438_v40 = vadd.f32 %v2068_v31, %v2767_v30  ;;  %v2071_v41 = vadd.f32 %v2070_v39, %v2069_v36  ;;  %v2134_v42 = vpop.f32.mrb[35].mxu1 }
 0x13f   : > { %v2135_v43 = vadd.f32 %v2134_v42, %v2133_v38 }
 0x140   : > { %v1441_v44 = vadd.f32 %v2071_v41, %v2770_v32  ;;  %v2816_v45 = vadd.f32 %v2132_v37, %v1438_v40 }
 0x142   : > { %v2072_v18 = vpop.f32.mrb[36].mxu0  ;;  %v2818_v47 = vadd.f32 %v2135_v43, %v1441_v44 }
 0x143   : > { %v2136_v49 = vpop.f32.mrb[36].mxu1  ;;  %v2073_v50 = vpop.f32.mrb[37].mxu0 }
 0x144   : > { %v2074_v52 = vadd.f32 %v2073_v50, %v2072_v18  ;;  %v2137_v54 = vpop.f32.mrb[37].mxu1  ;;  %v2075_v55 = vpop.f32.mrb[38].mxu0 }
 0x145   : > { %v2138_v56 = vadd.f32 %v2137_v54, %v2136_v49  ;;  %v2139_v57 = vpop.f32.mrb[38].mxu1  ;;  %v2076_v58 = vpop.f32.mrb[39].mxu0 }
 0x146   : > { %v1446_v30 = vadd.f32 %v2074_v52, %v2773_v46  ;;  %v2077_v59 = vadd.f32 %v2076_v58, %v2075_v55  ;;  %v2140_v60 = vpop.f32.mrb[39].mxu1 }
 0x147   : > { %v2141_v61 = vadd.f32 %v2140_v60, %v2139_v57 }
 0x148   : > { %v1449_v32 = vadd.f32 %v2077_v59, %v2776_v48  ;;  %v2822_v63 = vadd.f32 %v2138_v56, %v1446_v30 }
 0x14a   : > { %v2078_v1 = vpop.f32.mrb[40].mxu0  ;;  %v2824_v2 = vadd.f32 %v2141_v61, %v1449_v32 }
 0x14b   : > { %v2142_v3 = vpop.f32.mrb[40].mxu1  ;;  %v2079_v4 = vpop.f32.mrb[41].mxu0 }
 0x14c   : > { %v2080_v6 = vadd.f32 %v2079_v4, %v2078_v1  ;;  %v2143_v8 = vpop.f32.mrb[41].mxu1  ;;  %v2081_v9 = vpop.f32.mrb[42].mxu0 }
 0x14d   : > { %v2144_v10 = vadd.f32 %v2143_v8, %v2142_v3  ;;  %v2145_v11 = vpop.f32.mrb[42].mxu1  ;;  %v2082_v12 = vpop.f32.mrb[43].mxu0 }
 0x14e   : > { %v1454_v46 = vadd.f32 %v2080_v6, %v2779_v62  ;;  %v2083_v13 = vadd.f32 %v2082_v12, %v2081_v9  ;;  %v2146_v15 = vpop.f32.mrb[43].mxu1 }
 0x14f   : > { %v2147_v17 = vadd.f32 %v2146_v15, %v2145_v11 }
 0x150   : > { %v1457_v48 = vadd.f32 %v2083_v13, %v2782_v0  ;;  %v2828_v19 = vadd.f32 %v2144_v10, %v1454_v46 }
 0x152   : > { %v2084_v20 = vpop.f32.mrb[44].mxu0  ;;  %v2830_v21 = vadd.f32 %v2147_v17, %v1457_v48 }
 0x153   : > { %v2148_v22 = vpop.f32.mrb[44].mxu1  ;;  %v2085_v23 = vpop.f32.mrb[45].mxu0 }
 0x154   : > { %v2086_v25 = vadd.f32 %v2085_v23, %v2084_v20  ;;  %v2149_v27 = vpop.f32.mrb[45].mxu1  ;;  %v2087_v28 = vpop.f32.mrb[46].mxu0 }
 0x155   : > { %v2150_v29 = vadd.f32 %v2149_v27, %v2148_v22  ;;  %v2151_v31 = vpop.f32.mrb[46].mxu1  ;;  %v2088_v34 = vpop.f32.mrb[47].mxu0 }
 0x156   : > { %v1462_v62 = vadd.f32 %v2086_v25, %v2785_v14  ;;  %v2089_v36 = vadd.f32 %v2088_v34, %v2087_v28  ;;  %v2152_v37 = vpop.f32.mrb[47].mxu1 }
 0x157   : > { %v2153_v38 = vadd.f32 %v2152_v37, %v2151_v31 }
 0x158   : > { %v1465_v0 = vadd.f32 %v2089_v36, %v2788_v16  ;;  %v2834_v39 = vadd.f32 %v2150_v29, %v1462_v62 }
 0x15a   : > { %v2090_v40 = vpop.f32.mrb[48].mxu0  ;;  %v2836_v41 = vadd.f32 %v2153_v38, %v1465_v0 }
 0x15b   : > { %v2154_v42 = vpop.f32.mrb[48].mxu1  ;;  %v2091_v43 = vpop.f32.mrb[49].mxu0 }
 0x15c   : > { %v2092_v44 = vadd.f32 %v2091_v43, %v2090_v40  ;;  %v2155_v18 = vpop.f32.mrb[49].mxu1  ;;  %v2093_v49 = vpop.f32.mrb[50].mxu0 }
 0x15d   : > { %v2156_v50 = vadd.f32 %v2155_v18, %v2154_v42  ;;  %v2157_v52 = vpop.f32.mrb[50].mxu1  ;;  %v2094_v54 = vpop.f32.mrb[51].mxu0 }
 0x15e   : > { %v1470_v14 = vadd.f32 %v2092_v44, %v2791_v33  ;;  %v2095_v55 = vadd.f32 %v2094_v54, %v2093_v49  ;;  %v2158_v56 = vpop.f32.mrb[51].mxu1 }
 0x15f   : > { %v2159_v57 = vadd.f32 %v2158_v56, %v2157_v52 }
 0x160   : > { %v1473_v16 = vadd.f32 %v2095_v55, %v2794_v35  ;;  %v1567_v58 = vadd.f32 %v2156_v50, %v1470_v14 }
 0x162   : > { %v2096_v30 = vpop.f32.mrb[52].mxu0  ;;  %v2840_v59 = vadd.f32 %v2159_v57, %v1473_v16 }
 0x163   : > { %v2160_v60 = vpop.f32.mrb[52].mxu1  ;;  %v2097_v61 = vpop.f32.mrb[53].mxu0 }
 0x164   : > { %v2098_v32 = vadd.f32 %v2097_v61, %v2096_v30  ;;  %v2161_v1 = vpop.f32.mrb[53].mxu1  ;;  %v2099_v3 = vpop.f32.mrb[54].mxu0 }
 0x165   : > { %v2162_v4 = vadd.f32 %v2161_v1, %v2160_v60  ;;  %v2163_v6 = vpop.f32.mrb[54].mxu1  ;;  %v2100_v8 = vpop.f32.mrb[55].mxu0 }
 0x166   : > { %v1478_v9 = vadd.f32 %v2098_v32, %v2797_v51  ;;  %v2101_v33 = vadd.f32 %v2100_v8, %v2099_v3  ;;  %v2164_v10 = vpop.f32.mrb[55].mxu1 }
 0x167   : > { %v2165_v11 = vadd.f32 %v2164_v10, %v2163_v6 }
 0x168   : > { %v1481_v12 = vadd.f32 %v2101_v33, %v2800_v53  ;;  %v1575_v35 = vadd.f32 %v2162_v4, %v1478_v9 }
 0x16a   : > { %v2102_v46 = vpop.f32.mrb[56].mxu0  ;;  %v1578_v13 = vadd.f32 %v2165_v11, %v1481_v12 }
 0x16b   : > { %v2166_v15 = vpop.f32.mrb[56].mxu1  ;;  %v2103_v17 = vpop.f32.mrb[57].mxu0 }
 0x16c   : > { %v2104_v48 = vadd.f32 %v2103_v17, %v2102_v46  ;;  %v2167_v20 = vpop.f32.mrb[57].mxu1  ;;  %v2105_v22 = vpop.f32.mrb[58].mxu0 }
 0x16d   : > { %v2168_v23 = vadd.f32 %v2167_v20, %v2166_v15  ;;  %v2169_v25 = vpop.f32.mrb[58].mxu1  ;;  %v2106_v27 = vpop.f32.mrb[59].mxu0 }
 0x16e   : > { %v1486_v28 = vadd.f32 %v2104_v48, %v2803_v5  ;;  %v2107_v29 = vadd.f32 %v2106_v27, %v2105_v22  ;;  %v2170_v51 = vpop.f32.mrb[59].mxu1 }
 0x16f   : > { %v2171_v31 = vadd.f32 %v2170_v51, %v2169_v25 }
 0x170   : > { %v1489_v34 = vadd.f32 %v2107_v29, %v2806_v7  ;;  %v1583_v53 = vadd.f32 %v2168_v23, %v1486_v28 }
 0x172   : > { %v2108_v62 = vpop.f32.mrb[60].mxu0  ;;  %v1586_v36 = vadd.f32 %v2171_v31, %v1489_v34 }
 0x173   : > { %v2172_v37 = vpop.f32.mrb[60].mxu1  ;;  %v2109_v38 = vpop.f32.mrb[61].mxu0 }
 0x174   : > { %v2110_v0 = vadd.f32 %v2109_v38, %v2108_v62  ;;  %v2173_v40 = vpop.f32.mrb[61].mxu1  ;;  %v2111_v42 = vpop.f32.mrb[62].mxu0 }
 0x175   : > { %v2174_v43 = vadd.f32 %v2173_v40, %v2172_v37  ;;  %v2175_v44 = vpop.f32.mrb[62].mxu1  ;;  %v2112_v18 = vpop.f32.mrb[63].mxu0 }
 0x176   : > { %v1494_v49 = vadd.f32 %v2110_v0, %v2809_v24  ;;  %v2113_v5 = vadd.f32 %v2112_v18, %v2111_v42  ;;  %v2176_v50 = vpop.f32.mrb[63].mxu1 }
 0x177   : > { %v2177_v52 = vadd.f32 %v2176_v50, %v2175_v44 }
 0x178   : > { %v1497_v7 = vadd.f32 %v2113_v5, %v2812_v26  ;;  %v1591_v54 = vadd.f32 %v2174_v43, %v1494_v49 }
 0x17a   : > { %v2212_v14 = vpop.f32.mrb[64].mxu0  ;;  %v1594_v55 = vadd.f32 %v2177_v52, %v1497_v7 }
 0x17b   : > { %v1640_v56 = vadd.f32 %v2212_v14, %v2822_v63  ;;  %v2220_v24 = vpop.f32.mrb[64].mxu1  ;;  %v1631_v57 = vpop.f32.mrb[65].mxu0 }
 0x17c   : > { %v1672_v16 = vadd.f32 %v2220_v24, %v1575_v35  ;;  %v1632_v26 = vadd.f32 %v1631_v57, %v2816_v45  ;;  %v1663_v30 = vpop.f32.mrb[65].mxu1  ;;  %v2213_v60 = vpop.f32.mrb[66].mxu0 }
 0x17d   : > { %1696 = vst [vmem:[%s2852_s20 + $0x10] sm:$0xff] %v1640_v56  ;;  %v1664_v61 = vadd.f32 %v1663_v30, %v1567_v58  ;;  %v1643_v32 = vadd.f32 %v2213_v60, %v2824_v2  ;;  %v2221_v1 = vpop.f32.mrb[66].mxu1  ;;  %v1634_v3 = vpop.f32.mrb[67].mxu0 }
 0x17e   : > { %1704 = vst [vmem:[%s2852_s20 + $0x50] sm:$0xff] %v1672_v16  ;;  %1694 = vst [vmem:[%s2852_s20] sm:$0xff] %v1632_v26  ;;  %v1675_v63 = vadd.f32 %v2221_v1, %v1578_v13  ;;  %v1635_v4 = vadd.f32 %v1634_v3, %v2818_v47  ;;  %v1666_v6 = vpop.f32.mrb[67].mxu1 }
 0x17f   : > { %1702 = vst [vmem:[%s2852_s20 + $0x40] sm:$0xff] %v1664_v61  ;;  %1697 = vst [vmem:[%s2852_s20 + $0x18] sm:$0xff] %v1643_v32  ;;  %v1667_v45 = vadd.f32 %v1666_v6, %v2840_v59 }
 0x180   : > { %1705 = vst [vmem:[%s2852_s20 + $0x58] sm:$0xff] %v1675_v63  ;;  %1695 = vst [vmem:[%s2852_s20 + $0x8] sm:$0xff] %v1635_v4 }
 0x181   : > { %1703 = vst [vmem:[%s2852_s20 + $0x48] sm:$0xff] %v1667_v45 }
 0x182   : > { %v2216_v58 = vpop.f32.mrb[68].mxu0 }
 0x183   : > { %v1656_v2 = vadd.f32 %v2216_v58, %v2834_v39  ;;  %v2224_v8 = vpop.f32.mrb[68].mxu1  ;;  %v1647_v9 = vpop.f32.mrb[69].mxu0 }
 0x184   : > { %v1688_v33 = vadd.f32 %v2224_v8, %v1591_v54  ;;  %v1648_v47 = vadd.f32 %v1647_v9, %v2828_v19  ;;  %v1679_v10 = vpop.f32.mrb[69].mxu1  ;;  %v2217_v11 = vpop.f32.mrb[70].mxu0 }
 0x185   : > { %1700 = vst [vmem:[%s2852_s20 + $0x30] sm:$0xff] %v1656_v2  ;;  %v1680_v59 = vadd.f32 %v1679_v10, %v1583_v53  ;;  %v1659_v12 = vadd.f32 %v2217_v11, %v2836_v41  ;;  %v2225_v35 = vpop.f32.mrb[70].mxu1  ;;  %v1650_v46 = vpop.f32.mrb[71].mxu0 }
 0x186   : > { %1708 = vst [vmem:[%s2852_s20 + $0x70] sm:$0xff] %v1688_v33  ;;  %1698 = vst [vmem:[%s2852_s20 + $0x20] sm:$0xff] %v1648_v47  ;;  %v1691_v39 = vadd.f32 %v2225_v35, %v1594_v55  ;;  %v1651_v13 = vadd.f32 %v1650_v46, %v2830_v21  ;;  %v1682_v15 = vpop.f32.mrb[71].mxu1 }
 0x187   : > { %1706 = vst [vmem:[%s2852_s20 + $0x60] sm:$0xff] %v1680_v59  ;;  %1701 = vst [vmem:[%s2852_s20 + $0x38] sm:$0xff] %v1659_v12  ;;  %v1683_v19 = vadd.f32 %v1682_v15, %v1586_v36 }
 0x188   : > { %1709 = vst [vmem:[%s2852_s20 + $0x78] sm:$0xff] %v1691_v39  ;;  %1699 = vst [vmem:[%s2852_s20 + $0x28] sm:$0xff] %v1651_v13 }
 0x189   : > { %1707 = vst [vmem:[%s2852_s20 + $0x68] sm:$0xff] %v1683_v19 }
 0x18a PF: > { %s13_s12 = sadd.s32 1, %s2433_s12  }
 0x18b   : > { %p10_p4 = scmp.ge.s32.totalorder %s13_s12, 5  }
 0x18d   :  { %12 = sbr.rel (!%p10_p4) target bundleno = 1 (0x1), region = 62 }

// kernel: tsm_retinanet_forward.43
= control target key start
LH: loop header
LB: loop body
LE: loop exit
PB: predicated region body
PF: predicated region fallthrough
CT: control target
= control target key end

     0   :  { %v139_v34 = vlaneseq  ;;  %vm303_vm0 = vcmask 1040384   ;;  %vm312_vm1 = vcmask 1041408   ;;  %vm321_vm2 = vcmask 1042432   ;;  %s527_s0 = inlined_call_operand.vmem [shape: f32[4,4,256], index: 0, kind: input, shape index: {}]   ;;  %s528_s1 = inlined_call_operand.vmem [shape: f32[4,4,256], index: 1, kind: input, shape index: {}]   ;;  %s529_s2 = inlined_call_operand.vmem [shape: f32[4,256], index: 2, kind: input, shape index: {}]   ;;  %s530_s3 = inlined_call_operand.vmem [shape: f32[4,4,256], index: 3, kind: output, shape index: {0}]   ;;  %s531_s4 = inlined_call_operand.vmem [shape: f32[4,4,256], index: 4, kind: output, shape index: {1}]  }
   0x1   :  { %v16_v0 = vld [vmem:[%s527_s0] sm:$0xff]  ;;  %v17_v1 = vld [vmem:[%s527_s0 + $0x8] sm:$0xff]  ;;  %v18_v2 = vld [vmem:[%s527_s0 + $0x10] sm:$0xff] }
   0x2   :  { %v358_v3 = vmul.f32 -1.442695, %v16_v0  ;;  %v359_v4 = vmul.f32 -1.442695, %v17_v1  ;;  %v360_v5 = vmul.f32 -1.442695, %v18_v2 }
   0x3   :  { %v19_v6 = vld [vmem:[%s527_s0 + $0x18] sm:$0xff]  ;;  %v48_v7 = vld [vmem:[%s529_s2] sm:$0xff]  ;;  %v60_v12 = vld [vmem:[%s528_s1 + $0x8] sm:$0xff]  ;;  %v140_v42 = vshrl.u32 %v139_v34, 7 }
   0x4   :  { %v59_v8 = vld [vmem:[%s528_s1] sm:$0xff]  ;;  %363 = vpow2.f32 %v358_v3  ;;  %v361_v9 = vmul.f32 -1.442695, %v19_v6  ;;  %v50_v10 = vrot.slane %v48_v7, 6  ;;  %v61_v13 = vld [vmem:[%s528_s1 + $0x10] sm:$0xff]  ;;  %v62_v14 = vld [vmem:[%s528_s1 + $0x18] sm:$0xff] }
   0x5   :  { %v63_v11 = vmin.f32 %v59_v8, 4.1351666  ;;  %365 = vpow2.f32 %v359_v4  ;;  %v64_v17 = vmin.f32 %v60_v12, 4.1351666  ;;  %v65_v18 = vmin.f32 %v61_v13, 4.1351666 }
   0x6   :  { %367 = vpow2.f32 %v360_v5  ;;  %v52_v15 = vsub.f32 %v48_v7, %v50_v10  ;;  %v66_v19 = vmin.f32 %v62_v14, 4.1351666  ;;  %v439_v53 = vsub.s32 0, %v140_v42 }
   0x7   :  { %v79_v16 = vmul.f32 1.442695, %v63_v11  ;;  %369 = vpow2.f32 %v361_v9  ;;  %v81_v20 = vmul.f32 1.442695, %v64_v17  ;;  %v83_v21 = vmul.f32 1.442695, %v65_v18 }
   0x8   :  { %v85_v22 = vmul.f32 1.442695, %v66_v19  ;;  %v53_v23 = vmul.f32 0.5, %v52_v15  ;;  %v68_v24 = vrot.slane %v52_v15, 6  ;;  %v441_v55 = vsub.s32 4, %v140_v42 }
   0x9   :  { %371 = vpow2.f32 %v79_v16  ;;  %v446_v1 = vsub.s32 1, %v140_v42 }
   0xa   :  { %373 = vpow2.f32 %v81_v20  ;;  %v362_v28 = vrot.slane %v53_v23, 10  ;;  %v69_v29 = vrot.slane %v68_v24, 4 }
   0xb   :  { %375 = vpow2.f32 %v83_v21 }
   0xc   :  { %377 = vpow2.f32 %v85_v22  ;;  %v58_v37 = vadd.f32 %v362_v28, %v48_v7  ;;  %v71_v38 = vmul.f32 %v69_v29, %v59_v8  ;;  %v72_v43 = vmul.f32 %v69_v29, %v60_v12 }
   0xd   :  { %v73_v50 = vmul.f32 %v69_v29, %v61_v13  ;;  %v74_v62 = vmul.f32 %v69_v29, %v62_v14  ;;  %v451_v8 = vsub.s32 5, %v140_v42 }
   0xe   :  { %v364_v25 = vpop.eup %363  ;;  %v75_v46 = vadd.f32 %v71_v38, %v58_v37  ;;  %v76_v56 = vadd.f32 %v72_v43, %v58_v37 }
   0xf   :  { %v366_v26 = vpop.eup %365  ;;  %v32_v27 = vadd.f32 1.0, %v364_v25  ;;  %v77_v3 = vadd.f32 %v73_v50, %v58_v37  ;;  %v78_v16 = vadd.f32 %v74_v62, %v58_v37 }
  0x10   :  { %v368_v30 = vpop.eup %367  ;;  %v33_v31 = vadd.f32 1.0, %v366_v26 }
  0x11   :  { %v370_v32 = vpop.eup %369  ;;  %379 = vrcp.f32 %v32_v27  ;;  %v34_v33 = vadd.f32 1.0, %v368_v30 }
  0x12   :  { %381 = vrcp.f32 %v33_v31  ;;  %v35_v36 = vadd.f32 1.0, %v370_v32 }
  0x13   :  { %v372_v35 = vpop.eup %371  ;;  %383 = vrcp.f32 %v34_v33 }
  0x14   :  { %v87_v39 = vmul.f32 %v372_v35, %v52_v15  ;;  %385 = vrcp.f32 %v35_v36  ;;  %v374_v40 = vpop.eup %373 }
  0x15   :  { %v88_v44 = vmul.f32 %v374_v40, %v52_v15  ;;  %v376_v45 = vpop.eup %375 }
  0x16   :  { %v91_v41 = vmul.f32 0.5, %v87_v39  ;;  %v378_v48 = vpop.eup %377  ;;  %v89_v51 = vmul.f32 %v376_v45, %v52_v15 }
  0x17   :  { %v92_v49 = vmul.f32 0.5, %v88_v44  ;;  %v90_v54 = vmul.f32 %v378_v48, %v52_v15 }
  0x18   :  { %v99_v47 = vrot.slane %v91_v41, 6  ;;  %v93_v58 = vmul.f32 0.5, %v89_v51 }
  0x19   :  { %v101_v57 = vrot.slane %v92_v49, 6  ;;  %v94_v63 = vmul.f32 0.5, %v90_v54 }
  0x1a   :  { %v100_v52 = vrot.slane %v99_v47, 4  ;;  %v103_v4 = vrot.slane %v93_v58, 6 }
  0x1b   :  { %v380_v59 = vpop.eup %379  ;;  %v102_v2 = vrot.slane %v101_v57, 4  ;;  %v105_v9 = vrot.slane %v94_v63, 6 }
  0x1c   :  { %v111_v60 = vsub.f32 %v75_v46, %v100_v52  ;;  %v123_v61 = vadd.f32 %v100_v52, %v75_v46  ;;  %v382_v0 = vpop.eup %381  ;;  %44 = vst [vmem:[%s530_s3] sm:$0xff] %v380_v59  ;;  %v104_v13 = vrot.slane %v103_v4, 4 }
  0x1d   :  { %v384_v5 = vpop.eup %383  ;;  %45 = vst [vmem:[%s530_s3 + $0x8] sm:$0xff] %v382_v0  ;;  %v112_v11 = vsub.f32 %v76_v56, %v102_v2  ;;  %v124_v12 = vadd.f32 %v102_v2, %v76_v56  ;;  %v106_v17 = vrot.slane %v105_v9, 4 }
  0x1e   :  { %v115_v6 = vmax.f32 %v111_v60, 0.0  ;;  %v127_v7 = vmax.f32 %v123_v61, 0.0  ;;  %v386_v10 = vpop.eup %385  ;;  %46 = vst [vmem:[%s530_s3 + $0x10] sm:$0xff] %v384_v5  ;;  %v113_v20 = vsub.f32 %v77_v3, %v104_v13  ;;  %v125_v21 = vadd.f32 %v104_v13, %v77_v3 }
  0x1f   :  { %47 = vst [vmem:[%s530_s3 + $0x18] sm:$0xff] %v386_v10  ;;  %v116_v18 = vmax.f32 %v112_v11, 0.0  ;;  %v128_v19 = vmax.f32 %v124_v12, 0.0  ;;  %v114_v54 = vsub.f32 %v78_v16, %v106_v17  ;;  %v126_v12 = vadd.f32 %v106_v17, %v78_v16 }
  0x20   :  { %v119_v14 = vmin.f32 %v115_v6, 64.0  ;;  %v131_v15 = vmin.f32 %v127_v7, 64.0  ;;  %v117_v36 = vmax.f32 %v113_v20, 0.0  ;;  %v129_v37 = vmax.f32 %v125_v21, 0.0 }
  0x21   :  { %v120_v32 = vmin.f32 %v116_v18, 64.0  ;;  %v132_v33 = vmin.f32 %v128_v19, 64.0  ;;  %v118_v9 = vmax.f32 %v114_v54, 0.0  ;;  %v130_v19 = vmax.f32 %v126_v12, 0.0 }
  0x22   :  { %v142_v22 = vrot.slane %v119_v14, %v439_v53  ;;  %v146_v23 = vrot.slane %v119_v14, %v441_v55  ;;  %v182_v24 = vrot.slane %v119_v14, %v446_v1  ;;  %v186_v25 = vrot.slane %v119_v14, %v451_v8 }
  0x23   :  { %v226_v26 = vrot.slane %v131_v15, %v439_v53  ;;  %v230_v27 = vrot.slane %v131_v15, %v441_v55  ;;  %v266_v28 = vrot.slane %v131_v15, %v446_v1  ;;  %v270_v29 = vrot.slane %v131_v15, %v451_v8 }
  0x24   :  { %v304_v30 = vsel %vm303_vm0, %v142_v22, %v182_v24  ;;  %v305_v31 = vsel %vm303_vm0, %v146_v23, %v186_v25  ;;  %v150_v40 = vrot.slane %v120_v32, %v439_v53  ;;  %v154_v41 = vrot.slane %v120_v32, %v441_v55 }
  0x25   :  { %v313_v34 = vsel %vm312_vm1, %v304_v30, %v226_v26  ;;  %v314_v35 = vsel %vm312_vm1, %v305_v31, %v230_v27  ;;  %v190_v43 = vrot.slane %v120_v32, %v446_v1  ;;  %v194_v44 = vrot.slane %v120_v32, %v451_v8 }
  0x26   :  { %v322_v38 = vsel %vm321_vm2, %v313_v34, %v266_v28  ;;  %v323_v39 = vsel %vm321_vm2, %v314_v35, %v270_v29  ;;  %v234_v45 = vrot.slane %v132_v33, %v439_v53  ;;  %v238_v46 = vrot.slane %v132_v33, %v441_v55 }
  0x27   :  { %v338_v42 = vcombine.low %v322_v38, %v323_v39  ;;  %v274_v47 = vrot.slane %v132_v33, %v446_v1  ;;  %v278_v48 = vrot.slane %v132_v33, %v451_v8  ;;  %v121_v49 = vmin.f32 %v117_v36, 64.0 }
  0x28   :  { %v306_v50 = vsel %vm303_vm0, %v150_v40, %v190_v43  ;;  %v307_v51 = vsel %vm303_vm0, %v154_v41, %v194_v44  ;;  %v133_v52 = vmin.f32 %v129_v37, 64.0  ;;  %v122_v15 = vmin.f32 %v118_v9, 64.0 }
  0x29   :  { %346 = vst [vmem:[%s531_s4] sm:$0xff] %v338_v42  ;;  %v315_v56 = vsel %vm312_vm1, %v306_v50, %v234_v45  ;;  %v316_v57 = vsel %vm312_vm1, %v307_v51, %v238_v46  ;;  %v158_v58 = vrot.slane %v121_v49, %v439_v53  ;;  %v162_v59 = vrot.slane %v121_v49, %v441_v55 }
  0x2a   :  { %v324_v60 = vsel %vm321_vm2, %v315_v56, %v274_v47  ;;  %v325_v61 = vsel %vm321_vm2, %v316_v57, %v278_v48  ;;  %v198_v62 = vrot.slane %v121_v49, %v446_v1  ;;  %v202_v63 = vrot.slane %v121_v49, %v451_v8 }
  0x2b   :  { %v339_v0 = vcombine.low %v324_v60, %v325_v61  ;;  %v242_v2 = vrot.slane %v133_v52, %v439_v53  ;;  %v246_v3 = vrot.slane %v133_v52, %v441_v55  ;;  %v282_v4 = vrot.slane %v133_v52, %v446_v1 }
  0x2c   :  { %v286_v5 = vrot.slane %v133_v52, %v451_v8  ;;  %v308_v6 = vsel %vm303_vm0, %v158_v58, %v198_v62  ;;  %v309_v7 = vsel %vm303_vm0, %v162_v59, %v202_v63  ;;  %v166_v20 = vrot.slane %v122_v15, %v439_v53 }
  0x2d   :  { %347 = vst [vmem:[%s531_s4 + $0x8] sm:$0xff] %v339_v0  ;;  %v317_v10 = vsel %vm312_vm1, %v308_v6, %v242_v2  ;;  %v318_v11 = vsel %vm312_vm1, %v309_v7, %v246_v3  ;;  %v170_v21 = vrot.slane %v122_v15, %v441_v55  ;;  %v206_v22 = vrot.slane %v122_v15, %v446_v1 }
  0x2e   :  { %v326_v13 = vsel %vm321_vm2, %v317_v10, %v282_v4  ;;  %v327_v14 = vsel %vm321_vm2, %v318_v11, %v286_v5  ;;  %v210_v23 = vrot.slane %v122_v15, %v451_v8  ;;  %v134_v16 = vmin.f32 %v130_v19, 64.0 }
  0x2f   :  { %v340_v18 = vcombine.low %v326_v13, %v327_v14  ;;  %v310_v17 = vsel %vm303_vm0, %v166_v20, %v206_v22 }
  0x30   :  { %v311_v24 = vsel %vm303_vm0, %v170_v21, %v210_v23  ;;  %v250_v25 = vrot.slane %v134_v16, %v439_v53  ;;  %v254_v26 = vrot.slane %v134_v16, %v441_v55  ;;  %v290_v27 = vrot.slane %v134_v16, %v446_v1 }
  0x31   :  { %348 = vst [vmem:[%s531_s4 + $0x10] sm:$0xff] %v340_v18  ;;  %v294_v28 = vrot.slane %v134_v16, %v451_v8 }
  0x32   :  { %v319_v29 = vsel %vm312_vm1, %v310_v17, %v250_v25  ;;  %v320_v30 = vsel %vm312_vm1, %v311_v24, %v254_v26 }
  0x33   :  { %v328_v31 = vsel %vm321_vm2, %v319_v29, %v290_v27  ;;  %v329_v32 = vsel %vm321_vm2, %v320_v30, %v294_v28 }
  0x34   :  { %v341_v33 = vcombine.low %v328_v31, %v329_v32 }
  0x36   :  { %349 = vst [vmem:[%s531_s4 + $0x18] sm:$0xff] %v341_v33 }

</bundles_post_ra>
